<compile_context>
chip_gen: v7x
topology: tpu7x:2x2x1
jax: 0.10.0
libtpu: 0.0.40
codegen_flags: <defaults>
</compile_context>

<pallas_src>
from functools import partial

import numpy as np
import jax
import jax.numpy as jnp
from jax.experimental import pallas as pl
from jax.experimental.pallas import tpu as pltpu


# ----------------------------- QuantConfig-style setup (plain numpy glue) -----------------------------

def _quant_max(bit: int, unsign: bool) -> int:
    return (1 << bit) - 1 if unsign else (1 << (bit - 1)) - 1


def _quant_min(bit: int, unsign: bool, narrow: bool) -> int:
    if unsign:
        return 0
    return -_quant_max(bit, unsign) if narrow else -(1 << (bit - 1))


def build_softmax_tables(dim_len: int,
                         input_bit: int, input_amax: float, input_unsign: bool,
                         output_bit: int, output_amax: float, output_unsign: bool = True,
                         acc_bit: int = 16, narrow: bool = False):
    """Deterministically build the integer LUTs exactly like Softmax.__init__ does."""
    assert input_bit <= 8
    in_qmax = _quant_max(input_bit, input_unsign)
    in_qmin = _quant_min(input_bit, input_unsign, narrow)
    in_scale = float(input_amax) / in_qmax

    out_qmax = _quant_max(output_bit, output_unsign)
    out_qmin = _quant_min(output_bit, output_unsign, narrow)
    out_scale = float(output_amax) / out_qmax

    input_quant = np.arange(in_qmin, in_qmax + 1, dtype=np.int64)
    input_float_minus_max = ((input_quant - in_qmax).astype(np.float32) * np.float32(in_scale))
    exp_float = np.exp(input_float_minus_max).astype(np.float32)

    acc_qmax = _quant_max(acc_bit, False)
    acc_qmin = _quant_min(acc_bit, False, False)
    den_scale = 1.0 / (acc_qmax // dim_len)
    den_q = np.clip(np.round(exp_float / den_scale), acc_qmin, acc_qmax).astype(np.int32)

    num_bit = acc_bit + output_bit
    num_qmax = _quant_max(num_bit, False)
    num_qmin = _quant_min(num_bit, False, False)
    num_scale = den_scale * out_scale
    num_q = np.clip(np.round(exp_float / num_scale), num_qmin, num_qmax).astype(np.int32)

    if not input_unsign:
        # reorder so that table[code mod L] == entry for the signed quant code
        index = in_qmax if narrow else in_qmax + 1
        den_q = np.concatenate([den_q[index:], den_q[:index]])
        num_q = np.concatenate([num_q[index:], num_q[:index]])

    return den_q, num_q, out_qmin, out_qmax, in_scale, in_qmin, in_qmax


def pack_lut(den_q, num_q, in_qmin, in_qmax, input_unsign):
    """Host-side packed, transposed LUT: (16, 256) bf16, column-indexed by (code & 0xFF).

    Rows (2^k weights folded in, every entry is chunk*2^k with chunk <= 255 -> bf16-exact):
      row 0: den_lo          row 1: den_hi * 256
      row 2: num_lo          row 3: num_mid * 256     row 4: num_hi * 65536
    Remaining rows are zero (pad to the bf16 (16,128) tile).
    """
    L = int(den_q.shape[0])
    lut = np.zeros((16, 256), np.float32)
    for j in range(256):
        c = j if (input_unsign or j < 128) else j - 256
        c = int(np.clip(c, in_qmin, in_qmax))       # out-of-range codes never occur
        k = c % L                                   # torch-style negative wrap
        d = int(den_q[k]); n = int(num_q[k])
        assert 0 <= d <= 0xFFFF and 0 <= n <= 0xFFFFFF
        lut[0, j] = float(d & 0xFF)
        lut[1, j] = float((d >> 8) & 0xFF) * 256.0
        lut[2, j] = float(n & 0xFF)
        lut[3, j] = float((n >> 8) & 0xFF) * 256.0
        lut[4, j] = float((n >> 16) & 0xFF) * 65536.0
    return jnp.asarray(lut, dtype=jnp.bfloat16)


# ----------------------------- Pallas kernel (hot path) -----------------------------

def _softmax_lut_kernel(x_ref, lut_ref, *refs, dim_len, out_qmin, out_qmax,
                        packed, n_chunks, bf16_cmp):
    if packed:
        seg_ref, out_ref = refs
        num_sc = den_sc = None
    elif n_chunks > 1:
        out_ref, num_sc, den_sc = refs
        seg_ref = None
    else:
        (out_ref,) = refs
        seg_ref = num_sc = den_sc = None

    tm, cw = x_ref.shape
    n = tm * cw
    k = pl.program_id(1)

    # torch-style negative-index wrap of the 8-bit quant codes into [0, 256),
    # flattened lane-dense so the transposed gather output is (chunk-rows, elements).
    idx = (x_ref[...].astype(jnp.int32) & 0xFF).reshape(1, n)          # (1, N)
    codes = jax.lax.broadcasted_iota(jnp.int32, (256, 1), 0)           # (256, 1)
    if bf16_cmp:
        onehot = (codes.astype(jnp.bfloat16) == idx.astype(jnp.bfloat16)
                  ).astype(jnp.bfloat16)                               # (256, N)
    else:
        onehot = (codes == idx).astype(jnp.bfloat16)                   # i32 compares (v5e-)

    # Transposed gather on the MXU: (16,256) @ (256,N) -> (16,N) f32.  Only a single
    # one-hot term per column is nonzero, so every row is the exact LUT chunk value.
    res = jnp.dot(lut_ref[...], onehot, preferred_element_type=jnp.float32)

    # Recombination is plain adds (weights already folded into the LUT).
    num = (res[2:3, :] + res[3:4, :] + res[4:5, :]).reshape(tm, cw)    # exact, < 2^24

    if packed:
        den_lo = res[0:1, :].reshape(tm, cw)                           # <= 255
        den_hi = res[1:2, :].reshape(tm, cw)                           # chunk*256 <= 65280
        # One stacked (256,128) segment matmul does the per-D-lane-segment sums for
        # both chunks at once; all operands are bf16-exact, accumulation is f32-exact.
        den_cat = jnp.concatenate([den_lo, den_hi], axis=-1).astype(jnp.bfloat16)
        denom = jnp.dot(den_cat, seg_ref[...], preferred_element_type=jnp.float32)
        y = jnp.clip(num / denom, out_qmin, out_qmax)
        out_ref[...] = y.astype(jnp.int32).astype(out_ref.dtype)       # trunc toward zero
        return

    den = (res[0:1, :] + res[1:2, :]).reshape(tm, cw)
    if n_chunks * cw != dim_len:                                       # mask padded lanes
        lane = jax.lax.broadcasted_iota(jnp.int32, (1, cw), 1) + k * cw
        den = jnp.where(lane < dim_len, den, 0.0)
    part = jnp.sum(den, axis=-1, keepdims=True)                        # <= acc_qmax, exact

    if n_chunks == 1:
        y = jnp.clip(num / part, out_qmin, out_qmax)
        out_ref[...] = y.astype(jnp.int32).astype(out_ref.dtype)
        return

    # Chunked general path: accumulate the denominator across the lane-chunk grid axis,
    # stage the numerator in VMEM, finalize (divide + store) on the last chunk.
    @pl.when(k == 0)
    def _():
        den_sc[...] = jnp.zeros_like(den_sc)

    den_sc[...] = den_sc[...] + part                                   # lane-broadcast add
    num_sc[:, pl.ds(pl.multiple_of(k * cw, 128), cw)] = num            # unmasked stores

    @pl.when(k == n_chunks - 1)
    def _():
        denom = den_sc[:, 0:1]
        y = jnp.clip(num_sc[...] / denom, out_qmin, out_qmax)
        out_ref[...] = y.astype(jnp.int32).astype(out_ref.dtype)


def _device_kind() -> str:
    try:
        return jax.devices()[0].device_kind.lower()
    except Exception:
        return ""


def quantized_softmax(x_q, lut_t, out_qmin, out_qmax, out_dtype=jnp.uint8, pad_code=0):
    """x_q: int8/uint8 quantized codes (..., dim_len); LUT softmax over the last axis."""
    # TODO(synk): only dim == -1 (last axis) is implemented; other dims would need a
    # wrapper-level transpose.
    assert x_q.dtype in (jnp.int8, jnp.uint8), "expects 8-bit quantized codes"
    orig_shape = x_q.shape
    D = int(orig_shape[-1])
    x2d = x_q.reshape(-1, D)
    N = int(x2d.shape[0])
    pad_code = int(pad_code)

    kind = _device_kind()
    legacy = any(t in kind for t in ("v2", "v3", "v4", "v5"))     # no bf16 VALU
    big_vmem = legacy or ("v6" in kind)                           # 128 MiB-VMEM chips
    elem_budget = 49152 if big_vmem else 32768                    # elements per grid step
    vmem_limit = (64 if big_vmem else 40) * 1024 * 1024           # headroom on v7x (64 MiB/TC)

    packed = (D <= 128) and (128 % D == 0)
    if packed:
        P = 128 // D
        R = (N + P - 1) // P
        if R * P != N:
            x2d = jnp.pad(x2d, ((0, R * P - N), (0, 0)), constant_values=pad_code)
        xw = x2d.reshape(R, 128)                 # free merge: P logical rows per 128 lanes
        W = 128
        seg_id = np.arange(128) // D
        seg = (seg_id[:, None] == seg_id[None, :]).astype(np.float32)
        seg2 = jnp.asarray(np.concatenate([seg, seg], axis=0), dtype=jnp.bfloat16)  # (256,128)
    else:
        W = ((D + 127) // 128) * 128             # lane-dense width
        xw = jnp.pad(x2d, ((0, 0), (0, W - D)), constant_values=pad_code) if W != D else x2d
        R = N
        seg2 = None

    # Lane chunking (second grid axis) keeps the (256, TM*CW) one-hot bounded
    # independently of dim_len (important on v7x's 64 MiB/TC VMEM).
    CW = min(W, 512)
    n_chunks = W // CW

    # Row tile from a per-chip element budget; int8 sublane alignment of 32.
    TM = min(256, max(32, (elem_budget // CW) // 32 * 32))
    TM = min(TM, max(32, ((R + 31) // 32) * 32))
    if R <= TM and R > 32:
        # guarantee >= 2 row blocks so both v7x TensorCores get work
        TM = max(32, (((R + 1) // 2) + 31) // 32 * 32)
    R_pad = ((R + TM - 1) // TM) * TM
    if R_pad != R:
        xw = jnp.pad(xw, ((0, R_pad - R), (0, 0)), constant_values=pad_code)

    kernel = partial(_softmax_lut_kernel, dim_len=D, packed=packed, n_chunks=n_chunks,
                     out_qmin=float(out_qmin), out_qmax=float(out_qmax),
                     bf16_cmp=not legacy)

    in_specs = [pl.BlockSpec((TM, CW), lambda i, k: (i, k)),      # int8 codes, lane-dense
                pl.BlockSpec((16, 256), lambda i, k: (0, 0))]     # transposed packed LUT
    operands = [xw, lut_t]
    scratch_shapes = []
    if packed:
        in_specs.append(pl.BlockSpec((256, 128), lambda i, k: (0, 0)))   # stacked seg matrix
        operands.append(seg2)
    elif n_chunks > 1:
        scratch_shapes = [pltpu.VMEM((TM, W), jnp.float32),       # numerator staging
                          pltpu.VMEM((TM, 128), jnp.float32)]     # denominator accumulator

    yw = pl.pallas_call(
        kernel,
        out_shape=jax.ShapeDtypeStruct((R_pad, W), out_dtype),
        grid_spec=pltpu.PrefetchScalarGridSpec(
            num_scalar_prefetch=0,
            grid=(R_pad // TM, n_chunks),
            in_specs=in_specs,
            out_specs=pl.BlockSpec((TM, W), lambda i, k: (i, 0)),  # lane-dense uint8 tile
            scratch_shapes=scratch_shapes,
        ),
        compiler_params=pltpu.CompilerParams(
            dimension_semantics=("parallel", "arbitrary"),
            vmem_limit_bytes=vmem_limit,
        ),
    )(*operands)

    if packed:
        y2d = yw[:R].reshape(R * (128 // D), D)[:N]
    else:
        y2d = yw[:N, :D]
    return y2d.reshape(orig_shape)


# ----------------------------- demo / self-check -----------------------------

def _reference(x_q, den_t, num_t, out_qmin, out_qmax):
    """Pure-numpy reference of the module's forward (keepdim softmax over last axis)."""
    xq = np.asarray(x_q).astype(np.int64)
    L = den_t.shape[0]
    idx = np.where(xq < 0, xq + L, xq)
    den_e = den_t[idx].astype(np.float32)
    num_e = num_t[idx].astype(np.float32)
    denom = den_e.sum(axis=-1, keepdims=True)
    return np.clip(num_e / denom, out_qmin, out_qmax).astype(np.uint8)


def _check(y, x_q, den_t, num_t, out_qmin, out_qmax):
    ref = _reference(x_q, den_t, num_t, out_qmin, out_qmax)
    diff = np.abs(np.asarray(y).astype(np.int32) - ref.astype(np.int32))
    # <=1 LSB slack: hardware f32 division may differ by 1 ulp from numpy at exact-integer
    # quotient boundaries before the truncating cast.
    assert int(diff.max()) <= 1, f"max diff {int(diff.max())}"


if __name__ == "__main__":
    key = jax.random.PRNGKey(0)
    key1, key2 = jax.random.split(key)

    # --- case 1: dim_len = 32 (packed lane-dense path, 4 logical rows per 128-lane row) ---
    dim_len = 32
    den_t, num_t, oqmin, oqmax, in_scale, iqmin, iqmax = build_softmax_tables(
        dim_len=dim_len, input_bit=8, input_amax=8.0, input_unsign=False,
        output_bit=8, output_amax=1.0, output_unsign=True, acc_bit=16, narrow=False)
    lut = pack_lut(den_t, num_t, iqmin, iqmax, input_unsign=False)

    x_f = jax.random.uniform(key1, (2, 9, dim_len), minval=-8.0, maxval=8.0,
                             dtype=jnp.float32)
    x_q = jnp.clip(jnp.round(x_f / in_scale), iqmin, iqmax).astype(jnp.int8)
    y = jax.block_until_ready(
        quantized_softmax(x_q, lut, oqmin, oqmax, jnp.uint8, pad_code=iqmax))
    _check(y, x_q, den_t, num_t, oqmin, oqmax)

    # --- case 2: dim_len = 256 (general multiple-of-128 path) ---
    dim_len2 = 256
    den2, num2, oqmin2, oqmax2, in_scale2, iqmin2, iqmax2 = build_softmax_tables(
        dim_len=dim_len2, input_bit=8, input_amax=8.0, input_unsign=False,
        output_bit=8, output_amax=1.0, output_unsign=True, acc_bit=16, narrow=False)
    lut2 = pack_lut(den2, num2, iqmin2, iqmax2, input_unsign=False)

    x_f2 = jax.random.uniform(key2, (2, 4, dim_len2), minval=-8.0, maxval=8.0,
                              dtype=jnp.float32)
    x_q2 = jnp.clip(jnp.round(x_f2 / in_scale2), iqmin2, iqmax2).astype(jnp.int8)
    y2 = jax.block_until_ready(
        quantized_softmax(x_q2, lut2, oqmin2, oqmax2, jnp.uint8, pad_code=iqmax2))
    _check(y2, x_q2, den2, num2, oqmin2, oqmax2)

    print("KERNEL_OK")
</pallas_src>

<mosaic_0001>
module attributes {stable_mosaic.version = 11 : i64} {
  func.func @_softmax_lut_kernel(%arg0: i32, %arg1: i32, %arg2: memref<32x128xi8, #tpu.memory_space<vmem>>, %arg3: memref<16x256xbf16, #tpu.memory_space<vmem>>, %arg4: memref<256x128xbf16, #tpu.memory_space<vmem>>, %arg5: memref<32x128xi8, #tpu.memory_space<vmem>>) attributes {dimension_semantics = [#tpu.dimension_semantics<parallel>, #tpu.dimension_semantics<arbitrary>], iteration_bounds = array<i64: 1, 1>, scalar_prefetch = 0 : i64, scratch_operands = 0 : i64, tpu.core_type = #tpu.core_type<tc>, window_params = [{transform_indices = @transform_0, window_bounds = array<i64: 32, 128>}, {pipeline_mode = #tpu.pipeline_mode<synchronous>, transform_indices = @transform_1, window_bounds = array<i64: 16, 256>}, {pipeline_mode = #tpu.pipeline_mode<synchronous>, transform_indices = @transform_2, window_bounds = array<i64: 256, 128>}, {transform_indices = @transform_3, window_bounds = array<i64: 32, 128>}]} {
    %c0 = arith.constant 0 : index
    %c0_0 = arith.constant 0 : index
    %0 = vector.load %arg2[%c0, %c0_0] : memref<32x128xi8, #tpu.memory_space<vmem>>, vector<32x128xi8>
    %1 = arith.extsi %0 : vector<32x128xi8> to vector<32x128xi32>
    %c255_i32 = arith.constant 255 : i32
    %2 = vector.broadcast %c255_i32 : i32 to vector<32x128xi32>
    %3 = arith.andi %1, %2 : vector<32x128xi32>
    %4 = vector.shape_cast %3 : vector<32x128xi32> to vector<1x4096xi32>
    %5 = tpu.iota {dimensions = array<i32: 0>} : vector<256x1xi32>
    %6 = arith.sitofp %5 : vector<256x1xi32> to vector<256x1xbf16>
    %7 = arith.sitofp %4 : vector<1x4096xi32> to vector<1x4096xbf16>
    %8 = vector.broadcast %6 : vector<256x1xbf16> to vector<256x4096xbf16>
    %9 = vector.broadcast %7 : vector<1x4096xbf16> to vector<256x4096xbf16>
    %10 = arith.cmpf oeq, %8, %9 : vector<256x4096xbf16>
    %11 = arith.extui %10 : vector<256x4096xi1> to vector<256x4096xi32>
    %12 = arith.sitofp %11 : vector<256x4096xi32> to vector<256x4096xf32>
    %13 = arith.truncf %12 : vector<256x4096xf32> to vector<256x4096xbf16>
    %c0_1 = arith.constant 0 : index
    %c0_2 = arith.constant 0 : index
    %14 = vector.load %arg3[%c0_1, %c0_2] : memref<16x256xbf16, #tpu.memory_space<vmem>>, vector<16x256xbf16>
    %cst = arith.constant dense<0.000000e+00> : vector<16x4096xf32>
    %15 = tpu.matmul %14, %13, %cst {dimension_numbers = #tpu.dot_dimension_numbers<[1], [0], [0], [1], [0, 0, 1, 1], [], []>} : vector<16x256xbf16>, vector<256x4096xbf16>, vector<16x4096xf32> -> vector<16x4096xf32>
    %16 = vector.extract_strided_slice %15 {offsets = [2, 0], sizes = [1, 4096], strides = [1, 1]} : vector<16x4096xf32> to vector<1x4096xf32>
    %17 = vector.extract_strided_slice %15 {offsets = [3, 0], sizes = [1, 4096], strides = [1, 1]} : vector<16x4096xf32> to vector<1x4096xf32>
    %18 = arith.addf %16, %17 : vector<1x4096xf32>
    %19 = vector.extract_strided_slice %15 {offsets = [4, 0], sizes = [1, 4096], strides = [1, 1]} : vector<16x4096xf32> to vector<1x4096xf32>
    %20 = arith.addf %18, %19 : vector<1x4096xf32>
    %21 = vector.shape_cast %20 : vector<1x4096xf32> to vector<32x128xf32>
    %22 = vector.extract_strided_slice %15 {offsets = [0, 0], sizes = [1, 4096], strides = [1, 1]} : vector<16x4096xf32> to vector<1x4096xf32>
    %23 = vector.shape_cast %22 : vector<1x4096xf32> to vector<32x128xf32>
    %24 = vector.extract_strided_slice %15 {offsets = [1, 0], sizes = [1, 4096], strides = [1, 1]} : vector<16x4096xf32> to vector<1x4096xf32>
    %25 = vector.shape_cast %24 : vector<1x4096xf32> to vector<32x128xf32>
    %26 = tpu.concatenate %23, %25 in 1 : vector<32x128xf32>, vector<32x128xf32> -> vector<32x256xf32>
    %27 = arith.truncf %26 : vector<32x256xf32> to vector<32x256xbf16>
    %c0_3 = arith.constant 0 : index
    %c0_4 = arith.constant 0 : index
    %28 = vector.load %arg4[%c0_3, %c0_4] : memref<256x128xbf16, #tpu.memory_space<vmem>>, vector<256x128xbf16>
    %cst_5 = arith.constant dense<0.000000e+00> : vector<32x128xf32>
    %29 = tpu.matmul %27, %28, %cst_5 {dimension_numbers = #tpu.dot_dimension_numbers<[1], [0], [0], [1], [0, 0, 1, 1], [], []>} : vector<32x256xbf16>, vector<256x128xbf16>, vector<32x128xf32> -> vector<32x128xf32>
    %30 = arith.divf %21, %29 : vector<32x128xf32>
    %cst_6 = arith.constant 0.000000e+00 : f32
    %cst_7 = arith.constant 2.550000e+02 : f32
    %31 = vector.broadcast %cst_6 : f32 to vector<32x128xf32>
    %32 = arith.maximumf %31, %30 : vector<32x128xf32>
    %33 = vector.broadcast %cst_7 : f32 to vector<32x128xf32>
    %34 = arith.minimumf %33, %32 : vector<32x128xf32>
    %35 = arith.fptosi %34 : vector<32x128xf32> to vector<32x128xi32>
    %36 = arith.trunci %35 : vector<32x128xi32> to vector<32x128xi8>
    %c0_8 = arith.constant 0 : index
    %c0_9 = arith.constant 0 : index
    %37 = vector.load %arg5[%c0_8, %c0_9] : memref<32x128xi8, #tpu.memory_space<vmem>>, vector<32x128xi8>
    tpu.vector_store %arg5[%c0_8, %c0_9], %36 {strides = array<i32>} : memref<32x128xi8, #tpu.memory_space<vmem>>, vector<32x128xi8>,
    return
  }
  func.func @transform_0(%arg0: i32, %arg1: i32) -> (i32, i32) {
    %c0_i32 = arith.constant 0 : i32
    return %arg0, %arg1 : i32, i32
  }
  func.func @transform_1(%arg0: i32, %arg1: i32) -> (i32, i32) {
    %c0_i32 = arith.constant 0 : i32
    %c0_i32_0 = arith.constant 0 : i32
    %c0_i32_1 = arith.constant 0 : i32
    return %c0_i32, %c0_i32_0 : i32, i32
  }
  func.func @transform_2(%arg0: i32, %arg1: i32) -> (i32, i32) {
    %c0_i32 = arith.constant 0 : i32
    %c0_i32_0 = arith.constant 0 : i32
    %c0_i32_1 = arith.constant 0 : i32
    return %c0_i32, %c0_i32_0 : i32, i32
  }
  func.func @transform_3(%arg0: i32, %arg1: i32) -> (i32, i32) {
    %c0_i32 = arith.constant 0 : i32
    %c0_i32_0 = arith.constant 0 : i32
    return %arg0, %c0_i32 : i32, i32
  }
}

</mosaic_0001>

<bundles_post_ra>
// kernel: tpu_custom_call.1
= control target key start
LH: loop header
LB: loop body
LE: loop exit
PB: predicated region body
PF: predicated region fallthrough
CT: control target
= control target key end

     0   :  { %8 = vsyncpa [#allocation3], 0  ;;  %s19086_s0 = inlined_call_operand.hbm [shape: s8[32,128], index: 0, kind: input, shape index: {}]   ;;  %s19087_s1 = inlined_call_operand.hbm [shape: bf16[16,256], index: 1, kind: input, shape index: {}]   ;;  %s19088_s2 = inlined_call_operand.hbm [shape: bf16[256,128], index: 2, kind: input, shape index: {}]   ;;  %s19089_s3 = inlined_call_operand.hbm [shape: u8[32,128], index: 3, kind: output, shape index: {}]  }
   0x1   :  { %9 = vsyncpa [#allocation6], 0 }
   0x2   :  { %10 = vsyncpa [#allocation4], 0  ;;  %s13159_s12 = smov [#allocation5]   ;;  %s13065_s16 = scalar_lea.hbm %s19087_s1, 256 }
   0x3   :  { %s26_s13 = sshll.u32 %s13159_s12, 4  ;;  %p13066_p0 = scmp.ne.s32.totalorder %s19087_s1, %s13065_s16  ;;  %s27_s13 = int_to_ptr.vmem [resolvable:$true] %s26_s13 }
   0x4   :  { %p13069_p1 = scmp.lt.u32.totalorder %s13065_s16, %s19087_s1 }
   0x6   :  { %p13071_p2 = pnand %p13069_p1, %p13066_p0 }
   0x8   :  { %13074 = shalt.err (!%p13071_p2)
}
   0x9   :  { %s13075_s21 = scalar_lea.vmem %s27_s13, 256  ;;  %p13080_p4 = scmp.lt.s32.totalorder %s27_s13, %s27_s13 }
   0xa   :  { %p13076_p3 = scmp.ne.s32.totalorder %s27_s13, %s13075_s21  ;;  %p13081_p5 = scmp.lt.s32.totalorder %s13075_s21, %s13075_s21 }
   0xc   :  { %p13082_p6 = por %p13081_p5, %p13080_p4 }
   0xe   :  { %p13083_p7 = pnand %p13082_p6, %p13076_p3 }
  0x10   :  { %13086 = shalt.err (!%p13083_p7)
}
  0x11   :  { %s13160_s22 = smov 128   ;;  %s13161_s23 = smov 8  }
  0x12   :  { %32 = dma.hbm_to_vmem [thread:$0]  %s19087_s1, 256, %s27_s13, [#allocation6], %s13160_s22, %s13160_s22, %s13161_s23  }
  0x13   :  { %s13162_s26 = smov [#allocation2]   ;;  %s13163_s28 = smov [#allocation7]  }
  0x14   :  { %s17_s27 = sshll.u32 %s13162_s26, 4  ;;  %s38_s29 = sshll.u32 %s13163_s28, 4  ;;  %s18_s27 = int_to_ptr.vmem [resolvable:$true] %s17_s27  ;;  %s39_s29 = int_to_ptr.vmem [resolvable:$true] %s38_s29 }
  0x15   :  { %s13087_s5 = scalar_lea.hbm %s19086_s0, 128 }
  0x16   :  { %p13088_p8 = scmp.ne.s32.totalorder %s19086_s0, %s13087_s5  ;;  %p13091_p9 = scmp.lt.u32.totalorder %s13087_s5, %s19086_s0 }
  0x18   :  { %p13093_p10 = pnand %p13091_p9, %p13088_p8 }
  0x1a   :  { %13096 = shalt.err (!%p13093_p10)
}
  0x1b   :  { %s13097_s1 = scalar_lea.vmem %s18_s27, 128  ;;  %p13102_p12 = scmp.lt.s32.totalorder %s18_s27, %s18_s27 }
  0x1c   :  { %p13098_p11 = scmp.ne.s32.totalorder %s18_s27, %s13097_s1  ;;  %p13103_p13 = scmp.lt.s32.totalorder %s13097_s1, %s13097_s1 }
  0x1e   :  { %p13104_p0 = por %p13103_p13, %p13102_p12 }
  0x20   :  { %p13105_p1 = pnand %p13104_p0, %p13098_p11 }
  0x22   :  { %13108 = shalt.err (!%p13105_p1)
}
  0x23   :  { %20 = dma.hbm_to_vmem [thread:$0]  %s19086_s0, 128, %s18_s27, [#allocation3]  }
  0x24   :  { %s13109_s14 = scalar_lea.hbm %s19088_s2, 2048 }
  0x25   :  { %p13110_p2 = scmp.ne.s32.totalorder %s19088_s2, %s13109_s14  ;;  %p13113_p3 = scmp.lt.u32.totalorder %s13109_s14, %s19088_s2 }
  0x27   :  { %p13115_p4 = pnand %p13113_p3, %p13110_p2 }
  0x29   :  { %13118 = shalt.err (!%p13115_p4)
}
  0x2a   :  { %s13119_s19 = scalar_lea.vmem %s39_s29, 2048  ;;  %p13124_p6 = scmp.lt.s32.totalorder %s39_s29, %s39_s29 }
  0x2b   :  { %p13120_p5 = scmp.ne.s32.totalorder %s39_s29, %s13119_s19  ;;  %p13125_p7 = scmp.lt.s32.totalorder %s13119_s19, %s13119_s19 }
  0x2d   :  { %p13126_p8 = por %p13125_p7, %p13124_p6 }
  0x2f   :  { %p13127_p9 = pnand %p13126_p8, %p13120_p5 }
  0x31   :  { %13130 = shalt.err (!%p13127_p9)
}
  0x32   :  { %s13164_s0 = smov 64   ;;  %s13165_s20 = smov 4  }
  0x33   :  { %44 = dma.hbm_to_vmem [thread:$0]  %s19088_s2, 2048, %s39_s29, [#allocation6], %s13164_s0, %s13164_s0, %s13165_s20  }
  0x34   :  { %13153 = dma.done.wait [#allocation3], 128  }
  0x35   :  { %13154 = vsyncadd [#allocation3], 4294967168 }
  0x36   :  { %13155 = dma.done.wait [#allocation6], 2304  }
  0x37   :  { %13156 = vsyncadd [#allocation6], 4294964992  ;;  %v66_v0 = vlaneseq  ;;  %v57_v14 = vld [vmem:[#allocation2] sm:$0xff]  ;;  %s13169_s2 = smov [#allocation8]  }
  0x38   :  { %v58_v19 = vunpack.c.0.s8 %v57_v14  ;;  %s10370_s23 = sshll.u32 %s13169_s2, 4  ;;  %s10371_s23 = int_to_ptr.vmem [resolvable:$true] %s10370_s23 }
  0x39   :  { %v13226_v1 = vshrl.u32 %v66_v0, 7  ;;  %s13131_s24 = scalar_lea.vmem %s10371_s23, 128  ;;  %p13136_p11 = scmp.lt.s32.totalorder %s10371_s23, %s10371_s23 }
  0x3a   :  { %v62_v27 = vand.u32 255, %v58_v19  ;;  %p13132_p10 = scmp.ne.s32.totalorder %s10371_s23, %s13131_s24  ;;  %p13137_p12 = scmp.lt.s32.totalorder %s13131_s24, %s13131_s24 }
  0x3b   :  { %v68_v2 = vadd.s32 8, %v13226_v1  ;;  %v99_v3 = vcvt.s32.f32 %v13226_v1  ;;  %v13231_v4 = vsub.s32 0, %v13226_v1  ;;  %v13234_v5 = vsub.s32 1, %v13226_v1 }
  0x3c   :  { %v13237_v6 = vsub.s32 2, %v13226_v1  ;;  %v13240_v7 = vsub.s32 3, %v13226_v1  ;;  %v69_v8 = vadd.s32 16, %v13226_v1  ;;  %v70_v9 = vadd.s32 24, %v13226_v1  ;;  %p13138_p13 = por %p13137_p12, %p13136_p11 }
  0x3d   :  { %v100_v10 = vcvt.s32.f32 %v68_v2  ;;  %v71_v11 = vadd.s32 32, %v13226_v1  ;;  %v72_v12 = vadd.s32 40, %v13226_v1  ;;  %v73_v13 = vadd.s32 48, %v13226_v1 }
  0x3e   :  { %v101_v15 = vcvt.s32.f32 %v69_v8  ;;  %v102_v16 = vcvt.s32.f32 %v70_v9  ;;  %v74_v17 = vadd.s32 56, %v13226_v1  ;;  %v75_v18 = vadd.s32 64, %v13226_v1  ;;  %p13139_p0 = pnand %p13138_p13, %p13132_p10 }
  0x3f   :  { %v13249_v20 = vpack.c.bf16 %v100_v10, %v99_v3  ;;  %v103_v21 = vcvt.s32.f32 %v71_v11  ;;  %v104_v22 = vcvt.s32.f32 %v72_v12  ;;  %v105_v24 = vcvt.s32.f32 %v73_v13 }
  0x40   :  { %v13251_v23 = vpack.c.bf16 %v102_v16, %v101_v15  ;;  %v106_v25 = vcvt.s32.f32 %v74_v17  ;;  %v76_v26 = vadd.s32 72, %v13226_v1  ;;  %v107_v29 = vcvt.s32.f32 %v75_v18 }
  0x41   :  { %v13254_v28 = vpack.c.bf16 %v104_v22, %v103_v21  ;;  %v77_v30 = vadd.s32 80, %v13226_v1  ;;  %v78_v33 = vadd.s32 88, %v13226_v1  ;;  %v79_v34 = vadd.s32 96, %v13226_v1 }
  0x42   :  { %v13257_v31 = vpack.c.bf16 %v106_v25, %v105_v24  ;;  %v108_v32 = vcvt.s32.f32 %v76_v26  ;;  %v13261_v35 = vcvt.s32.f32 %v62_v27  ;;  %v80_v37 = vadd.s32 104, %v13226_v1 }
  0x43   :  { %v109_v36 = vcvt.s32.f32 %v77_v30  ;;  %v81_v38 = vadd.s32 112, %v13226_v1  ;;  %v110_v40 = vcvt.s32.f32 %v78_v33  ;;  %v111_v41 = vcvt.s32.f32 %v79_v34 }
  0x44   :  { %v13265_v39 = vpack.c.bf16 %v108_v32, %v107_v29  ;;  %v82_v42 = vadd.s32 120, %v13226_v1  ;;  %v158_v43 = vrot.slane %v13261_v35, %v13231_v4  ;;  %v162_v44 = vrot.slane %v13261_v35, %v13234_v5 }
  0x45   :  { %v166_v45 = vrot.slane %v13261_v35, %v13237_v6  ;;  %v170_v46 = vrot.slane %v13261_v35, %v13240_v7  ;;  %v13276_v47 = vpack.c.bf16 %v110_v40, %v109_v36  ;;  %v112_v48 = vcvt.s32.f32 %v80_v37 }
  0x46   :  { %v113_v49 = vcvt.s32.f32 %v81_v38  ;;  %v114_v50 = vcvt.s32.f32 %v82_v42  ;;  %v315_v51 = vpack.c.bf16 %v158_v43, %v158_v43  ;;  %v316_v52 = vpack.c.bf16 %v162_v44, %v162_v44 }
  0x47   :  { %v317_v53 = vpack.c.bf16 %v166_v45, %v166_v45  ;;  %v318_v54 = vpack.c.bf16 %v170_v46, %v170_v46  ;;  %v13278_v55 = vpack.c.bf16 %v112_v48, %v111_v41  ;;  %v83_v57 = vadd.s32 128, %v13226_v1 }
  0x48   :  { %v13280_v56 = vpack.c.bf16 %v114_v50, %v113_v49  ;;  %v84_v58 = vadd.s32 136, %v13226_v1  ;;  %v348_v59 = vpack.i.b16 %v315_v51, %v315_v51  ;;  %v355_v60 = vpack.i.b16 %v316_v52, %v316_v52 }
  0x49   :  { %v362_v61 = vpack.i.b16 %v317_v53, %v317_v53  ;;  %v369_v62 = vpack.i.b16 %v318_v54, %v318_v54  ;;  %v115_v63 = vcvt.s32.f32 %v83_v57  ;;  %v13285_v2 = vadd.s32 144, %v13226_v1 }
  0x4a   :  { %v116_v0 = vcvt.s32.f32 %v84_v58  ;;  %v13288_v3 = vadd.s32 152, %v13226_v1  ;;  %v13291_v8 = vrot.slane %v348_v59, %v13231_v4  ;;  %v13294_v9 = vrot.slane %v355_v60, %v13231_v4 }
  0x4b   :  { %v13297_v10 = vrot.slane %v362_v61, %v13231_v4  ;;  %v13300_v11 = vrot.slane %v369_v62, %v13231_v4  ;;  %v117_v13 = vcvt.s32.f32 %v13285_v2  ;;  %v13307_v15 = vadd.s32 160, %v13226_v1 }
  0x4c   :  { %v13302_v12 = vpack.c.bf16 %v116_v0, %v115_v63  ;;  %v118_v14 = vcvt.s32.f32 %v13288_v3  ;;  %vm571_vm0 = vcmp.eq.bf16.partialorder %v13249_v20, %v13291_v8  ;;  %vm572_vm1 = vcmp.eq.bf16.partialorder %v13249_v20, %v13294_v9 }
  0x4d   :  { %vm573_vm2 = vcmp.eq.bf16.partialorder %v13249_v20, %v13297_v10  ;;  %vm574_vm3 = vcmp.eq.bf16.partialorder %v13249_v20, %v13300_v11  ;;  %v13166_v16 = vmov 0   ;;  %vm603_vm4 = vcmp.eq.bf16.partialorder %v13251_v23, %v13291_v8 }
  0x4e   :  { %v1083_v17 = vsel %vm571_vm0, 65537, %v13166_v16  ;;  %v1084_v18 = vsel %vm572_vm1, 65537, %v13166_v16  ;;  %v1085_v19 = vsel %vm573_vm2, 65537, %v13166_v16  ;;  %v1086_v21 = vsel %vm574_vm3, 65537, %v13166_v16 }
  0x4f   :  { %v10380_v22 = vcombine.low %v1083_v17, %v1084_v18  ;;  %v10396_v24 = vcombine.high %v1083_v17, %v1084_v18  ;;  %v10381_v25 = vcombine.low %v1085_v19, %v1086_v21  ;;  %v10397_v26 = vcombine.high %v1085_v19, %v1086_v21 }
  0x50   :  { %vm604_vm5 = vcmp.eq.bf16.partialorder %v13251_v23, %v13294_v9  ;;  %vm605_vm6 = vcmp.eq.bf16.partialorder %v13251_v23, %v13297_v10  ;;  %vm606_vm7 = vcmp.eq.bf16.partialorder %v13251_v23, %v13300_v11  ;;  %v13167_v48 = vmov 1.0|1.0  }
  0x51   :  { %vm3131_vm8 = vcmp.ne.s16.totalorder %v10380_v22, 0  ;;  %vm3147_vm9 = vcmp.ne.s16.totalorder %v10396_v24, 0  ;;  %vm3132_vm10 = vcmp.ne.s16.totalorder %v10381_v25, 0  ;;  %vm3148_vm11 = vcmp.ne.s16.totalorder %v10397_v26, 0 }
  0x52   :  { %v3643_v27 = vsel %vm3131_vm8, 65537, %v13166_v16  ;;  %v3659_v29 = vsel %vm3147_vm9, 65537, %v13166_v16  ;;  %v3644_v30 = vsel %vm3132_vm10, 65537, %v13166_v16  ;;  %v3660_v32 = vsel %vm3148_vm11, 65537, %v13166_v16 }
  0x53   :  { %v4156_v33 = vunpack.c.h.b16 %v3643_v27  ;;  %v4188_v34 = vunpack.c.h.b16 %v3659_v29  ;;  %v4158_v36 = vunpack.c.h.b16 %v3644_v30  ;;  %v4190_v37 = vunpack.c.h.b16 %v3660_v32 }
  0x54   :  { %v4155_v38 = vunpack.c.l.b16 %v3643_v27  ;;  %v4187_v40 = vunpack.c.l.b16 %v3659_v29  ;;  %v4157_v41 = vunpack.c.l.b16 %v3644_v30  ;;  %v4189_v42 = vunpack.c.l.b16 %v3660_v32 }
  0x55   :  { %vm5180_vm12 = vcmp.ne.s32.totalorder %v4156_v33, 0  ;;  %vm5212_vm13 = vcmp.ne.s32.totalorder %v4188_v34, 0  ;;  %vm5182_vm14 = vcmp.ne.s32.totalorder %v4158_v36, 0  ;;  %vm5214_vm15 = vcmp.ne.s32.totalorder %v4190_v37, 0 }
  0x56   :  { %vm11918_vm0 = vmpackc.low %vm5212_vm13, %vm5180_vm12  ;;  %vm13333_vm1 = vcmp.ne.s32.totalorder %v4155_v38, 0  ;;  %vm13337_vm2 = vcmp.ne.s32.totalorder %v4187_v40, 0  ;;  %vm13341_vm3 = vcmp.ne.s32.totalorder %v4157_v41, 0  ;;  %vm13345_vm8 = vcmp.ne.s32.totalorder %v4189_v42, 0 }
  0x57   :  { %11919 = vmatprep.subr.msk.bf16.mxu0 %vm11918_vm0, %v13167_v48  ;;  %vm11982_vm9 = vmpackc.low %vm5214_vm15, %vm5182_vm14  ;;  %v1115_v49 = vsel %vm603_vm4, 65537, %v13166_v16  ;;  %v1116_v50 = vsel %vm604_vm5, 65537, %v13166_v16  ;;  %v1117_v51 = vsel %vm605_vm6, 65537, %v13166_v16  ;;  %v1118_v52 = vsel %vm606_vm7, 65537, %v13166_v16 }
  0x58   :  { %11983 = vmatprep.subr.msk.bf16.mxu1 %vm11982_vm9, %v13167_v48  ;;  %vm11920_vm4 = vmpackc.low %vm13337_vm2, %vm13333_vm1  ;;  %v10412_v53 = vcombine.low %v1115_v49, %v1116_v50  ;;  %v10428_v54 = vcombine.high %v1115_v49, %v1116_v50  ;;  %v10413_v57 = vcombine.low %v1117_v51, %v1118_v52  ;;  %v10429_v58 = vcombine.high %v1117_v51, %v1118_v52 }
  0x59   :  { %11921 = vmatpush1.bf16.msk.msra.mxu0 %vm11920_vm4, %v13167_v48  ;;  %vm11984_vm5 = vmpackc.low %vm13345_vm8, %vm13341_vm3  ;;  %vm635_vm6 = vcmp.eq.bf16.partialorder %v13254_v28, %v13291_v8  ;;  %vm636_vm7 = vcmp.eq.bf16.partialorder %v13254_v28, %v13294_v9  ;;  %vm637_vm10 = vcmp.eq.bf16.partialorder %v13254_v28, %v13297_v10  ;;  %vm638_vm11 = vcmp.eq.bf16.partialorder %v13254_v28, %v13300_v11 }
  0x5a   :  { %11985 = vmatpush1.bf16.msk.msra.mxu1 %vm11984_vm5, %v13167_v48  ;;  %vm3163_vm12 = vcmp.ne.s16.totalorder %v10412_v53, 0  ;;  %vm3179_vm13 = vcmp.ne.s16.totalorder %v10428_v54, 0  ;;  %vm3164_vm14 = vcmp.ne.s16.totalorder %v10413_v57, 0  ;;  %vm3180_vm15 = vcmp.ne.s16.totalorder %v10429_v58, 0 }
  0x5b   :  { %v3675_v59 = vsel %vm3163_vm12, 65537, %v13166_v16  ;;  %v3691_v60 = vsel %vm3179_vm13, 65537, %v13166_v16  ;;  %v3676_v61 = vsel %vm3164_vm14, 65537, %v13166_v16  ;;  %v3692_v62 = vsel %vm3180_vm15, 65537, %v13166_v16 }
  0x5c   :  { %v4220_v63 = vunpack.c.h.b16 %v3675_v59  ;;  %v4252_v0 = vunpack.c.h.b16 %v3691_v60  ;;  %v4222_v17 = vunpack.c.h.b16 %v3676_v61  ;;  %v4254_v18 = vunpack.c.h.b16 %v3692_v62 }
  0x5d   :  { %v4219_v19 = vunpack.c.l.b16 %v3675_v59  ;;  %v4251_v21 = vunpack.c.l.b16 %v3691_v60  ;;  %v4221_v22 = vunpack.c.l.b16 %v3676_v61  ;;  %v4253_v24 = vunpack.c.l.b16 %v3692_v62 }
  0x5e   :  { %vm5244_vm0 = vcmp.ne.s32.totalorder %v4220_v63, 0  ;;  %vm5276_vm1 = vcmp.ne.s32.totalorder %v4252_v0, 0  ;;  %vm5246_vm2 = vcmp.ne.s32.totalorder %v4222_v17, 0  ;;  %vm5278_vm3 = vcmp.ne.s32.totalorder %v4254_v18, 0 }
  0x5f   :  { %vm11922_vm8 = vmpackc.low %vm5276_vm1, %vm5244_vm0  ;;  %vm13389_vm9 = vcmp.ne.s32.totalorder %v4219_v19, 0  ;;  %vm13393_vm4 = vcmp.ne.s32.totalorder %v4251_v21, 0  ;;  %vm13397_vm5 = vcmp.ne.s32.totalorder %v4221_v22, 0  ;;  %vm13401_vm12 = vcmp.ne.s32.totalorder %v4253_v24, 0  ;;  %v13021_v22 = vld [vmem:[#allocation5 + $0x4] ss:$8 sps:$4 sm:$0xff]  }
  0x60   :  { %11923 = vmatprep.subr.msk.bf16.mxu0 %vm11922_vm8, %v13167_v48  ;;  %vm11986_vm13 = vmpackc.low %vm5278_vm3, %vm5246_vm2  ;;  %v1147_v30 = vsel %vm635_vm6, 65537, %v13166_v16  ;;  %v1148_v32 = vsel %vm636_vm7, 65537, %v13166_v16  ;;  %v1149_v33 = vsel %vm637_vm10, 65537, %v13166_v16  ;;  %v1150_v34 = vsel %vm638_vm11, 65537, %v13166_v16  ;;  %8807 = vmatprep.mubr.bf16.mxu0 %v13021_v22 }
  0x61   :  { %11987 = vmatprep.subr.msk.bf16.mxu1 %vm11986_vm13, %v13167_v48  ;;  %vm11924_vm6 = vmpackc.low %vm13393_vm4, %vm13389_vm9  ;;  %v10444_v36 = vcombine.low %v1147_v30, %v1148_v32  ;;  %v10460_v37 = vcombine.high %v1147_v30, %v1148_v32  ;;  %v10445_v38 = vcombine.low %v1149_v33, %v1150_v34  ;;  %v10461_v40 = vcombine.high %v1149_v33, %v1150_v34 }
  0x62   :  { %11925 = vmatpush1.bf16.msk.msra.mxu0 %vm11924_vm6, %v13167_v48  ;;  %vm11988_vm7 = vmpackc.low %vm13401_vm12, %vm13397_vm5  ;;  %vm667_vm10 = vcmp.eq.bf16.partialorder %v13257_v31, %v13291_v8  ;;  %vm668_vm11 = vcmp.eq.bf16.partialorder %v13257_v31, %v13294_v9  ;;  %vm669_vm14 = vcmp.eq.bf16.partialorder %v13257_v31, %v13297_v10  ;;  %vm670_vm15 = vcmp.eq.bf16.partialorder %v13257_v31, %v13300_v11 }
  0x63   :  { %11989 = vmatpush1.bf16.msk.msra.mxu1 %vm11988_vm7, %v13167_v48  ;;  %vm3195_vm0 = vcmp.ne.s16.totalorder %v10444_v36, 0  ;;  %vm3211_vm1 = vcmp.ne.s16.totalorder %v10460_v37, 0  ;;  %vm3196_vm2 = vcmp.ne.s16.totalorder %v10445_v38, 0  ;;  %vm3212_vm3 = vcmp.ne.s16.totalorder %v10461_v40, 0  ;;  %8848 = vmatprep.mubr.bf16.mxu1 %v13021_v22 }
  0x64   :  { %v3707_v41 = vsel %vm3195_vm0, 65537, %v13166_v16  ;;  %v3723_v42 = vsel %vm3211_vm1, 65537, %v13166_v16  ;;  %v3708_v43 = vsel %vm3196_vm2, 65537, %v13166_v16  ;;  %v3724_v44 = vsel %vm3212_vm3, 65537, %v13166_v16 }
  0x65   :  { %v4284_v45 = vunpack.c.h.b16 %v3707_v41  ;;  %v4316_v46 = vunpack.c.h.b16 %v3723_v42  ;;  %v4286_v49 = vunpack.c.h.b16 %v3708_v43  ;;  %v4318_v50 = vunpack.c.h.b16 %v3724_v44 }
  0x66   :  { %v4283_v51 = vunpack.c.l.b16 %v3707_v41  ;;  %v4315_v52 = vunpack.c.l.b16 %v3723_v42  ;;  %v4285_v53 = vunpack.c.l.b16 %v3708_v43  ;;  %v4317_v54 = vunpack.c.l.b16 %v3724_v44 }
  0x67   :  { %vm5308_vm8 = vcmp.ne.s32.totalorder %v4284_v45, 0  ;;  %vm5340_vm9 = vcmp.ne.s32.totalorder %v4316_v46, 0  ;;  %vm5310_vm4 = vcmp.ne.s32.totalorder %v4286_v49, 0  ;;  %vm5342_vm5 = vcmp.ne.s32.totalorder %v4318_v50, 0 }
  0x68   :  { %vm11926_vm12 = vmpackc.low %vm5340_vm9, %vm5308_vm8  ;;  %vm13445_vm13 = vcmp.ne.s32.totalorder %v4283_v51, 0  ;;  %vm13449_vm6 = vcmp.ne.s32.totalorder %v4315_v52, 0  ;;  %vm13453_vm7 = vcmp.ne.s32.totalorder %v4285_v53, 0  ;;  %vm13457_vm0 = vcmp.ne.s32.totalorder %v4317_v54, 0 }
  0x69   :  { %11927 = vmatprep.subr.msk.bf16.mxu0 %vm11926_vm12, %v13167_v48  ;;  %vm11990_vm1 = vmpackc.low %vm5342_vm5, %vm5310_vm4  ;;  %v1179_v61 = vsel %vm667_vm10, 65537, %v13166_v16  ;;  %v1180_v62 = vsel %vm668_vm11, 65537, %v13166_v16  ;;  %v1181_v63 = vsel %vm669_vm14, 65537, %v13166_v16  ;;  %v1182_v0 = vsel %vm670_vm15, 65537, %v13166_v16 }
  0x6a   :  { %11991 = vmatprep.subr.msk.bf16.mxu1 %vm11990_vm1, %v13167_v48  ;;  %vm11928_vm10 = vmpackc.low %vm13449_vm6, %vm13445_vm13  ;;  %v10476_v17 = vcombine.low %v1179_v61, %v1180_v62  ;;  %v10492_v18 = vcombine.high %v1179_v61, %v1180_v62  ;;  %v10477_v19 = vcombine.low %v1181_v63, %v1182_v0  ;;  %v10493_v21 = vcombine.high %v1181_v63, %v1182_v0 }
  0x6b   :  { %11929 = vmatpush1.bf16.msk.msra.mxu0 %vm11928_vm10, %v13167_v48  ;;  %vm11992_vm11 = vmpackc.low %vm13457_vm0, %vm13453_vm7  ;;  %vm699_vm14 = vcmp.eq.bf16.partialorder %v13265_v39, %v13291_v8  ;;  %vm700_vm15 = vcmp.eq.bf16.partialorder %v13265_v39, %v13294_v9  ;;  %vm701_vm2 = vcmp.eq.bf16.partialorder %v13265_v39, %v13297_v10  ;;  %vm702_vm3 = vcmp.eq.bf16.partialorder %v13265_v39, %v13300_v11 }
  0x6c   :  { %11993 = vmatpush1.bf16.msk.msra.mxu1 %vm11992_vm11, %v13167_v48  ;;  %vm3227_vm8 = vcmp.ne.s16.totalorder %v10476_v17, 0  ;;  %vm3243_vm9 = vcmp.ne.s16.totalorder %v10492_v18, 0  ;;  %vm3228_vm4 = vcmp.ne.s16.totalorder %v10477_v19, 0  ;;  %vm3244_vm5 = vcmp.ne.s16.totalorder %v10493_v21, 0 }
  0x6d   :  { %v3739_v24 = vsel %vm3227_vm8, 65537, %v13166_v16  ;;  %v3755_v25 = vsel %vm3243_vm9, 65537, %v13166_v16  ;;  %v3740_v26 = vsel %vm3228_vm4, 65537, %v13166_v16  ;;  %v3756_v27 = vsel %vm3244_vm5, 65537, %v13166_v16 }
  0x6e   :  { %v4348_v29 = vunpack.c.h.b16 %v3739_v24  ;;  %v4380_v30 = vunpack.c.h.b16 %v3755_v25  ;;  %v4350_v32 = vunpack.c.h.b16 %v3740_v26  ;;  %v4382_v33 = vunpack.c.h.b16 %v3756_v27 }
  0x6f   :  { %v4347_v34 = vunpack.c.l.b16 %v3739_v24  ;;  %v4379_v36 = vunpack.c.l.b16 %v3755_v25  ;;  %v4349_v37 = vunpack.c.l.b16 %v3740_v26  ;;  %v4381_v38 = vunpack.c.l.b16 %v3756_v27 }
  0x70   :  { %vm5372_vm12 = vcmp.ne.s32.totalorder %v4348_v29, 0  ;;  %vm5404_vm13 = vcmp.ne.s32.totalorder %v4380_v30, 0  ;;  %vm5374_vm6 = vcmp.ne.s32.totalorder %v4350_v32, 0  ;;  %vm5406_vm7 = vcmp.ne.s32.totalorder %v4382_v33, 0 }
  0x71   :  { %vm11930_vm0 = vmpackc.low %vm5404_vm13, %vm5372_vm12  ;;  %vm13501_vm1 = vcmp.ne.s32.totalorder %v4347_v34, 0  ;;  %vm13505_vm10 = vcmp.ne.s32.totalorder %v4379_v36, 0  ;;  %vm13509_vm11 = vcmp.ne.s32.totalorder %v4349_v37, 0  ;;  %vm13513_vm8 = vcmp.ne.s32.totalorder %v4381_v38, 0 }
  0x72   :  { %11931 = vmatprep.subr.msk.bf16.mxu0 %vm11930_vm0, %v13167_v48  ;;  %vm11994_vm9 = vmpackc.low %vm5406_vm7, %vm5374_vm6  ;;  %v1211_v44 = vsel %vm699_vm14, 65537, %v13166_v16  ;;  %v1212_v45 = vsel %vm700_vm15, 65537, %v13166_v16  ;;  %v1213_v46 = vsel %vm701_vm2, 65537, %v13166_v16  ;;  %v1214_v49 = vsel %vm702_vm3, 65537, %v13166_v16 }
  0x73   :  { %11995 = vmatprep.subr.msk.bf16.mxu1 %vm11994_vm9, %v13167_v48  ;;  %vm11932_vm14 = vmpackc.low %vm13505_vm10, %vm13501_vm1  ;;  %v10508_v50 = vcombine.low %v1211_v44, %v1212_v45  ;;  %v10524_v51 = vcombine.high %v1211_v44, %v1212_v45  ;;  %v10509_v52 = vcombine.low %v1213_v46, %v1214_v49  ;;  %v10525_v53 = vcombine.high %v1213_v46, %v1214_v49 }
  0x74   :  { %11933 = vmatpush1.bf16.msk.msra.mxu0 %vm11932_vm14, %v13167_v48  ;;  %vm11996_vm15 = vmpackc.low %vm13513_vm8, %vm13509_vm11  ;;  %vm731_vm2 = vcmp.eq.bf16.partialorder %v13276_v47, %v13291_v8  ;;  %vm732_vm3 = vcmp.eq.bf16.partialorder %v13276_v47, %v13294_v9  ;;  %vm733_vm4 = vcmp.eq.bf16.partialorder %v13276_v47, %v13297_v10  ;;  %vm734_vm5 = vcmp.eq.bf16.partialorder %v13276_v47, %v13300_v11 }
  0x75   :  { %11997 = vmatpush1.bf16.msk.msra.mxu1 %vm11996_vm15, %v13167_v48  ;;  %vm3259_vm12 = vcmp.ne.s16.totalorder %v10508_v50, 0  ;;  %vm3275_vm13 = vcmp.ne.s16.totalorder %v10524_v51, 0  ;;  %vm3260_vm6 = vcmp.ne.s16.totalorder %v10509_v52, 0  ;;  %vm3276_vm7 = vcmp.ne.s16.totalorder %v10525_v53, 0 }
  0x76   :  { %v3771_v54 = vsel %vm3259_vm12, 65537, %v13166_v16  ;;  %v3787_v57 = vsel %vm3275_vm13, 65537, %v13166_v16  ;;  %v3772_v58 = vsel %vm3260_vm6, 65537, %v13166_v16  ;;  %v3788_v59 = vsel %vm3276_vm7, 65537, %v13166_v16 }
  0x77   :  { %v4412_v60 = vunpack.c.h.b16 %v3771_v54  ;;  %v4444_v61 = vunpack.c.h.b16 %v3787_v57  ;;  %v4414_v62 = vunpack.c.h.b16 %v3772_v58  ;;  %v4446_v63 = vunpack.c.h.b16 %v3788_v59 }
  0x78   :  { %v4411_v0 = vunpack.c.l.b16 %v3771_v54  ;;  %v4443_v17 = vunpack.c.l.b16 %v3787_v57  ;;  %v4413_v18 = vunpack.c.l.b16 %v3772_v58  ;;  %v4445_v19 = vunpack.c.l.b16 %v3788_v59 }
  0x79   :  { %vm5436_vm0 = vcmp.ne.s32.totalorder %v4412_v60, 0  ;;  %vm5468_vm1 = vcmp.ne.s32.totalorder %v4444_v61, 0  ;;  %vm5438_vm10 = vcmp.ne.s32.totalorder %v4414_v62, 0  ;;  %vm5470_vm11 = vcmp.ne.s32.totalorder %v4446_v63, 0 }
  0x7a   :  { %vm11934_vm8 = vmpackc.low %vm5468_vm1, %vm5436_vm0  ;;  %vm13557_vm9 = vcmp.ne.s32.totalorder %v4411_v0, 0  ;;  %vm13561_vm14 = vcmp.ne.s32.totalorder %v4443_v17, 0  ;;  %vm13565_vm15 = vcmp.ne.s32.totalorder %v4413_v18, 0  ;;  %vm13569_vm12 = vcmp.ne.s32.totalorder %v4445_v19, 0 }
  0x7b   :  { %11935 = vmatprep.subr.msk.bf16.mxu0 %vm11934_vm8, %v13167_v48  ;;  %vm11998_vm13 = vmpackc.low %vm5470_vm11, %vm5438_vm10  ;;  %v1243_v26 = vsel %vm731_vm2, 65537, %v13166_v16  ;;  %v1244_v27 = vsel %vm732_vm3, 65537, %v13166_v16  ;;  %v1245_v29 = vsel %vm733_vm4, 65537, %v13166_v16  ;;  %v1246_v30 = vsel %vm734_vm5, 65537, %v13166_v16 }
  0x7c   :  { %11999 = vmatprep.subr.msk.bf16.mxu1 %vm11998_vm13, %v13167_v48  ;;  %vm11936_vm2 = vmpackc.low %vm13561_vm14, %vm13557_vm9  ;;  %v10540_v32 = vcombine.low %v1243_v26, %v1244_v27  ;;  %v10556_v33 = vcombine.high %v1243_v26, %v1244_v27  ;;  %v10541_v34 = vcombine.low %v1245_v29, %v1246_v30  ;;  %v10557_v36 = vcombine.high %v1245_v29, %v1246_v30 }
  0x7d   :  { %11937 = vmatpush1.bf16.msk.msra.mxu0 %vm11936_vm2, %v13167_v48  ;;  %vm12000_vm3 = vmpackc.low %vm13569_vm12, %vm13565_vm15  ;;  %vm763_vm4 = vcmp.eq.bf16.partialorder %v13278_v55, %v13291_v8  ;;  %vm764_vm5 = vcmp.eq.bf16.partialorder %v13278_v55, %v13294_v9  ;;  %vm765_vm6 = vcmp.eq.bf16.partialorder %v13278_v55, %v13297_v10  ;;  %vm766_vm7 = vcmp.eq.bf16.partialorder %v13278_v55, %v13300_v11 }
  0x7e   :  { %12001 = vmatpush1.bf16.msk.msra.mxu1 %vm12000_vm3, %v13167_v48  ;;  %vm3291_vm0 = vcmp.ne.s16.totalorder %v10540_v32, 0  ;;  %vm3307_vm1 = vcmp.ne.s16.totalorder %v10556_v33, 0  ;;  %vm3292_vm10 = vcmp.ne.s16.totalorder %v10541_v34, 0  ;;  %vm3308_vm11 = vcmp.ne.s16.totalorder %v10557_v36, 0 }
  0x7f   :  { %v3803_v37 = vsel %vm3291_vm0, 65537, %v13166_v16  ;;  %v3819_v38 = vsel %vm3307_vm1, 65537, %v13166_v16  ;;  %v3804_v40 = vsel %vm3292_vm10, 65537, %v13166_v16  ;;  %v3820_v41 = vsel %vm3308_vm11, 65537, %v13166_v16 }
  0x80   :  { %v4476_v42 = vunpack.c.h.b16 %v3803_v37  ;;  %v4508_v43 = vunpack.c.h.b16 %v3819_v38  ;;  %v4478_v44 = vunpack.c.h.b16 %v3804_v40  ;;  %v4510_v45 = vunpack.c.h.b16 %v3820_v41 }
  0x81   :  { %v4475_v46 = vunpack.c.l.b16 %v3803_v37  ;;  %v4507_v49 = vunpack.c.l.b16 %v3819_v38  ;;  %v4477_v50 = vunpack.c.l.b16 %v3804_v40  ;;  %v4509_v51 = vunpack.c.l.b16 %v3820_v41 }
  0x82   :  { %vm5500_vm8 = vcmp.ne.s32.totalorder %v4476_v42, 0  ;;  %vm5532_vm9 = vcmp.ne.s32.totalorder %v4508_v43, 0  ;;  %vm5502_vm14 = vcmp.ne.s32.totalorder %v4478_v44, 0  ;;  %vm5534_vm15 = vcmp.ne.s32.totalorder %v4510_v45, 0 }
  0x83   :  { %vm11938_vm12 = vmpackc.low %vm5532_vm9, %vm5500_vm8  ;;  %vm13613_vm13 = vcmp.ne.s32.totalorder %v4475_v46, 0  ;;  %vm13617_vm2 = vcmp.ne.s32.totalorder %v4507_v49, 0  ;;  %vm13621_vm3 = vcmp.ne.s32.totalorder %v4477_v50, 0  ;;  %vm13625_vm0 = vcmp.ne.s32.totalorder %v4509_v51, 0 }
  0x84   :  { %11939 = vmatprep.subr.msk.bf16.mxu0 %vm11938_vm12, %v13167_v48  ;;  %vm12002_vm1 = vmpackc.low %vm5534_vm15, %vm5502_vm14  ;;  %v1275_v58 = vsel %vm763_vm4, 65537, %v13166_v16  ;;  %v1276_v59 = vsel %vm764_vm5, 65537, %v13166_v16  ;;  %v1277_v60 = vsel %vm765_vm6, 65537, %v13166_v16  ;;  %v1278_v61 = vsel %vm766_vm7, 65537, %v13166_v16 }
  0x85   :  { %12003 = vmatprep.subr.msk.bf16.mxu1 %vm12002_vm1, %v13167_v48  ;;  %vm11940_vm4 = vmpackc.low %vm13617_vm2, %vm13613_vm13  ;;  %v10572_v62 = vcombine.low %v1275_v58, %v1276_v59  ;;  %v10588_v63 = vcombine.high %v1275_v58, %v1276_v59  ;;  %v10573_v0 = vcombine.low %v1277_v60, %v1278_v61  ;;  %v10589_v17 = vcombine.high %v1277_v60, %v1278_v61 }
  0x86   :  { %11941 = vmatpush1.bf16.msk.msra.mxu0 %vm11940_vm4, %v13167_v48  ;;  %vm12004_vm5 = vmpackc.low %vm13625_vm0, %vm13621_vm3  ;;  %vm795_vm6 = vcmp.eq.bf16.partialorder %v13280_v56, %v13291_v8  ;;  %vm796_vm7 = vcmp.eq.bf16.partialorder %v13280_v56, %v13294_v9  ;;  %vm797_vm10 = vcmp.eq.bf16.partialorder %v13280_v56, %v13297_v10  ;;  %vm798_vm11 = vcmp.eq.bf16.partialorder %v13280_v56, %v13300_v11 }
  0x87   :  { %12005 = vmatpush1.bf16.msk.msra.mxu1 %vm12004_vm5, %v13167_v48  ;;  %vm3323_vm8 = vcmp.ne.s16.totalorder %v10572_v62, 0  ;;  %vm3339_vm9 = vcmp.ne.s16.totalorder %v10588_v63, 0  ;;  %vm3324_vm14 = vcmp.ne.s16.totalorder %v10573_v0, 0  ;;  %vm3340_vm15 = vcmp.ne.s16.totalorder %v10589_v17, 0 }
  0x88   :  { %v3835_v18 = vsel %vm3323_vm8, 65537, %v13166_v16  ;;  %v3851_v19 = vsel %vm3339_vm9, 65537, %v13166_v16  ;;  %v3836_v21 = vsel %vm3324_vm14, 65537, %v13166_v16  ;;  %v3852_v22 = vsel %vm3340_vm15, 65537, %v13166_v16 }
  0x89   :  { %v4540_v24 = vunpack.c.h.b16 %v3835_v18  ;;  %v4572_v25 = vunpack.c.h.b16 %v3851_v19  ;;  %v4542_v26 = vunpack.c.h.b16 %v3836_v21  ;;  %v4574_v27 = vunpack.c.h.b16 %v3852_v22 }
  0x8a   :  { %v4539_v29 = vunpack.c.l.b16 %v3835_v18  ;;  %v4571_v30 = vunpack.c.l.b16 %v3851_v19  ;;  %v4541_v32 = vunpack.c.l.b16 %v3836_v21  ;;  %v4573_v33 = vunpack.c.l.b16 %v3852_v22 }
  0x8b   :  { %vm5564_vm12 = vcmp.ne.s32.totalorder %v4540_v24, 0  ;;  %vm5596_vm13 = vcmp.ne.s32.totalorder %v4572_v25, 0  ;;  %vm5566_vm2 = vcmp.ne.s32.totalorder %v4542_v26, 0  ;;  %vm5598_vm3 = vcmp.ne.s32.totalorder %v4574_v27, 0 }
  0x8c   :  { %vm11942_vm0 = vmpackc.low %vm5596_vm13, %vm5564_vm12  ;;  %vm13669_vm1 = vcmp.ne.s32.totalorder %v4539_v29, 0  ;;  %vm13673_vm4 = vcmp.ne.s32.totalorder %v4571_v30, 0  ;;  %vm13677_vm5 = vcmp.ne.s32.totalorder %v4541_v32, 0  ;;  %vm13681_vm8 = vcmp.ne.s32.totalorder %v4573_v33, 0 }
  0x8d   :  { %11943 = vmatprep.subr.msk.bf16.mxu0 %vm11942_vm0, %v13167_v48  ;;  %vm12006_vm9 = vmpackc.low %vm5598_vm3, %vm5566_vm2  ;;  %v1307_v40 = vsel %vm795_vm6, 65537, %v13166_v16  ;;  %v1308_v41 = vsel %vm796_vm7, 65537, %v13166_v16  ;;  %v1309_v42 = vsel %vm797_vm10, 65537, %v13166_v16  ;;  %v1310_v43 = vsel %vm798_vm11, 65537, %v13166_v16 }
  0x8e   :  { %12007 = vmatprep.subr.msk.bf16.mxu1 %vm12006_vm9, %v13167_v48  ;;  %vm11944_vm6 = vmpackc.low %vm13673_vm4, %vm13669_vm1  ;;  %v10604_v44 = vcombine.low %v1307_v40, %v1308_v41  ;;  %v10620_v45 = vcombine.high %v1307_v40, %v1308_v41  ;;  %v10605_v46 = vcombine.low %v1309_v42, %v1310_v43  ;;  %v10621_v49 = vcombine.high %v1309_v42, %v1310_v43 }
  0x8f   :  { %11945 = vmatpush1.bf16.msk.msra.mxu0 %vm11944_vm6, %v13167_v48  ;;  %vm12008_vm7 = vmpackc.low %vm13681_vm8, %vm13677_vm5  ;;  %vm827_vm10 = vcmp.eq.bf16.partialorder %v13302_v12, %v13291_v8  ;;  %vm828_vm11 = vcmp.eq.bf16.partialorder %v13302_v12, %v13294_v9  ;;  %vm829_vm14 = vcmp.eq.bf16.partialorder %v13302_v12, %v13297_v10  ;;  %vm830_vm15 = vcmp.eq.bf16.partialorder %v13302_v12, %v13300_v11 }
  0x90   :  { %12009 = vmatpush1.bf16.msk.msra.mxu1 %vm12008_vm7, %v13167_v48  ;;  %vm3355_vm12 = vcmp.ne.s16.totalorder %v10604_v44, 0  ;;  %vm3371_vm13 = vcmp.ne.s16.totalorder %v10620_v45, 0  ;;  %vm3356_vm2 = vcmp.ne.s16.totalorder %v10605_v46, 0  ;;  %vm3372_vm3 = vcmp.ne.s16.totalorder %v10621_v49, 0 }
  0x91   :  { %v3867_v50 = vsel %vm3355_vm12, 65537, %v13166_v16  ;;  %v3883_v51 = vsel %vm3371_vm13, 65537, %v13166_v16  ;;  %v3868_v52 = vsel %vm3356_vm2, 65537, %v13166_v16  ;;  %v3884_v53 = vsel %vm3372_vm3, 65537, %v13166_v16 }
  0x92   :  { %v4604_v54 = vunpack.c.h.b16 %v3867_v50  ;;  %v4636_v57 = vunpack.c.h.b16 %v3883_v51  ;;  %v4606_v58 = vunpack.c.h.b16 %v3868_v52  ;;  %v4638_v59 = vunpack.c.h.b16 %v3884_v53 }
  0x93   :  { %v4603_v60 = vunpack.c.l.b16 %v3867_v50  ;;  %v4635_v61 = vunpack.c.l.b16 %v3883_v51  ;;  %v4605_v62 = vunpack.c.l.b16 %v3868_v52  ;;  %v4637_v63 = vunpack.c.l.b16 %v3884_v53 }
  0x94   :  { %vm5628_vm0 = vcmp.ne.s32.totalorder %v4604_v54, 0  ;;  %vm5660_vm1 = vcmp.ne.s32.totalorder %v4636_v57, 0  ;;  %vm5630_vm4 = vcmp.ne.s32.totalorder %v4606_v58, 0  ;;  %vm5662_vm5 = vcmp.ne.s32.totalorder %v4638_v59, 0 }
  0x95   :  { %vm11946_vm8 = vmpackc.low %vm5660_vm1, %vm5628_vm0  ;;  %vm13725_vm9 = vcmp.ne.s32.totalorder %v4603_v60, 0  ;;  %vm13729_vm6 = vcmp.ne.s32.totalorder %v4635_v61, 0  ;;  %vm13733_vm7 = vcmp.ne.s32.totalorder %v4605_v62, 0  ;;  %vm13737_vm12 = vcmp.ne.s32.totalorder %v4637_v63, 0 }
  0x96   :  { %11947 = vmatprep.subr.msk.bf16.mxu0 %vm11946_vm8, %v13167_v48  ;;  %vm12010_vm13 = vmpackc.low %vm5662_vm5, %vm5630_vm4  ;;  %v1339_v21 = vsel %vm827_vm10, 65537, %v13166_v16  ;;  %v1340_v22 = vsel %vm828_vm11, 65537, %v13166_v16  ;;  %v1341_v24 = vsel %vm829_vm14, 65537, %v13166_v16  ;;  %v1342_v25 = vsel %vm830_vm15, 65537, %v13166_v16 }
  0x97   :  { %12011 = vmatprep.subr.msk.bf16.mxu1 %vm12010_vm13, %v13167_v48  ;;  %vm11948_vm10 = vmpackc.low %vm13729_vm6, %vm13725_vm9  ;;  %v10636_v26 = vcombine.low %v1339_v21, %v1340_v22  ;;  %v10652_v27 = vcombine.high %v1339_v21, %v1340_v22  ;;  %v10637_v29 = vcombine.low %v1341_v24, %v1342_v25  ;;  %v10653_v30 = vcombine.high %v1341_v24, %v1342_v25 }
  0x98   :  { %11949 = vmatpush1.bf16.msk.msra.mxu0 %vm11948_vm10, %v13167_v48  ;;  %vm12012_vm11 = vmpackc.low %vm13737_vm12, %vm13733_vm7  ;;  %v13772_v32 = vpack.c.bf16 %v118_v14, %v117_v13  ;;  %v13775_v33 = vadd.s32 168, %v13226_v1  ;;  %v119_v34 = vcvt.s32.f32 %v13307_v15  ;;  %v13779_v36 = vadd.s32 176, %v13226_v1 }
  0x99   :  { %12013 = vmatpush1.bf16.msk.msra.mxu1 %vm12012_vm11, %v13167_v48  ;;  %vm3387_vm14 = vcmp.ne.s16.totalorder %v10636_v26, 0  ;;  %vm3403_vm15 = vcmp.ne.s16.totalorder %v10652_v27, 0  ;;  %vm3388_vm2 = vcmp.ne.s16.totalorder %v10637_v29, 0  ;;  %vm3404_vm3 = vcmp.ne.s16.totalorder %v10653_v30, 0 }
  0x9a   :  { %v3899_v2 = vsel %vm3387_vm14, 65537, %v13166_v16  ;;  %v3915_v3 = vsel %vm3403_vm15, 65537, %v13166_v16  ;;  %v3900_v13 = vsel %vm3388_vm2, 65537, %v13166_v16  ;;  %v3916_v14 = vsel %vm3404_vm3, 65537, %v13166_v16 }
  0x9b   :  { %v4668_v37 = vunpack.c.h.b16 %v3899_v2  ;;  %v4700_v38 = vunpack.c.h.b16 %v3915_v3  ;;  %v4670_v40 = vunpack.c.h.b16 %v3900_v13  ;;  %v4702_v41 = vunpack.c.h.b16 %v3916_v14 }
  0x9c   :  { %v4667_v42 = vunpack.c.l.b16 %v3899_v2  ;;  %v4699_v43 = vunpack.c.l.b16 %v3915_v3  ;;  %v4669_v44 = vunpack.c.l.b16 %v3900_v13  ;;  %v4701_v45 = vunpack.c.l.b16 %v3916_v14 }
  0x9d   :  { %vm5692_vm0 = vcmp.ne.s32.totalorder %v4668_v37, 0  ;;  %vm5724_vm1 = vcmp.ne.s32.totalorder %v4700_v38, 0  ;;  %vm5694_vm4 = vcmp.ne.s32.totalorder %v4670_v40, 0  ;;  %vm5726_vm5 = vcmp.ne.s32.totalorder %v4702_v41, 0 }
  0x9e   :  { %vm11950_vm8 = vmpackc.low %vm5724_vm1, %vm5692_vm0  ;;  %vm13786_vm9 = vcmp.ne.s32.totalorder %v4667_v42, 0  ;;  %vm13790_vm6 = vcmp.ne.s32.totalorder %v4699_v43, 0  ;;  %vm13794_vm7 = vcmp.ne.s32.totalorder %v4669_v44, 0  ;;  %vm13798_vm12 = vcmp.ne.s32.totalorder %v4701_v45, 0 }
  0x9f   :  { %11951 = vmatprep.subr.msk.bf16.mxu0 %vm11950_vm8, %v13167_v48  ;;  %vm12014_vm13 = vmpackc.low %vm5726_vm5, %vm5694_vm4  ;;  %vm859_vm10 = vcmp.eq.bf16.partialorder %v13772_v32, %v13291_v8  ;;  %vm860_vm11 = vcmp.eq.bf16.partialorder %v13772_v32, %v13294_v9  ;;  %vm861_vm14 = vcmp.eq.bf16.partialorder %v13772_v32, %v13297_v10  ;;  %vm862_vm15 = vcmp.eq.bf16.partialorder %v13772_v32, %v13300_v11 }
  0xa0   :  { %12015 = vmatprep.subr.msk.bf16.mxu1 %vm12014_vm13, %v13167_v48  ;;  %vm11952_vm2 = vmpackc.low %vm13790_vm6, %vm13786_vm9  ;;  %v1371_v52 = vsel %vm859_vm10, 65537, %v13166_v16  ;;  %v1372_v53 = vsel %vm860_vm11, 65537, %v13166_v16  ;;  %v1373_v54 = vsel %vm861_vm14, 65537, %v13166_v16  ;;  %v1374_v57 = vsel %vm862_vm15, 65537, %v13166_v16 }
  0xa1   :  { %11953 = vmatpush1.bf16.msk.msra.mxu0 %vm11952_vm2, %v13167_v48  ;;  %vm12016_vm3 = vmpackc.low %vm13798_vm12, %vm13794_vm7  ;;  %v10668_v58 = vcombine.low %v1371_v52, %v1372_v53  ;;  %v10684_v59 = vcombine.high %v1371_v52, %v1372_v53  ;;  %v10669_v60 = vcombine.low %v1373_v54, %v1374_v57  ;;  %v10685_v61 = vcombine.high %v1373_v54, %v1374_v57 }
  0xa2   :  { %12017 = vmatpush1.bf16.msk.msra.mxu1 %vm12016_vm3, %v13167_v48  ;;  %v120_v62 = vcvt.s32.f32 %v13775_v33  ;;  %v90_v63 = vadd.s32 184, %v13226_v1  ;;  %v121_v0 = vcvt.s32.f32 %v13779_v36  ;;  %v13830_v17 = vadd.s32 192, %v13226_v1 }
  0xa3   :  { %vm3419_vm0 = vcmp.ne.s16.totalorder %v10668_v58, 0  ;;  %vm3435_vm1 = vcmp.ne.s16.totalorder %v10684_v59, 0  ;;  %vm3420_vm4 = vcmp.ne.s16.totalorder %v10669_v60, 0  ;;  %vm3436_vm5 = vcmp.ne.s16.totalorder %v10685_v61, 0 }
  0xa4   :  { %v3931_v18 = vsel %vm3419_vm0, 65537, %v13166_v16  ;;  %v3947_v19 = vsel %vm3435_vm1, 65537, %v13166_v16  ;;  %v3932_v21 = vsel %vm3420_vm4, 65537, %v13166_v16  ;;  %v3948_v22 = vsel %vm3436_vm5, 65537, %v13166_v16 }
  0xa5   :  { %v4732_v24 = vunpack.c.h.b16 %v3931_v18  ;;  %v4764_v25 = vunpack.c.h.b16 %v3947_v19  ;;  %v4734_v26 = vunpack.c.h.b16 %v3932_v21  ;;  %v4766_v27 = vunpack.c.h.b16 %v3948_v22 }
  0xa6   :  { %v4731_v29 = vunpack.c.l.b16 %v3931_v18  ;;  %v4763_v30 = vunpack.c.l.b16 %v3947_v19  ;;  %v4733_v33 = vunpack.c.l.b16 %v3932_v21  ;;  %v4765_v36 = vunpack.c.l.b16 %v3948_v22 }
  0xa7   :  { %vm5756_vm8 = vcmp.ne.s32.totalorder %v4732_v24, 0  ;;  %vm5788_vm9 = vcmp.ne.s32.totalorder %v4764_v25, 0  ;;  %vm5758_vm6 = vcmp.ne.s32.totalorder %v4734_v26, 0  ;;  %vm5790_vm7 = vcmp.ne.s32.totalorder %v4766_v27, 0 }
  0xa8   :  { %vm11954_vm12 = vmpackc.low %vm5788_vm9, %vm5756_vm8  ;;  %vm13836_vm13 = vcmp.ne.s32.totalorder %v4731_v29, 0  ;;  %vm13840_vm10 = vcmp.ne.s32.totalorder %v4763_v30, 0  ;;  %vm13844_vm11 = vcmp.ne.s32.totalorder %v4733_v33, 0  ;;  %vm13848_vm14 = vcmp.ne.s32.totalorder %v4765_v36, 0 }
  0xa9   :  { %11955 = vmatprep.subr.msk.bf16.mxu0 %vm11954_vm12, %v13167_v48  ;;  %vm12018_vm15 = vmpackc.low %vm5790_vm7, %vm5758_vm6  ;;  %v13855_v37 = vpack.c.bf16 %v120_v62, %v119_v34  ;;  %v122_v38 = vcvt.s32.f32 %v90_v63  ;;  %v13858_v40 = vadd.s32 200, %v13226_v1  ;;  %v123_v41 = vcvt.s32.f32 %v13830_v17 }
  0xaa   :  { %12019 = vmatprep.subr.msk.bf16.mxu1 %vm12018_vm15, %v13167_v48  ;;  %vm11956_vm2 = vmpackc.low %vm13840_vm10, %vm13836_vm13  ;;  %v13867_v42 = vadd.s32 208, %v13226_v1  ;;  %v13870_v15 = vadd.s32 216, %v13226_v1  ;;  %v13873_v34 = vadd.s32 224, %v13226_v1  ;;  %v13876_v43 = vadd.s32 232, %v13226_v1 }
  0xab   :  { %11957 = vmatpush1.bf16.msk.msra.mxu0 %vm11956_vm2, %v13167_v48  ;;  %vm12020_vm3 = vmpackc.low %vm13848_vm14, %vm13844_vm11  ;;  %vm891_vm0 = vcmp.eq.bf16.partialorder %v13855_v37, %v13291_v8  ;;  %vm892_vm1 = vcmp.eq.bf16.partialorder %v13855_v37, %v13294_v9  ;;  %vm893_vm4 = vcmp.eq.bf16.partialorder %v13855_v37, %v13297_v10  ;;  %vm894_vm5 = vcmp.eq.bf16.partialorder %v13855_v37, %v13300_v11 }
  0xac   :  { %12021 = vmatpush1.bf16.msk.msra.mxu1 %vm12020_vm3, %v13167_v48  ;;  %v1403_v44 = vsel %vm891_vm0, 65537, %v13166_v16  ;;  %v1404_v45 = vsel %vm892_vm1, 65537, %v13166_v16  ;;  %v1405_v46 = vsel %vm893_vm4, 65537, %v13166_v16  ;;  %v1406_v49 = vsel %vm894_vm5, 65537, %v13166_v16 }
  0xad   :  { %v10700_v50 = vcombine.low %v1403_v44, %v1404_v45  ;;  %v10716_v51 = vcombine.high %v1403_v44, %v1404_v45  ;;  %v10701_v52 = vcombine.low %v1405_v46, %v1406_v49  ;;  %v10717_v53 = vcombine.high %v1405_v46, %v1406_v49 }
  0xae   :  { %v13896_v54 = vpack.c.bf16 %v122_v38, %v121_v0  ;;  %v124_v57 = vcvt.s32.f32 %v13858_v40  ;;  %v125_v58 = vcvt.s32.f32 %v13867_v42  ;;  %v126_v59 = vcvt.s32.f32 %v13870_v15 }
  0xaf   :  { %vm3451_vm8 = vcmp.ne.s16.totalorder %v10700_v50, 0  ;;  %vm3467_vm9 = vcmp.ne.s16.totalorder %v10716_v51, 0  ;;  %vm3452_vm6 = vcmp.ne.s16.totalorder %v10701_v52, 0  ;;  %vm3468_vm7 = vcmp.ne.s16.totalorder %v10717_v53, 0 }
  0xb0   :  { %v3963_v60 = vsel %vm3451_vm8, 65537, %v13166_v16  ;;  %v3979_v61 = vsel %vm3467_vm9, 65537, %v13166_v16  ;;  %v3964_v62 = vsel %vm3452_vm6, 65537, %v13166_v16  ;;  %v3980_v63 = vsel %vm3468_vm7, 65537, %v13166_v16 }
  0xb1   :  { %v4796_v0 = vunpack.c.h.b16 %v3963_v60  ;;  %v4828_v18 = vunpack.c.h.b16 %v3979_v61  ;;  %v4798_v19 = vunpack.c.h.b16 %v3964_v62  ;;  %v4830_v21 = vunpack.c.h.b16 %v3980_v63 }
  0xb2   :  { %v4795_v22 = vunpack.c.l.b16 %v3963_v60  ;;  %v4827_v24 = vunpack.c.l.b16 %v3979_v61  ;;  %v4797_v25 = vunpack.c.l.b16 %v3964_v62  ;;  %v4829_v26 = vunpack.c.l.b16 %v3980_v63 }
  0xb3   :  { %vm5820_vm12 = vcmp.ne.s32.totalorder %v4796_v0, 0  ;;  %vm5852_vm13 = vcmp.ne.s32.totalorder %v4828_v18, 0  ;;  %vm5822_vm10 = vcmp.ne.s32.totalorder %v4798_v19, 0  ;;  %vm5854_vm11 = vcmp.ne.s32.totalorder %v4830_v21, 0 }
  0xb4   :  { %vm11958_vm14 = vmpackc.low %vm5852_vm13, %vm5820_vm12  ;;  %vm13905_vm15 = vcmp.ne.s32.totalorder %v4795_v22, 0  ;;  %vm13909_vm2 = vcmp.ne.s32.totalorder %v4827_v24, 0  ;;  %vm13913_vm3 = vcmp.ne.s32.totalorder %v4797_v25, 0  ;;  %vm13917_vm0 = vcmp.ne.s32.totalorder %v4829_v26, 0 }
  0xb5   :  { %11959 = vmatprep.subr.msk.bf16.mxu0 %vm11958_vm14, %v13167_v48  ;;  %vm12022_vm1 = vmpackc.low %vm5854_vm11, %vm5822_vm10  ;;  %vm923_vm4 = vcmp.eq.bf16.partialorder %v13896_v54, %v13291_v8  ;;  %vm924_vm5 = vcmp.eq.bf16.partialorder %v13896_v54, %v13294_v9  ;;  %vm925_vm8 = vcmp.eq.bf16.partialorder %v13896_v54, %v13297_v10  ;;  %vm926_vm9 = vcmp.eq.bf16.partialorder %v13896_v54, %v13300_v11 }
  0xb6   :  { %12023 = vmatprep.subr.msk.bf16.mxu1 %vm12022_vm1, %v13167_v48  ;;  %vm11960_vm6 = vmpackc.low %vm13909_vm2, %vm13905_vm15  ;;  %v1435_v36 = vsel %vm923_vm4, 65537, %v13166_v16  ;;  %v1436_v2 = vsel %vm924_vm5, 65537, %v13166_v16  ;;  %v1437_v3 = vsel %vm925_vm8, 65537, %v13166_v16  ;;  %v1438_v13 = vsel %vm926_vm9, 65537, %v13166_v16 }
  0xb7   :  { %11961 = vmatpush1.bf16.msk.msra.mxu0 %vm11960_vm6, %v13167_v48  ;;  %vm12024_vm7 = vmpackc.low %vm13917_vm0, %vm13913_vm3  ;;  %v10732_v14 = vcombine.low %v1435_v36, %v1436_v2  ;;  %v10748_v38 = vcombine.high %v1435_v36, %v1436_v2  ;;  %v10733_v40 = vcombine.low %v1437_v3, %v1438_v13  ;;  %v10749_v42 = vcombine.high %v1437_v3, %v1438_v13 }
  0xb8   :  { %12025 = vmatpush1.bf16.msk.msra.mxu1 %vm12024_vm7, %v13167_v48  ;;  %v13947_v15 = vpack.c.bf16 %v124_v57, %v123_v41  ;;  %v13949_v44 = vpack.c.bf16 %v126_v59, %v125_v58  ;;  %v127_v45 = vcvt.s32.f32 %v13873_v34  ;;  %v128_v46 = vcvt.s32.f32 %v13876_v43 }
  0xb9   :  { %vm3483_vm12 = vcmp.ne.s16.totalorder %v10732_v14, 0  ;;  %vm3499_vm13 = vcmp.ne.s16.totalorder %v10748_v38, 0  ;;  %vm3484_vm10 = vcmp.ne.s16.totalorder %v10733_v40, 0  ;;  %vm3500_vm11 = vcmp.ne.s16.totalorder %v10749_v42, 0 }
  0xba   :  { %v3995_v49 = vsel %vm3483_vm12, 65537, %v13166_v16  ;;  %v4011_v50 = vsel %vm3499_vm13, 65537, %v13166_v16  ;;  %v3996_v51 = vsel %vm3484_vm10, 65537, %v13166_v16  ;;  %v4012_v17 = vsel %vm3500_vm11, 65537, %v13166_v16 }
  0xbb   :  { %v4860_v41 = vunpack.c.h.b16 %v3995_v49  ;;  %v4892_v52 = vunpack.c.h.b16 %v4011_v50  ;;  %v4862_v53 = vunpack.c.h.b16 %v3996_v51  ;;  %v4894_v57 = vunpack.c.h.b16 %v4012_v17 }
  0xbc   :  { %v4859_v58 = vunpack.c.l.b16 %v3995_v49  ;;  %v4891_v59 = vunpack.c.l.b16 %v4011_v50  ;;  %v4861_v60 = vunpack.c.l.b16 %v3996_v51  ;;  %v4893_v61 = vunpack.c.l.b16 %v4012_v17 }
  0xbd   :  { %vm5884_vm14 = vcmp.ne.s32.totalorder %v4860_v41, 0  ;;  %vm5916_vm15 = vcmp.ne.s32.totalorder %v4892_v52, 0  ;;  %vm5886_vm2 = vcmp.ne.s32.totalorder %v4862_v53, 0  ;;  %vm5918_vm3 = vcmp.ne.s32.totalorder %v4894_v57, 0 }
  0xbe   :  { %vm11962_vm0 = vmpackc.low %vm5916_vm15, %vm5884_vm14  ;;  %vm13957_vm1 = vcmp.ne.s32.totalorder %v4859_v58, 0  ;;  %vm13961_vm4 = vcmp.ne.s32.totalorder %v4891_v59, 0  ;;  %vm13965_vm5 = vcmp.ne.s32.totalorder %v4861_v60, 0  ;;  %vm13969_vm8 = vcmp.ne.s32.totalorder %v4893_v61, 0 }
  0xbf   :  { %11963 = vmatprep.subr.msk.bf16.mxu0 %vm11962_vm0, %v13167_v48  ;;  %vm12026_vm9 = vmpackc.low %vm5918_vm3, %vm5886_vm2  ;;  %vm955_vm6 = vcmp.eq.bf16.partialorder %v13947_v15, %v13291_v8  ;;  %vm956_vm7 = vcmp.eq.bf16.partialorder %v13947_v15, %v13294_v9  ;;  %vm957_vm12 = vcmp.eq.bf16.partialorder %v13947_v15, %v13297_v10  ;;  %vm958_vm13 = vcmp.eq.bf16.partialorder %v13947_v15, %v13300_v11 }
  0xc0   :  { %12027 = vmatprep.subr.msk.bf16.mxu1 %vm12026_vm9, %v13167_v48  ;;  %vm11964_vm10 = vmpackc.low %vm13961_vm4, %vm13957_vm1  ;;  %v1467_v19 = vsel %vm955_vm6, 65537, %v13166_v16  ;;  %v1468_v21 = vsel %vm956_vm7, 65537, %v13166_v16  ;;  %v1469_v22 = vsel %vm957_vm12, 65537, %v13166_v16  ;;  %v1470_v24 = vsel %vm958_vm13, 65537, %v13166_v16 }
  0xc1   :  { %11965 = vmatpush1.bf16.msk.msra.mxu0 %vm11964_vm10, %v13167_v48  ;;  %vm12028_vm11 = vmpackc.low %vm13969_vm8, %vm13965_vm5  ;;  %v10764_v25 = vcombine.low %v1467_v19, %v1468_v21  ;;  %v10780_v26 = vcombine.high %v1467_v19, %v1468_v21  ;;  %v10765_v27 = vcombine.low %v1469_v22, %v1470_v24  ;;  %v10781_v29 = vcombine.high %v1469_v22, %v1470_v24 }
  0xc2   :  { %12029 = vmatpush1.bf16.msk.msra.mxu1 %vm12028_vm11, %v13167_v48  ;;  %vm987_vm14 = vcmp.eq.bf16.partialorder %v13949_v44, %v13291_v8  ;;  %vm988_vm15 = vcmp.eq.bf16.partialorder %v13949_v44, %v13294_v9  ;;  %vm989_vm2 = vcmp.eq.bf16.partialorder %v13949_v44, %v13297_v10  ;;  %vm990_vm3 = vcmp.eq.bf16.partialorder %v13949_v44, %v13300_v11 }
  0xc3   :  { %vm3515_vm0 = vcmp.ne.s16.totalorder %v10764_v25, 0  ;;  %vm3531_vm1 = vcmp.ne.s16.totalorder %v10780_v26, 0  ;;  %vm3516_vm4 = vcmp.ne.s16.totalorder %v10765_v27, 0  ;;  %vm3532_vm5 = vcmp.ne.s16.totalorder %v10781_v29, 0 }
  0xc4   :  { %v4027_v30 = vsel %vm3515_vm0, 65537, %v13166_v16  ;;  %v4043_v33 = vsel %vm3531_vm1, 65537, %v13166_v16  ;;  %v4028_v36 = vsel %vm3516_vm4, 65537, %v13166_v16  ;;  %v4044_v2 = vsel %vm3532_vm5, 65537, %v13166_v16 }
  0xc5   :  { %v4924_v3 = vunpack.c.h.b16 %v4027_v30  ;;  %v4956_v13 = vunpack.c.h.b16 %v4043_v33  ;;  %v4926_v14 = vunpack.c.h.b16 %v4028_v36  ;;  %v4958_v38 = vunpack.c.h.b16 %v4044_v2 }
  0xc6   :  { %v4923_v40 = vunpack.c.l.b16 %v4027_v30  ;;  %v4955_v42 = vunpack.c.l.b16 %v4043_v33  ;;  %v4925_v49 = vunpack.c.l.b16 %v4028_v36  ;;  %v4957_v50 = vunpack.c.l.b16 %v4044_v2 }
  0xc7   :  { %vm5948_vm8 = vcmp.ne.s32.totalorder %v4924_v3, 0  ;;  %vm5980_vm9 = vcmp.ne.s32.totalorder %v4956_v13, 0  ;;  %vm5950_vm6 = vcmp.ne.s32.totalorder %v4926_v14, 0  ;;  %vm5982_vm7 = vcmp.ne.s32.totalorder %v4958_v38, 0 }
  0xc8   :  { %vm11966_vm12 = vmpackc.low %vm5980_vm9, %vm5948_vm8  ;;  %vm14009_vm13 = vcmp.ne.s32.totalorder %v4923_v40, 0  ;;  %vm14013_vm10 = vcmp.ne.s32.totalorder %v4955_v42, 0  ;;  %vm14017_vm11 = vcmp.ne.s32.totalorder %v4925_v49, 0  ;;  %vm14021_vm0 = vcmp.ne.s32.totalorder %v4957_v50, 0 }
  0xc9   :  { %11967 = vmatprep.subr.msk.bf16.mxu0 %vm11966_vm12, %v13167_v48  ;;  %vm12030_vm1 = vmpackc.low %vm5982_vm7, %vm5950_vm6  ;;  %v1499_v53 = vsel %vm987_vm14, 65537, %v13166_v16  ;;  %v1500_v57 = vsel %vm988_vm15, 65537, %v13166_v16  ;;  %v1501_v58 = vsel %vm989_vm2, 65537, %v13166_v16  ;;  %v1502_v59 = vsel %vm990_vm3, 65537, %v13166_v16 }
  0xca   :  { %12031 = vmatprep.subr.msk.bf16.mxu1 %vm12030_vm1, %v13167_v48  ;;  %vm11968_vm14 = vmpackc.low %vm14013_vm10, %vm14009_vm13  ;;  %v10796_v60 = vcombine.low %v1499_v53, %v1500_v57  ;;  %v10812_v61 = vcombine.high %v1499_v53, %v1500_v57  ;;  %v10797_v62 = vcombine.low %v1501_v58, %v1502_v59  ;;  %v10813_v63 = vcombine.high %v1501_v58, %v1502_v59 }
  0xcb   :  { %11969 = vmatpush1.bf16.msk.msra.mxu0 %vm11968_vm14, %v13167_v48  ;;  %vm12032_vm15 = vmpackc.low %vm14021_vm0, %vm14017_vm11  ;;  %v14056_v0 = vpack.c.bf16 %v128_v46, %v127_v45  ;;  %v14059_v18 = vadd.s32 240, %v13226_v1  ;;  %v14062_v19 = vadd.s32 248, %v13226_v1  ;;  %v14065_v21 = vsub.s32 4, %v13226_v1 }
  0xcc   :  { %12033 = vmatpush1.bf16.msk.msra.mxu1 %vm12032_vm15, %v13167_v48  ;;  %vm3547_vm2 = vcmp.ne.s16.totalorder %v10796_v60, 0  ;;  %vm3563_vm3 = vcmp.ne.s16.totalorder %v10812_v61, 0  ;;  %vm3548_vm4 = vcmp.ne.s16.totalorder %v10797_v62, 0  ;;  %vm3564_vm5 = vcmp.ne.s16.totalorder %v10813_v63, 0 }
  0xcd   :  { %v4059_v34 = vsel %vm3547_vm2, 65537, %v13166_v16  ;;  %v4075_v43 = vsel %vm3563_vm3, 65537, %v13166_v16  ;;  %v4060_v45 = vsel %vm3548_vm4, 65537, %v13166_v16  ;;  %v4076_v46 = vsel %vm3564_vm5, 65537, %v13166_v16 }
  0xce   :  { %v4988_v22 = vunpack.c.h.b16 %v4059_v34  ;;  %v5020_v24 = vunpack.c.h.b16 %v4075_v43  ;;  %v4990_v25 = vunpack.c.h.b16 %v4060_v45  ;;  %v5022_v26 = vunpack.c.h.b16 %v4076_v46 }
  0xcf   :  { %v4987_v27 = vunpack.c.l.b16 %v4059_v34  ;;  %v5019_v29 = vunpack.c.l.b16 %v4075_v43  ;;  %v4989_v30 = vunpack.c.l.b16 %v4060_v45  ;;  %v5021_v33 = vunpack.c.l.b16 %v4076_v46 }
  0xd0   :  { %vm6012_vm8 = vcmp.ne.s32.totalorder %v4988_v22, 0  ;;  %vm6044_vm9 = vcmp.ne.s32.totalorder %v5020_v24, 0  ;;  %vm6014_vm6 = vcmp.ne.s32.totalorder %v4990_v25, 0  ;;  %vm6046_vm7 = vcmp.ne.s32.totalorder %v5022_v26, 0 }
  0xd1   :  { %vm11970_vm12 = vmpackc.low %vm6044_vm9, %vm6012_vm8  ;;  %vm14072_vm13 = vcmp.ne.s32.totalorder %v4987_v27, 0  ;;  %vm14076_vm10 = vcmp.ne.s32.totalorder %v5019_v29, 0  ;;  %vm14080_vm11 = vcmp.ne.s32.totalorder %v4989_v30, 0  ;;  %vm14084_vm0 = vcmp.ne.s32.totalorder %v5021_v33, 0 }
  0xd2   :  { %11971 = vmatprep.subr.msk.bf16.mxu0 %vm11970_vm12, %v13167_v48  ;;  %vm12034_vm1 = vmpackc.low %vm6046_vm7, %vm6014_vm6  ;;  %vm1019_vm14 = vcmp.eq.bf16.partialorder %v14056_v0, %v13291_v8  ;;  %vm1020_vm15 = vcmp.eq.bf16.partialorder %v14056_v0, %v13294_v9  ;;  %vm1021_vm2 = vcmp.eq.bf16.partialorder %v14056_v0, %v13297_v10  ;;  %vm1022_vm3 = vcmp.eq.bf16.partialorder %v14056_v0, %v13300_v11 }
  0xd3   :  { %12035 = vmatprep.subr.msk.bf16.mxu1 %vm12034_vm1, %v13167_v48  ;;  %vm11972_vm4 = vmpackc.low %vm14076_vm10, %vm14072_vm13  ;;  %v1531_v14 = vsel %vm1019_vm14, 65537, %v13166_v16  ;;  %v1532_v38 = vsel %vm1020_vm15, 65537, %v13166_v16  ;;  %v1533_v40 = vsel %vm1021_vm2, 65537, %v13166_v16  ;;  %v1534_v42 = vsel %vm1022_vm3, 65537, %v13166_v16 }
  0xd4   :  { %11973 = vmatpush1.bf16.msk.msra.mxu0 %vm11972_vm4, %v13167_v48  ;;  %vm12036_vm5 = vmpackc.low %vm14084_vm0, %vm14080_vm11  ;;  %v10828_v49 = vcombine.low %v1531_v14, %v1532_v38  ;;  %v10844_v50 = vcombine.high %v1531_v14, %v1532_v38  ;;  %v10829_v51 = vcombine.low %v1533_v40, %v1534_v42  ;;  %v10845_v17 = vcombine.high %v1533_v40, %v1534_v42 }
  0xd5   :  { %12037 = vmatpush1.bf16.msk.msra.mxu1 %vm12036_vm5, %v13167_v48  ;;  %v129_v41 = vcvt.s32.f32 %v14059_v18  ;;  %v130_v52 = vcvt.s32.f32 %v14062_v19  ;;  %v174_v53 = vrot.slane %v13261_v35, %v14065_v21  ;;  %v14117_v57 = vsub.s32 5, %v13226_v1 }
  0xd6   :  { %vm3579_vm8 = vcmp.ne.s16.totalorder %v10828_v49, 0  ;;  %vm3595_vm9 = vcmp.ne.s16.totalorder %v10844_v50, 0  ;;  %vm3580_vm6 = vcmp.ne.s16.totalorder %v10829_v51, 0  ;;  %vm3596_vm7 = vcmp.ne.s16.totalorder %v10845_v17, 0 }
  0xd7   :  { %v4091_v58 = vsel %vm3579_vm8, 65537, %v13166_v16  ;;  %v4107_v59 = vsel %vm3595_vm9, 65537, %v13166_v16  ;;  %v4092_v60 = vsel %vm3580_vm6, 65537, %v13166_v16  ;;  %v4108_v61 = vsel %vm3596_vm7, 65537, %v13166_v16 }
  0xd8   :  { %v5052_v62 = vunpack.c.h.b16 %v4091_v58  ;;  %v5084_v63 = vunpack.c.h.b16 %v4107_v59  ;;  %v5054_v18 = vunpack.c.h.b16 %v4092_v60  ;;  %v5086_v19 = vunpack.c.h.b16 %v4108_v61 }
  0xd9   :  { %v5051_v34 = vunpack.c.l.b16 %v4091_v58  ;;  %v5083_v43 = vunpack.c.l.b16 %v4107_v59  ;;  %v5053_v45 = vunpack.c.l.b16 %v4092_v60  ;;  %v5085_v46 = vunpack.c.l.b16 %v4108_v61 }
  0xda   :  { %vm6076_vm12 = vcmp.ne.s32.totalorder %v5052_v62, 0  ;;  %vm6108_vm13 = vcmp.ne.s32.totalorder %v5084_v63, 0  ;;  %vm6078_vm10 = vcmp.ne.s32.totalorder %v5054_v18, 0  ;;  %vm6110_vm11 = vcmp.ne.s32.totalorder %v5086_v19, 0 }
  0xdb   :  { %vm11974_vm0 = vmpackc.low %vm6108_vm13, %vm6076_vm12  ;;  %vm6075_vm1 = vcmp.ne.s32.totalorder %v5051_v34, 0  ;;  %vm6107_vm14 = vcmp.ne.s32.totalorder %v5083_v43, 0  ;;  %vm14123_vm15 = vcmp.ne.s32.totalorder %v5053_v45, 0  ;;  %vm14127_vm2 = vcmp.ne.s32.totalorder %v5085_v46, 0  ;;  %v13023_v43 = vld [vmem:[#allocation5] ss:$8 sps:$4 sm:$0xff]  }
  0xdc   :  { %11975 = vmatprep.subr.msk.bf16.mxu0 %vm11974_vm0, %v13167_v48  ;;  %vm12038_vm3 = vmpackc.low %vm6110_vm11, %vm6078_vm10  ;;  %v14132_v25 = vpack.c.bf16 %v130_v52, %v129_v41  ;;  %v178_v26 = vrot.slane %v13261_v35, %v14117_v57  ;;  %v319_v27 = vpack.c.bf16 %v174_v53, %v174_v53  ;;  %v14138_v29 = vsub.s32 6, %v13226_v1 }
  0xdd   :  { %12039 = vmatprep.subr.msk.bf16.mxu1 %vm12038_vm3, %v13167_v48  ;;  %vm11976_vm4 = vmpackc.low %vm6107_vm14, %vm6075_vm1  ;;  %v14141_v30 = vsub.s32 7, %v13226_v1 }
  0xde   :  { %11977 = vmatpush1.bf16.msk.msra.mxu0 %vm11976_vm4, %v13167_v48  ;;  %vm12040_vm5 = vmpackc.low %vm14127_vm2, %vm14123_vm15  ;;  %vm1051_vm8 = vcmp.eq.bf16.partialorder %v14132_v25, %v13291_v8  ;;  %vm1052_vm9 = vcmp.eq.bf16.partialorder %v14132_v25, %v13294_v9  ;;  %vm1053_vm6 = vcmp.eq.bf16.partialorder %v14132_v25, %v13297_v10  ;;  %vm1054_vm7 = vcmp.eq.bf16.partialorder %v14132_v25, %v13300_v11 }
  0xdf   :  { %12041 = vmatpush1.bf16.msk.msra.mxu1 %vm12040_vm5, %v13167_v48  ;;  %v1563_v33 = vsel %vm1051_vm8, 65537, %v13166_v16  ;;  %v1564_v36 = vsel %vm1052_vm9, 65537, %v13166_v16  ;;  %v1565_v2 = vsel %vm1053_vm6, 65537, %v13166_v16  ;;  %v1566_v3 = vsel %vm1054_vm7, 65537, %v13166_v16 }
  0xe0   :  { %v10860_v8 = vcombine.low %v1563_v33, %v1564_v36  ;;  %v10876_v13 = vcombine.high %v1563_v33, %v1564_v36  ;;  %v10861_v14 = vcombine.low %v1565_v2, %v1566_v3  ;;  %v10877_v9 = vcombine.high %v1565_v2, %v1566_v3 }
  0xe1   :  { %v320_v38 = vpack.c.bf16 %v178_v26, %v178_v26  ;;  %v376_v40 = vpack.i.b16 %v319_v27, %v319_v27  ;;  %v182_v10 = vrot.slane %v13261_v35, %v14138_v29  ;;  %v186_v11 = vrot.slane %v13261_v35, %v14141_v30 }
  0xe2   :  { %vm3611_vm12 = vcmp.ne.s16.totalorder %v10860_v8, 0  ;;  %vm3627_vm13 = vcmp.ne.s16.totalorder %v10876_v13, 0  ;;  %vm3612_vm10 = vcmp.ne.s16.totalorder %v10861_v14, 0  ;;  %vm3628_vm11 = vcmp.ne.s16.totalorder %v10877_v9, 0 }
  0xe3   :  { %v4123_v42 = vsel %vm3611_vm12, 65537, %v13166_v16  ;;  %v4139_v49 = vsel %vm3627_vm13, 65537, %v13166_v16  ;;  %v4124_v50 = vsel %vm3612_vm10, 65537, %v13166_v16  ;;  %v4140_v51 = vsel %vm3628_vm11, 65537, %v13166_v16 }
  0xe4   :  { %v5116_v17 = vunpack.c.h.b16 %v4123_v42  ;;  %v5148_v41 = vunpack.c.h.b16 %v4139_v49  ;;  %v5118_v52 = vunpack.c.h.b16 %v4124_v50  ;;  %v5150_v53 = vunpack.c.h.b16 %v4140_v51 }
  0xe5   :  { %v5115_v58 = vunpack.c.l.b16 %v4123_v42  ;;  %v5147_v59 = vunpack.c.l.b16 %v4139_v49  ;;  %v5117_v60 = vunpack.c.l.b16 %v4124_v50  ;;  %v5149_v35 = vunpack.c.l.b16 %v4140_v51 }
  0xe6   :  { %vm6140_vm0 = vcmp.ne.s32.totalorder %v5116_v17, 0  ;;  %vm6172_vm1 = vcmp.ne.s32.totalorder %v5148_v41, 0  ;;  %vm6142_vm14 = vcmp.ne.s32.totalorder %v5118_v52, 0  ;;  %vm6174_vm15 = vcmp.ne.s32.totalorder %v5150_v53, 0 }
  0xe7   :  { %vm11978_vm2 = vmpackc.low %vm6172_vm1, %vm6140_vm0  ;;  %vm6139_vm3 = vcmp.ne.s32.totalorder %v5115_v58, 0  ;;  %vm6171_vm4 = vcmp.ne.s32.totalorder %v5147_v59, 0  ;;  %vm14169_vm5 = vcmp.ne.s32.totalorder %v5117_v60, 0  ;;  %vm14173_vm8 = vcmp.ne.s32.totalorder %v5149_v35, 0 }
  0xe8   :  { %11979 = vmatprep.subr.msk.bf16.mxu0 %vm11978_vm2, %v13167_v48  ;;  %vm12042_vm9 = vmpackc.low %vm6174_vm15, %vm6142_vm14  ;;  %v14179_v63 = vrot.slane %v376_v40, %v13231_v4  ;;  %v383_v18 = vpack.i.b16 %v320_v38, %v320_v38  ;;  %v321_v19 = vpack.c.bf16 %v182_v10, %v182_v10  ;;  %v322_v34 = vpack.c.bf16 %v186_v11, %v186_v11  ;;  %v13048_v40 = vld [vmem:[#allocation5 + $0x4] ss:$8 sps:$4 sm:$0xff]  }
  0xe9   :  { %12043 = vmatprep.subr.msk.bf16.mxu1 %vm12042_vm9, %v13167_v48  ;;  %vm11980_vm6 = vmpackc.low %vm6171_vm4, %vm6139_vm3 }
  0xea   :  { %11981 = vmatpush1.bf16.msk.msra.mxu0 %vm11980_vm6, %v13167_v48  ;;  %vm12044_vm7 = vmpackc.low %vm14173_vm8, %vm14169_vm5  ;;  %v14188_v45 = vrot.slane %v383_v18, %v13231_v4  ;;  %vm575_vm12 = vcmp.eq.bf16.partialorder %v13249_v20, %v14179_v63  ;;  %v390_v46 = vpack.i.b16 %v321_v19, %v321_v19  ;;  %v397_v22 = vpack.i.b16 %v322_v34, %v322_v34 }
  0xeb   :  { %12045 = vmatpush1.bf16.msk.msra.mxu1 %vm12044_vm7, %v13167_v48  ;;  %v1087_v24 = vsel %vm575_vm12, 65537, %v13166_v16  ;;  %vm607_vm13 = vcmp.eq.bf16.partialorder %v13251_v23, %v14179_v63  ;;  %vm639_vm14 = vcmp.eq.bf16.partialorder %v13254_v28, %v14179_v63  ;;  %vm671_vm8 = vcmp.eq.bf16.partialorder %v13257_v31, %v14179_v63 }
  0xec   :  { %vm576_vm10 = vcmp.eq.bf16.partialorder %v13249_v20, %v14188_v45  ;;  %v14199_v26 = vrot.slane %v390_v46, %v13231_v4  ;;  %v14202_v27 = vrot.slane %v397_v22, %v13231_v4  ;;  %vm608_vm11 = vcmp.eq.bf16.partialorder %v13251_v23, %v14188_v45 }
  0xed   :  { %8808 = vmatmul.mubr.bf16.vlgmr.msra.gmra.mrb[0].mxu0 %v13023_v43  ;;  %v1088_v33 = vsel %vm576_vm10, 65537, %v13166_v16  ;;  %v1119_v36 = vsel %vm607_vm13, 65537, %v13166_v16  ;;  %v1120_v2 = vsel %vm608_vm11, 65537, %v13166_v16  ;;  %vm640_vm15 = vcmp.eq.bf16.partialorder %v13254_v28, %v14188_v45 }
  0xee   :  { %8849 = vmatmul.mubr.bf16.vlgmr.msra.gmra.mrb[0].mxu1 %v13023_v43  ;;  %v10382_v3 = vcombine.low %v1087_v24, %v1088_v33  ;;  %v10398_v8 = vcombine.high %v1087_v24, %v1088_v33  ;;  %vm577_vm0 = vcmp.eq.bf16.partialorder %v13249_v20, %v14199_v26  ;;  %vm578_vm1 = vcmp.eq.bf16.partialorder %v13249_v20, %v14202_v27 }
  0xef   :  { %v1089_v13 = vsel %vm577_vm0, 65537, %v13166_v16  ;;  %v1090_v14 = vsel %vm578_vm1, 65537, %v13166_v16  ;;  %v10414_v9 = vcombine.low %v1119_v36, %v1120_v2  ;;  %v10430_v38 = vcombine.high %v1119_v36, %v1120_v2  ;;  %8889 = vmatprep.mubr.bf16.mxu0 %v13048_v40  ;;  %8930 = vmatprep.mubr.bf16.mxu1 %v13048_v40 }
  0xf0   :  { %vm3133_vm2 = vcmp.ne.s16.totalorder %v10382_v3, 0  ;;  %vm3149_vm3 = vcmp.ne.s16.totalorder %v10398_v8, 0  ;;  %v10383_v10 = vcombine.low %v1089_v13, %v1090_v14  ;;  %v10399_v11 = vcombine.high %v1089_v13, %v1090_v14 }
  0xf1   :  { %v3645_v42 = vsel %vm3133_vm2, 65537, %v13166_v16  ;;  %v3661_v49 = vsel %vm3149_vm3, 65537, %v13166_v16  ;;  %vm3165_vm4 = vcmp.ne.s16.totalorder %v10414_v9, 0  ;;  %vm3181_vm5 = vcmp.ne.s16.totalorder %v10430_v38, 0 }
  0xf2   :  { %v4159_v50 = vunpack.c.l.b16 %v3645_v42  ;;  %v4160_v51 = vunpack.c.h.b16 %v3645_v42  ;;  %v4191_v17 = vunpack.c.l.b16 %v3661_v49  ;;  %v4192_v41 = vunpack.c.h.b16 %v3661_v49 }
  0xf3   :  { %vm3134_vm9 = vcmp.ne.s16.totalorder %v10383_v10, 0  ;;  %vm3150_vm6 = vcmp.ne.s16.totalorder %v10399_v11, 0  ;;  %v3677_v52 = vsel %vm3165_vm4, 65537, %v13166_v16  ;;  %v3693_v53 = vsel %vm3181_vm5, 65537, %v13166_v16 }
  0xf4   :  { %vm5184_vm7 = vcmp.ne.s32.totalorder %v4160_v51, 0  ;;  %vm5216_vm12 = vcmp.ne.s32.totalorder %v4192_v41, 0  ;;  %v3646_v58 = vsel %vm3134_vm9, 65537, %v13166_v16  ;;  %v3662_v59 = vsel %vm3150_vm6, 65537, %v13166_v16 }
  0xf5   :  { %vm12046_vm13 = vmpackc.low %vm5216_vm12, %vm5184_vm7  ;;  %v4161_v60 = vunpack.c.l.b16 %v3646_v58  ;;  %v4162_v35 = vunpack.c.h.b16 %v3646_v58  ;;  %v4193_v61 = vunpack.c.l.b16 %v3662_v59  ;;  %v4194_v62 = vunpack.c.h.b16 %v3662_v59 }
  0xf6   :  { %12047 = vmatprep.subr.msk.bf16.mxu0 %vm12046_vm13, %v13167_v48  ;;  %vm5183_vm10 = vcmp.ne.s32.totalorder %v4159_v50, 0  ;;  %vm5215_vm11 = vcmp.ne.s32.totalorder %v4191_v17, 0  ;;  %v4223_v18 = vunpack.c.l.b16 %v3677_v52  ;;  %v4224_v19 = vunpack.c.h.b16 %v3677_v52 }
  0xf7   :  { %vm5186_vm0 = vcmp.ne.s32.totalorder %v4162_v35, 0  ;;  %vm5218_vm1 = vcmp.ne.s32.totalorder %v4194_v62, 0  ;;  %vm12048_vm2 = vmpackc.low %vm5215_vm11, %vm5183_vm10  ;;  %vm5185_vm3 = vcmp.ne.s32.totalorder %v4161_v60, 0  ;;  %vm5217_vm4 = vcmp.ne.s32.totalorder %v4193_v61, 0 }
  0xf8   :  { %vm12110_vm5 = vmpackc.low %vm5218_vm1, %vm5186_vm0  ;;  %12049 = vmatpush1.bf16.msk.msra.mxu0 %vm12048_vm2, %v13167_v48  ;;  %v4255_v34 = vunpack.c.l.b16 %v3693_v53  ;;  %v4256_v43 = vunpack.c.h.b16 %v3693_v53  ;;  %vm14229_vm9 = vcmp.ne.s32.totalorder %v4224_v19, 0  ;;  %vm609_vm6 = vcmp.eq.bf16.partialorder %v13251_v23, %v14199_v26 }
  0xf9   :  { %12111 = vmatprep.subr.msk.bf16.mxu1 %vm12110_vm5, %v13167_v48  ;;  %vm12112_vm7 = vmpackc.low %vm5217_vm4, %vm5185_vm3  ;;  %vm610_vm12 = vcmp.eq.bf16.partialorder %v13251_v23, %v14202_v27  ;;  %v1121_v22 = vsel %vm609_vm6, 65537, %v13166_v16  ;;  %vm14239_vm13 = vcmp.ne.s32.totalorder %v4223_v18, 0  ;;  %v1151_v33 = vsel %vm639_vm14, 65537, %v13166_v16 }
  0xfa   :  { %12113 = vmatpush1.bf16.msk.msra.mxu1 %vm12112_vm7, %v13167_v48  ;;  %vm5280_vm10 = vcmp.ne.s32.totalorder %v4256_v43, 0  ;;  %v1122_v36 = vsel %vm610_vm12, 65537, %v13166_v16  ;;  %vm14249_vm11 = vcmp.ne.s32.totalorder %v4255_v34, 0  ;;  %v1152_v3 = vsel %vm640_vm15, 65537, %v13166_v16 }
  0xfb   :  { %vm12050_vm0 = vmpackc.low %vm5280_vm10, %vm14229_vm9  ;;  %v10415_v8 = vcombine.low %v1121_v22, %v1122_v36  ;;  %v10431_v13 = vcombine.high %v1121_v22, %v1122_v36  ;;  %v10446_v14 = vcombine.low %v1151_v33, %v1152_v3  ;;  %v10462_v9 = vcombine.high %v1151_v33, %v1152_v3 }
  0xfc   :  { %12051 = vmatprep.subr.msk.bf16.mxu0 %vm12050_vm0, %v13167_v48  ;;  %vm12052_vm14 = vmpackc.low %vm14249_vm11, %vm14239_vm13  ;;  %vm641_vm1 = vcmp.eq.bf16.partialorder %v13254_v28, %v14199_v26  ;;  %vm642_vm15 = vcmp.eq.bf16.partialorder %v13254_v28, %v14202_v27  ;;  %vm672_vm2 = vcmp.eq.bf16.partialorder %v13257_v31, %v14188_v45  ;;  %v1183_v38 = vsel %vm671_vm8, 65537, %v13166_v16 }
  0xfd   :  { %vm3166_vm3 = vcmp.ne.s16.totalorder %v10415_v8, 0  ;;  %vm3182_vm4 = vcmp.ne.s16.totalorder %v10431_v13, 0  ;;  %12053 = vmatpush1.bf16.msk.msra.mxu0 %vm12052_vm14, %v13167_v48  ;;  %vm3197_vm5 = vcmp.ne.s16.totalorder %v10446_v14, 0  ;;  %vm3213_vm9 = vcmp.ne.s16.totalorder %v10462_v9, 0 }
  0xfe   :  { %v3678_v40 = vsel %vm3166_vm3, 65537, %v13166_v16  ;;  %v3694_v10 = vsel %vm3182_vm4, 65537, %v13166_v16  ;;  %v3709_v11 = vsel %vm3197_vm5, 65537, %v13166_v16  ;;  %v3725_v42 = vsel %vm3213_vm9, 65537, %v13166_v16 }
  0xff   :  { %v4225_v49 = vunpack.c.l.b16 %v3678_v40  ;;  %v4226_v50 = vunpack.c.h.b16 %v3678_v40  ;;  %v4257_v51 = vunpack.c.l.b16 %v3694_v10  ;;  %v4258_v17 = vunpack.c.h.b16 %v3694_v10 }
 0x100   :  { %v4287_v41 = vunpack.c.l.b16 %v3709_v11  ;;  %v4288_v52 = vunpack.c.h.b16 %v3709_v11  ;;  %v4319_v53 = vunpack.c.l.b16 %v3725_v42  ;;  %v4320_v58 = vunpack.c.h.b16 %v3725_v42 }
 0x101   :  { %vm5250_vm8 = vcmp.ne.s32.totalorder %v4226_v50, 0  ;;  %vm5282_vm6 = vcmp.ne.s32.totalorder %v4258_v17, 0  ;;  %vm5249_vm7 = vcmp.ne.s32.totalorder %v4225_v49, 0  ;;  %vm5281_vm12 = vcmp.ne.s32.totalorder %v4257_v51, 0 }
 0x102   :  { %vm12114_vm13 = vmpackc.low %vm5282_vm6, %vm5250_vm8  ;;  %vm14279_vm10 = vcmp.ne.s32.totalorder %v4288_v52, 0  ;;  %vm14283_vm11 = vcmp.ne.s32.totalorder %v4320_v58, 0  ;;  %v1153_v35 = vsel %vm641_vm1, 65537, %v13166_v16  ;;  %v1154_v61 = vsel %vm642_vm15, 65537, %v13166_v16 }
 0x103   :  { %12115 = vmatprep.subr.msk.bf16.mxu1 %vm12114_vm13, %v13167_v48  ;;  %vm12116_vm0 = vmpackc.low %vm5281_vm12, %vm5249_vm7  ;;  %v10447_v62 = vcombine.low %v1153_v35, %v1154_v61  ;;  %v10463_v18 = vcombine.high %v1153_v35, %v1154_v61  ;;  %vm14296_vm14 = vcmp.ne.s32.totalorder %v4287_v41, 0  ;;  %vm14300_vm3 = vcmp.ne.s32.totalorder %v4319_v53, 0 }
 0x104   :  { %12117 = vmatpush1.bf16.msk.msra.mxu1 %vm12116_vm0, %v13167_v48  ;;  %vm12054_vm1 = vmpackc.low %vm14283_vm11, %vm14279_vm10  ;;  %v1184_v43 = vsel %vm672_vm2, 65537, %v13166_v16  ;;  %vm673_vm15 = vcmp.eq.bf16.partialorder %v13257_v31, %v14199_v26  ;;  %vm674_vm4 = vcmp.eq.bf16.partialorder %v13257_v31, %v14202_v27  ;;  %vm703_vm5 = vcmp.eq.bf16.partialorder %v13265_v39, %v14179_v63 }
 0x105   :  { %12055 = vmatprep.subr.msk.bf16.mxu0 %vm12054_vm1, %v13167_v48  ;;  %vm3198_vm9 = vcmp.ne.s16.totalorder %v10447_v62, 0  ;;  %vm3214_vm8 = vcmp.ne.s16.totalorder %v10463_v18, 0  ;;  %vm12056_vm6 = vmpackc.low %vm14300_vm3, %vm14296_vm14  ;;  %v10478_v46 = vcombine.low %v1183_v38, %v1184_v43  ;;  %v10494_v22 = vcombine.high %v1183_v38, %v1184_v43 }
 0x106   :  { %v3710_v24 = vsel %vm3198_vm9, 65537, %v13166_v16  ;;  %v3726_v33 = vsel %vm3214_vm8, 65537, %v13166_v16  ;;  %12057 = vmatpush1.bf16.msk.msra.mxu0 %vm12056_vm6, %v13167_v48  ;;  %v1185_v36 = vsel %vm673_vm15, 65537, %v13166_v16  ;;  %v1186_v2 = vsel %vm674_vm4, 65537, %v13166_v16 }
 0x107   :  { %v4289_v3 = vunpack.c.l.b16 %v3710_v24  ;;  %v4290_v8 = vunpack.c.h.b16 %v3710_v24  ;;  %v4321_v13 = vunpack.c.l.b16 %v3726_v33  ;;  %v4322_v14 = vunpack.c.h.b16 %v3726_v33 }
 0x108   :  { %vm3229_vm2 = vcmp.ne.s16.totalorder %v10478_v46, 0  ;;  %vm3245_vm7 = vcmp.ne.s16.totalorder %v10494_v22, 0  ;;  %v10479_v9 = vcombine.low %v1185_v36, %v1186_v2  ;;  %v10495_v40 = vcombine.high %v1185_v36, %v1186_v2 }
 0x109   :  { %vm5314_vm12 = vcmp.ne.s32.totalorder %v4290_v8, 0  ;;  %vm5346_vm13 = vcmp.ne.s32.totalorder %v4322_v14, 0  ;;  %vm5313_vm10 = vcmp.ne.s32.totalorder %v4289_v3, 0  ;;  %vm5345_vm11 = vcmp.ne.s32.totalorder %v4321_v13, 0 }
 0x10a   :  { %vm12118_vm0 = vmpackc.low %vm5346_vm13, %vm5314_vm12  ;;  %v3741_v38 = vsel %vm3229_vm2, 65537, %v13166_v16  ;;  %v3757_v10 = vsel %vm3245_vm7, 65537, %v13166_v16  ;;  %vm3230_vm14 = vcmp.ne.s16.totalorder %v10479_v9, 0  ;;  %vm3246_vm3 = vcmp.ne.s16.totalorder %v10495_v40, 0 }
 0x10b   :  { %12119 = vmatprep.subr.msk.bf16.mxu1 %vm12118_vm0, %v13167_v48  ;;  %vm12120_vm1 = vmpackc.low %vm5345_vm11, %vm5313_vm10  ;;  %v4351_v11 = vunpack.c.l.b16 %v3741_v38  ;;  %v4352_v42 = vunpack.c.h.b16 %v3741_v38  ;;  %v4383_v49 = vunpack.c.l.b16 %v3757_v10  ;;  %v4384_v50 = vunpack.c.h.b16 %v3757_v10 }
 0x10c   :  { %12121 = vmatpush1.bf16.msk.msra.mxu1 %vm12120_vm1, %v13167_v48  ;;  %v3742_v51 = vsel %vm3230_vm14, 65537, %v13166_v16  ;;  %v3758_v17 = vsel %vm3246_vm3, 65537, %v13166_v16  ;;  %vm704_vm15 = vcmp.eq.bf16.partialorder %v13265_v39, %v14188_v45  ;;  %v1215_v41 = vsel %vm703_vm5, 65537, %v13166_v16 }
 0x10d   :  { %vm5376_vm4 = vcmp.ne.s32.totalorder %v4352_v42, 0  ;;  %vm5408_vm9 = vcmp.ne.s32.totalorder %v4384_v50, 0  ;;  %v4353_v52 = vunpack.c.l.b16 %v3742_v51  ;;  %v4354_v53 = vunpack.c.h.b16 %v3742_v51 }
 0x10e   :  { %vm12058_vm8 = vmpackc.low %vm5408_vm9, %vm5376_vm4  ;;  %v4385_v58 = vunpack.c.l.b16 %v3758_v17  ;;  %v4386_v59 = vunpack.c.h.b16 %v3758_v17  ;;  %vm5375_vm6 = vcmp.ne.s32.totalorder %v4351_v11, 0  ;;  %vm5407_vm2 = vcmp.ne.s32.totalorder %v4383_v49, 0 }
 0x10f   :  { %12059 = vmatprep.subr.msk.bf16.mxu0 %vm12058_vm8, %v13167_v48  ;;  %vm14342_vm7 = vcmp.ne.s32.totalorder %v4354_v53, 0  ;;  %vm12060_vm12 = vmpackc.low %vm5407_vm2, %vm5375_vm6  ;;  %vm14346_vm13 = vcmp.ne.s32.totalorder %v4353_v52, 0  ;;  %v1216_v61 = vsel %vm704_vm15, 65537, %v13166_v16  ;;  %vm705_vm5 = vcmp.eq.bf16.partialorder %v13265_v39, %v14199_v26 }
 0x110   :  { %vm5410_vm10 = vcmp.ne.s32.totalorder %v4386_v59, 0  ;;  %12061 = vmatpush1.bf16.msk.msra.mxu0 %vm12060_vm12, %v13167_v48  ;;  %vm5409_vm11 = vcmp.ne.s32.totalorder %v4385_v58, 0  ;;  %v10510_v62 = vcombine.low %v1215_v41, %v1216_v61  ;;  %v10526_v18 = vcombine.high %v1215_v41, %v1216_v61 }
 0x111   :  { %vm12122_vm0 = vmpackc.low %vm5410_vm10, %vm14342_vm7  ;;  %vm706_vm14 = vcmp.eq.bf16.partialorder %v13265_v39, %v14202_v27  ;;  %v1217_v19 = vsel %vm705_vm5, 65537, %v13166_v16  ;;  %vm735_vm3 = vcmp.eq.bf16.partialorder %v13276_v47, %v14179_v63  ;;  %vm736_vm1 = vcmp.eq.bf16.partialorder %v13276_v47, %v14188_v45 }
 0x112   :  { %12123 = vmatprep.subr.msk.bf16.mxu1 %vm12122_vm0, %v13167_v48  ;;  %vm12124_vm15 = vmpackc.low %vm5409_vm11, %vm14346_vm13  ;;  %vm3261_vm4 = vcmp.ne.s16.totalorder %v10510_v62, 0  ;;  %vm3277_vm9 = vcmp.ne.s16.totalorder %v10526_v18, 0  ;;  %v1218_v34 = vsel %vm706_vm14, 65537, %v13166_v16  ;;  %v1247_v43 = vsel %vm735_vm3, 65537, %v13166_v16 }
 0x113   :  { %12125 = vmatpush1.bf16.msk.msra.mxu1 %vm12124_vm15, %v13167_v48  ;;  %v3773_v46 = vsel %vm3261_vm4, 65537, %v13166_v16  ;;  %v3789_v22 = vsel %vm3277_vm9, 65537, %v13166_v16  ;;  %v10511_v24 = vcombine.low %v1217_v19, %v1218_v34  ;;  %v10527_v33 = vcombine.high %v1217_v19, %v1218_v34 }
 0x114   :  { %v4415_v36 = vunpack.c.l.b16 %v3773_v46  ;;  %v4416_v2 = vunpack.c.h.b16 %v3773_v46  ;;  %v4447_v3 = vunpack.c.l.b16 %v3789_v22  ;;  %v4448_v8 = vunpack.c.h.b16 %v3789_v22 }
 0x115   :  { %vm3262_vm8 = vcmp.ne.s16.totalorder %v10511_v24, 0  ;;  %vm3278_vm6 = vcmp.ne.s16.totalorder %v10527_v33, 0  ;;  %v1248_v13 = vsel %vm736_vm1, 65537, %v13166_v16  ;;  %vm737_vm2 = vcmp.eq.bf16.partialorder %v13276_v47, %v14199_v26 }
 0x116   :  { %vm5440_vm7 = vcmp.ne.s32.totalorder %v4416_v2, 0  ;;  %vm5472_vm12 = vcmp.ne.s32.totalorder %v4448_v8, 0  ;;  %v3774_v14 = vsel %vm3262_vm8, 65537, %v13166_v16  ;;  %v3790_v9 = vsel %vm3278_vm6, 65537, %v13166_v16 }
 0x117   :  { %vm12062_vm13 = vmpackc.low %vm5472_vm12, %vm5440_vm7  ;;  %v4417_v40 = vunpack.c.l.b16 %v3774_v14  ;;  %v4418_v38 = vunpack.c.h.b16 %v3774_v14  ;;  %v4449_v10 = vunpack.c.l.b16 %v3790_v9  ;;  %v4450_v11 = vunpack.c.h.b16 %v3790_v9 }
 0x118   :  { %12063 = vmatprep.subr.msk.bf16.mxu0 %vm12062_vm13, %v13167_v48  ;;  %vm5439_vm5 = vcmp.ne.s32.totalorder %v4415_v36, 0  ;;  %vm5471_vm10 = vcmp.ne.s32.totalorder %v4447_v3, 0  ;;  %v10542_v42 = vcombine.low %v1247_v43, %v1248_v13  ;;  %v10558_v49 = vcombine.high %v1247_v43, %v1248_v13 }
 0x119   :  { %vm5442_vm11 = vcmp.ne.s32.totalorder %v4418_v38, 0  ;;  %vm5474_vm0 = vcmp.ne.s32.totalorder %v4450_v11, 0  ;;  %vm12064_vm14 = vmpackc.low %vm5471_vm10, %vm5439_vm5  ;;  %vm5441_vm3 = vcmp.ne.s32.totalorder %v4417_v40, 0  ;;  %vm5473_vm1 = vcmp.ne.s32.totalorder %v4449_v10, 0 }
 0x11a   :  { %vm12126_vm15 = vmpackc.low %vm5474_vm0, %vm5442_vm11  ;;  %12065 = vmatpush1.bf16.msk.msra.mxu0 %vm12064_vm14, %v13167_v48  ;;  %vm3293_vm4 = vcmp.ne.s16.totalorder %v10542_v42, 0  ;;  %vm3309_vm9 = vcmp.ne.s16.totalorder %v10558_v49, 0  ;;  %vm738_vm8 = vcmp.eq.bf16.partialorder %v13276_v47, %v14202_v27  ;;  %v1249_v50 = vsel %vm737_vm2, 65537, %v13166_v16 }
 0x11b   :  { %12127 = vmatprep.subr.msk.bf16.mxu1 %vm12126_vm15, %v13167_v48  ;;  %vm12128_vm6 = vmpackc.low %vm5473_vm1, %vm5441_vm3  ;;  %v3805_v51 = vsel %vm3293_vm4, 65537, %v13166_v16  ;;  %v3821_v17 = vsel %vm3309_vm9, 65537, %v13166_v16  ;;  %v1250_v41 = vsel %vm738_vm8, 65537, %v13166_v16  ;;  %vm767_vm7 = vcmp.eq.bf16.partialorder %v13278_v55, %v14179_v63 }
 0x11c   :  { %12129 = vmatpush1.bf16.msk.msra.mxu1 %vm12128_vm6, %v13167_v48  ;;  %v4479_v52 = vunpack.c.l.b16 %v3805_v51  ;;  %v4480_v53 = vunpack.c.h.b16 %v3805_v51  ;;  %v4511_v58 = vunpack.c.l.b16 %v3821_v17  ;;  %v4512_v59 = vunpack.c.h.b16 %v3821_v17 }
 0x11d   :  { %v10543_v60 = vcombine.low %v1249_v50, %v1250_v41  ;;  %v10559_v35 = vcombine.high %v1249_v50, %v1250_v41  ;;  %vm768_vm2 = vcmp.eq.bf16.partialorder %v13278_v55, %v14188_v45  ;;  %v1279_v61 = vsel %vm767_vm7, 65537, %v13166_v16 }
 0x11e   :  { %vm5504_vm12 = vcmp.ne.s32.totalorder %v4480_v53, 0  ;;  %vm5536_vm13 = vcmp.ne.s32.totalorder %v4512_v59, 0  ;;  %vm14397_vm5 = vcmp.ne.s32.totalorder %v4479_v52, 0  ;;  %vm14401_vm10 = vcmp.ne.s32.totalorder %v4511_v58, 0 }
 0x11f   :  { %vm12066_vm11 = vmpackc.low %vm5536_vm13, %vm5504_vm12  ;;  %vm3294_vm0 = vcmp.ne.s16.totalorder %v10543_v60, 0  ;;  %vm3310_vm14 = vcmp.ne.s16.totalorder %v10559_v35, 0  ;;  %v1280_v19 = vsel %vm768_vm2, 65537, %v13166_v16  ;;  %vm769_vm3 = vcmp.eq.bf16.partialorder %v13278_v55, %v14199_v26 }
 0x120   :  { %12067 = vmatprep.subr.msk.bf16.mxu0 %vm12066_vm11, %v13167_v48  ;;  %v3806_v34 = vsel %vm3294_vm0, 65537, %v13166_v16  ;;  %v3822_v43 = vsel %vm3310_vm14, 65537, %v13166_v16  ;;  %vm12068_vm1 = vmpackc.low %vm14401_vm10, %vm14397_vm5  ;;  %v10574_v46 = vcombine.low %v1279_v61, %v1280_v19  ;;  %v10590_v22 = vcombine.high %v1279_v61, %v1280_v19 }
 0x121   :  { %v4481_v24 = vunpack.c.l.b16 %v3806_v34  ;;  %v4482_v33 = vunpack.c.h.b16 %v3806_v34  ;;  %v4513_v36 = vunpack.c.l.b16 %v3822_v43  ;;  %v4514_v2 = vunpack.c.h.b16 %v3822_v43  ;;  %12069 = vmatpush1.bf16.msk.msra.mxu0 %vm12068_vm1, %v13167_v48 }
 0x122   :  { %vm3325_vm15 = vcmp.ne.s16.totalorder %v10574_v46, 0  ;;  %vm3341_vm4 = vcmp.ne.s16.totalorder %v10590_v22, 0  ;;  %vm770_vm9 = vcmp.eq.bf16.partialorder %v13278_v55, %v14202_v27  ;;  %v1281_v3 = vsel %vm769_vm3, 65537, %v13166_v16 }
 0x123   :  { %vm5506_vm8 = vcmp.ne.s32.totalorder %v4482_v33, 0  ;;  %vm5538_vm6 = vcmp.ne.s32.totalorder %v4514_v2, 0  ;;  %vm5505_vm7 = vcmp.ne.s32.totalorder %v4481_v24, 0  ;;  %vm5537_vm2 = vcmp.ne.s32.totalorder %v4513_v36, 0 }
 0x124   :  { %vm12130_vm12 = vmpackc.low %vm5538_vm6, %vm5506_vm8  ;;  %v3837_v8 = vsel %vm3325_vm15, 65537, %v13166_v16  ;;  %v3853_v13 = vsel %vm3341_vm4, 65537, %v13166_v16  ;;  %v1282_v14 = vsel %vm770_vm9, 65537, %v13166_v16  ;;  %vm799_vm13 = vcmp.eq.bf16.partialorder %v13280_v56, %v14179_v63 }
 0x125   :  { %12131 = vmatprep.subr.msk.bf16.mxu1 %vm12130_vm12, %v13167_v48  ;;  %vm12132_vm5 = vmpackc.low %vm5537_vm2, %vm5505_vm7  ;;  %v4543_v9 = vunpack.c.l.b16 %v3837_v8  ;;  %v4544_v40 = vunpack.c.h.b16 %v3837_v8  ;;  %v4575_v38 = vunpack.c.l.b16 %v3853_v13  ;;  %v4576_v10 = vunpack.c.h.b16 %v3853_v13 }
 0x126   :  { %12133 = vmatpush1.bf16.msk.msra.mxu1 %vm12132_vm5, %v13167_v48  ;;  %v10575_v11 = vcombine.low %v1281_v3, %v1282_v14  ;;  %v10591_v42 = vcombine.high %v1281_v3, %v1282_v14  ;;  %vm800_vm10 = vcmp.eq.bf16.partialorder %v13280_v56, %v14188_v45  ;;  %v1311_v49 = vsel %vm799_vm13, 65537, %v13166_v16 }
 0x127   :  { %vm5568_vm11 = vcmp.ne.s32.totalorder %v4544_v40, 0  ;;  %vm5600_vm0 = vcmp.ne.s32.totalorder %v4576_v10, 0  ;;  %vm14429_vm14 = vcmp.ne.s32.totalorder %v4543_v9, 0  ;;  %vm14433_vm3 = vcmp.ne.s32.totalorder %v4575_v38, 0 }
 0x128   :  { %vm12070_vm1 = vmpackc.low %vm5600_vm0, %vm5568_vm11  ;;  %vm3326_vm15 = vcmp.ne.s16.totalorder %v10575_v11, 0  ;;  %vm3342_vm4 = vcmp.ne.s16.totalorder %v10591_v42, 0  ;;  %v1312_v17 = vsel %vm800_vm10, 65537, %v13166_v16  ;;  %vm801_vm9 = vcmp.eq.bf16.partialorder %v13280_v56, %v14199_v26 }
 0x129   :  { %12071 = vmatprep.subr.msk.bf16.mxu0 %vm12070_vm1, %v13167_v48  ;;  %v3838_v41 = vsel %vm3326_vm15, 65537, %v13166_v16  ;;  %v3854_v52 = vsel %vm3342_vm4, 65537, %v13166_v16  ;;  %vm12072_vm8 = vmpackc.low %vm14433_vm3, %vm14429_vm14  ;;  %v10606_v53 = vcombine.low %v1311_v49, %v1312_v17  ;;  %v10622_v58 = vcombine.high %v1311_v49, %v1312_v17 }
 0x12a   :  { %v4545_v59 = vunpack.c.l.b16 %v3838_v41  ;;  %v4546_v60 = vunpack.c.h.b16 %v3838_v41  ;;  %v4577_v35 = vunpack.c.l.b16 %v3854_v52  ;;  %v4578_v61 = vunpack.c.h.b16 %v3854_v52  ;;  %12073 = vmatpush1.bf16.msk.msra.mxu0 %vm12072_vm8, %v13167_v48 }
 0x12b   :  { %vm3357_vm6 = vcmp.ne.s16.totalorder %v10606_v53, 0  ;;  %vm3373_vm7 = vcmp.ne.s16.totalorder %v10622_v58, 0  ;;  %vm802_vm2 = vcmp.eq.bf16.partialorder %v13280_v56, %v14202_v27  ;;  %v1313_v62 = vsel %vm801_vm9, 65537, %v13166_v16 }
 0x12c   :  { %vm5570_vm12 = vcmp.ne.s32.totalorder %v4546_v60, 0  ;;  %vm5602_vm13 = vcmp.ne.s32.totalorder %v4578_v61, 0  ;;  %vm5569_vm5 = vcmp.ne.s32.totalorder %v4545_v59, 0  ;;  %vm5601_vm10 = vcmp.ne.s32.totalorder %v4577_v35, 0 }
 0x12d   :  { %vm12134_vm11 = vmpackc.low %vm5602_vm13, %vm5570_vm12  ;;  %v3869_v18 = vsel %vm3357_vm6, 65537, %v13166_v16  ;;  %v3885_v19 = vsel %vm3373_vm7, 65537, %v13166_v16  ;;  %v1314_v34 = vsel %vm802_vm2, 65537, %v13166_v16  ;;  %vm831_vm0 = vcmp.eq.bf16.partialorder %v13302_v12, %v14179_v63 }
 0x12e   :  { %12135 = vmatprep.subr.msk.bf16.mxu1 %vm12134_vm11, %v13167_v48  ;;  %vm12136_vm14 = vmpackc.low %vm5601_vm10, %vm5569_vm5  ;;  %v4607_v43 = vunpack.c.l.b16 %v3869_v18  ;;  %v4608_v46 = vunpack.c.h.b16 %v3869_v18  ;;  %v4639_v22 = vunpack.c.l.b16 %v3885_v19  ;;  %v4640_v24 = vunpack.c.h.b16 %v3885_v19 }
 0x12f   :  { %12137 = vmatpush1.bf16.msk.msra.mxu1 %vm12136_vm14, %v13167_v48  ;;  %v10607_v33 = vcombine.low %v1313_v62, %v1314_v34  ;;  %v10623_v36 = vcombine.high %v1313_v62, %v1314_v34  ;;  %vm832_vm3 = vcmp.eq.bf16.partialorder %v13302_v12, %v14188_v45  ;;  %v1343_v2 = vsel %vm831_vm0, 65537, %v13166_v16 }
 0x130   :  { %vm5632_vm1 = vcmp.ne.s32.totalorder %v4608_v46, 0  ;;  %vm5664_vm15 = vcmp.ne.s32.totalorder %v4640_v24, 0  ;;  %vm14461_vm4 = vcmp.ne.s32.totalorder %v4607_v43, 0  ;;  %vm14465_vm9 = vcmp.ne.s32.totalorder %v4639_v22, 0 }
 0x131   :  { %vm12074_vm8 = vmpackc.low %vm5664_vm15, %vm5632_vm1  ;;  %vm3358_vm6 = vcmp.ne.s16.totalorder %v10607_v33, 0  ;;  %vm3374_vm7 = vcmp.ne.s16.totalorder %v10623_v36, 0  ;;  %v1344_v13 = vsel %vm832_vm3, 65537, %v13166_v16  ;;  %vm833_vm2 = vcmp.eq.bf16.partialorder %v13302_v12, %v14199_v26 }
 0x132   :  { %12075 = vmatprep.subr.msk.bf16.mxu0 %vm12074_vm8, %v13167_v48  ;;  %v3870_v14 = vsel %vm3358_vm6, 65537, %v13166_v16  ;;  %v3886_v9 = vsel %vm3374_vm7, 65537, %v13166_v16  ;;  %vm12076_vm12 = vmpackc.low %vm14465_vm9, %vm14461_vm4  ;;  %v10638_v40 = vcombine.low %v1343_v2, %v1344_v13  ;;  %v10654_v38 = vcombine.high %v1343_v2, %v1344_v13 }
 0x133   :  { %v4609_v10 = vunpack.c.l.b16 %v3870_v14  ;;  %v4610_v11 = vunpack.c.h.b16 %v3870_v14  ;;  %v4641_v42 = vunpack.c.l.b16 %v3886_v9  ;;  %v4642_v49 = vunpack.c.h.b16 %v3886_v9  ;;  %12077 = vmatpush1.bf16.msk.msra.mxu0 %vm12076_vm12, %v13167_v48 }
 0x134   :  { %vm3389_vm13 = vcmp.ne.s16.totalorder %v10638_v40, 0  ;;  %vm3405_vm5 = vcmp.ne.s16.totalorder %v10654_v38, 0  ;;  %vm834_vm10 = vcmp.eq.bf16.partialorder %v13302_v12, %v14202_v27  ;;  %v1345_v50 = vsel %vm833_vm2, 65537, %v13166_v16 }
 0x135   :  { %vm5634_vm11 = vcmp.ne.s32.totalorder %v4610_v11, 0  ;;  %vm5666_vm0 = vcmp.ne.s32.totalorder %v4642_v49, 0  ;;  %vm5633_vm14 = vcmp.ne.s32.totalorder %v4609_v10, 0  ;;  %vm5665_vm3 = vcmp.ne.s32.totalorder %v4641_v42, 0 }
 0x136   :  { %vm12138_vm1 = vmpackc.low %vm5666_vm0, %vm5634_vm11  ;;  %v3901_v51 = vsel %vm3389_vm13, 65537, %v13166_v16  ;;  %v3917_v17 = vsel %vm3405_vm5, 65537, %v13166_v16  ;;  %v1346_v41 = vsel %vm834_vm10, 65537, %v13166_v16  ;;  %vm863_vm15 = vcmp.eq.bf16.partialorder %v13772_v32, %v14179_v63 }
 0x137   :  { %12139 = vmatprep.subr.msk.bf16.mxu1 %vm12138_vm1, %v13167_v48  ;;  %vm12140_vm4 = vmpackc.low %vm5665_vm3, %vm5633_vm14  ;;  %v4671_v52 = vunpack.c.l.b16 %v3901_v51  ;;  %v4672_v53 = vunpack.c.h.b16 %v3901_v51  ;;  %v4703_v58 = vunpack.c.l.b16 %v3917_v17  ;;  %v4704_v59 = vunpack.c.h.b16 %v3917_v17 }
 0x138   :  { %12141 = vmatpush1.bf16.msk.msra.mxu1 %vm12140_vm4, %v13167_v48  ;;  %v10639_v60 = vcombine.low %v1345_v50, %v1346_v41  ;;  %v10655_v35 = vcombine.high %v1345_v50, %v1346_v41  ;;  %vm864_vm9 = vcmp.eq.bf16.partialorder %v13772_v32, %v14188_v45  ;;  %v1375_v61 = vsel %vm863_vm15, 65537, %v13166_v16 }
 0x139   :  { %vm5696_vm8 = vcmp.ne.s32.totalorder %v4672_v53, 0  ;;  %vm5728_vm6 = vcmp.ne.s32.totalorder %v4704_v59, 0  ;;  %vm14493_vm7 = vcmp.ne.s32.totalorder %v4671_v52, 0  ;;  %vm14497_vm2 = vcmp.ne.s32.totalorder %v4703_v58, 0 }
 0x13a   :  { %vm12078_vm12 = vmpackc.low %vm5728_vm6, %vm5696_vm8  ;;  %vm3390_vm13 = vcmp.ne.s16.totalorder %v10639_v60, 0  ;;  %vm3406_vm5 = vcmp.ne.s16.totalorder %v10655_v35, 0  ;;  %v1376_v19 = vsel %vm864_vm9, 65537, %v13166_v16  ;;  %vm865_vm10 = vcmp.eq.bf16.partialorder %v13772_v32, %v14199_v26 }
 0x13b   :  { %12079 = vmatprep.subr.msk.bf16.mxu0 %vm12078_vm12, %v13167_v48  ;;  %v3902_v34 = vsel %vm3390_vm13, 65537, %v13166_v16  ;;  %v3918_v43 = vsel %vm3406_vm5, 65537, %v13166_v16  ;;  %vm12080_vm11 = vmpackc.low %vm14497_vm2, %vm14493_vm7  ;;  %v10670_v46 = vcombine.low %v1375_v61, %v1376_v19  ;;  %v10686_v22 = vcombine.high %v1375_v61, %v1376_v19 }
 0x13c   :  { %v4673_v24 = vunpack.c.l.b16 %v3902_v34  ;;  %v4674_v33 = vunpack.c.h.b16 %v3902_v34  ;;  %v4705_v36 = vunpack.c.l.b16 %v3918_v43  ;;  %v4706_v2 = vunpack.c.h.b16 %v3918_v43  ;;  %12081 = vmatpush1.bf16.msk.msra.mxu0 %vm12080_vm11, %v13167_v48 }
 0x13d   :  { %vm3421_vm0 = vcmp.ne.s16.totalorder %v10670_v46, 0  ;;  %vm3437_vm14 = vcmp.ne.s16.totalorder %v10686_v22, 0  ;;  %vm866_vm3 = vcmp.eq.bf16.partialorder %v13772_v32, %v14202_v27  ;;  %v1377_v3 = vsel %vm865_vm10, 65537, %v13166_v16 }
 0x13e   :  { %vm5698_vm1 = vcmp.ne.s32.totalorder %v4674_v33, 0  ;;  %vm5730_vm15 = vcmp.ne.s32.totalorder %v4706_v2, 0  ;;  %vm5697_vm4 = vcmp.ne.s32.totalorder %v4673_v24, 0  ;;  %vm5729_vm9 = vcmp.ne.s32.totalorder %v4705_v36, 0 }
 0x13f   :  { %vm12142_vm8 = vmpackc.low %vm5730_vm15, %vm5698_vm1  ;;  %v3933_v8 = vsel %vm3421_vm0, 65537, %v13166_v16  ;;  %v3949_v13 = vsel %vm3437_vm14, 65537, %v13166_v16  ;;  %v1378_v14 = vsel %vm866_vm3, 65537, %v13166_v16  ;;  %vm895_vm6 = vcmp.eq.bf16.partialorder %v13855_v37, %v14179_v63 }
 0x140   :  { %12143 = vmatprep.subr.msk.bf16.mxu1 %vm12142_vm8, %v13167_v48  ;;  %vm12144_vm7 = vmpackc.low %vm5729_vm9, %vm5697_vm4  ;;  %v4735_v9 = vunpack.c.l.b16 %v3933_v8  ;;  %v4736_v40 = vunpack.c.h.b16 %v3933_v8  ;;  %v4767_v38 = vunpack.c.l.b16 %v3949_v13  ;;  %v4768_v10 = vunpack.c.h.b16 %v3949_v13 }
 0x141   :  { %12145 = vmatpush1.bf16.msk.msra.mxu1 %vm12144_vm7, %v13167_v48  ;;  %v10671_v11 = vcombine.low %v1377_v3, %v1378_v14  ;;  %v10687_v42 = vcombine.high %v1377_v3, %v1378_v14  ;;  %vm896_vm2 = vcmp.eq.bf16.partialorder %v13855_v37, %v14188_v45  ;;  %v1407_v49 = vsel %vm895_vm6, 65537, %v13166_v16 }
 0x142   :  { %vm5760_vm12 = vcmp.ne.s32.totalorder %v4736_v40, 0  ;;  %vm5792_vm13 = vcmp.ne.s32.totalorder %v4768_v10, 0  ;;  %vm14525_vm5 = vcmp.ne.s32.totalorder %v4735_v9, 0  ;;  %vm14529_vm10 = vcmp.ne.s32.totalorder %v4767_v38, 0 }
 0x143   :  { %vm12082_vm11 = vmpackc.low %vm5792_vm13, %vm5760_vm12  ;;  %vm3422_vm0 = vcmp.ne.s16.totalorder %v10671_v11, 0  ;;  %vm3438_vm14 = vcmp.ne.s16.totalorder %v10687_v42, 0  ;;  %v1408_v17 = vsel %vm896_vm2, 65537, %v13166_v16  ;;  %vm897_vm3 = vcmp.eq.bf16.partialorder %v13855_v37, %v14199_v26 }
 0x144   :  { %12083 = vmatprep.subr.msk.bf16.mxu0 %vm12082_vm11, %v13167_v48  ;;  %v3934_v41 = vsel %vm3422_vm0, 65537, %v13166_v16  ;;  %v3950_v52 = vsel %vm3438_vm14, 65537, %v13166_v16  ;;  %vm12084_vm1 = vmpackc.low %vm14529_vm10, %vm14525_vm5  ;;  %v10702_v53 = vcombine.low %v1407_v49, %v1408_v17  ;;  %v10718_v58 = vcombine.high %v1407_v49, %v1408_v17 }
 0x145   :  { %v4737_v59 = vunpack.c.l.b16 %v3934_v41  ;;  %v4738_v60 = vunpack.c.h.b16 %v3934_v41  ;;  %v4769_v35 = vunpack.c.l.b16 %v3950_v52  ;;  %v4770_v61 = vunpack.c.h.b16 %v3950_v52  ;;  %12085 = vmatpush1.bf16.msk.msra.mxu0 %vm12084_vm1, %v13167_v48 }
 0x146   :  { %vm3453_vm15 = vcmp.ne.s16.totalorder %v10702_v53, 0  ;;  %vm3469_vm4 = vcmp.ne.s16.totalorder %v10718_v58, 0  ;;  %vm898_vm9 = vcmp.eq.bf16.partialorder %v13855_v37, %v14202_v27  ;;  %v1409_v62 = vsel %vm897_vm3, 65537, %v13166_v16 }
 0x147   :  { %vm5762_vm8 = vcmp.ne.s32.totalorder %v4738_v60, 0  ;;  %vm5794_vm6 = vcmp.ne.s32.totalorder %v4770_v61, 0  ;;  %vm5761_vm7 = vcmp.ne.s32.totalorder %v4737_v59, 0  ;;  %vm5793_vm2 = vcmp.ne.s32.totalorder %v4769_v35, 0 }
 0x148   :  { %vm12146_vm12 = vmpackc.low %vm5794_vm6, %vm5762_vm8  ;;  %v3965_v18 = vsel %vm3453_vm15, 65537, %v13166_v16  ;;  %v3981_v19 = vsel %vm3469_vm4, 65537, %v13166_v16  ;;  %v1410_v34 = vsel %vm898_vm9, 65537, %v13166_v16  ;;  %vm927_vm13 = vcmp.eq.bf16.partialorder %v13896_v54, %v14179_v63 }
 0x149   :  { %12147 = vmatprep.subr.msk.bf16.mxu1 %vm12146_vm12, %v13167_v48  ;;  %vm12148_vm5 = vmpackc.low %vm5793_vm2, %vm5761_vm7  ;;  %v4799_v43 = vunpack.c.l.b16 %v3965_v18  ;;  %v4800_v46 = vunpack.c.h.b16 %v3965_v18  ;;  %v4831_v22 = vunpack.c.l.b16 %v3981_v19  ;;  %v4832_v24 = vunpack.c.h.b16 %v3981_v19 }
 0x14a   :  { %12149 = vmatpush1.bf16.msk.msra.mxu1 %vm12148_vm5, %v13167_v48  ;;  %v10703_v33 = vcombine.low %v1409_v62, %v1410_v34  ;;  %v10719_v36 = vcombine.high %v1409_v62, %v1410_v34  ;;  %vm928_vm10 = vcmp.eq.bf16.partialorder %v13896_v54, %v14188_v45  ;;  %v1439_v2 = vsel %vm927_vm13, 65537, %v13166_v16 }
 0x14b   :  { %vm5824_vm11 = vcmp.ne.s32.totalorder %v4800_v46, 0  ;;  %vm5856_vm0 = vcmp.ne.s32.totalorder %v4832_v24, 0  ;;  %vm14557_vm14 = vcmp.ne.s32.totalorder %v4799_v43, 0  ;;  %vm14561_vm3 = vcmp.ne.s32.totalorder %v4831_v22, 0 }
 0x14c   :  { %vm12086_vm1 = vmpackc.low %vm5856_vm0, %vm5824_vm11  ;;  %vm3454_vm15 = vcmp.ne.s16.totalorder %v10703_v33, 0  ;;  %vm3470_vm4 = vcmp.ne.s16.totalorder %v10719_v36, 0  ;;  %v1440_v13 = vsel %vm928_vm10, 65537, %v13166_v16  ;;  %vm929_vm9 = vcmp.eq.bf16.partialorder %v13896_v54, %v14199_v26 }
 0x14d   :  { %12087 = vmatprep.subr.msk.bf16.mxu0 %vm12086_vm1, %v13167_v48  ;;  %v3966_v14 = vsel %vm3454_vm15, 65537, %v13166_v16  ;;  %v3982_v9 = vsel %vm3470_vm4, 65537, %v13166_v16  ;;  %vm12088_vm8 = vmpackc.low %vm14561_vm3, %vm14557_vm14  ;;  %v10734_v40 = vcombine.low %v1439_v2, %v1440_v13  ;;  %v10750_v38 = vcombine.high %v1439_v2, %v1440_v13 }
 0x14e   :  { %v4801_v10 = vunpack.c.l.b16 %v3966_v14  ;;  %v4802_v11 = vunpack.c.h.b16 %v3966_v14  ;;  %v4833_v42 = vunpack.c.l.b16 %v3982_v9  ;;  %v4834_v49 = vunpack.c.h.b16 %v3982_v9  ;;  %12089 = vmatpush1.bf16.msk.msra.mxu0 %vm12088_vm8, %v13167_v48 }
 0x14f   :  { %vm3485_vm6 = vcmp.ne.s16.totalorder %v10734_v40, 0  ;;  %vm3501_vm7 = vcmp.ne.s16.totalorder %v10750_v38, 0  ;;  %vm930_vm2 = vcmp.eq.bf16.partialorder %v13896_v54, %v14202_v27  ;;  %v1441_v50 = vsel %vm929_vm9, 65537, %v13166_v16 }
 0x150   :  { %vm5826_vm12 = vcmp.ne.s32.totalorder %v4802_v11, 0  ;;  %vm5858_vm13 = vcmp.ne.s32.totalorder %v4834_v49, 0  ;;  %vm5825_vm5 = vcmp.ne.s32.totalorder %v4801_v10, 0  ;;  %vm5857_vm10 = vcmp.ne.s32.totalorder %v4833_v42, 0 }
 0x151   :  { %vm12150_vm11 = vmpackc.low %vm5858_vm13, %vm5826_vm12  ;;  %v3997_v51 = vsel %vm3485_vm6, 65537, %v13166_v16  ;;  %v4013_v17 = vsel %vm3501_vm7, 65537, %v13166_v16  ;;  %v1442_v41 = vsel %vm930_vm2, 65537, %v13166_v16  ;;  %vm959_vm0 = vcmp.eq.bf16.partialorder %v13947_v15, %v14179_v63 }
 0x152   :  { %12151 = vmatprep.subr.msk.bf16.mxu1 %vm12150_vm11, %v13167_v48  ;;  %vm12152_vm14 = vmpackc.low %vm5857_vm10, %vm5825_vm5  ;;  %v4863_v52 = vunpack.c.l.b16 %v3997_v51  ;;  %v4864_v53 = vunpack.c.h.b16 %v3997_v51  ;;  %v4895_v58 = vunpack.c.l.b16 %v4013_v17  ;;  %v4896_v59 = vunpack.c.h.b16 %v4013_v17 }
 0x153   :  { %12153 = vmatpush1.bf16.msk.msra.mxu1 %vm12152_vm14, %v13167_v48  ;;  %v10735_v60 = vcombine.low %v1441_v50, %v1442_v41  ;;  %v10751_v35 = vcombine.high %v1441_v50, %v1442_v41  ;;  %vm960_vm3 = vcmp.eq.bf16.partialorder %v13947_v15, %v14188_v45  ;;  %v1471_v61 = vsel %vm959_vm0, 65537, %v13166_v16 }
 0x154   :  { %vm5888_vm1 = vcmp.ne.s32.totalorder %v4864_v53, 0  ;;  %vm5920_vm15 = vcmp.ne.s32.totalorder %v4896_v59, 0  ;;  %vm14589_vm4 = vcmp.ne.s32.totalorder %v4863_v52, 0  ;;  %vm14593_vm9 = vcmp.ne.s32.totalorder %v4895_v58, 0 }
 0x155   :  { %vm12090_vm8 = vmpackc.low %vm5920_vm15, %vm5888_vm1  ;;  %vm3486_vm6 = vcmp.ne.s16.totalorder %v10735_v60, 0  ;;  %vm3502_vm7 = vcmp.ne.s16.totalorder %v10751_v35, 0  ;;  %v1472_v19 = vsel %vm960_vm3, 65537, %v13166_v16  ;;  %vm961_vm2 = vcmp.eq.bf16.partialorder %v13947_v15, %v14199_v26 }
 0x156   :  { %12091 = vmatprep.subr.msk.bf16.mxu0 %vm12090_vm8, %v13167_v48  ;;  %v3998_v34 = vsel %vm3486_vm6, 65537, %v13166_v16  ;;  %v4014_v43 = vsel %vm3502_vm7, 65537, %v13166_v16  ;;  %vm12092_vm12 = vmpackc.low %vm14593_vm9, %vm14589_vm4  ;;  %v10766_v46 = vcombine.low %v1471_v61, %v1472_v19  ;;  %v10782_v22 = vcombine.high %v1471_v61, %v1472_v19 }
 0x157   :  { %v4865_v24 = vunpack.c.l.b16 %v3998_v34  ;;  %v4866_v33 = vunpack.c.h.b16 %v3998_v34  ;;  %v4897_v36 = vunpack.c.l.b16 %v4014_v43  ;;  %v4898_v2 = vunpack.c.h.b16 %v4014_v43  ;;  %12093 = vmatpush1.bf16.msk.msra.mxu0 %vm12092_vm12, %v13167_v48 }
 0x158   :  { %vm3517_vm13 = vcmp.ne.s16.totalorder %v10766_v46, 0  ;;  %vm3533_vm5 = vcmp.ne.s16.totalorder %v10782_v22, 0  ;;  %vm962_vm10 = vcmp.eq.bf16.partialorder %v13947_v15, %v14202_v27  ;;  %v1473_v3 = vsel %vm961_vm2, 65537, %v13166_v16 }
 0x159   :  { %vm5890_vm11 = vcmp.ne.s32.totalorder %v4866_v33, 0  ;;  %vm5922_vm0 = vcmp.ne.s32.totalorder %v4898_v2, 0  ;;  %vm5889_vm14 = vcmp.ne.s32.totalorder %v4865_v24, 0  ;;  %vm5921_vm3 = vcmp.ne.s32.totalorder %v4897_v36, 0 }
 0x15a   :  { %vm12154_vm1 = vmpackc.low %vm5922_vm0, %vm5890_vm11  ;;  %v4029_v8 = vsel %vm3517_vm13, 65537, %v13166_v16  ;;  %v4045_v13 = vsel %vm3533_vm5, 65537, %v13166_v16  ;;  %v1474_v14 = vsel %vm962_vm10, 65537, %v13166_v16  ;;  %vm991_vm15 = vcmp.eq.bf16.partialorder %v13949_v44, %v14179_v63 }
 0x15b   :  { %12155 = vmatprep.subr.msk.bf16.mxu1 %vm12154_vm1, %v13167_v48  ;;  %vm12156_vm4 = vmpackc.low %vm5921_vm3, %vm5889_vm14  ;;  %v4927_v9 = vunpack.c.l.b16 %v4029_v8  ;;  %v4928_v40 = vunpack.c.h.b16 %v4029_v8  ;;  %v4959_v38 = vunpack.c.l.b16 %v4045_v13  ;;  %v4960_v10 = vunpack.c.h.b16 %v4045_v13  ;;  %v13049_v8 = vld [vmem:[#allocation2] sm:$0xff] }
 0x15c   :  { %12157 = vmatpush1.bf16.msk.msra.mxu1 %vm12156_vm4, %v13167_v48  ;;  %v10767_v11 = vcombine.low %v1473_v3, %v1474_v14  ;;  %v10783_v42 = vcombine.high %v1473_v3, %v1474_v14  ;;  %vm992_vm9 = vcmp.eq.bf16.partialorder %v13949_v44, %v14188_v45  ;;  %v1503_v49 = vsel %vm991_vm15, 65537, %v13166_v16 }
 0x15d   :  { %vm5952_vm8 = vcmp.ne.s32.totalorder %v4928_v40, 0  ;;  %vm5984_vm6 = vcmp.ne.s32.totalorder %v4960_v10, 0  ;;  %vm14621_vm7 = vcmp.ne.s32.totalorder %v4927_v9, 0  ;;  %vm14625_vm2 = vcmp.ne.s32.totalorder %v4959_v38, 0 }
 0x15e   :  { %vm12094_vm12 = vmpackc.low %vm5984_vm6, %vm5952_vm8  ;;  %vm3518_vm13 = vcmp.ne.s16.totalorder %v10767_v11, 0  ;;  %vm3534_vm5 = vcmp.ne.s16.totalorder %v10783_v42, 0  ;;  %v1504_v17 = vsel %vm992_vm9, 65537, %v13166_v16  ;;  %vm993_vm10 = vcmp.eq.bf16.partialorder %v13949_v44, %v14199_v26 }
 0x15f   :  { %12095 = vmatprep.subr.msk.bf16.mxu0 %vm12094_vm12, %v13167_v48  ;;  %v4030_v41 = vsel %vm3518_vm13, 65537, %v13166_v16  ;;  %v4046_v52 = vsel %vm3534_vm5, 65537, %v13166_v16  ;;  %vm12096_vm11 = vmpackc.low %vm14625_vm2, %vm14621_vm7  ;;  %v10798_v53 = vcombine.low %v1503_v49, %v1504_v17  ;;  %v10814_v58 = vcombine.high %v1503_v49, %v1504_v17 }
 0x160   :  { %v4929_v59 = vunpack.c.l.b16 %v4030_v41  ;;  %v4930_v60 = vunpack.c.h.b16 %v4030_v41  ;;  %v4961_v35 = vunpack.c.l.b16 %v4046_v52  ;;  %v4962_v61 = vunpack.c.h.b16 %v4046_v52  ;;  %12097 = vmatpush1.bf16.msk.msra.mxu0 %vm12096_vm11, %v13167_v48 }
 0x161   :  { %vm3549_vm0 = vcmp.ne.s16.totalorder %v10798_v53, 0  ;;  %vm3565_vm14 = vcmp.ne.s16.totalorder %v10814_v58, 0  ;;  %vm994_vm3 = vcmp.eq.bf16.partialorder %v13949_v44, %v14202_v27  ;;  %v1505_v62 = vsel %vm993_vm10, 65537, %v13166_v16 }
 0x162   :  { %vm5954_vm1 = vcmp.ne.s32.totalorder %v4930_v60, 0  ;;  %vm5986_vm15 = vcmp.ne.s32.totalorder %v4962_v61, 0  ;;  %vm5953_vm4 = vcmp.ne.s32.totalorder %v4929_v59, 0  ;;  %vm5985_vm9 = vcmp.ne.s32.totalorder %v4961_v35, 0 }
 0x163   :  { %vm12158_vm8 = vmpackc.low %vm5986_vm15, %vm5954_vm1  ;;  %v4061_v18 = vsel %vm3549_vm0, 65537, %v13166_v16  ;;  %v4077_v19 = vsel %vm3565_vm14, 65537, %v13166_v16  ;;  %v1506_v34 = vsel %vm994_vm3, 65537, %v13166_v16  ;;  %vm1023_vm6 = vcmp.eq.bf16.partialorder %v14056_v0, %v14179_v63 }
 0x164   :  { %12159 = vmatprep.subr.msk.bf16.mxu1 %vm12158_vm8, %v13167_v48  ;;  %vm12160_vm7 = vmpackc.low %vm5985_vm9, %vm5953_vm4  ;;  %v4991_v43 = vunpack.c.l.b16 %v4061_v18  ;;  %v4992_v46 = vunpack.c.h.b16 %v4061_v18  ;;  %v5023_v22 = vunpack.c.l.b16 %v4077_v19  ;;  %v5024_v24 = vunpack.c.h.b16 %v4077_v19 }
 0x165   :  { %12161 = vmatpush1.bf16.msk.msra.mxu1 %vm12160_vm7, %v13167_v48  ;;  %v10799_v33 = vcombine.low %v1505_v62, %v1506_v34  ;;  %v10815_v36 = vcombine.high %v1505_v62, %v1506_v34  ;;  %vm1024_vm2 = vcmp.eq.bf16.partialorder %v14056_v0, %v14188_v45  ;;  %v1535_v2 = vsel %vm1023_vm6, 65537, %v13166_v16 }
 0x166   :  { %vm6016_vm12 = vcmp.ne.s32.totalorder %v4992_v46, 0  ;;  %vm6048_vm13 = vcmp.ne.s32.totalorder %v5024_v24, 0  ;;  %vm14653_vm5 = vcmp.ne.s32.totalorder %v4991_v43, 0  ;;  %vm14657_vm10 = vcmp.ne.s32.totalorder %v5023_v22, 0 }
 0x167   :  { %vm12098_vm11 = vmpackc.low %vm6048_vm13, %vm6016_vm12  ;;  %vm3550_vm0 = vcmp.ne.s16.totalorder %v10799_v33, 0  ;;  %vm3566_vm14 = vcmp.ne.s16.totalorder %v10815_v36, 0  ;;  %v1536_v13 = vsel %vm1024_vm2, 65537, %v13166_v16  ;;  %vm1025_vm3 = vcmp.eq.bf16.partialorder %v14056_v0, %v14199_v26 }
 0x168   :  { %12099 = vmatprep.subr.msk.bf16.mxu0 %vm12098_vm11, %v13167_v48  ;;  %v4062_v14 = vsel %vm3550_vm0, 65537, %v13166_v16  ;;  %v4078_v9 = vsel %vm3566_vm14, 65537, %v13166_v16  ;;  %vm12100_vm1 = vmpackc.low %vm14657_vm10, %vm14653_vm5  ;;  %v10830_v40 = vcombine.low %v1535_v2, %v1536_v13  ;;  %v10846_v38 = vcombine.high %v1535_v2, %v1536_v13 }
 0x169   :  { %v4993_v10 = vunpack.c.l.b16 %v4062_v14  ;;  %v4994_v11 = vunpack.c.h.b16 %v4062_v14  ;;  %v5025_v42 = vunpack.c.l.b16 %v4078_v9  ;;  %v5026_v49 = vunpack.c.h.b16 %v4078_v9  ;;  %12101 = vmatpush1.bf16.msk.msra.mxu0 %vm12100_vm1, %v13167_v48 }
 0x16a   :  { %vm3581_vm15 = vcmp.ne.s16.totalorder %v10830_v40, 0  ;;  %vm3597_vm4 = vcmp.ne.s16.totalorder %v10846_v38, 0  ;;  %vm1026_vm9 = vcmp.eq.bf16.partialorder %v14056_v0, %v14202_v27  ;;  %v1537_v50 = vsel %vm1025_vm3, 65537, %v13166_v16 }
 0x16b   :  { %vm6018_vm8 = vcmp.ne.s32.totalorder %v4994_v11, 0  ;;  %vm6050_vm6 = vcmp.ne.s32.totalorder %v5026_v49, 0  ;;  %vm6017_vm7 = vcmp.ne.s32.totalorder %v4993_v10, 0  ;;  %vm6049_vm2 = vcmp.ne.s32.totalorder %v5025_v42, 0 }
 0x16c   :  { %vm12162_vm12 = vmpackc.low %vm6050_vm6, %vm6018_vm8  ;;  %v4093_v51 = vsel %vm3581_vm15, 65537, %v13166_v16  ;;  %v4109_v17 = vsel %vm3597_vm4, 65537, %v13166_v16  ;;  %v1538_v41 = vsel %vm1026_vm9, 65537, %v13166_v16  ;;  %vm1055_vm13 = vcmp.eq.bf16.partialorder %v14132_v25, %v14179_v63 }
 0x16d   :  { %12163 = vmatprep.subr.msk.bf16.mxu1 %vm12162_vm12, %v13167_v48  ;;  %vm12164_vm5 = vmpackc.low %vm6049_vm2, %vm6017_vm7  ;;  %v5055_v52 = vunpack.c.l.b16 %v4093_v51  ;;  %v5056_v53 = vunpack.c.h.b16 %v4093_v51  ;;  %v5087_v58 = vunpack.c.l.b16 %v4109_v17  ;;  %v5088_v59 = vunpack.c.h.b16 %v4109_v17 }
 0x16e   :  { %12165 = vmatpush1.bf16.msk.msra.mxu1 %vm12164_vm5, %v13167_v48  ;;  %v10831_v60 = vcombine.low %v1537_v50, %v1538_v41  ;;  %v10847_v35 = vcombine.high %v1537_v50, %v1538_v41  ;;  %vm1056_vm10 = vcmp.eq.bf16.partialorder %v14132_v25, %v14188_v45  ;;  %v1567_v61 = vsel %vm1055_vm13, 65537, %v13166_v16 }
 0x16f   :  { %vm6080_vm11 = vcmp.ne.s32.totalorder %v5056_v53, 0  ;;  %vm6112_vm0 = vcmp.ne.s32.totalorder %v5088_v59, 0  ;;  %vm14685_vm14 = vcmp.ne.s32.totalorder %v5055_v52, 0  ;;  %vm14689_vm3 = vcmp.ne.s32.totalorder %v5087_v58, 0 }
 0x170   :  { %vm12102_vm1 = vmpackc.low %vm6112_vm0, %vm6080_vm11  ;;  %vm3582_vm15 = vcmp.ne.s16.totalorder %v10831_v60, 0  ;;  %vm3598_vm4 = vcmp.ne.s16.totalorder %v10847_v35, 0  ;;  %v1568_v18 = vsel %vm1056_vm10, 65537, %v13166_v16  ;;  %vm1057_vm9 = vcmp.eq.bf16.partialorder %v14132_v25, %v14199_v26  ;;  %v13050_v35 = vld [vmem:[#allocation5] ss:$8 sps:$4 sm:$0xff]  }
 0x171   :  { %12103 = vmatprep.subr.msk.bf16.mxu0 %vm12102_vm1, %v13167_v48  ;;  %v4094_v45 = vsel %vm3582_vm15, 65537, %v13166_v16  ;;  %v4110_v19 = vsel %vm3598_vm4, 65537, %v13166_v16  ;;  %vm12104_vm8 = vmpackc.low %vm14689_vm3, %vm14685_vm14  ;;  %v10862_v34 = vcombine.low %v1567_v61, %v1568_v18  ;;  %v10878_v43 = vcombine.high %v1567_v61, %v1568_v18 }
 0x172   :  { %v5057_v46 = vunpack.c.l.b16 %v4094_v45  ;;  %v5058_v22 = vunpack.c.h.b16 %v4094_v45  ;;  %v5089_v24 = vunpack.c.l.b16 %v4110_v19  ;;  %v5090_v33 = vunpack.c.h.b16 %v4110_v19  ;;  %12105 = vmatpush1.bf16.msk.msra.mxu0 %vm12104_vm8, %v13167_v48  ;;  %v13051_v45 = vld [vmem:[#allocation5 + $0x4] ss:$8 sps:$4 sm:$0xff]  }
 0x173   :  { %vm3613_vm6 = vcmp.ne.s16.totalorder %v10862_v34, 0  ;;  %vm3629_vm7 = vcmp.ne.s16.totalorder %v10878_v43, 0  ;;  %vm1058_vm2 = vcmp.eq.bf16.partialorder %v14132_v25, %v14202_v27  ;;  %v1569_v26 = vsel %vm1057_vm9, 65537, %v13166_v16 }
 0x174   :  { %vm6082_vm12 = vcmp.ne.s32.totalorder %v5058_v22, 0  ;;  %vm6114_vm13 = vcmp.ne.s32.totalorder %v5090_v33, 0  ;;  %vm6081_vm5 = vcmp.ne.s32.totalorder %v5057_v46, 0  ;;  %vm6113_vm10 = vcmp.ne.s32.totalorder %v5089_v24, 0 }
 0x175   :  { %vm12166_vm11 = vmpackc.low %vm6114_vm13, %vm6082_vm12  ;;  %v4125_v36 = vsel %vm3613_vm6, 65537, %v13166_v16  ;;  %v4141_v2 = vsel %vm3629_vm7, 65537, %v13166_v16  ;;  %v1570_v3 = vsel %vm1058_vm2, 65537, %v13166_v16  ;;  %v59_v13 = vunpack.c.1.s8 %v13049_v8 }
 0x176   :  { %12167 = vmatprep.subr.msk.bf16.mxu1 %vm12166_vm11, %v13167_v48  ;;  %vm12168_vm0 = vmpackc.low %vm6113_vm10, %vm6081_vm5  ;;  %v5119_v14 = vunpack.c.l.b16 %v4125_v36  ;;  %v5120_v27 = vunpack.c.h.b16 %v4125_v36  ;;  %v5151_v9 = vunpack.c.l.b16 %v4141_v2  ;;  %v5152_v40 = vunpack.c.h.b16 %v4141_v2 }
 0x177   :  { %12169 = vmatpush1.bf16.msk.msra.mxu1 %vm12168_vm0, %v13167_v48  ;;  %v10863_v38 = vcombine.low %v1569_v26, %v1570_v3  ;;  %v10879_v10 = vcombine.high %v1569_v26, %v1570_v3  ;;  %v63_v11 = vand.u32 255, %v59_v13 }
 0x178   :  { %vm6144_vm14 = vcmp.ne.s32.totalorder %v5120_v27, 0  ;;  %vm6176_vm3 = vcmp.ne.s32.totalorder %v5152_v40, 0  ;;  %vm6143_vm1 = vcmp.ne.s32.totalorder %v5119_v14, 0  ;;  %vm6175_vm15 = vcmp.ne.s32.totalorder %v5151_v9, 0 }
 0x179   :  { %vm12106_vm4 = vmpackc.low %vm6176_vm3, %vm6144_vm14  ;;  %vm3614_vm9 = vcmp.ne.s16.totalorder %v10863_v38, 0  ;;  %vm3630_vm8 = vcmp.ne.s16.totalorder %v10879_v10, 0  ;;  %v14712_v42 = vcvt.s32.f32 %v63_v11 }
 0x17a   :  { %12107 = vmatprep.subr.msk.bf16.mxu0 %vm12106_vm4, %v13167_v48  ;;  %v4126_v49 = vsel %vm3614_vm9, 65537, %v13166_v16  ;;  %v4142_v50 = vsel %vm3630_vm8, 65537, %v13166_v16  ;;  %vm12108_vm6 = vmpackc.low %vm6175_vm15, %vm6143_vm1 }
 0x17b   :  { %v5121_v51 = vunpack.c.l.b16 %v4126_v49  ;;  %v5122_v17 = vunpack.c.h.b16 %v4126_v49  ;;  %v5153_v41 = vunpack.c.l.b16 %v4142_v50  ;;  %v5154_v52 = vunpack.c.h.b16 %v4142_v50  ;;  %12109 = vmatpush1.bf16.msk.msra.mxu0 %vm12108_vm6, %v13167_v48 }
 0x17c   :  { %v190_v53 = vrot.slane %v14712_v42, %v13231_v4  ;;  %v194_v58 = vrot.slane %v14712_v42, %v13234_v5  ;;  %v198_v59 = vrot.slane %v14712_v42, %v13237_v6  ;;  %v202_v60 = vrot.slane %v14712_v42, %v13240_v7 }
 0x17d   :  { %vm6146_vm7 = vcmp.ne.s32.totalorder %v5122_v17, 0  ;;  %vm6178_vm2 = vcmp.ne.s32.totalorder %v5154_v52, 0  ;;  %vm6145_vm12 = vcmp.ne.s32.totalorder %v5121_v51, 0  ;;  %vm6177_vm13 = vcmp.ne.s32.totalorder %v5153_v41, 0 }
 0x17e   :  { %vm12170_vm5 = vmpackc.low %vm6178_vm2, %vm6146_vm7  ;;  %8890 = vmatmul.mubr.bf16.vlgmr.msra.gmra.mrb[4].mxu0 %v13050_v35  ;;  %v323_v61 = vpack.c.bf16 %v190_v53, %v190_v53  ;;  %v324_v63 = vpack.c.bf16 %v194_v58, %v194_v58  ;;  %v325_v62 = vpack.c.bf16 %v198_v59, %v198_v59  ;;  %v326_v18 = vpack.c.bf16 %v202_v60, %v202_v60 }
 0x17f   :  { %12171 = vmatprep.subr.msk.bf16.mxu1 %vm12170_vm5, %v13167_v48  ;;  %vm12172_vm10 = vmpackc.low %vm6177_vm13, %vm6145_vm12  ;;  %8971 = vmatprep.mubr.bf16.mxu0 %v13051_v45 }
 0x180   :  { %12173 = vmatpush1.bf16.msk.msra.mxu1 %vm12172_vm10, %v13167_v48  ;;  %v404_v19 = vpack.i.b16 %v323_v61, %v323_v61  ;;  %v411_v34 = vpack.i.b16 %v324_v63, %v324_v63  ;;  %v418_v43 = vpack.i.b16 %v325_v62, %v325_v62  ;;  %v425_v46 = vpack.i.b16 %v326_v18, %v326_v18 }
 0x182   :  { %v14729_v22 = vrot.slane %v404_v19, %v13231_v4  ;;  %v14732_v24 = vrot.slane %v411_v34, %v13231_v4  ;;  %v14735_v33 = vrot.slane %v418_v43, %v13231_v4  ;;  %v14738_v26 = vrot.slane %v425_v46, %v13231_v4 }
 0x183   :  { %8931 = vmatmul.mubr.bf16.vlgmr.msra.gmra.mrb[4].mxu1 %v13050_v35 }
 0x184   :  { %vm579_vm11 = vcmp.eq.bf16.partialorder %v13249_v20, %v14729_v22  ;;  %vm580_vm0 = vcmp.eq.bf16.partialorder %v13249_v20, %v14732_v24  ;;  %vm581_vm14 = vcmp.eq.bf16.partialorder %v13249_v20, %v14735_v33  ;;  %vm582_vm3 = vcmp.eq.bf16.partialorder %v13249_v20, %v14738_v26  ;;  %9012 = vmatprep.mubr.bf16.mxu1 %v13051_v45 }
 0x185   :  { %v1091_v36 = vsel %vm579_vm11, 65537, %v13166_v16  ;;  %v1092_v2 = vsel %vm580_vm0, 65537, %v13166_v16  ;;  %v1093_v3 = vsel %vm581_vm14, 65537, %v13166_v16  ;;  %v1094_v8 = vsel %vm582_vm3, 65537, %v13166_v16 }
 0x186   :  { %v10384_v13 = vcombine.low %v1091_v36, %v1092_v2  ;;  %v10400_v14 = vcombine.high %v1091_v36, %v1092_v2  ;;  %v10385_v27 = vcombine.low %v1093_v3, %v1094_v8  ;;  %v10401_v9 = vcombine.high %v1093_v3, %v1094_v8 }
 0x187   :  { %vm611_vm1 = vcmp.eq.bf16.partialorder %v13251_v23, %v14729_v22  ;;  %vm612_vm15 = vcmp.eq.bf16.partialorder %v13251_v23, %v14732_v24  ;;  %vm613_vm4 = vcmp.eq.bf16.partialorder %v13251_v23, %v14735_v33  ;;  %vm614_vm9 = vcmp.eq.bf16.partialorder %v13251_v23, %v14738_v26 }
 0x188   :  { %vm3135_vm8 = vcmp.ne.s16.totalorder %v10384_v13, 0  ;;  %vm3151_vm6 = vcmp.ne.s16.totalorder %v10400_v14, 0  ;;  %vm3136_vm7 = vcmp.ne.s16.totalorder %v10385_v27, 0  ;;  %vm3152_vm2 = vcmp.ne.s16.totalorder %v10401_v9, 0 }
 0x189   :  { %v3647_v40 = vsel %vm3135_vm8, 65537, %v13166_v16  ;;  %v3663_v38 = vsel %vm3151_vm6, 65537, %v13166_v16  ;;  %v3648_v10 = vsel %vm3136_vm7, 65537, %v13166_v16  ;;  %v3664_v11 = vsel %vm3152_vm2, 65537, %v13166_v16 }
 0x18a   :  { %v4163_v49 = vunpack.c.l.b16 %v3647_v40  ;;  %v4164_v50 = vunpack.c.h.b16 %v3647_v40  ;;  %v4195_v51 = vunpack.c.l.b16 %v3663_v38  ;;  %v4196_v17 = vunpack.c.h.b16 %v3663_v38 }
 0x18b   :  { %v4165_v41 = vunpack.c.l.b16 %v3648_v10  ;;  %v4166_v52 = vunpack.c.h.b16 %v3648_v10  ;;  %v4197_v53 = vunpack.c.l.b16 %v3664_v11  ;;  %v4198_v58 = vunpack.c.h.b16 %v3664_v11 }
 0x18c   :  { %vm5188_vm12 = vcmp.ne.s32.totalorder %v4164_v50, 0  ;;  %vm5220_vm13 = vcmp.ne.s32.totalorder %v4196_v17, 0  ;;  %vm14764_vm5 = vcmp.ne.s32.totalorder %v4163_v49, 0  ;;  %vm14768_vm10 = vcmp.ne.s32.totalorder %v4195_v51, 0 }
 0x18d   :  { %vm12174_vm11 = vmpackc.low %vm5220_vm13, %vm5188_vm12  ;;  %vm5190_vm0 = vcmp.ne.s32.totalorder %v4166_v52, 0  ;;  %vm5222_vm14 = vcmp.ne.s32.totalorder %v4198_v58, 0  ;;  %vm14772_vm3 = vcmp.ne.s32.totalorder %v4165_v41, 0  ;;  %vm14776_vm8 = vcmp.ne.s32.totalorder %v4197_v53, 0 }
 0x18e   :  { %12175 = vmatprep.subr.msk.bf16.mxu0 %vm12174_vm11, %v13167_v48  ;;  %vm12238_vm6 = vmpackc.low %vm5222_vm14, %vm5190_vm0  ;;  %v1123_v63 = vsel %vm611_vm1, 65537, %v13166_v16  ;;  %v1124_v62 = vsel %vm612_vm15, 65537, %v13166_v16  ;;  %v1125_v18 = vsel %vm613_vm4, 65537, %v13166_v16  ;;  %v1126_v45 = vsel %vm614_vm9, 65537, %v13166_v16 }
 0x18f   :  { %12239 = vmatprep.subr.msk.bf16.mxu1 %vm12238_vm6, %v13167_v48  ;;  %vm12176_vm1 = vmpackc.low %vm14768_vm10, %vm14764_vm5  ;;  %v10416_v19 = vcombine.low %v1123_v63, %v1124_v62  ;;  %v10432_v34 = vcombine.high %v1123_v63, %v1124_v62  ;;  %v10417_v43 = vcombine.low %v1125_v18, %v1126_v45  ;;  %v10433_v46 = vcombine.high %v1125_v18, %v1126_v45 }
 0x190   :  { %12177 = vmatpush1.bf16.msk.msra.mxu0 %vm12176_vm1, %v13167_v48  ;;  %vm12240_vm15 = vmpackc.low %vm14776_vm8, %vm14772_vm3  ;;  %vm643_vm4 = vcmp.eq.bf16.partialorder %v13254_v28, %v14729_v22  ;;  %vm644_vm9 = vcmp.eq.bf16.partialorder %v13254_v28, %v14732_v24  ;;  %vm645_vm7 = vcmp.eq.bf16.partialorder %v13254_v28, %v14735_v33  ;;  %vm646_vm2 = vcmp.eq.bf16.partialorder %v13254_v28, %v14738_v26 }
 0x191   :  { %12241 = vmatpush1.bf16.msk.msra.mxu1 %vm12240_vm15, %v13167_v48  ;;  %vm3167_vm12 = vcmp.ne.s16.totalorder %v10416_v19, 0  ;;  %vm3183_vm13 = vcmp.ne.s16.totalorder %v10432_v34, 0  ;;  %vm3168_vm5 = vcmp.ne.s16.totalorder %v10417_v43, 0  ;;  %vm3184_vm10 = vcmp.ne.s16.totalorder %v10433_v46, 0 }
 0x192   :  { %v3679_v36 = vsel %vm3167_vm12, 65537, %v13166_v16  ;;  %v3695_v2 = vsel %vm3183_vm13, 65537, %v13166_v16  ;;  %v3680_v3 = vsel %vm3168_vm5, 65537, %v13166_v16  ;;  %v3696_v8 = vsel %vm3184_vm10, 65537, %v13166_v16 }
 0x193   :  { %v4227_v13 = vunpack.c.l.b16 %v3679_v36  ;;  %v4228_v14 = vunpack.c.h.b16 %v3679_v36  ;;  %v4259_v27 = vunpack.c.l.b16 %v3695_v2  ;;  %v4260_v9 = vunpack.c.h.b16 %v3695_v2 }
 0x194   :  { %v4229_v40 = vunpack.c.l.b16 %v3680_v3  ;;  %v4230_v38 = vunpack.c.h.b16 %v3680_v3  ;;  %v4261_v10 = vunpack.c.l.b16 %v3696_v8  ;;  %v4262_v11 = vunpack.c.h.b16 %v3696_v8 }
 0x195   :  { %vm5252_vm11 = vcmp.ne.s32.totalorder %v4228_v14, 0  ;;  %vm5284_vm0 = vcmp.ne.s32.totalorder %v4260_v9, 0  ;;  %vm14820_vm14 = vcmp.ne.s32.totalorder %v4227_v13, 0  ;;  %vm14824_vm3 = vcmp.ne.s32.totalorder %v4259_v27, 0 }
 0x196   :  { %vm12178_vm8 = vmpackc.low %vm5284_vm0, %vm5252_vm11  ;;  %vm5254_vm6 = vcmp.ne.s32.totalorder %v4230_v38, 0  ;;  %vm5286_vm1 = vcmp.ne.s32.totalorder %v4262_v11, 0  ;;  %vm14828_vm15 = vcmp.ne.s32.totalorder %v4229_v40, 0  ;;  %vm14832_vm12 = vcmp.ne.s32.totalorder %v4261_v10, 0 }
 0x197   :  { %12179 = vmatprep.subr.msk.bf16.mxu0 %vm12178_vm8, %v13167_v48  ;;  %vm12242_vm13 = vmpackc.low %vm5286_vm1, %vm5254_vm6  ;;  %v1155_v41 = vsel %vm643_vm4, 65537, %v13166_v16  ;;  %v1156_v52 = vsel %vm644_vm9, 65537, %v13166_v16  ;;  %v1157_v53 = vsel %vm645_vm7, 65537, %v13166_v16  ;;  %v1158_v58 = vsel %vm646_vm2, 65537, %v13166_v16 }
 0x198   :  { %12243 = vmatprep.subr.msk.bf16.mxu1 %vm12242_vm13, %v13167_v48  ;;  %vm12180_vm4 = vmpackc.low %vm14824_vm3, %vm14820_vm14  ;;  %v10448_v59 = vcombine.low %v1155_v41, %v1156_v52  ;;  %v10464_v60 = vcombine.high %v1155_v41, %v1156_v52  ;;  %v10449_v35 = vcombine.low %v1157_v53, %v1158_v58  ;;  %v10465_v61 = vcombine.high %v1157_v53, %v1158_v58 }
 0x199   :  { %12181 = vmatpush1.bf16.msk.msra.mxu0 %vm12180_vm4, %v13167_v48  ;;  %vm12244_vm9 = vmpackc.low %vm14832_vm12, %vm14828_vm15  ;;  %vm675_vm7 = vcmp.eq.bf16.partialorder %v13257_v31, %v14729_v22  ;;  %vm676_vm2 = vcmp.eq.bf16.partialorder %v13257_v31, %v14732_v24  ;;  %vm677_vm5 = vcmp.eq.bf16.partialorder %v13257_v31, %v14735_v33  ;;  %vm678_vm10 = vcmp.eq.bf16.partialorder %v13257_v31, %v14738_v26 }
 0x19a   :  { %12245 = vmatpush1.bf16.msk.msra.mxu1 %vm12244_vm9, %v13167_v48  ;;  %vm3199_vm11 = vcmp.ne.s16.totalorder %v10448_v59, 0  ;;  %vm3215_vm0 = vcmp.ne.s16.totalorder %v10464_v60, 0  ;;  %vm3200_vm14 = vcmp.ne.s16.totalorder %v10449_v35, 0  ;;  %vm3216_vm3 = vcmp.ne.s16.totalorder %v10465_v61, 0 }
 0x19b   :  { %v3711_v63 = vsel %vm3199_vm11, 65537, %v13166_v16  ;;  %v3727_v62 = vsel %vm3215_vm0, 65537, %v13166_v16  ;;  %v3712_v18 = vsel %vm3200_vm14, 65537, %v13166_v16  ;;  %v3728_v45 = vsel %vm3216_vm3, 65537, %v13166_v16 }
 0x19c   :  { %v4291_v19 = vunpack.c.l.b16 %v3711_v63  ;;  %v4292_v34 = vunpack.c.h.b16 %v3711_v63  ;;  %v4323_v43 = vunpack.c.l.b16 %v3727_v62  ;;  %v4324_v46 = vunpack.c.h.b16 %v3727_v62 }
 0x19d   :  { %v4293_v36 = vunpack.c.l.b16 %v3712_v18  ;;  %v4294_v2 = vunpack.c.h.b16 %v3712_v18  ;;  %v4325_v3 = vunpack.c.l.b16 %v3728_v45  ;;  %v4326_v8 = vunpack.c.h.b16 %v3728_v45 }
 0x19e   :  { %vm5316_vm8 = vcmp.ne.s32.totalorder %v4292_v34, 0  ;;  %vm5348_vm6 = vcmp.ne.s32.totalorder %v4324_v46, 0  ;;  %vm14876_vm1 = vcmp.ne.s32.totalorder %v4291_v19, 0  ;;  %vm14880_vm15 = vcmp.ne.s32.totalorder %v4323_v43, 0 }
 0x19f   :  { %vm12182_vm12 = vmpackc.low %vm5348_vm6, %vm5316_vm8  ;;  %vm5318_vm13 = vcmp.ne.s32.totalorder %v4294_v2, 0  ;;  %vm5350_vm4 = vcmp.ne.s32.totalorder %v4326_v8, 0  ;;  %vm14884_vm9 = vcmp.ne.s32.totalorder %v4293_v36, 0  ;;  %vm14888_vm11 = vcmp.ne.s32.totalorder %v4325_v3, 0 }
 0x1a0   :  { %12183 = vmatprep.subr.msk.bf16.mxu0 %vm12182_vm12, %v13167_v48  ;;  %vm12246_vm0 = vmpackc.low %vm5350_vm4, %vm5318_vm13  ;;  %v1187_v40 = vsel %vm675_vm7, 65537, %v13166_v16  ;;  %v1188_v38 = vsel %vm676_vm2, 65537, %v13166_v16  ;;  %v1189_v10 = vsel %vm677_vm5, 65537, %v13166_v16  ;;  %v1190_v11 = vsel %vm678_vm10, 65537, %v13166_v16 }
 0x1a1   :  { %12247 = vmatprep.subr.msk.bf16.mxu1 %vm12246_vm0, %v13167_v48  ;;  %vm12184_vm7 = vmpackc.low %vm14880_vm15, %vm14876_vm1  ;;  %v10480_v49 = vcombine.low %v1187_v40, %v1188_v38  ;;  %v10496_v50 = vcombine.high %v1187_v40, %v1188_v38  ;;  %v10481_v51 = vcombine.low %v1189_v10, %v1190_v11  ;;  %v10497_v17 = vcombine.high %v1189_v10, %v1190_v11 }
 0x1a2   :  { %12185 = vmatpush1.bf16.msk.msra.mxu0 %vm12184_vm7, %v13167_v48  ;;  %vm12248_vm2 = vmpackc.low %vm14888_vm11, %vm14884_vm9  ;;  %vm707_vm5 = vcmp.eq.bf16.partialorder %v13265_v39, %v14729_v22  ;;  %vm708_vm10 = vcmp.eq.bf16.partialorder %v13265_v39, %v14732_v24  ;;  %vm709_vm14 = vcmp.eq.bf16.partialorder %v13265_v39, %v14735_v33  ;;  %vm710_vm3 = vcmp.eq.bf16.partialorder %v13265_v39, %v14738_v26 }
 0x1a3   :  { %12249 = vmatpush1.bf16.msk.msra.mxu1 %vm12248_vm2, %v13167_v48  ;;  %vm3231_vm8 = vcmp.ne.s16.totalorder %v10480_v49, 0  ;;  %vm3247_vm6 = vcmp.ne.s16.totalorder %v10496_v50, 0  ;;  %vm3232_vm1 = vcmp.ne.s16.totalorder %v10481_v51, 0  ;;  %vm3248_vm15 = vcmp.ne.s16.totalorder %v10497_v17, 0 }
 0x1a4   :  { %v3743_v41 = vsel %vm3231_vm8, 65537, %v13166_v16  ;;  %v3759_v52 = vsel %vm3247_vm6, 65537, %v13166_v16  ;;  %v3744_v53 = vsel %vm3232_vm1, 65537, %v13166_v16  ;;  %v3760_v58 = vsel %vm3248_vm15, 65537, %v13166_v16 }
 0x1a5   :  { %v4355_v59 = vunpack.c.l.b16 %v3743_v41  ;;  %v4356_v60 = vunpack.c.h.b16 %v3743_v41  ;;  %v4387_v35 = vunpack.c.l.b16 %v3759_v52  ;;  %v4388_v61 = vunpack.c.h.b16 %v3759_v52 }
 0x1a6   :  { %v4357_v63 = vunpack.c.l.b16 %v3744_v53  ;;  %v4358_v62 = vunpack.c.h.b16 %v3744_v53  ;;  %v4389_v18 = vunpack.c.l.b16 %v3760_v58  ;;  %v4390_v45 = vunpack.c.h.b16 %v3760_v58 }
 0x1a7   :  { %vm5380_vm12 = vcmp.ne.s32.totalorder %v4356_v60, 0  ;;  %vm5412_vm13 = vcmp.ne.s32.totalorder %v4388_v61, 0  ;;  %vm14932_vm4 = vcmp.ne.s32.totalorder %v4355_v59, 0  ;;  %vm14936_vm9 = vcmp.ne.s32.totalorder %v4387_v35, 0 }
 0x1a8   :  { %vm12186_vm11 = vmpackc.low %vm5412_vm13, %vm5380_vm12  ;;  %vm5382_vm0 = vcmp.ne.s32.totalorder %v4358_v62, 0  ;;  %vm5414_vm7 = vcmp.ne.s32.totalorder %v4390_v45, 0  ;;  %vm14940_vm2 = vcmp.ne.s32.totalorder %v4357_v63, 0  ;;  %vm14944_vm8 = vcmp.ne.s32.totalorder %v4389_v18, 0 }
 0x1a9   :  { %12187 = vmatprep.subr.msk.bf16.mxu0 %vm12186_vm11, %v13167_v48  ;;  %vm12250_vm6 = vmpackc.low %vm5414_vm7, %vm5382_vm0  ;;  %v1219_v36 = vsel %vm707_vm5, 65537, %v13166_v16  ;;  %v1220_v2 = vsel %vm708_vm10, 65537, %v13166_v16  ;;  %v1221_v3 = vsel %vm709_vm14, 65537, %v13166_v16  ;;  %v1222_v8 = vsel %vm710_vm3, 65537, %v13166_v16 }
 0x1aa   :  { %12251 = vmatprep.subr.msk.bf16.mxu1 %vm12250_vm6, %v13167_v48  ;;  %vm12188_vm5 = vmpackc.low %vm14936_vm9, %vm14932_vm4  ;;  %v10512_v13 = vcombine.low %v1219_v36, %v1220_v2  ;;  %v10528_v14 = vcombine.high %v1219_v36, %v1220_v2  ;;  %v10513_v27 = vcombine.low %v1221_v3, %v1222_v8  ;;  %v10529_v9 = vcombine.high %v1221_v3, %v1222_v8 }
 0x1ab   :  { %12189 = vmatpush1.bf16.msk.msra.mxu0 %vm12188_vm5, %v13167_v48  ;;  %vm12252_vm10 = vmpackc.low %vm14944_vm8, %vm14940_vm2  ;;  %vm739_vm14 = vcmp.eq.bf16.partialorder %v13276_v47, %v14729_v22  ;;  %vm740_vm3 = vcmp.eq.bf16.partialorder %v13276_v47, %v14732_v24  ;;  %vm741_vm1 = vcmp.eq.bf16.partialorder %v13276_v47, %v14735_v33  ;;  %vm742_vm15 = vcmp.eq.bf16.partialorder %v13276_v47, %v14738_v26 }
 0x1ac   :  { %12253 = vmatpush1.bf16.msk.msra.mxu1 %vm12252_vm10, %v13167_v48  ;;  %vm3263_vm12 = vcmp.ne.s16.totalorder %v10512_v13, 0  ;;  %vm3279_vm13 = vcmp.ne.s16.totalorder %v10528_v14, 0  ;;  %vm3264_vm4 = vcmp.ne.s16.totalorder %v10513_v27, 0  ;;  %vm3280_vm9 = vcmp.ne.s16.totalorder %v10529_v9, 0 }
 0x1ad   :  { %v3775_v40 = vsel %vm3263_vm12, 65537, %v13166_v16  ;;  %v3791_v38 = vsel %vm3279_vm13, 65537, %v13166_v16  ;;  %v3776_v10 = vsel %vm3264_vm4, 65537, %v13166_v16  ;;  %v3792_v11 = vsel %vm3280_vm9, 65537, %v13166_v16 }
 0x1ae   :  { %v4419_v49 = vunpack.c.l.b16 %v3775_v40  ;;  %v4420_v50 = vunpack.c.h.b16 %v3775_v40  ;;  %v4451_v51 = vunpack.c.l.b16 %v3791_v38  ;;  %v4452_v17 = vunpack.c.h.b16 %v3791_v38 }
 0x1af   :  { %v4421_v41 = vunpack.c.l.b16 %v3776_v10  ;;  %v4422_v52 = vunpack.c.h.b16 %v3776_v10  ;;  %v4453_v53 = vunpack.c.l.b16 %v3792_v11  ;;  %v4454_v58 = vunpack.c.h.b16 %v3792_v11 }
 0x1b0   :  { %vm5444_vm11 = vcmp.ne.s32.totalorder %v4420_v50, 0  ;;  %vm5476_vm0 = vcmp.ne.s32.totalorder %v4452_v17, 0  ;;  %vm14988_vm7 = vcmp.ne.s32.totalorder %v4419_v49, 0  ;;  %vm14992_vm2 = vcmp.ne.s32.totalorder %v4451_v51, 0 }
 0x1b1   :  { %vm12190_vm8 = vmpackc.low %vm5476_vm0, %vm5444_vm11  ;;  %vm5446_vm6 = vcmp.ne.s32.totalorder %v4422_v52, 0  ;;  %vm5478_vm5 = vcmp.ne.s32.totalorder %v4454_v58, 0  ;;  %vm14996_vm10 = vcmp.ne.s32.totalorder %v4421_v41, 0  ;;  %vm15000_vm12 = vcmp.ne.s32.totalorder %v4453_v53, 0 }
 0x1b2   :  { %12191 = vmatprep.subr.msk.bf16.mxu0 %vm12190_vm8, %v13167_v48  ;;  %vm12254_vm13 = vmpackc.low %vm5478_vm5, %vm5446_vm6  ;;  %v1251_v63 = vsel %vm739_vm14, 65537, %v13166_v16  ;;  %v1252_v62 = vsel %vm740_vm3, 65537, %v13166_v16  ;;  %v1253_v18 = vsel %vm741_vm1, 65537, %v13166_v16  ;;  %v1254_v45 = vsel %vm742_vm15, 65537, %v13166_v16 }
 0x1b3   :  { %12255 = vmatprep.subr.msk.bf16.mxu1 %vm12254_vm13, %v13167_v48  ;;  %vm12192_vm14 = vmpackc.low %vm14992_vm2, %vm14988_vm7  ;;  %v10544_v19 = vcombine.low %v1251_v63, %v1252_v62  ;;  %v10560_v34 = vcombine.high %v1251_v63, %v1252_v62  ;;  %v10545_v43 = vcombine.low %v1253_v18, %v1254_v45  ;;  %v10561_v46 = vcombine.high %v1253_v18, %v1254_v45 }
 0x1b4   :  { %12193 = vmatpush1.bf16.msk.msra.mxu0 %vm12192_vm14, %v13167_v48  ;;  %vm12256_vm3 = vmpackc.low %vm15000_vm12, %vm14996_vm10  ;;  %vm771_vm1 = vcmp.eq.bf16.partialorder %v13278_v55, %v14729_v22  ;;  %vm772_vm15 = vcmp.eq.bf16.partialorder %v13278_v55, %v14732_v24  ;;  %vm773_vm4 = vcmp.eq.bf16.partialorder %v13278_v55, %v14735_v33  ;;  %vm774_vm9 = vcmp.eq.bf16.partialorder %v13278_v55, %v14738_v26 }
 0x1b5   :  { %12257 = vmatpush1.bf16.msk.msra.mxu1 %vm12256_vm3, %v13167_v48  ;;  %vm3295_vm11 = vcmp.ne.s16.totalorder %v10544_v19, 0  ;;  %vm3311_vm0 = vcmp.ne.s16.totalorder %v10560_v34, 0  ;;  %vm3296_vm7 = vcmp.ne.s16.totalorder %v10545_v43, 0  ;;  %vm3312_vm2 = vcmp.ne.s16.totalorder %v10561_v46, 0 }
 0x1b6   :  { %v3807_v36 = vsel %vm3295_vm11, 65537, %v13166_v16  ;;  %v3823_v2 = vsel %vm3311_vm0, 65537, %v13166_v16  ;;  %v3808_v3 = vsel %vm3296_vm7, 65537, %v13166_v16  ;;  %v3824_v8 = vsel %vm3312_vm2, 65537, %v13166_v16 }
 0x1b7   :  { %v4483_v13 = vunpack.c.l.b16 %v3807_v36  ;;  %v4484_v14 = vunpack.c.h.b16 %v3807_v36  ;;  %v4515_v27 = vunpack.c.l.b16 %v3823_v2  ;;  %v4516_v9 = vunpack.c.h.b16 %v3823_v2 }
 0x1b8   :  { %v4485_v40 = vunpack.c.l.b16 %v3808_v3  ;;  %v4486_v38 = vunpack.c.h.b16 %v3808_v3  ;;  %v4517_v10 = vunpack.c.l.b16 %v3824_v8  ;;  %v4518_v11 = vunpack.c.h.b16 %v3824_v8 }
 0x1b9   :  { %vm5508_vm8 = vcmp.ne.s32.totalorder %v4484_v14, 0  ;;  %vm5540_vm6 = vcmp.ne.s32.totalorder %v4516_v9, 0  ;;  %vm15044_vm5 = vcmp.ne.s32.totalorder %v4483_v13, 0  ;;  %vm15048_vm10 = vcmp.ne.s32.totalorder %v4515_v27, 0 }
 0x1ba   :  { %vm12194_vm12 = vmpackc.low %vm5540_vm6, %vm5508_vm8  ;;  %vm5510_vm13 = vcmp.ne.s32.totalorder %v4486_v38, 0  ;;  %vm5542_vm14 = vcmp.ne.s32.totalorder %v4518_v11, 0  ;;  %vm15052_vm3 = vcmp.ne.s32.totalorder %v4485_v40, 0  ;;  %vm15056_vm11 = vcmp.ne.s32.totalorder %v4517_v10, 0 }
 0x1bb   :  { %12195 = vmatprep.subr.msk.bf16.mxu0 %vm12194_vm12, %v13167_v48  ;;  %vm12258_vm0 = vmpackc.low %vm5542_vm14, %vm5510_vm13  ;;  %v1283_v41 = vsel %vm771_vm1, 65537, %v13166_v16  ;;  %v1284_v52 = vsel %vm772_vm15, 65537, %v13166_v16  ;;  %v1285_v53 = vsel %vm773_vm4, 65537, %v13166_v16  ;;  %v1286_v58 = vsel %vm774_vm9, 65537, %v13166_v16 }
 0x1bc   :  { %12259 = vmatprep.subr.msk.bf16.mxu1 %vm12258_vm0, %v13167_v48  ;;  %vm12196_vm1 = vmpackc.low %vm15048_vm10, %vm15044_vm5  ;;  %v10576_v59 = vcombine.low %v1283_v41, %v1284_v52  ;;  %v10592_v60 = vcombine.high %v1283_v41, %v1284_v52  ;;  %v10577_v35 = vcombine.low %v1285_v53, %v1286_v58  ;;  %v10593_v61 = vcombine.high %v1285_v53, %v1286_v58 }
 0x1bd   :  { %12197 = vmatpush1.bf16.msk.msra.mxu0 %vm12196_vm1, %v13167_v48  ;;  %vm12260_vm15 = vmpackc.low %vm15056_vm11, %vm15052_vm3  ;;  %vm803_vm4 = vcmp.eq.bf16.partialorder %v13280_v56, %v14729_v22  ;;  %vm804_vm9 = vcmp.eq.bf16.partialorder %v13280_v56, %v14732_v24  ;;  %vm805_vm7 = vcmp.eq.bf16.partialorder %v13280_v56, %v14735_v33  ;;  %vm806_vm2 = vcmp.eq.bf16.partialorder %v13280_v56, %v14738_v26 }
 0x1be   :  { %12261 = vmatpush1.bf16.msk.msra.mxu1 %vm12260_vm15, %v13167_v48  ;;  %vm3327_vm8 = vcmp.ne.s16.totalorder %v10576_v59, 0  ;;  %vm3343_vm6 = vcmp.ne.s16.totalorder %v10592_v60, 0  ;;  %vm3328_vm5 = vcmp.ne.s16.totalorder %v10577_v35, 0  ;;  %vm3344_vm10 = vcmp.ne.s16.totalorder %v10593_v61, 0 }
 0x1bf   :  { %v3839_v63 = vsel %vm3327_vm8, 65537, %v13166_v16  ;;  %v3855_v62 = vsel %vm3343_vm6, 65537, %v13166_v16  ;;  %v3840_v18 = vsel %vm3328_vm5, 65537, %v13166_v16  ;;  %v3856_v45 = vsel %vm3344_vm10, 65537, %v13166_v16 }
 0x1c0   :  { %v4547_v19 = vunpack.c.l.b16 %v3839_v63  ;;  %v4548_v34 = vunpack.c.h.b16 %v3839_v63  ;;  %v4579_v43 = vunpack.c.l.b16 %v3855_v62  ;;  %v4580_v46 = vunpack.c.h.b16 %v3855_v62 }
 0x1c1   :  { %v4549_v36 = vunpack.c.l.b16 %v3840_v18  ;;  %v4550_v2 = vunpack.c.h.b16 %v3840_v18  ;;  %v4581_v3 = vunpack.c.l.b16 %v3856_v45  ;;  %v4582_v8 = vunpack.c.h.b16 %v3856_v45 }
 0x1c2   :  { %vm5572_vm12 = vcmp.ne.s32.totalorder %v4548_v34, 0  ;;  %vm5604_vm13 = vcmp.ne.s32.totalorder %v4580_v46, 0  ;;  %vm15100_vm14 = vcmp.ne.s32.totalorder %v4547_v19, 0  ;;  %vm15104_vm3 = vcmp.ne.s32.totalorder %v4579_v43, 0 }
 0x1c3   :  { %vm12198_vm11 = vmpackc.low %vm5604_vm13, %vm5572_vm12  ;;  %vm5574_vm0 = vcmp.ne.s32.totalorder %v4550_v2, 0  ;;  %vm5606_vm1 = vcmp.ne.s32.totalorder %v4582_v8, 0  ;;  %vm15108_vm15 = vcmp.ne.s32.totalorder %v4549_v36, 0  ;;  %vm15112_vm8 = vcmp.ne.s32.totalorder %v4581_v3, 0 }
 0x1c4   :  { %12199 = vmatprep.subr.msk.bf16.mxu0 %vm12198_vm11, %v13167_v48  ;;  %vm12262_vm6 = vmpackc.low %vm5606_vm1, %vm5574_vm0  ;;  %v1315_v40 = vsel %vm803_vm4, 65537, %v13166_v16  ;;  %v1316_v38 = vsel %vm804_vm9, 65537, %v13166_v16  ;;  %v1317_v10 = vsel %vm805_vm7, 65537, %v13166_v16  ;;  %v1318_v11 = vsel %vm806_vm2, 65537, %v13166_v16 }
 0x1c5   :  { %12263 = vmatprep.subr.msk.bf16.mxu1 %vm12262_vm6, %v13167_v48  ;;  %vm12200_vm4 = vmpackc.low %vm15104_vm3, %vm15100_vm14  ;;  %v10608_v49 = vcombine.low %v1315_v40, %v1316_v38  ;;  %v10624_v50 = vcombine.high %v1315_v40, %v1316_v38  ;;  %v10609_v51 = vcombine.low %v1317_v10, %v1318_v11  ;;  %v10625_v17 = vcombine.high %v1317_v10, %v1318_v11 }
 0x1c6   :  { %12201 = vmatpush1.bf16.msk.msra.mxu0 %vm12200_vm4, %v13167_v48  ;;  %vm12264_vm9 = vmpackc.low %vm15112_vm8, %vm15108_vm15  ;;  %vm835_vm7 = vcmp.eq.bf16.partialorder %v13302_v12, %v14729_v22  ;;  %vm836_vm2 = vcmp.eq.bf16.partialorder %v13302_v12, %v14732_v24  ;;  %vm837_vm5 = vcmp.eq.bf16.partialorder %v13302_v12, %v14735_v33  ;;  %vm838_vm10 = vcmp.eq.bf16.partialorder %v13302_v12, %v14738_v26 }
 0x1c7   :  { %12265 = vmatpush1.bf16.msk.msra.mxu1 %vm12264_vm9, %v13167_v48  ;;  %vm3359_vm12 = vcmp.ne.s16.totalorder %v10608_v49, 0  ;;  %vm3375_vm13 = vcmp.ne.s16.totalorder %v10624_v50, 0  ;;  %vm3360_vm14 = vcmp.ne.s16.totalorder %v10609_v51, 0  ;;  %vm3376_vm3 = vcmp.ne.s16.totalorder %v10625_v17, 0 }
 0x1c8   :  { %v3871_v41 = vsel %vm3359_vm12, 65537, %v13166_v16  ;;  %v3887_v52 = vsel %vm3375_vm13, 65537, %v13166_v16  ;;  %v3872_v53 = vsel %vm3360_vm14, 65537, %v13166_v16  ;;  %v3888_v58 = vsel %vm3376_vm3, 65537, %v13166_v16 }
 0x1c9   :  { %v4611_v59 = vunpack.c.l.b16 %v3871_v41  ;;  %v4612_v60 = vunpack.c.h.b16 %v3871_v41  ;;  %v4643_v35 = vunpack.c.l.b16 %v3887_v52  ;;  %v4644_v61 = vunpack.c.h.b16 %v3887_v52 }
 0x1ca   :  { %v4613_v63 = vunpack.c.l.b16 %v3872_v53  ;;  %v4614_v62 = vunpack.c.h.b16 %v3872_v53  ;;  %v4645_v18 = vunpack.c.l.b16 %v3888_v58  ;;  %v4646_v45 = vunpack.c.h.b16 %v3888_v58 }
 0x1cb   :  { %vm5636_vm11 = vcmp.ne.s32.totalorder %v4612_v60, 0  ;;  %vm5668_vm0 = vcmp.ne.s32.totalorder %v4644_v61, 0  ;;  %vm15156_vm1 = vcmp.ne.s32.totalorder %v4611_v59, 0  ;;  %vm15160_vm15 = vcmp.ne.s32.totalorder %v4643_v35, 0 }
 0x1cc   :  { %vm12202_vm8 = vmpackc.low %vm5668_vm0, %vm5636_vm11  ;;  %vm5638_vm6 = vcmp.ne.s32.totalorder %v4614_v62, 0  ;;  %vm5670_vm4 = vcmp.ne.s32.totalorder %v4646_v45, 0  ;;  %vm15164_vm9 = vcmp.ne.s32.totalorder %v4613_v63, 0  ;;  %vm15168_vm12 = vcmp.ne.s32.totalorder %v4645_v18, 0 }
 0x1cd   :  { %12203 = vmatprep.subr.msk.bf16.mxu0 %vm12202_vm8, %v13167_v48  ;;  %vm12266_vm13 = vmpackc.low %vm5670_vm4, %vm5638_vm6  ;;  %v1347_v36 = vsel %vm835_vm7, 65537, %v13166_v16  ;;  %v1348_v2 = vsel %vm836_vm2, 65537, %v13166_v16  ;;  %v1349_v3 = vsel %vm837_vm5, 65537, %v13166_v16  ;;  %v1350_v8 = vsel %vm838_vm10, 65537, %v13166_v16 }
 0x1ce   :  { %12267 = vmatprep.subr.msk.bf16.mxu1 %vm12266_vm13, %v13167_v48  ;;  %vm12204_vm7 = vmpackc.low %vm15160_vm15, %vm15156_vm1  ;;  %v10640_v13 = vcombine.low %v1347_v36, %v1348_v2  ;;  %v10656_v14 = vcombine.high %v1347_v36, %v1348_v2  ;;  %v10641_v27 = vcombine.low %v1349_v3, %v1350_v8  ;;  %v10657_v9 = vcombine.high %v1349_v3, %v1350_v8 }
 0x1cf   :  { %12205 = vmatpush1.bf16.msk.msra.mxu0 %vm12204_vm7, %v13167_v48  ;;  %vm12268_vm2 = vmpackc.low %vm15168_vm12, %vm15164_vm9  ;;  %vm867_vm5 = vcmp.eq.bf16.partialorder %v13772_v32, %v14729_v22  ;;  %vm868_vm10 = vcmp.eq.bf16.partialorder %v13772_v32, %v14732_v24  ;;  %vm869_vm14 = vcmp.eq.bf16.partialorder %v13772_v32, %v14735_v33  ;;  %vm870_vm3 = vcmp.eq.bf16.partialorder %v13772_v32, %v14738_v26 }
 0x1d0   :  { %12269 = vmatpush1.bf16.msk.msra.mxu1 %vm12268_vm2, %v13167_v48  ;;  %vm3391_vm11 = vcmp.ne.s16.totalorder %v10640_v13, 0  ;;  %vm3407_vm0 = vcmp.ne.s16.totalorder %v10656_v14, 0  ;;  %vm3392_vm1 = vcmp.ne.s16.totalorder %v10641_v27, 0  ;;  %vm3408_vm15 = vcmp.ne.s16.totalorder %v10657_v9, 0 }
 0x1d1   :  { %v3903_v40 = vsel %vm3391_vm11, 65537, %v13166_v16  ;;  %v3919_v38 = vsel %vm3407_vm0, 65537, %v13166_v16  ;;  %v3904_v10 = vsel %vm3392_vm1, 65537, %v13166_v16  ;;  %v3920_v11 = vsel %vm3408_vm15, 65537, %v13166_v16 }
 0x1d2   :  { %v4675_v49 = vunpack.c.l.b16 %v3903_v40  ;;  %v4676_v50 = vunpack.c.h.b16 %v3903_v40  ;;  %v4707_v51 = vunpack.c.l.b16 %v3919_v38  ;;  %v4708_v17 = vunpack.c.h.b16 %v3919_v38 }
 0x1d3   :  { %v4677_v41 = vunpack.c.l.b16 %v3904_v10  ;;  %v4678_v52 = vunpack.c.h.b16 %v3904_v10  ;;  %v4709_v53 = vunpack.c.l.b16 %v3920_v11  ;;  %v4710_v58 = vunpack.c.h.b16 %v3920_v11 }
 0x1d4   :  { %vm5700_vm8 = vcmp.ne.s32.totalorder %v4676_v50, 0  ;;  %vm5732_vm6 = vcmp.ne.s32.totalorder %v4708_v17, 0  ;;  %vm15212_vm4 = vcmp.ne.s32.totalorder %v4675_v49, 0  ;;  %vm15216_vm9 = vcmp.ne.s32.totalorder %v4707_v51, 0 }
 0x1d5   :  { %vm12206_vm12 = vmpackc.low %vm5732_vm6, %vm5700_vm8  ;;  %vm5702_vm13 = vcmp.ne.s32.totalorder %v4678_v52, 0  ;;  %vm5734_vm7 = vcmp.ne.s32.totalorder %v4710_v58, 0  ;;  %vm15220_vm2 = vcmp.ne.s32.totalorder %v4677_v41, 0  ;;  %vm15224_vm11 = vcmp.ne.s32.totalorder %v4709_v53, 0 }
 0x1d6   :  { %12207 = vmatprep.subr.msk.bf16.mxu0 %vm12206_vm12, %v13167_v48  ;;  %vm12270_vm0 = vmpackc.low %vm5734_vm7, %vm5702_vm13  ;;  %v1379_v63 = vsel %vm867_vm5, 65537, %v13166_v16  ;;  %v1380_v62 = vsel %vm868_vm10, 65537, %v13166_v16  ;;  %v1381_v18 = vsel %vm869_vm14, 65537, %v13166_v16  ;;  %v1382_v45 = vsel %vm870_vm3, 65537, %v13166_v16 }
 0x1d7   :  { %12271 = vmatprep.subr.msk.bf16.mxu1 %vm12270_vm0, %v13167_v48  ;;  %vm12208_vm5 = vmpackc.low %vm15216_vm9, %vm15212_vm4  ;;  %v10672_v19 = vcombine.low %v1379_v63, %v1380_v62  ;;  %v10688_v34 = vcombine.high %v1379_v63, %v1380_v62  ;;  %v10673_v43 = vcombine.low %v1381_v18, %v1382_v45  ;;  %v10689_v46 = vcombine.high %v1381_v18, %v1382_v45 }
 0x1d8   :  { %12209 = vmatpush1.bf16.msk.msra.mxu0 %vm12208_vm5, %v13167_v48  ;;  %vm12272_vm10 = vmpackc.low %vm15224_vm11, %vm15220_vm2  ;;  %vm899_vm14 = vcmp.eq.bf16.partialorder %v13855_v37, %v14729_v22  ;;  %vm900_vm3 = vcmp.eq.bf16.partialorder %v13855_v37, %v14732_v24  ;;  %vm901_vm1 = vcmp.eq.bf16.partialorder %v13855_v37, %v14735_v33  ;;  %vm902_vm15 = vcmp.eq.bf16.partialorder %v13855_v37, %v14738_v26 }
 0x1d9   :  { %12273 = vmatpush1.bf16.msk.msra.mxu1 %vm12272_vm10, %v13167_v48  ;;  %vm3423_vm8 = vcmp.ne.s16.totalorder %v10672_v19, 0  ;;  %vm3439_vm6 = vcmp.ne.s16.totalorder %v10688_v34, 0  ;;  %vm3424_vm4 = vcmp.ne.s16.totalorder %v10673_v43, 0  ;;  %vm3440_vm9 = vcmp.ne.s16.totalorder %v10689_v46, 0 }
 0x1da   :  { %v3935_v36 = vsel %vm3423_vm8, 65537, %v13166_v16  ;;  %v3951_v2 = vsel %vm3439_vm6, 65537, %v13166_v16  ;;  %v3936_v3 = vsel %vm3424_vm4, 65537, %v13166_v16  ;;  %v3952_v8 = vsel %vm3440_vm9, 65537, %v13166_v16 }
 0x1db   :  { %v4739_v13 = vunpack.c.l.b16 %v3935_v36  ;;  %v4740_v14 = vunpack.c.h.b16 %v3935_v36  ;;  %v4771_v27 = vunpack.c.l.b16 %v3951_v2  ;;  %v4772_v9 = vunpack.c.h.b16 %v3951_v2 }
 0x1dc   :  { %v4741_v40 = vunpack.c.l.b16 %v3936_v3  ;;  %v4742_v38 = vunpack.c.h.b16 %v3936_v3  ;;  %v4773_v10 = vunpack.c.l.b16 %v3952_v8  ;;  %v4774_v11 = vunpack.c.h.b16 %v3952_v8 }
 0x1dd   :  { %vm5764_vm12 = vcmp.ne.s32.totalorder %v4740_v14, 0  ;;  %vm5796_vm13 = vcmp.ne.s32.totalorder %v4772_v9, 0  ;;  %vm15268_vm7 = vcmp.ne.s32.totalorder %v4739_v13, 0  ;;  %vm15272_vm2 = vcmp.ne.s32.totalorder %v4771_v27, 0 }
 0x1de   :  { %vm12210_vm11 = vmpackc.low %vm5796_vm13, %vm5764_vm12  ;;  %vm5766_vm0 = vcmp.ne.s32.totalorder %v4742_v38, 0  ;;  %vm5798_vm5 = vcmp.ne.s32.totalorder %v4774_v11, 0  ;;  %vm15276_vm10 = vcmp.ne.s32.totalorder %v4741_v40, 0  ;;  %vm15280_vm8 = vcmp.ne.s32.totalorder %v4773_v10, 0 }
 0x1df   :  { %12211 = vmatprep.subr.msk.bf16.mxu0 %vm12210_vm11, %v13167_v48  ;;  %vm12274_vm6 = vmpackc.low %vm5798_vm5, %vm5766_vm0  ;;  %v1411_v41 = vsel %vm899_vm14, 65537, %v13166_v16  ;;  %v1412_v52 = vsel %vm900_vm3, 65537, %v13166_v16  ;;  %v1413_v53 = vsel %vm901_vm1, 65537, %v13166_v16  ;;  %v1414_v58 = vsel %vm902_vm15, 65537, %v13166_v16 }
 0x1e0   :  { %12275 = vmatprep.subr.msk.bf16.mxu1 %vm12274_vm6, %v13167_v48  ;;  %vm12212_vm14 = vmpackc.low %vm15272_vm2, %vm15268_vm7  ;;  %v10704_v59 = vcombine.low %v1411_v41, %v1412_v52  ;;  %v10720_v60 = vcombine.high %v1411_v41, %v1412_v52  ;;  %v10705_v35 = vcombine.low %v1413_v53, %v1414_v58  ;;  %v10721_v61 = vcombine.high %v1413_v53, %v1414_v58 }
 0x1e1   :  { %12213 = vmatpush1.bf16.msk.msra.mxu0 %vm12212_vm14, %v13167_v48  ;;  %vm12276_vm3 = vmpackc.low %vm15280_vm8, %vm15276_vm10  ;;  %vm931_vm1 = vcmp.eq.bf16.partialorder %v13896_v54, %v14729_v22  ;;  %vm932_vm15 = vcmp.eq.bf16.partialorder %v13896_v54, %v14732_v24  ;;  %vm933_vm4 = vcmp.eq.bf16.partialorder %v13896_v54, %v14735_v33  ;;  %vm934_vm9 = vcmp.eq.bf16.partialorder %v13896_v54, %v14738_v26 }
 0x1e2   :  { %12277 = vmatpush1.bf16.msk.msra.mxu1 %vm12276_vm3, %v13167_v48  ;;  %vm3455_vm12 = vcmp.ne.s16.totalorder %v10704_v59, 0  ;;  %vm3471_vm13 = vcmp.ne.s16.totalorder %v10720_v60, 0  ;;  %vm3456_vm7 = vcmp.ne.s16.totalorder %v10705_v35, 0  ;;  %vm3472_vm2 = vcmp.ne.s16.totalorder %v10721_v61, 0 }
 0x1e3   :  { %v3967_v63 = vsel %vm3455_vm12, 65537, %v13166_v16  ;;  %v3983_v62 = vsel %vm3471_vm13, 65537, %v13166_v16  ;;  %v3968_v18 = vsel %vm3456_vm7, 65537, %v13166_v16  ;;  %v3984_v45 = vsel %vm3472_vm2, 65537, %v13166_v16 }
 0x1e4   :  { %v4803_v19 = vunpack.c.l.b16 %v3967_v63  ;;  %v4804_v34 = vunpack.c.h.b16 %v3967_v63  ;;  %v4835_v43 = vunpack.c.l.b16 %v3983_v62  ;;  %v4836_v46 = vunpack.c.h.b16 %v3983_v62 }
 0x1e5   :  { %v4805_v36 = vunpack.c.l.b16 %v3968_v18  ;;  %v4806_v2 = vunpack.c.h.b16 %v3968_v18  ;;  %v4837_v3 = vunpack.c.l.b16 %v3984_v45  ;;  %v4838_v8 = vunpack.c.h.b16 %v3984_v45 }
 0x1e6   :  { %vm5828_vm11 = vcmp.ne.s32.totalorder %v4804_v34, 0  ;;  %vm5860_vm0 = vcmp.ne.s32.totalorder %v4836_v46, 0  ;;  %vm15324_vm5 = vcmp.ne.s32.totalorder %v4803_v19, 0  ;;  %vm15328_vm10 = vcmp.ne.s32.totalorder %v4835_v43, 0 }
 0x1e7   :  { %vm12214_vm8 = vmpackc.low %vm5860_vm0, %vm5828_vm11  ;;  %vm5830_vm6 = vcmp.ne.s32.totalorder %v4806_v2, 0  ;;  %vm5862_vm14 = vcmp.ne.s32.totalorder %v4838_v8, 0  ;;  %vm15332_vm3 = vcmp.ne.s32.totalorder %v4805_v36, 0  ;;  %vm15336_vm12 = vcmp.ne.s32.totalorder %v4837_v3, 0 }
 0x1e8   :  { %12215 = vmatprep.subr.msk.bf16.mxu0 %vm12214_vm8, %v13167_v48  ;;  %vm12278_vm13 = vmpackc.low %vm5862_vm14, %vm5830_vm6  ;;  %v1443_v40 = vsel %vm931_vm1, 65537, %v13166_v16  ;;  %v1444_v38 = vsel %vm932_vm15, 65537, %v13166_v16  ;;  %v1445_v10 = vsel %vm933_vm4, 65537, %v13166_v16  ;;  %v1446_v11 = vsel %vm934_vm9, 65537, %v13166_v16 }
 0x1e9   :  { %12279 = vmatprep.subr.msk.bf16.mxu1 %vm12278_vm13, %v13167_v48  ;;  %vm12216_vm1 = vmpackc.low %vm15328_vm10, %vm15324_vm5  ;;  %v10736_v49 = vcombine.low %v1443_v40, %v1444_v38  ;;  %v10752_v50 = vcombine.high %v1443_v40, %v1444_v38  ;;  %v10737_v51 = vcombine.low %v1445_v10, %v1446_v11  ;;  %v10753_v17 = vcombine.high %v1445_v10, %v1446_v11 }
 0x1ea   :  { %12217 = vmatpush1.bf16.msk.msra.mxu0 %vm12216_vm1, %v13167_v48  ;;  %vm12280_vm15 = vmpackc.low %vm15336_vm12, %vm15332_vm3  ;;  %vm963_vm4 = vcmp.eq.bf16.partialorder %v13947_v15, %v14729_v22  ;;  %vm964_vm9 = vcmp.eq.bf16.partialorder %v13947_v15, %v14732_v24  ;;  %vm965_vm7 = vcmp.eq.bf16.partialorder %v13947_v15, %v14735_v33  ;;  %vm966_vm2 = vcmp.eq.bf16.partialorder %v13947_v15, %v14738_v26 }
 0x1eb   :  { %12281 = vmatpush1.bf16.msk.msra.mxu1 %vm12280_vm15, %v13167_v48  ;;  %vm3487_vm11 = vcmp.ne.s16.totalorder %v10736_v49, 0  ;;  %vm3503_vm0 = vcmp.ne.s16.totalorder %v10752_v50, 0  ;;  %vm3488_vm5 = vcmp.ne.s16.totalorder %v10737_v51, 0  ;;  %vm3504_vm10 = vcmp.ne.s16.totalorder %v10753_v17, 0 }
 0x1ec   :  { %v3999_v41 = vsel %vm3487_vm11, 65537, %v13166_v16  ;;  %v4015_v52 = vsel %vm3503_vm0, 65537, %v13166_v16  ;;  %v4000_v53 = vsel %vm3488_vm5, 65537, %v13166_v16  ;;  %v4016_v58 = vsel %vm3504_vm10, 65537, %v13166_v16 }
 0x1ed   :  { %v4867_v59 = vunpack.c.l.b16 %v3999_v41  ;;  %v4868_v60 = vunpack.c.h.b16 %v3999_v41  ;;  %v4899_v35 = vunpack.c.l.b16 %v4015_v52  ;;  %v4900_v61 = vunpack.c.h.b16 %v4015_v52 }
 0x1ee   :  { %v4869_v63 = vunpack.c.l.b16 %v4000_v53  ;;  %v4870_v62 = vunpack.c.h.b16 %v4000_v53  ;;  %v4901_v18 = vunpack.c.l.b16 %v4016_v58  ;;  %v4902_v45 = vunpack.c.h.b16 %v4016_v58 }
 0x1ef   :  { %vm5892_vm8 = vcmp.ne.s32.totalorder %v4868_v60, 0  ;;  %vm5924_vm6 = vcmp.ne.s32.totalorder %v4900_v61, 0  ;;  %vm15380_vm14 = vcmp.ne.s32.totalorder %v4867_v59, 0  ;;  %vm15384_vm3 = vcmp.ne.s32.totalorder %v4899_v35, 0 }
 0x1f0   :  { %vm12218_vm12 = vmpackc.low %vm5924_vm6, %vm5892_vm8  ;;  %vm5894_vm13 = vcmp.ne.s32.totalorder %v4870_v62, 0  ;;  %vm5926_vm1 = vcmp.ne.s32.totalorder %v4902_v45, 0  ;;  %vm15388_vm15 = vcmp.ne.s32.totalorder %v4869_v63, 0  ;;  %vm15392_vm11 = vcmp.ne.s32.totalorder %v4901_v18, 0 }
 0x1f1   :  { %12219 = vmatprep.subr.msk.bf16.mxu0 %vm12218_vm12, %v13167_v48  ;;  %vm12282_vm0 = vmpackc.low %vm5926_vm1, %vm5894_vm13  ;;  %v1475_v36 = vsel %vm963_vm4, 65537, %v13166_v16  ;;  %v1476_v2 = vsel %vm964_vm9, 65537, %v13166_v16  ;;  %v1477_v3 = vsel %vm965_vm7, 65537, %v13166_v16  ;;  %v1478_v8 = vsel %vm966_vm2, 65537, %v13166_v16 }
 0x1f2   :  { %12283 = vmatprep.subr.msk.bf16.mxu1 %vm12282_vm0, %v13167_v48  ;;  %vm12220_vm4 = vmpackc.low %vm15384_vm3, %vm15380_vm14  ;;  %v10768_v13 = vcombine.low %v1475_v36, %v1476_v2  ;;  %v10784_v14 = vcombine.high %v1475_v36, %v1476_v2  ;;  %v10769_v27 = vcombine.low %v1477_v3, %v1478_v8  ;;  %v10785_v9 = vcombine.high %v1477_v3, %v1478_v8 }
 0x1f3   :  { %12221 = vmatpush1.bf16.msk.msra.mxu0 %vm12220_vm4, %v13167_v48  ;;  %vm12284_vm9 = vmpackc.low %vm15392_vm11, %vm15388_vm15  ;;  %vm995_vm7 = vcmp.eq.bf16.partialorder %v13949_v44, %v14729_v22  ;;  %vm996_vm2 = vcmp.eq.bf16.partialorder %v13949_v44, %v14732_v24  ;;  %vm997_vm5 = vcmp.eq.bf16.partialorder %v13949_v44, %v14735_v33  ;;  %vm998_vm10 = vcmp.eq.bf16.partialorder %v13949_v44, %v14738_v26 }
 0x1f4   :  { %12285 = vmatpush1.bf16.msk.msra.mxu1 %vm12284_vm9, %v13167_v48  ;;  %vm3519_vm8 = vcmp.ne.s16.totalorder %v10768_v13, 0  ;;  %vm3535_vm6 = vcmp.ne.s16.totalorder %v10784_v14, 0  ;;  %vm3520_vm14 = vcmp.ne.s16.totalorder %v10769_v27, 0  ;;  %vm3536_vm3 = vcmp.ne.s16.totalorder %v10785_v9, 0 }
 0x1f5   :  { %v4031_v40 = vsel %vm3519_vm8, 65537, %v13166_v16  ;;  %v4047_v38 = vsel %vm3535_vm6, 65537, %v13166_v16  ;;  %v4032_v10 = vsel %vm3520_vm14, 65537, %v13166_v16  ;;  %v4048_v11 = vsel %vm3536_vm3, 65537, %v13166_v16 }
 0x1f6   :  { %v4931_v49 = vunpack.c.l.b16 %v4031_v40  ;;  %v4932_v50 = vunpack.c.h.b16 %v4031_v40  ;;  %v4963_v51 = vunpack.c.l.b16 %v4047_v38  ;;  %v4964_v17 = vunpack.c.h.b16 %v4047_v38 }
 0x1f7   :  { %v4933_v41 = vunpack.c.l.b16 %v4032_v10  ;;  %v4934_v52 = vunpack.c.h.b16 %v4032_v10  ;;  %v4965_v53 = vunpack.c.l.b16 %v4048_v11  ;;  %v4966_v58 = vunpack.c.h.b16 %v4048_v11 }
 0x1f8   :  { %vm5956_vm12 = vcmp.ne.s32.totalorder %v4932_v50, 0  ;;  %vm5988_vm13 = vcmp.ne.s32.totalorder %v4964_v17, 0  ;;  %vm15436_vm1 = vcmp.ne.s32.totalorder %v4931_v49, 0  ;;  %vm15440_vm15 = vcmp.ne.s32.totalorder %v4963_v51, 0 }
 0x1f9   :  { %vm12222_vm11 = vmpackc.low %vm5988_vm13, %vm5956_vm12  ;;  %vm5958_vm0 = vcmp.ne.s32.totalorder %v4934_v52, 0  ;;  %vm5990_vm4 = vcmp.ne.s32.totalorder %v4966_v58, 0  ;;  %vm15444_vm9 = vcmp.ne.s32.totalorder %v4933_v41, 0  ;;  %vm15448_vm8 = vcmp.ne.s32.totalorder %v4965_v53, 0 }
 0x1fa   :  { %12223 = vmatprep.subr.msk.bf16.mxu0 %vm12222_vm11, %v13167_v48  ;;  %vm12286_vm6 = vmpackc.low %vm5990_vm4, %vm5958_vm0  ;;  %v1507_v63 = vsel %vm995_vm7, 65537, %v13166_v16  ;;  %v1508_v62 = vsel %vm996_vm2, 65537, %v13166_v16  ;;  %v1509_v18 = vsel %vm997_vm5, 65537, %v13166_v16  ;;  %v1510_v45 = vsel %vm998_vm10, 65537, %v13166_v16 }
 0x1fb   :  { %12287 = vmatprep.subr.msk.bf16.mxu1 %vm12286_vm6, %v13167_v48  ;;  %vm12224_vm7 = vmpackc.low %vm15440_vm15, %vm15436_vm1  ;;  %v10800_v19 = vcombine.low %v1507_v63, %v1508_v62  ;;  %v10816_v34 = vcombine.high %v1507_v63, %v1508_v62  ;;  %v10801_v43 = vcombine.low %v1509_v18, %v1510_v45  ;;  %v10817_v46 = vcombine.high %v1509_v18, %v1510_v45 }
 0x1fc   :  { %12225 = vmatpush1.bf16.msk.msra.mxu0 %vm12224_vm7, %v13167_v48  ;;  %vm12288_vm2 = vmpackc.low %vm15448_vm8, %vm15444_vm9  ;;  %vm1027_vm5 = vcmp.eq.bf16.partialorder %v14056_v0, %v14729_v22  ;;  %vm1028_vm10 = vcmp.eq.bf16.partialorder %v14056_v0, %v14732_v24  ;;  %vm1029_vm14 = vcmp.eq.bf16.partialorder %v14056_v0, %v14735_v33  ;;  %vm1030_vm3 = vcmp.eq.bf16.partialorder %v14056_v0, %v14738_v26 }
 0x1fd   :  { %12289 = vmatpush1.bf16.msk.msra.mxu1 %vm12288_vm2, %v13167_v48  ;;  %vm3551_vm12 = vcmp.ne.s16.totalorder %v10800_v19, 0  ;;  %vm3567_vm13 = vcmp.ne.s16.totalorder %v10816_v34, 0  ;;  %vm3552_vm1 = vcmp.ne.s16.totalorder %v10801_v43, 0  ;;  %vm3568_vm15 = vcmp.ne.s16.totalorder %v10817_v46, 0 }
 0x1fe   :  { %v4063_v36 = vsel %vm3551_vm12, 65537, %v13166_v16  ;;  %v4079_v2 = vsel %vm3567_vm13, 65537, %v13166_v16  ;;  %v4064_v3 = vsel %vm3552_vm1, 65537, %v13166_v16  ;;  %v4080_v8 = vsel %vm3568_vm15, 65537, %v13166_v16 }
 0x1ff   :  { %v4995_v13 = vunpack.c.l.b16 %v4063_v36  ;;  %v4996_v14 = vunpack.c.h.b16 %v4063_v36  ;;  %v5027_v27 = vunpack.c.l.b16 %v4079_v2  ;;  %v5028_v9 = vunpack.c.h.b16 %v4079_v2 }
 0x200   :  { %v4997_v40 = vunpack.c.l.b16 %v4064_v3  ;;  %v4998_v38 = vunpack.c.h.b16 %v4064_v3  ;;  %v5029_v10 = vunpack.c.l.b16 %v4080_v8  ;;  %v5030_v11 = vunpack.c.h.b16 %v4080_v8 }
 0x201   :  { %vm6020_vm11 = vcmp.ne.s32.totalorder %v4996_v14, 0  ;;  %vm6052_vm0 = vcmp.ne.s32.totalorder %v5028_v9, 0  ;;  %vm15492_vm4 = vcmp.ne.s32.totalorder %v4995_v13, 0  ;;  %vm15496_vm9 = vcmp.ne.s32.totalorder %v5027_v27, 0 }
 0x202   :  { %vm12226_vm8 = vmpackc.low %vm6052_vm0, %vm6020_vm11  ;;  %vm6022_vm6 = vcmp.ne.s32.totalorder %v4998_v38, 0  ;;  %vm6054_vm7 = vcmp.ne.s32.totalorder %v5030_v11, 0  ;;  %vm15500_vm2 = vcmp.ne.s32.totalorder %v4997_v40, 0  ;;  %vm15504_vm12 = vcmp.ne.s32.totalorder %v5029_v10, 0 }
 0x203   :  { %12227 = vmatprep.subr.msk.bf16.mxu0 %vm12226_vm8, %v13167_v48  ;;  %vm12290_vm13 = vmpackc.low %vm6054_vm7, %vm6022_vm6  ;;  %v1539_v41 = vsel %vm1027_vm5, 65537, %v13166_v16  ;;  %v1540_v52 = vsel %vm1028_vm10, 65537, %v13166_v16  ;;  %v1541_v53 = vsel %vm1029_vm14, 65537, %v13166_v16  ;;  %v1542_v58 = vsel %vm1030_vm3, 65537, %v13166_v16 }
 0x204   :  { %12291 = vmatprep.subr.msk.bf16.mxu1 %vm12290_vm13, %v13167_v48  ;;  %vm12228_vm5 = vmpackc.low %vm15496_vm9, %vm15492_vm4  ;;  %v10832_v59 = vcombine.low %v1539_v41, %v1540_v52  ;;  %v10848_v60 = vcombine.high %v1539_v41, %v1540_v52  ;;  %v10833_v35 = vcombine.low %v1541_v53, %v1542_v58  ;;  %v10849_v61 = vcombine.high %v1541_v53, %v1542_v58 }
 0x205   :  { %12229 = vmatpush1.bf16.msk.msra.mxu0 %vm12228_vm5, %v13167_v48  ;;  %vm12292_vm10 = vmpackc.low %vm15504_vm12, %vm15500_vm2  ;;  %vm1059_vm14 = vcmp.eq.bf16.partialorder %v14132_v25, %v14729_v22  ;;  %vm1060_vm3 = vcmp.eq.bf16.partialorder %v14132_v25, %v14732_v24  ;;  %vm1061_vm1 = vcmp.eq.bf16.partialorder %v14132_v25, %v14735_v33  ;;  %vm1062_vm15 = vcmp.eq.bf16.partialorder %v14132_v25, %v14738_v26 }
 0x206   :  { %12293 = vmatpush1.bf16.msk.msra.mxu1 %vm12292_vm10, %v13167_v48  ;;  %vm3583_vm11 = vcmp.ne.s16.totalorder %v10832_v59, 0  ;;  %vm3599_vm0 = vcmp.ne.s16.totalorder %v10848_v60, 0  ;;  %vm3584_vm4 = vcmp.ne.s16.totalorder %v10833_v35, 0  ;;  %vm3600_vm9 = vcmp.ne.s16.totalorder %v10849_v61, 0 }
 0x207   :  { %v4095_v63 = vsel %vm3583_vm11, 65537, %v13166_v16  ;;  %v4111_v62 = vsel %vm3599_vm0, 65537, %v13166_v16  ;;  %v4096_v18 = vsel %vm3584_vm4, 65537, %v13166_v16  ;;  %v4112_v45 = vsel %vm3600_vm9, 65537, %v13166_v16 }
 0x208   :  { %v5059_v19 = vunpack.c.l.b16 %v4095_v63  ;;  %v5060_v34 = vunpack.c.h.b16 %v4095_v63  ;;  %v5091_v43 = vunpack.c.l.b16 %v4111_v62  ;;  %v5092_v46 = vunpack.c.h.b16 %v4111_v62 }
 0x209   :  { %v5061_v36 = vunpack.c.l.b16 %v4096_v18  ;;  %v5062_v2 = vunpack.c.h.b16 %v4096_v18  ;;  %v5093_v3 = vunpack.c.l.b16 %v4112_v45  ;;  %v5094_v8 = vunpack.c.h.b16 %v4112_v45 }
 0x20a   :  { %vm6084_vm8 = vcmp.ne.s32.totalorder %v5060_v34, 0  ;;  %vm6116_vm6 = vcmp.ne.s32.totalorder %v5092_v46, 0  ;;  %vm15548_vm7 = vcmp.ne.s32.totalorder %v5059_v19, 0  ;;  %vm15552_vm2 = vcmp.ne.s32.totalorder %v5091_v43, 0 }
 0x20b   :  { %vm12230_vm12 = vmpackc.low %vm6116_vm6, %vm6084_vm8  ;;  %vm6086_vm13 = vcmp.ne.s32.totalorder %v5062_v2, 0  ;;  %vm6118_vm5 = vcmp.ne.s32.totalorder %v5094_v8, 0  ;;  %vm15556_vm10 = vcmp.ne.s32.totalorder %v5061_v36, 0  ;;  %vm15560_vm11 = vcmp.ne.s32.totalorder %v5093_v3, 0 }
 0x20c   :  { %12231 = vmatprep.subr.msk.bf16.mxu0 %vm12230_vm12, %v13167_v48  ;;  %vm12294_vm0 = vmpackc.low %vm6118_vm5, %vm6086_vm13  ;;  %v1571_v40 = vsel %vm1059_vm14, 65537, %v13166_v16  ;;  %v1572_v38 = vsel %vm1060_vm3, 65537, %v13166_v16  ;;  %v1573_v10 = vsel %vm1061_vm1, 65537, %v13166_v16  ;;  %v1574_v11 = vsel %vm1062_vm15, 65537, %v13166_v16 }
 0x20d   :  { %12295 = vmatprep.subr.msk.bf16.mxu1 %vm12294_vm0, %v13167_v48  ;;  %vm12232_vm14 = vmpackc.low %vm15552_vm2, %vm15548_vm7  ;;  %v10864_v22 = vcombine.low %v1571_v40, %v1572_v38  ;;  %v10880_v24 = vcombine.high %v1571_v40, %v1572_v38  ;;  %v10865_v49 = vcombine.low %v1573_v10, %v1574_v11  ;;  %v10881_v50 = vcombine.high %v1573_v10, %v1574_v11  ;;  %v13052_v10 = vld [vmem:[#allocation5] ss:$8 sps:$4 sm:$0xff]   ;;  %v15638_v11 = vld [vmem:[#allocation2] sm:$0xff] }
 0x20e   :  { %12233 = vmatpush1.bf16.msk.msra.mxu0 %vm12232_vm14, %v13167_v48  ;;  %vm12296_vm3 = vmpackc.low %vm15560_vm11, %vm15556_vm10  ;;  %v206_v33 = vrot.slane %v14712_v42, %v14065_v21  ;;  %v210_v26 = vrot.slane %v14712_v42, %v14117_v57  ;;  %v214_v51 = vrot.slane %v14712_v42, %v14138_v29  ;;  %v218_v17 = vrot.slane %v14712_v42, %v14141_v30 }
 0x20f   :  { %12297 = vmatpush1.bf16.msk.msra.mxu1 %vm12296_vm3, %v13167_v48  ;;  %vm3615_vm1 = vcmp.ne.s16.totalorder %v10864_v22, 0  ;;  %vm3631_vm15 = vcmp.ne.s16.totalorder %v10880_v24, 0  ;;  %vm3616_vm4 = vcmp.ne.s16.totalorder %v10865_v49, 0  ;;  %vm3632_vm9 = vcmp.ne.s16.totalorder %v10881_v50, 0 }
 0x210   :  { %v4127_v41 = vsel %vm3615_vm1, 65537, %v13166_v16  ;;  %v4143_v52 = vsel %vm3631_vm15, 65537, %v13166_v16  ;;  %v4128_v53 = vsel %vm3616_vm4, 65537, %v13166_v16  ;;  %v4144_v58 = vsel %vm3632_vm9, 65537, %v13166_v16 }
 0x211   :  { %v5123_v59 = vunpack.c.l.b16 %v4127_v41  ;;  %v5124_v60 = vunpack.c.h.b16 %v4127_v41  ;;  %v5155_v35 = vunpack.c.l.b16 %v4143_v52  ;;  %v5156_v61 = vunpack.c.h.b16 %v4143_v52 }
 0x212   :  { %v5125_v63 = vunpack.c.l.b16 %v4128_v53  ;;  %v5126_v42 = vunpack.c.h.b16 %v4128_v53  ;;  %v5157_v62 = vunpack.c.l.b16 %v4144_v58  ;;  %v5158_v18 = vunpack.c.h.b16 %v4144_v58 }
 0x213   :  { %vm6148_vm8 = vcmp.ne.s32.totalorder %v5124_v60, 0  ;;  %vm6180_vm6 = vcmp.ne.s32.totalorder %v5156_v61, 0  ;;  %vm15604_vm7 = vcmp.ne.s32.totalorder %v5123_v59, 0  ;;  %vm6179_vm2 = vcmp.ne.s32.totalorder %v5155_v35, 0 }
 0x214   :  { %vm12234_vm12 = vmpackc.low %vm6180_vm6, %vm6148_vm8  ;;  %vm6150_vm13 = vcmp.ne.s32.totalorder %v5126_v42, 0  ;;  %vm6182_vm5 = vcmp.ne.s32.totalorder %v5158_v18, 0  ;;  %vm15608_vm10 = vcmp.ne.s32.totalorder %v5125_v63, 0  ;;  %vm15612_vm11 = vcmp.ne.s32.totalorder %v5157_v62, 0 }
 0x215   :  { %12235 = vmatprep.subr.msk.bf16.mxu0 %vm12234_vm12, %v13167_v48  ;;  %vm12298_vm0 = vmpackc.low %vm6182_vm5, %vm6150_vm13  ;;  %v327_v43 = vpack.c.bf16 %v206_v33, %v206_v33  ;;  %v328_v46 = vpack.c.bf16 %v210_v26, %v210_v26  ;;  %v329_v36 = vpack.c.bf16 %v214_v51, %v214_v51  ;;  %v330_v2 = vpack.c.bf16 %v218_v17, %v218_v17  ;;  %v13054_v26 = vld [vmem:[#allocation5 + $0x4] ss:$8 sps:$4 sm:$0xff]  }
 0x216   :  { %12299 = vmatprep.subr.msk.bf16.mxu1 %vm12298_vm0, %v13167_v48  ;;  %vm12236_vm14 = vmpackc.low %vm6179_vm2, %vm15604_vm7  ;;  %v60_v22 = vunpack.c.2.s8 %v15638_v11 }
 0x217   :  { %12237 = vmatpush1.bf16.msk.msra.mxu0 %vm12236_vm14, %v13167_v48  ;;  %vm12300_vm3 = vmpackc.low %vm15612_vm11, %vm15608_vm10  ;;  %v432_v3 = vpack.i.b16 %v327_v43, %v327_v43  ;;  %v439_v8 = vpack.i.b16 %v328_v46, %v328_v46  ;;  %v446_v13 = vpack.i.b16 %v329_v36, %v329_v36  ;;  %v453_v14 = vpack.i.b16 %v330_v2, %v330_v2 }
 0x218   :  { %12301 = vmatpush1.bf16.msk.msra.mxu1 %vm12300_vm3, %v13167_v48 }
 0x219   :  { %v15627_v27 = vrot.slane %v432_v3, %v13231_v4  ;;  %v15630_v9 = vrot.slane %v439_v8, %v13231_v4  ;;  %v15633_v40 = vrot.slane %v446_v13, %v13231_v4  ;;  %v15636_v38 = vrot.slane %v453_v14, %v13231_v4 }
 0x21a   :  { %8972 = vmatmul.mubr.bf16.vlgmr.msra.gmra.mrb[8].mxu0 %v13052_v10 }
 0x21b   :  { %9013 = vmatmul.mubr.bf16.vlgmr.msra.gmra.mrb[8].mxu1 %v13052_v10  ;;  %vm583_vm1 = vcmp.eq.bf16.partialorder %v13249_v20, %v15627_v27  ;;  %vm584_vm15 = vcmp.eq.bf16.partialorder %v13249_v20, %v15630_v9  ;;  %vm585_vm4 = vcmp.eq.bf16.partialorder %v13249_v20, %v15633_v40  ;;  %vm586_vm9 = vcmp.eq.bf16.partialorder %v13249_v20, %v15636_v38 }
 0x21c   :  { %v1095_v24 = vsel %vm583_vm1, 65537, %v13166_v16  ;;  %v1096_v49 = vsel %vm584_vm15, 65537, %v13166_v16  ;;  %v1097_v50 = vsel %vm585_vm4, 65537, %v13166_v16  ;;  %v1098_v33 = vsel %vm586_vm9, 65537, %v13166_v16  ;;  %9053 = vmatprep.mubr.bf16.mxu0 %v13054_v26  ;;  %9094 = vmatprep.mubr.bf16.mxu1 %v13054_v26 }
 0x21d   :  { %v10386_v51 = vcombine.low %v1095_v24, %v1096_v49  ;;  %v10402_v17 = vcombine.high %v1095_v24, %v1096_v49  ;;  %v10387_v41 = vcombine.low %v1097_v50, %v1098_v33  ;;  %v10403_v52 = vcombine.high %v1097_v50, %v1098_v33 }
 0x21e   :  { %vm615_vm8 = vcmp.eq.bf16.partialorder %v13251_v23, %v15627_v27  ;;  %vm616_vm6 = vcmp.eq.bf16.partialorder %v13251_v23, %v15630_v9  ;;  %vm617_vm7 = vcmp.eq.bf16.partialorder %v13251_v23, %v15633_v40  ;;  %vm618_vm2 = vcmp.eq.bf16.partialorder %v13251_v23, %v15636_v38 }
 0x21f   :  { %vm3137_vm12 = vcmp.ne.s16.totalorder %v10386_v51, 0  ;;  %vm3153_vm13 = vcmp.ne.s16.totalorder %v10402_v17, 0  ;;  %vm3138_vm5 = vcmp.ne.s16.totalorder %v10387_v41, 0  ;;  %vm3154_vm10 = vcmp.ne.s16.totalorder %v10403_v52, 0 }
 0x220   :  { %v3649_v53 = vsel %vm3137_vm12, 65537, %v13166_v16  ;;  %v3665_v58 = vsel %vm3153_vm13, 65537, %v13166_v16  ;;  %v3650_v59 = vsel %vm3138_vm5, 65537, %v13166_v16  ;;  %v3666_v60 = vsel %vm3154_vm10, 65537, %v13166_v16 }
 0x221   :  { %v4167_v35 = vunpack.c.l.b16 %v3649_v53  ;;  %v4168_v61 = vunpack.c.h.b16 %v3649_v53  ;;  %v4199_v63 = vunpack.c.l.b16 %v3665_v58  ;;  %v4200_v42 = vunpack.c.h.b16 %v3665_v58 }
 0x222   :  { %v4169_v62 = vunpack.c.l.b16 %v3650_v59  ;;  %v4170_v18 = vunpack.c.h.b16 %v3650_v59  ;;  %v4201_v45 = vunpack.c.l.b16 %v3666_v60  ;;  %v4202_v19 = vunpack.c.h.b16 %v3666_v60 }
 0x223   :  { %vm5192_vm11 = vcmp.ne.s32.totalorder %v4168_v61, 0  ;;  %vm5224_vm0 = vcmp.ne.s32.totalorder %v4200_v42, 0  ;;  %vm15665_vm14 = vcmp.ne.s32.totalorder %v4167_v35, 0  ;;  %vm15669_vm3 = vcmp.ne.s32.totalorder %v4199_v63, 0 }
 0x224   :  { %vm12302_vm1 = vmpackc.low %vm5224_vm0, %vm5192_vm11  ;;  %vm5194_vm15 = vcmp.ne.s32.totalorder %v4170_v18, 0  ;;  %vm5226_vm4 = vcmp.ne.s32.totalorder %v4202_v19, 0  ;;  %vm15673_vm9 = vcmp.ne.s32.totalorder %v4169_v62, 0  ;;  %vm15677_vm12 = vcmp.ne.s32.totalorder %v4201_v45, 0 }
 0x225   :  { %12303 = vmatprep.subr.msk.bf16.mxu0 %vm12302_vm1, %v13167_v48  ;;  %vm12366_vm13 = vmpackc.low %vm5226_vm4, %vm5194_vm15  ;;  %v1127_v2 = vsel %vm615_vm8, 65537, %v13166_v16  ;;  %v1128_v3 = vsel %vm616_vm6, 65537, %v13166_v16  ;;  %v1129_v8 = vsel %vm617_vm7, 65537, %v13166_v16  ;;  %v1130_v13 = vsel %vm618_vm2, 65537, %v13166_v16 }
 0x226   :  { %12367 = vmatprep.subr.msk.bf16.mxu1 %vm12366_vm13, %v13167_v48  ;;  %vm12304_vm8 = vmpackc.low %vm15669_vm3, %vm15665_vm14  ;;  %v10418_v14 = vcombine.low %v1127_v2, %v1128_v3  ;;  %v10434_v10 = vcombine.high %v1127_v2, %v1128_v3  ;;  %v10419_v24 = vcombine.low %v1129_v8, %v1130_v13  ;;  %v10435_v49 = vcombine.high %v1129_v8, %v1130_v13 }
 0x227   :  { %12305 = vmatpush1.bf16.msk.msra.mxu0 %vm12304_vm8, %v13167_v48  ;;  %vm12368_vm6 = vmpackc.low %vm15677_vm12, %vm15673_vm9  ;;  %vm647_vm7 = vcmp.eq.bf16.partialorder %v13254_v28, %v15627_v27  ;;  %vm648_vm2 = vcmp.eq.bf16.partialorder %v13254_v28, %v15630_v9  ;;  %vm649_vm5 = vcmp.eq.bf16.partialorder %v13254_v28, %v15633_v40  ;;  %vm650_vm10 = vcmp.eq.bf16.partialorder %v13254_v28, %v15636_v38 }
 0x228   :  { %12369 = vmatpush1.bf16.msk.msra.mxu1 %vm12368_vm6, %v13167_v48  ;;  %vm3169_vm11 = vcmp.ne.s16.totalorder %v10418_v14, 0  ;;  %vm3185_vm0 = vcmp.ne.s16.totalorder %v10434_v10, 0  ;;  %vm3170_vm14 = vcmp.ne.s16.totalorder %v10419_v24, 0  ;;  %vm3186_vm3 = vcmp.ne.s16.totalorder %v10435_v49, 0 }
 0x229   :  { %v3681_v50 = vsel %vm3169_vm11, 65537, %v13166_v16  ;;  %v3697_v33 = vsel %vm3185_vm0, 65537, %v13166_v16  ;;  %v3682_v26 = vsel %vm3170_vm14, 65537, %v13166_v16  ;;  %v3698_v51 = vsel %vm3186_vm3, 65537, %v13166_v16 }
 0x22a   :  { %v4231_v17 = vunpack.c.l.b16 %v3681_v50  ;;  %v4232_v41 = vunpack.c.h.b16 %v3681_v50  ;;  %v4263_v52 = vunpack.c.l.b16 %v3697_v33  ;;  %v4264_v53 = vunpack.c.h.b16 %v3697_v33 }
 0x22b   :  { %v4233_v58 = vunpack.c.l.b16 %v3682_v26  ;;  %v4234_v59 = vunpack.c.h.b16 %v3682_v26  ;;  %v4265_v60 = vunpack.c.l.b16 %v3698_v51  ;;  %v4266_v35 = vunpack.c.h.b16 %v3698_v51 }
 0x22c   :  { %vm5256_vm1 = vcmp.ne.s32.totalorder %v4232_v41, 0  ;;  %vm5288_vm15 = vcmp.ne.s32.totalorder %v4264_v53, 0  ;;  %vm15721_vm4 = vcmp.ne.s32.totalorder %v4231_v17, 0  ;;  %vm15725_vm9 = vcmp.ne.s32.totalorder %v4263_v52, 0 }
 0x22d   :  { %vm12306_vm12 = vmpackc.low %vm5288_vm15, %vm5256_vm1  ;;  %vm5258_vm13 = vcmp.ne.s32.totalorder %v4234_v59, 0  ;;  %vm5290_vm8 = vcmp.ne.s32.totalorder %v4266_v35, 0  ;;  %vm15729_vm6 = vcmp.ne.s32.totalorder %v4233_v58, 0  ;;  %vm15733_vm11 = vcmp.ne.s32.totalorder %v4265_v60, 0 }
 0x22e   :  { %12307 = vmatprep.subr.msk.bf16.mxu0 %vm12306_vm12, %v13167_v48  ;;  %vm12370_vm0 = vmpackc.low %vm5290_vm8, %vm5258_vm13  ;;  %v1159_v18 = vsel %vm647_vm7, 65537, %v13166_v16  ;;  %v1160_v45 = vsel %vm648_vm2, 65537, %v13166_v16  ;;  %v1161_v19 = vsel %vm649_vm5, 65537, %v13166_v16  ;;  %v1162_v34 = vsel %vm650_vm10, 65537, %v13166_v16 }
 0x22f   :  { %12371 = vmatprep.subr.msk.bf16.mxu1 %vm12370_vm0, %v13167_v48  ;;  %vm12308_vm7 = vmpackc.low %vm15725_vm9, %vm15721_vm4  ;;  %v10450_v43 = vcombine.low %v1159_v18, %v1160_v45  ;;  %v10466_v46 = vcombine.high %v1159_v18, %v1160_v45  ;;  %v10451_v36 = vcombine.low %v1161_v19, %v1162_v34  ;;  %v10467_v2 = vcombine.high %v1161_v19, %v1162_v34 }
 0x230   :  { %12309 = vmatpush1.bf16.msk.msra.mxu0 %vm12308_vm7, %v13167_v48  ;;  %vm12372_vm2 = vmpackc.low %vm15733_vm11, %vm15729_vm6  ;;  %vm679_vm5 = vcmp.eq.bf16.partialorder %v13257_v31, %v15627_v27  ;;  %vm680_vm10 = vcmp.eq.bf16.partialorder %v13257_v31, %v15630_v9  ;;  %vm681_vm14 = vcmp.eq.bf16.partialorder %v13257_v31, %v15633_v40  ;;  %vm682_vm3 = vcmp.eq.bf16.partialorder %v13257_v31, %v15636_v38 }
 0x231   :  { %12373 = vmatpush1.bf16.msk.msra.mxu1 %vm12372_vm2, %v13167_v48  ;;  %vm3201_vm1 = vcmp.ne.s16.totalorder %v10450_v43, 0  ;;  %vm3217_vm15 = vcmp.ne.s16.totalorder %v10466_v46, 0  ;;  %vm3202_vm4 = vcmp.ne.s16.totalorder %v10451_v36, 0  ;;  %vm3218_vm9 = vcmp.ne.s16.totalorder %v10467_v2, 0 }
 0x232   :  { %v3713_v3 = vsel %vm3201_vm1, 65537, %v13166_v16  ;;  %v3729_v8 = vsel %vm3217_vm15, 65537, %v13166_v16  ;;  %v3714_v13 = vsel %vm3202_vm4, 65537, %v13166_v16  ;;  %v3730_v14 = vsel %vm3218_vm9, 65537, %v13166_v16 }
 0x233   :  { %v4295_v10 = vunpack.c.l.b16 %v3713_v3  ;;  %v4296_v24 = vunpack.c.h.b16 %v3713_v3  ;;  %v4327_v49 = vunpack.c.l.b16 %v3729_v8  ;;  %v4328_v50 = vunpack.c.h.b16 %v3729_v8 }
 0x234   :  { %v4297_v33 = vunpack.c.l.b16 %v3714_v13  ;;  %v4298_v26 = vunpack.c.h.b16 %v3714_v13  ;;  %v4329_v51 = vunpack.c.l.b16 %v3730_v14  ;;  %v4330_v17 = vunpack.c.h.b16 %v3730_v14 }
 0x235   :  { %vm5320_vm12 = vcmp.ne.s32.totalorder %v4296_v24, 0  ;;  %vm5352_vm13 = vcmp.ne.s32.totalorder %v4328_v50, 0  ;;  %vm15777_vm8 = vcmp.ne.s32.totalorder %v4295_v10, 0  ;;  %vm15781_vm6 = vcmp.ne.s32.totalorder %v4327_v49, 0 }
 0x236   :  { %vm12310_vm11 = vmpackc.low %vm5352_vm13, %vm5320_vm12  ;;  %vm5322_vm0 = vcmp.ne.s32.totalorder %v4298_v26, 0  ;;  %vm5354_vm7 = vcmp.ne.s32.totalorder %v4330_v17, 0  ;;  %vm15785_vm2 = vcmp.ne.s32.totalorder %v4297_v33, 0  ;;  %vm15789_vm1 = vcmp.ne.s32.totalorder %v4329_v51, 0 }
 0x237   :  { %12311 = vmatprep.subr.msk.bf16.mxu0 %vm12310_vm11, %v13167_v48  ;;  %vm12374_vm15 = vmpackc.low %vm5354_vm7, %vm5322_vm0  ;;  %v1191_v59 = vsel %vm679_vm5, 65537, %v13166_v16  ;;  %v1192_v60 = vsel %vm680_vm10, 65537, %v13166_v16  ;;  %v1193_v35 = vsel %vm681_vm14, 65537, %v13166_v16  ;;  %v1194_v61 = vsel %vm682_vm3, 65537, %v13166_v16 }
 0x238   :  { %12375 = vmatprep.subr.msk.bf16.mxu1 %vm12374_vm15, %v13167_v48  ;;  %vm12312_vm5 = vmpackc.low %vm15781_vm6, %vm15777_vm8  ;;  %v10482_v63 = vcombine.low %v1191_v59, %v1192_v60  ;;  %v10498_v42 = vcombine.high %v1191_v59, %v1192_v60  ;;  %v10483_v62 = vcombine.low %v1193_v35, %v1194_v61  ;;  %v10499_v18 = vcombine.high %v1193_v35, %v1194_v61 }
 0x239   :  { %12313 = vmatpush1.bf16.msk.msra.mxu0 %vm12312_vm5, %v13167_v48  ;;  %vm12376_vm10 = vmpackc.low %vm15789_vm1, %vm15785_vm2  ;;  %vm711_vm14 = vcmp.eq.bf16.partialorder %v13265_v39, %v15627_v27  ;;  %vm712_vm3 = vcmp.eq.bf16.partialorder %v13265_v39, %v15630_v9  ;;  %vm713_vm4 = vcmp.eq.bf16.partialorder %v13265_v39, %v15633_v40  ;;  %vm714_vm9 = vcmp.eq.bf16.partialorder %v13265_v39, %v15636_v38 }
 0x23a   :  { %12377 = vmatpush1.bf16.msk.msra.mxu1 %vm12376_vm10, %v13167_v48  ;;  %vm3233_vm12 = vcmp.ne.s16.totalorder %v10482_v63, 0  ;;  %vm3249_vm13 = vcmp.ne.s16.totalorder %v10498_v42, 0  ;;  %vm3234_vm8 = vcmp.ne.s16.totalorder %v10483_v62, 0  ;;  %vm3250_vm6 = vcmp.ne.s16.totalorder %v10499_v18, 0 }
 0x23b   :  { %v3745_v45 = vsel %vm3233_vm12, 65537, %v13166_v16  ;;  %v3761_v19 = vsel %vm3249_vm13, 65537, %v13166_v16  ;;  %v3746_v34 = vsel %vm3234_vm8, 65537, %v13166_v16  ;;  %v3762_v43 = vsel %vm3250_vm6, 65537, %v13166_v16 }
 0x23c   :  { %v4359_v46 = vunpack.c.l.b16 %v3745_v45  ;;  %v4360_v36 = vunpack.c.h.b16 %v3745_v45  ;;  %v4391_v2 = vunpack.c.l.b16 %v3761_v19  ;;  %v4392_v3 = vunpack.c.h.b16 %v3761_v19 }
 0x23d   :  { %v4361_v8 = vunpack.c.l.b16 %v3746_v34  ;;  %v4362_v13 = vunpack.c.h.b16 %v3746_v34  ;;  %v4393_v14 = vunpack.c.l.b16 %v3762_v43  ;;  %v4394_v10 = vunpack.c.h.b16 %v3762_v43 }
 0x23e   :  { %vm5384_vm11 = vcmp.ne.s32.totalorder %v4360_v36, 0  ;;  %vm5416_vm0 = vcmp.ne.s32.totalorder %v4392_v3, 0  ;;  %vm15833_vm7 = vcmp.ne.s32.totalorder %v4359_v46, 0  ;;  %vm15837_vm2 = vcmp.ne.s32.totalorder %v4391_v2, 0 }
 0x23f   :  { %vm12314_vm1 = vmpackc.low %vm5416_vm0, %vm5384_vm11  ;;  %vm5386_vm15 = vcmp.ne.s32.totalorder %v4362_v13, 0  ;;  %vm5418_vm5 = vcmp.ne.s32.totalorder %v4394_v10, 0  ;;  %vm15841_vm10 = vcmp.ne.s32.totalorder %v4361_v8, 0  ;;  %vm15845_vm12 = vcmp.ne.s32.totalorder %v4393_v14, 0 }
 0x240   :  { %12315 = vmatprep.subr.msk.bf16.mxu0 %vm12314_vm1, %v13167_v48  ;;  %vm12378_vm13 = vmpackc.low %vm5418_vm5, %vm5386_vm15  ;;  %v1223_v26 = vsel %vm711_vm14, 65537, %v13166_v16  ;;  %v1224_v51 = vsel %vm712_vm3, 65537, %v13166_v16  ;;  %v1225_v17 = vsel %vm713_vm4, 65537, %v13166_v16  ;;  %v1226_v41 = vsel %vm714_vm9, 65537, %v13166_v16 }
 0x241   :  { %12379 = vmatprep.subr.msk.bf16.mxu1 %vm12378_vm13, %v13167_v48  ;;  %vm12316_vm14 = vmpackc.low %vm15837_vm2, %vm15833_vm7  ;;  %v10514_v52 = vcombine.low %v1223_v26, %v1224_v51  ;;  %v10530_v53 = vcombine.high %v1223_v26, %v1224_v51  ;;  %v10515_v58 = vcombine.low %v1225_v17, %v1226_v41  ;;  %v10531_v59 = vcombine.high %v1225_v17, %v1226_v41 }
 0x242   :  { %12317 = vmatpush1.bf16.msk.msra.mxu0 %vm12316_vm14, %v13167_v48  ;;  %vm12380_vm3 = vmpackc.low %vm15845_vm12, %vm15841_vm10  ;;  %vm743_vm4 = vcmp.eq.bf16.partialorder %v13276_v47, %v15627_v27  ;;  %vm744_vm9 = vcmp.eq.bf16.partialorder %v13276_v47, %v15630_v9  ;;  %vm745_vm8 = vcmp.eq.bf16.partialorder %v13276_v47, %v15633_v40  ;;  %vm746_vm6 = vcmp.eq.bf16.partialorder %v13276_v47, %v15636_v38 }
 0x243   :  { %12381 = vmatpush1.bf16.msk.msra.mxu1 %vm12380_vm3, %v13167_v48  ;;  %vm3265_vm11 = vcmp.ne.s16.totalorder %v10514_v52, 0  ;;  %vm3281_vm0 = vcmp.ne.s16.totalorder %v10530_v53, 0  ;;  %vm3266_vm7 = vcmp.ne.s16.totalorder %v10515_v58, 0  ;;  %vm3282_vm2 = vcmp.ne.s16.totalorder %v10531_v59, 0 }
 0x244   :  { %v3777_v60 = vsel %vm3265_vm11, 65537, %v13166_v16  ;;  %v3793_v35 = vsel %vm3281_vm0, 65537, %v13166_v16  ;;  %v3778_v61 = vsel %vm3266_vm7, 65537, %v13166_v16  ;;  %v3794_v63 = vsel %vm3282_vm2, 65537, %v13166_v16 }
 0x245   :  { %v4423_v42 = vunpack.c.l.b16 %v3777_v60  ;;  %v4424_v62 = vunpack.c.h.b16 %v3777_v60  ;;  %v4455_v18 = vunpack.c.l.b16 %v3793_v35  ;;  %v4456_v45 = vunpack.c.h.b16 %v3793_v35 }
 0x246   :  { %v4425_v19 = vunpack.c.l.b16 %v3778_v61  ;;  %v4426_v34 = vunpack.c.h.b16 %v3778_v61  ;;  %v4457_v43 = vunpack.c.l.b16 %v3794_v63  ;;  %v4458_v46 = vunpack.c.h.b16 %v3794_v63 }
 0x247   :  { %vm5448_vm1 = vcmp.ne.s32.totalorder %v4424_v62, 0  ;;  %vm5480_vm15 = vcmp.ne.s32.totalorder %v4456_v45, 0  ;;  %vm15889_vm5 = vcmp.ne.s32.totalorder %v4423_v42, 0  ;;  %vm15893_vm10 = vcmp.ne.s32.totalorder %v4455_v18, 0 }
 0x248   :  { %vm12318_vm12 = vmpackc.low %vm5480_vm15, %vm5448_vm1  ;;  %vm5450_vm13 = vcmp.ne.s32.totalorder %v4426_v34, 0  ;;  %vm5482_vm14 = vcmp.ne.s32.totalorder %v4458_v46, 0  ;;  %vm15897_vm3 = vcmp.ne.s32.totalorder %v4425_v19, 0  ;;  %vm15901_vm11 = vcmp.ne.s32.totalorder %v4457_v43, 0 }
 0x249   :  { %12319 = vmatprep.subr.msk.bf16.mxu0 %vm12318_vm12, %v13167_v48  ;;  %vm12382_vm0 = vmpackc.low %vm5482_vm14, %vm5450_vm13  ;;  %v1255_v13 = vsel %vm743_vm4, 65537, %v13166_v16  ;;  %v1256_v14 = vsel %vm744_vm9, 65537, %v13166_v16  ;;  %v1257_v10 = vsel %vm745_vm8, 65537, %v13166_v16  ;;  %v1258_v24 = vsel %vm746_vm6, 65537, %v13166_v16 }
 0x24a   :  { %12383 = vmatprep.subr.msk.bf16.mxu1 %vm12382_vm0, %v13167_v48  ;;  %vm12320_vm4 = vmpackc.low %vm15893_vm10, %vm15889_vm5  ;;  %v10546_v49 = vcombine.low %v1255_v13, %v1256_v14  ;;  %v10562_v50 = vcombine.high %v1255_v13, %v1256_v14  ;;  %v10547_v33 = vcombine.low %v1257_v10, %v1258_v24  ;;  %v10563_v26 = vcombine.high %v1257_v10, %v1258_v24 }
 0x24b   :  { %12321 = vmatpush1.bf16.msk.msra.mxu0 %vm12320_vm4, %v13167_v48  ;;  %vm12384_vm9 = vmpackc.low %vm15901_vm11, %vm15897_vm3  ;;  %vm775_vm8 = vcmp.eq.bf16.partialorder %v13278_v55, %v15627_v27  ;;  %vm776_vm6 = vcmp.eq.bf16.partialorder %v13278_v55, %v15630_v9  ;;  %vm777_vm7 = vcmp.eq.bf16.partialorder %v13278_v55, %v15633_v40  ;;  %vm778_vm2 = vcmp.eq.bf16.partialorder %v13278_v55, %v15636_v38 }
 0x24c   :  { %12385 = vmatpush1.bf16.msk.msra.mxu1 %vm12384_vm9, %v13167_v48  ;;  %vm3297_vm1 = vcmp.ne.s16.totalorder %v10546_v49, 0  ;;  %vm3313_vm15 = vcmp.ne.s16.totalorder %v10562_v50, 0  ;;  %vm3298_vm5 = vcmp.ne.s16.totalorder %v10547_v33, 0  ;;  %vm3314_vm10 = vcmp.ne.s16.totalorder %v10563_v26, 0 }
 0x24d   :  { %v3809_v51 = vsel %vm3297_vm1, 65537, %v13166_v16  ;;  %v3825_v17 = vsel %vm3313_vm15, 65537, %v13166_v16  ;;  %v3810_v41 = vsel %vm3298_vm5, 65537, %v13166_v16  ;;  %v3826_v52 = vsel %vm3314_vm10, 65537, %v13166_v16 }
 0x24e   :  { %v4487_v53 = vunpack.c.l.b16 %v3809_v51  ;;  %v4488_v58 = vunpack.c.h.b16 %v3809_v51  ;;  %v4519_v59 = vunpack.c.l.b16 %v3825_v17  ;;  %v4520_v60 = vunpack.c.h.b16 %v3825_v17 }
 0x24f   :  { %v4489_v35 = vunpack.c.l.b16 %v3810_v41  ;;  %v4490_v61 = vunpack.c.h.b16 %v3810_v41  ;;  %v4521_v63 = vunpack.c.l.b16 %v3826_v52  ;;  %v4522_v42 = vunpack.c.h.b16 %v3826_v52 }
 0x250   :  { %vm5512_vm12 = vcmp.ne.s32.totalorder %v4488_v58, 0  ;;  %vm5544_vm13 = vcmp.ne.s32.totalorder %v4520_v60, 0  ;;  %vm15945_vm14 = vcmp.ne.s32.totalorder %v4487_v53, 0  ;;  %vm15949_vm3 = vcmp.ne.s32.totalorder %v4519_v59, 0 }
 0x251   :  { %vm12322_vm11 = vmpackc.low %vm5544_vm13, %vm5512_vm12  ;;  %vm5514_vm0 = vcmp.ne.s32.totalorder %v4490_v61, 0  ;;  %vm5546_vm4 = vcmp.ne.s32.totalorder %v4522_v42, 0  ;;  %vm15953_vm9 = vcmp.ne.s32.totalorder %v4489_v35, 0  ;;  %vm15957_vm1 = vcmp.ne.s32.totalorder %v4521_v63, 0 }
 0x252   :  { %12323 = vmatprep.subr.msk.bf16.mxu0 %vm12322_vm11, %v13167_v48  ;;  %vm12386_vm15 = vmpackc.low %vm5546_vm4, %vm5514_vm0  ;;  %v1287_v34 = vsel %vm775_vm8, 65537, %v13166_v16  ;;  %v1288_v43 = vsel %vm776_vm6, 65537, %v13166_v16  ;;  %v1289_v46 = vsel %vm777_vm7, 65537, %v13166_v16  ;;  %v1290_v36 = vsel %vm778_vm2, 65537, %v13166_v16 }
 0x253   :  { %12387 = vmatprep.subr.msk.bf16.mxu1 %vm12386_vm15, %v13167_v48  ;;  %vm12324_vm8 = vmpackc.low %vm15949_vm3, %vm15945_vm14  ;;  %v10578_v2 = vcombine.low %v1287_v34, %v1288_v43  ;;  %v10594_v3 = vcombine.high %v1287_v34, %v1288_v43  ;;  %v10579_v8 = vcombine.low %v1289_v46, %v1290_v36  ;;  %v10595_v13 = vcombine.high %v1289_v46, %v1290_v36 }
 0x254   :  { %12325 = vmatpush1.bf16.msk.msra.mxu0 %vm12324_vm8, %v13167_v48  ;;  %vm12388_vm6 = vmpackc.low %vm15957_vm1, %vm15953_vm9  ;;  %vm807_vm7 = vcmp.eq.bf16.partialorder %v13280_v56, %v15627_v27  ;;  %vm808_vm2 = vcmp.eq.bf16.partialorder %v13280_v56, %v15630_v9  ;;  %vm809_vm5 = vcmp.eq.bf16.partialorder %v13280_v56, %v15633_v40  ;;  %vm810_vm10 = vcmp.eq.bf16.partialorder %v13280_v56, %v15636_v38 }
 0x255   :  { %12389 = vmatpush1.bf16.msk.msra.mxu1 %vm12388_vm6, %v13167_v48  ;;  %vm3329_vm12 = vcmp.ne.s16.totalorder %v10578_v2, 0  ;;  %vm3345_vm13 = vcmp.ne.s16.totalorder %v10594_v3, 0  ;;  %vm3330_vm14 = vcmp.ne.s16.totalorder %v10579_v8, 0  ;;  %vm3346_vm3 = vcmp.ne.s16.totalorder %v10595_v13, 0 }
 0x256   :  { %v3841_v14 = vsel %vm3329_vm12, 65537, %v13166_v16  ;;  %v3857_v10 = vsel %vm3345_vm13, 65537, %v13166_v16  ;;  %v3842_v24 = vsel %vm3330_vm14, 65537, %v13166_v16  ;;  %v3858_v49 = vsel %vm3346_vm3, 65537, %v13166_v16 }
 0x257   :  { %v4551_v50 = vunpack.c.l.b16 %v3841_v14  ;;  %v4552_v33 = vunpack.c.h.b16 %v3841_v14  ;;  %v4583_v26 = vunpack.c.l.b16 %v3857_v10  ;;  %v4584_v51 = vunpack.c.h.b16 %v3857_v10 }
 0x258   :  { %v4553_v17 = vunpack.c.l.b16 %v3842_v24  ;;  %v4554_v41 = vunpack.c.h.b16 %v3842_v24  ;;  %v4585_v52 = vunpack.c.l.b16 %v3858_v49  ;;  %v4586_v53 = vunpack.c.h.b16 %v3858_v49 }
 0x259   :  { %vm5576_vm11 = vcmp.ne.s32.totalorder %v4552_v33, 0  ;;  %vm5608_vm0 = vcmp.ne.s32.totalorder %v4584_v51, 0  ;;  %vm16001_vm4 = vcmp.ne.s32.totalorder %v4551_v50, 0  ;;  %vm16005_vm9 = vcmp.ne.s32.totalorder %v4583_v26, 0 }
 0x25a   :  { %vm12326_vm1 = vmpackc.low %vm5608_vm0, %vm5576_vm11  ;;  %vm5578_vm15 = vcmp.ne.s32.totalorder %v4554_v41, 0  ;;  %vm5610_vm8 = vcmp.ne.s32.totalorder %v4586_v53, 0  ;;  %vm16009_vm6 = vcmp.ne.s32.totalorder %v4553_v17, 0  ;;  %vm16013_vm12 = vcmp.ne.s32.totalorder %v4585_v52, 0 }
 0x25b   :  { %12327 = vmatprep.subr.msk.bf16.mxu0 %vm12326_vm1, %v13167_v48  ;;  %vm12390_vm13 = vmpackc.low %vm5610_vm8, %vm5578_vm15  ;;  %v1319_v61 = vsel %vm807_vm7, 65537, %v13166_v16  ;;  %v1320_v63 = vsel %vm808_vm2, 65537, %v13166_v16  ;;  %v1321_v42 = vsel %vm809_vm5, 65537, %v13166_v16  ;;  %v1322_v62 = vsel %vm810_vm10, 65537, %v13166_v16 }
 0x25c   :  { %12391 = vmatprep.subr.msk.bf16.mxu1 %vm12390_vm13, %v13167_v48  ;;  %vm12328_vm7 = vmpackc.low %vm16005_vm9, %vm16001_vm4  ;;  %v10610_v18 = vcombine.low %v1319_v61, %v1320_v63  ;;  %v10626_v45 = vcombine.high %v1319_v61, %v1320_v63  ;;  %v10611_v19 = vcombine.low %v1321_v42, %v1322_v62  ;;  %v10627_v34 = vcombine.high %v1321_v42, %v1322_v62  ;;  %v16109_v63 = vpop.f32.mrb[0].mxu0  ;;  %v16111_v42 = vpop.f32.mrb[0].mxu1 }
 0x25d   :  { %12329 = vmatpush1.bf16.msk.msra.mxu0 %vm12328_vm7, %v13167_v48  ;;  %vm12392_vm2 = vmpackc.low %vm16013_vm12, %vm16009_vm6  ;;  %vm839_vm5 = vcmp.eq.bf16.partialorder %v13302_v12, %v15627_v27  ;;  %vm840_vm10 = vcmp.eq.bf16.partialorder %v13302_v12, %v15630_v9  ;;  %vm841_vm14 = vcmp.eq.bf16.partialorder %v13302_v12, %v15633_v40  ;;  %vm842_vm3 = vcmp.eq.bf16.partialorder %v13302_v12, %v15636_v38 }
 0x25e   :  { %12393 = vmatpush1.bf16.msk.msra.mxu1 %vm12392_vm2, %v13167_v48  ;;  %vm3361_vm11 = vcmp.ne.s16.totalorder %v10610_v18, 0  ;;  %vm3377_vm0 = vcmp.ne.s16.totalorder %v10626_v45, 0  ;;  %vm3362_vm4 = vcmp.ne.s16.totalorder %v10611_v19, 0  ;;  %vm3378_vm9 = vcmp.ne.s16.totalorder %v10627_v34, 0  ;;  %v16117_v34 = vpop.f32.mrb[1].mxu0 }
 0x25f   :  { %v3873_v43 = vsel %vm3361_vm11, 65537, %v13166_v16  ;;  %v3889_v46 = vsel %vm3377_vm0, 65537, %v13166_v16  ;;  %v3874_v36 = vsel %vm3362_vm4, 65537, %v13166_v16  ;;  %v3890_v2 = vsel %vm3378_vm9, 65537, %v13166_v16 }
 0x260   :  { %v4615_v3 = vunpack.c.l.b16 %v3873_v43  ;;  %v4616_v8 = vunpack.c.h.b16 %v3873_v43  ;;  %v4647_v13 = vunpack.c.l.b16 %v3889_v46  ;;  %v4648_v14 = vunpack.c.h.b16 %v3889_v46  ;;  %v16119_v43 = vpop.f32.mrb[1].mxu1 }
 0x261   :  { %v4617_v10 = vunpack.c.l.b16 %v3874_v36  ;;  %v4618_v24 = vunpack.c.h.b16 %v3874_v36  ;;  %v4649_v49 = vunpack.c.l.b16 %v3890_v2  ;;  %v4650_v50 = vunpack.c.h.b16 %v3890_v2 }
 0x262   :  { %vm5640_vm1 = vcmp.ne.s32.totalorder %v4616_v8, 0  ;;  %vm5672_vm15 = vcmp.ne.s32.totalorder %v4648_v14, 0  ;;  %vm16057_vm8 = vcmp.ne.s32.totalorder %v4615_v3, 0  ;;  %vm16061_vm6 = vcmp.ne.s32.totalorder %v4647_v13, 0  ;;  %v8813_v8 = vpop.f32.mrb[2].mxu0  ;;  %v8854_v13 = vpop.f32.mrb[2].mxu1 }
 0x263   :  { %vm12330_vm12 = vmpackc.low %vm5672_vm15, %vm5640_vm1  ;;  %vm5642_vm13 = vcmp.ne.s32.totalorder %v4618_v24, 0  ;;  %vm5674_vm7 = vcmp.ne.s32.totalorder %v4650_v50, 0  ;;  %vm16065_vm2 = vcmp.ne.s32.totalorder %v4617_v10, 0  ;;  %vm16069_vm11 = vcmp.ne.s32.totalorder %v4649_v49, 0  ;;  %v8814_v50 = vpop.f32.mrb[3].mxu0  ;;  %v8855_v33 = vpop.f32.mrb[3].mxu1 }
 0x264   :  { %12331 = vmatprep.subr.msk.bf16.mxu0 %vm12330_vm12, %v13167_v48  ;;  %vm12394_vm0 = vmpackc.low %vm5674_vm7, %vm5642_vm13  ;;  %v1351_v41 = vsel %vm839_vm5, 65537, %v13166_v16  ;;  %v1352_v52 = vsel %vm840_vm10, 65537, %v13166_v16  ;;  %v1353_v53 = vsel %vm841_vm14, 65537, %v13166_v16  ;;  %v1354_v58 = vsel %vm842_vm3, 65537, %v13166_v16 }
 0x265   :  { %12395 = vmatprep.subr.msk.bf16.mxu1 %vm12394_vm0, %v13167_v48  ;;  %vm12332_vm5 = vmpackc.low %vm16061_vm6, %vm16057_vm8  ;;  %v10642_v59 = vcombine.low %v1351_v41, %v1352_v52  ;;  %v10658_v60 = vcombine.high %v1351_v41, %v1352_v52  ;;  %v10643_v35 = vcombine.low %v1353_v53, %v1354_v58  ;;  %v10659_v61 = vcombine.high %v1353_v53, %v1354_v58 }
 0x266   :  { %12333 = vmatpush1.bf16.msk.msra.mxu0 %vm12332_vm5, %v13167_v48  ;;  %vm12396_vm10 = vmpackc.low %vm16069_vm11, %vm16065_vm2  ;;  %vm871_vm14 = vcmp.eq.bf16.partialorder %v13772_v32, %v15627_v27  ;;  %vm872_vm3 = vcmp.eq.bf16.partialorder %v13772_v32, %v15630_v9  ;;  %vm873_vm4 = vcmp.eq.bf16.partialorder %v13772_v32, %v15633_v40  ;;  %vm874_vm9 = vcmp.eq.bf16.partialorder %v13772_v32, %v15636_v38 }
 0x267   :  { %12397 = vmatpush1.bf16.msk.msra.mxu1 %vm12396_vm10, %v13167_v48  ;;  %vm3393_vm1 = vcmp.ne.s16.totalorder %v10642_v59, 0  ;;  %vm3409_vm15 = vcmp.ne.s16.totalorder %v10658_v60, 0  ;;  %vm3394_vm8 = vcmp.ne.s16.totalorder %v10643_v35, 0  ;;  %vm3410_vm6 = vcmp.ne.s16.totalorder %v10659_v61, 0 }
 0x268   :  { %v3905_v62 = vsel %vm3393_vm1, 65537, %v13166_v16  ;;  %v3921_v18 = vsel %vm3409_vm15, 65537, %v13166_v16  ;;  %v3906_v45 = vsel %vm3394_vm8, 65537, %v13166_v16  ;;  %v3922_v19 = vsel %vm3410_vm6, 65537, %v13166_v16 }
 0x269   :  { %v4679_v46 = vunpack.c.l.b16 %v3905_v62  ;;  %v4680_v36 = vunpack.c.h.b16 %v3905_v62  ;;  %v4711_v2 = vunpack.c.l.b16 %v3921_v18  ;;  %v4712_v3 = vunpack.c.h.b16 %v3921_v18 }
 0x26a   :  { %v4681_v14 = vunpack.c.l.b16 %v3906_v45  ;;  %v4682_v10 = vunpack.c.h.b16 %v3906_v45  ;;  %v4713_v24 = vunpack.c.l.b16 %v3922_v19  ;;  %v4714_v49 = vunpack.c.h.b16 %v3922_v19 }
 0x26b   :  { %vm5704_vm12 = vcmp.ne.s32.totalorder %v4680_v36, 0  ;;  %vm5736_vm13 = vcmp.ne.s32.totalorder %v4712_v3, 0  ;;  %vm16121_vm7 = vcmp.ne.s32.totalorder %v4679_v46, 0  ;;  %vm16125_vm2 = vcmp.ne.s32.totalorder %v4711_v2, 0 }
 0x26c   :  { %vm12334_vm11 = vmpackc.low %vm5736_vm13, %vm5704_vm12  ;;  %vm5706_vm0 = vcmp.ne.s32.totalorder %v4682_v10, 0  ;;  %vm5738_vm5 = vcmp.ne.s32.totalorder %v4714_v49, 0  ;;  %vm16129_vm10 = vcmp.ne.s32.totalorder %v4681_v14, 0  ;;  %vm16133_vm1 = vcmp.ne.s32.totalorder %v4713_v24, 0 }
 0x26d   :  { %12335 = vmatprep.subr.msk.bf16.mxu0 %vm12334_vm11, %v13167_v48  ;;  %vm12398_vm15 = vmpackc.low %vm5738_vm5, %vm5706_vm0  ;;  %v1383_v52 = vsel %vm871_vm14, 65537, %v13166_v16  ;;  %v1384_v53 = vsel %vm872_vm3, 65537, %v13166_v16  ;;  %v1385_v58 = vsel %vm873_vm4, 65537, %v13166_v16  ;;  %v1386_v59 = vsel %vm874_vm9, 65537, %v13166_v16 }
 0x26e   :  { %12399 = vmatprep.subr.msk.bf16.mxu1 %vm12398_vm15, %v13167_v48  ;;  %vm12336_vm14 = vmpackc.low %vm16125_vm2, %vm16121_vm7  ;;  %v10674_v60 = vcombine.low %v1383_v52, %v1384_v53  ;;  %v10690_v35 = vcombine.high %v1383_v52, %v1384_v53  ;;  %v10675_v61 = vcombine.low %v1385_v58, %v1386_v59  ;;  %v10691_v62 = vcombine.high %v1385_v58, %v1386_v59 }
 0x26f   :  { %12337 = vmatpush1.bf16.msk.msra.mxu0 %vm12336_vm14, %v13167_v48  ;;  %vm12400_vm3 = vmpackc.low %vm16133_vm1, %vm16129_vm10  ;;  %vm903_vm4 = vcmp.eq.bf16.partialorder %v13855_v37, %v15627_v27  ;;  %vm904_vm9 = vcmp.eq.bf16.partialorder %v13855_v37, %v15630_v9  ;;  %vm905_vm8 = vcmp.eq.bf16.partialorder %v13855_v37, %v15633_v40  ;;  %vm906_vm6 = vcmp.eq.bf16.partialorder %v13855_v37, %v15636_v38 }
 0x270   :  { %12401 = vmatpush1.bf16.msk.msra.mxu1 %vm12400_vm3, %v13167_v48  ;;  %vm3425_vm12 = vcmp.ne.s16.totalorder %v10674_v60, 0  ;;  %vm3441_vm13 = vcmp.ne.s16.totalorder %v10690_v35, 0  ;;  %vm3426_vm7 = vcmp.ne.s16.totalorder %v10675_v61, 0  ;;  %vm3442_vm2 = vcmp.ne.s16.totalorder %v10691_v62, 0 }
 0x271   :  { %v3937_v18 = vsel %vm3425_vm12, 65537, %v13166_v16  ;;  %v3953_v45 = vsel %vm3441_vm13, 65537, %v13166_v16  ;;  %v3938_v19 = vsel %vm3426_vm7, 65537, %v13166_v16  ;;  %v3954_v46 = vsel %vm3442_vm2, 65537, %v13166_v16 }
 0x272   :  { %v4743_v36 = vunpack.c.l.b16 %v3937_v18  ;;  %v4744_v2 = vunpack.c.h.b16 %v3937_v18  ;;  %v4775_v3 = vunpack.c.l.b16 %v3953_v45  ;;  %v4776_v8 = vunpack.c.h.b16 %v3953_v45 }
 0x273   :  { %v4745_v13 = vunpack.c.l.b16 %v3938_v19  ;;  %v4746_v14 = vunpack.c.h.b16 %v3938_v19  ;;  %v4777_v10 = vunpack.c.l.b16 %v3954_v46  ;;  %v4778_v24 = vunpack.c.h.b16 %v3954_v46 }
 0x274   :  { %vm5768_vm11 = vcmp.ne.s32.totalorder %v4744_v2, 0  ;;  %vm5800_vm0 = vcmp.ne.s32.totalorder %v4776_v8, 0  ;;  %vm16177_vm5 = vcmp.ne.s32.totalorder %v4743_v36, 0  ;;  %vm16181_vm10 = vcmp.ne.s32.totalorder %v4775_v3, 0 }
 0x275   :  { %vm12338_vm1 = vmpackc.low %vm5800_vm0, %vm5768_vm11  ;;  %vm5770_vm15 = vcmp.ne.s32.totalorder %v4746_v14, 0  ;;  %vm5802_vm14 = vcmp.ne.s32.totalorder %v4778_v24, 0  ;;  %vm16185_vm3 = vcmp.ne.s32.totalorder %v4745_v13, 0  ;;  %vm16189_vm12 = vcmp.ne.s32.totalorder %v4777_v10, 0 }
 0x276   :  { %12339 = vmatprep.subr.msk.bf16.mxu0 %vm12338_vm1, %v13167_v48  ;;  %vm12402_vm13 = vmpackc.low %vm5802_vm14, %vm5770_vm15  ;;  %v1415_v51 = vsel %vm903_vm4, 65537, %v13166_v16  ;;  %v1416_v17 = vsel %vm904_vm9, 65537, %v13166_v16  ;;  %v1417_v41 = vsel %vm905_vm8, 65537, %v13166_v16  ;;  %v1418_v52 = vsel %vm906_vm6, 65537, %v13166_v16 }
 0x277   :  { %12403 = vmatprep.subr.msk.bf16.mxu1 %vm12402_vm13, %v13167_v48  ;;  %vm12340_vm4 = vmpackc.low %vm16181_vm10, %vm16177_vm5  ;;  %v10706_v53 = vcombine.low %v1415_v51, %v1416_v17  ;;  %v10722_v58 = vcombine.high %v1415_v51, %v1416_v17  ;;  %v10707_v59 = vcombine.low %v1417_v41, %v1418_v52  ;;  %v10723_v60 = vcombine.high %v1417_v41, %v1418_v52 }
 0x278   :  { %12341 = vmatpush1.bf16.msk.msra.mxu0 %vm12340_vm4, %v13167_v48  ;;  %vm12404_vm9 = vmpackc.low %vm16189_vm12, %vm16185_vm3  ;;  %vm935_vm8 = vcmp.eq.bf16.partialorder %v13896_v54, %v15627_v27  ;;  %vm936_vm6 = vcmp.eq.bf16.partialorder %v13896_v54, %v15630_v9  ;;  %vm937_vm7 = vcmp.eq.bf16.partialorder %v13896_v54, %v15633_v40  ;;  %vm938_vm2 = vcmp.eq.bf16.partialorder %v13896_v54, %v15636_v38 }
 0x279   :  { %12405 = vmatpush1.bf16.msk.msra.mxu1 %vm12404_vm9, %v13167_v48  ;;  %vm3457_vm11 = vcmp.ne.s16.totalorder %v10706_v53, 0  ;;  %vm3473_vm0 = vcmp.ne.s16.totalorder %v10722_v58, 0  ;;  %vm3458_vm5 = vcmp.ne.s16.totalorder %v10707_v59, 0  ;;  %vm3474_vm10 = vcmp.ne.s16.totalorder %v10723_v60, 0 }
 0x27a   :  { %v3969_v35 = vsel %vm3457_vm11, 65537, %v13166_v16  ;;  %v3985_v61 = vsel %vm3473_vm0, 65537, %v13166_v16  ;;  %v3970_v62 = vsel %vm3458_vm5, 65537, %v13166_v16  ;;  %v3986_v18 = vsel %vm3474_vm10, 65537, %v13166_v16 }
 0x27b   :  { %v4807_v45 = vunpack.c.l.b16 %v3969_v35  ;;  %v4808_v19 = vunpack.c.h.b16 %v3969_v35  ;;  %v4839_v46 = vunpack.c.l.b16 %v3985_v61  ;;  %v4840_v36 = vunpack.c.h.b16 %v3985_v61 }
 0x27c   :  { %v4809_v2 = vunpack.c.l.b16 %v3970_v62  ;;  %v4810_v3 = vunpack.c.h.b16 %v3970_v62  ;;  %v4841_v8 = vunpack.c.l.b16 %v3986_v18  ;;  %v4842_v13 = vunpack.c.h.b16 %v3986_v18 }
 0x27d   :  { %vm5832_vm1 = vcmp.ne.s32.totalorder %v4808_v19, 0  ;;  %vm5864_vm15 = vcmp.ne.s32.totalorder %v4840_v36, 0  ;;  %vm16233_vm14 = vcmp.ne.s32.totalorder %v4807_v45, 0  ;;  %vm16237_vm3 = vcmp.ne.s32.totalorder %v4839_v46, 0 }
 0x27e   :  { %vm12342_vm12 = vmpackc.low %vm5864_vm15, %vm5832_vm1  ;;  %vm5834_vm13 = vcmp.ne.s32.totalorder %v4810_v3, 0  ;;  %vm5866_vm4 = vcmp.ne.s32.totalorder %v4842_v13, 0  ;;  %vm16241_vm9 = vcmp.ne.s32.totalorder %v4809_v2, 0  ;;  %vm16245_vm11 = vcmp.ne.s32.totalorder %v4841_v8, 0 }
 0x27f   :  { %12343 = vmatprep.subr.msk.bf16.mxu0 %vm12342_vm12, %v13167_v48  ;;  %vm12406_vm0 = vmpackc.low %vm5866_vm4, %vm5834_vm13  ;;  %v1447_v50 = vsel %vm935_vm8, 65537, %v13166_v16  ;;  %v1448_v33 = vsel %vm936_vm6, 65537, %v13166_v16  ;;  %v1449_v26 = vsel %vm937_vm7, 65537, %v13166_v16  ;;  %v1450_v51 = vsel %vm938_vm2, 65537, %v13166_v16 }
 0x280   :  { %12407 = vmatprep.subr.msk.bf16.mxu1 %vm12406_vm0, %v13167_v48  ;;  %vm12344_vm8 = vmpackc.low %vm16237_vm3, %vm16233_vm14  ;;  %v10738_v17 = vcombine.low %v1447_v50, %v1448_v33  ;;  %v10754_v41 = vcombine.high %v1447_v50, %v1448_v33  ;;  %v10739_v52 = vcombine.low %v1449_v26, %v1450_v51  ;;  %v10755_v53 = vcombine.high %v1449_v26, %v1450_v51 }
 0x281   :  { %12345 = vmatpush1.bf16.msk.msra.mxu0 %vm12344_vm8, %v13167_v48  ;;  %vm12408_vm6 = vmpackc.low %vm16245_vm11, %vm16241_vm9  ;;  %vm967_vm7 = vcmp.eq.bf16.partialorder %v13947_v15, %v15627_v27  ;;  %vm968_vm2 = vcmp.eq.bf16.partialorder %v13947_v15, %v15630_v9  ;;  %vm969_vm5 = vcmp.eq.bf16.partialorder %v13947_v15, %v15633_v40  ;;  %vm970_vm10 = vcmp.eq.bf16.partialorder %v13947_v15, %v15636_v38 }
 0x282   :  { %12409 = vmatpush1.bf16.msk.msra.mxu1 %vm12408_vm6, %v13167_v48  ;;  %vm3489_vm1 = vcmp.ne.s16.totalorder %v10738_v17, 0  ;;  %vm3505_vm15 = vcmp.ne.s16.totalorder %v10754_v41, 0  ;;  %vm3490_vm14 = vcmp.ne.s16.totalorder %v10739_v52, 0  ;;  %vm3506_vm3 = vcmp.ne.s16.totalorder %v10755_v53, 0 }
 0x283   :  { %v4001_v58 = vsel %vm3489_vm1, 65537, %v13166_v16  ;;  %v4017_v59 = vsel %vm3505_vm15, 65537, %v13166_v16  ;;  %v4002_v60 = vsel %vm3490_vm14, 65537, %v13166_v16  ;;  %v4018_v35 = vsel %vm3506_vm3, 65537, %v13166_v16 }
 0x284   :  { %v4871_v61 = vunpack.c.l.b16 %v4001_v58  ;;  %v4872_v62 = vunpack.c.h.b16 %v4001_v58  ;;  %v4903_v18 = vunpack.c.l.b16 %v4017_v59  ;;  %v4904_v45 = vunpack.c.h.b16 %v4017_v59 }
 0x285   :  { %v4873_v19 = vunpack.c.l.b16 %v4002_v60  ;;  %v4874_v46 = vunpack.c.h.b16 %v4002_v60  ;;  %v4905_v36 = vunpack.c.l.b16 %v4018_v35  ;;  %v4906_v2 = vunpack.c.h.b16 %v4018_v35 }
 0x286   :  { %vm5896_vm12 = vcmp.ne.s32.totalorder %v4872_v62, 0  ;;  %vm5928_vm13 = vcmp.ne.s32.totalorder %v4904_v45, 0  ;;  %vm16289_vm4 = vcmp.ne.s32.totalorder %v4871_v61, 0  ;;  %vm16293_vm9 = vcmp.ne.s32.totalorder %v4903_v18, 0 }
 0x287   :  { %vm12346_vm11 = vmpackc.low %vm5928_vm13, %vm5896_vm12  ;;  %vm5898_vm0 = vcmp.ne.s32.totalorder %v4874_v46, 0  ;;  %vm5930_vm8 = vcmp.ne.s32.totalorder %v4906_v2, 0  ;;  %vm16297_vm6 = vcmp.ne.s32.totalorder %v4873_v19, 0  ;;  %vm16301_vm1 = vcmp.ne.s32.totalorder %v4905_v36, 0 }
 0x288   :  { %12347 = vmatprep.subr.msk.bf16.mxu0 %vm12346_vm11, %v13167_v48  ;;  %vm12410_vm15 = vmpackc.low %vm5930_vm8, %vm5898_vm0  ;;  %v1479_v10 = vsel %vm967_vm7, 65537, %v13166_v16  ;;  %v1480_v24 = vsel %vm968_vm2, 65537, %v13166_v16  ;;  %v1481_v49 = vsel %vm969_vm5, 65537, %v13166_v16  ;;  %v1482_v50 = vsel %vm970_vm10, 65537, %v13166_v16 }
 0x289   :  { %12411 = vmatprep.subr.msk.bf16.mxu1 %vm12410_vm15, %v13167_v48  ;;  %vm12348_vm7 = vmpackc.low %vm16293_vm9, %vm16289_vm4  ;;  %v10770_v33 = vcombine.low %v1479_v10, %v1480_v24  ;;  %v10786_v26 = vcombine.high %v1479_v10, %v1480_v24  ;;  %v10771_v51 = vcombine.low %v1481_v49, %v1482_v50  ;;  %v10787_v17 = vcombine.high %v1481_v49, %v1482_v50 }
 0x28a   :  { %12349 = vmatpush1.bf16.msk.msra.mxu0 %vm12348_vm7, %v13167_v48  ;;  %vm12412_vm2 = vmpackc.low %vm16301_vm1, %vm16297_vm6  ;;  %vm999_vm5 = vcmp.eq.bf16.partialorder %v13949_v44, %v15627_v27  ;;  %vm1000_vm10 = vcmp.eq.bf16.partialorder %v13949_v44, %v15630_v9  ;;  %vm1001_vm14 = vcmp.eq.bf16.partialorder %v13949_v44, %v15633_v40  ;;  %vm1002_vm3 = vcmp.eq.bf16.partialorder %v13949_v44, %v15636_v38 }
 0x28b   :  { %12413 = vmatpush1.bf16.msk.msra.mxu1 %vm12412_vm2, %v13167_v48  ;;  %vm3521_vm12 = vcmp.ne.s16.totalorder %v10770_v33, 0  ;;  %vm3537_vm13 = vcmp.ne.s16.totalorder %v10786_v26, 0  ;;  %vm3522_vm4 = vcmp.ne.s16.totalorder %v10771_v51, 0  ;;  %vm3538_vm9 = vcmp.ne.s16.totalorder %v10787_v17, 0 }
 0x28c   :  { %v4033_v41 = vsel %vm3521_vm12, 65537, %v13166_v16  ;;  %v4049_v52 = vsel %vm3537_vm13, 65537, %v13166_v16  ;;  %v4034_v53 = vsel %vm3522_vm4, 65537, %v13166_v16  ;;  %v4050_v58 = vsel %vm3538_vm9, 65537, %v13166_v16 }
 0x28d   :  { %v4935_v59 = vunpack.c.l.b16 %v4033_v41  ;;  %v4936_v60 = vunpack.c.h.b16 %v4033_v41  ;;  %v4967_v35 = vunpack.c.l.b16 %v4049_v52  ;;  %v4968_v61 = vunpack.c.h.b16 %v4049_v52 }
 0x28e   :  { %v4937_v62 = vunpack.c.l.b16 %v4034_v53  ;;  %v4938_v18 = vunpack.c.h.b16 %v4034_v53  ;;  %v4969_v45 = vunpack.c.l.b16 %v4050_v58  ;;  %v4970_v19 = vunpack.c.h.b16 %v4050_v58 }
 0x28f   :  { %vm5960_vm11 = vcmp.ne.s32.totalorder %v4936_v60, 0  ;;  %vm5992_vm0 = vcmp.ne.s32.totalorder %v4968_v61, 0  ;;  %vm16345_vm8 = vcmp.ne.s32.totalorder %v4935_v59, 0  ;;  %vm16349_vm6 = vcmp.ne.s32.totalorder %v4967_v35, 0 }
 0x290   :  { %vm12350_vm1 = vmpackc.low %vm5992_vm0, %vm5960_vm11  ;;  %vm5962_vm15 = vcmp.ne.s32.totalorder %v4938_v18, 0  ;;  %vm5994_vm7 = vcmp.ne.s32.totalorder %v4970_v19, 0  ;;  %vm16353_vm2 = vcmp.ne.s32.totalorder %v4937_v62, 0  ;;  %vm16357_vm12 = vcmp.ne.s32.totalorder %v4969_v45, 0 }
 0x291   :  { %12351 = vmatprep.subr.msk.bf16.mxu0 %vm12350_vm1, %v13167_v48  ;;  %vm12414_vm13 = vmpackc.low %vm5994_vm7, %vm5962_vm15  ;;  %v1511_v8 = vsel %vm999_vm5, 65537, %v13166_v16  ;;  %v1512_v13 = vsel %vm1000_vm10, 65537, %v13166_v16  ;;  %v1513_v14 = vsel %vm1001_vm14, 65537, %v13166_v16  ;;  %v1514_v10 = vsel %vm1002_vm3, 65537, %v13166_v16 }
 0x292   :  { %12415 = vmatprep.subr.msk.bf16.mxu1 %vm12414_vm13, %v13167_v48  ;;  %vm12352_vm5 = vmpackc.low %vm16349_vm6, %vm16345_vm8  ;;  %v10802_v24 = vcombine.low %v1511_v8, %v1512_v13  ;;  %v10818_v49 = vcombine.high %v1511_v8, %v1512_v13  ;;  %v10803_v50 = vcombine.low %v1513_v14, %v1514_v10  ;;  %v10819_v33 = vcombine.high %v1513_v14, %v1514_v10 }
 0x293   :  { %12353 = vmatpush1.bf16.msk.msra.mxu0 %vm12352_vm5, %v13167_v48  ;;  %vm12416_vm10 = vmpackc.low %vm16357_vm12, %vm16353_vm2  ;;  %vm1031_vm14 = vcmp.eq.bf16.partialorder %v14056_v0, %v15627_v27  ;;  %vm1032_vm3 = vcmp.eq.bf16.partialorder %v14056_v0, %v15630_v9  ;;  %vm1033_vm4 = vcmp.eq.bf16.partialorder %v14056_v0, %v15633_v40  ;;  %vm1034_vm9 = vcmp.eq.bf16.partialorder %v14056_v0, %v15636_v38 }
 0x294   :  { %12417 = vmatpush1.bf16.msk.msra.mxu1 %vm12416_vm10, %v13167_v48  ;;  %vm3553_vm11 = vcmp.ne.s16.totalorder %v10802_v24, 0  ;;  %vm3569_vm0 = vcmp.ne.s16.totalorder %v10818_v49, 0  ;;  %vm3554_vm8 = vcmp.ne.s16.totalorder %v10803_v50, 0  ;;  %vm3570_vm6 = vcmp.ne.s16.totalorder %v10819_v33, 0 }
 0x295   :  { %v4065_v26 = vsel %vm3553_vm11, 65537, %v13166_v16  ;;  %v4081_v51 = vsel %vm3569_vm0, 65537, %v13166_v16  ;;  %v4066_v17 = vsel %vm3554_vm8, 65537, %v13166_v16  ;;  %v4082_v41 = vsel %vm3570_vm6, 65537, %v13166_v16 }
 0x296   :  { %v4999_v52 = vunpack.c.l.b16 %v4065_v26  ;;  %v5000_v53 = vunpack.c.h.b16 %v4065_v26  ;;  %v5031_v58 = vunpack.c.l.b16 %v4081_v51  ;;  %v5032_v59 = vunpack.c.h.b16 %v4081_v51 }
 0x297   :  { %v5001_v60 = vunpack.c.l.b16 %v4066_v17  ;;  %v5002_v35 = vunpack.c.h.b16 %v4066_v17  ;;  %v5033_v61 = vunpack.c.l.b16 %v4082_v41  ;;  %v5034_v62 = vunpack.c.h.b16 %v4082_v41 }
 0x298   :  { %vm6024_vm1 = vcmp.ne.s32.totalorder %v5000_v53, 0  ;;  %vm6056_vm15 = vcmp.ne.s32.totalorder %v5032_v59, 0  ;;  %vm16401_vm7 = vcmp.ne.s32.totalorder %v4999_v52, 0  ;;  %vm16405_vm2 = vcmp.ne.s32.totalorder %v5031_v58, 0 }
 0x299   :  { %vm12354_vm12 = vmpackc.low %vm6056_vm15, %vm6024_vm1  ;;  %vm6026_vm13 = vcmp.ne.s32.totalorder %v5002_v35, 0  ;;  %vm6058_vm5 = vcmp.ne.s32.totalorder %v5034_v62, 0  ;;  %vm16409_vm10 = vcmp.ne.s32.totalorder %v5001_v60, 0  ;;  %vm16413_vm11 = vcmp.ne.s32.totalorder %v5033_v61, 0 }
 0x29a   :  { %12355 = vmatprep.subr.msk.bf16.mxu0 %vm12354_vm12, %v13167_v48  ;;  %vm12418_vm0 = vmpackc.low %vm6058_vm5, %vm6026_vm13  ;;  %v1543_v36 = vsel %vm1031_vm14, 65537, %v13166_v16  ;;  %v1544_v2 = vsel %vm1032_vm3, 65537, %v13166_v16  ;;  %v1545_v3 = vsel %vm1033_vm4, 65537, %v13166_v16  ;;  %v1546_v8 = vsel %vm1034_vm9, 65537, %v13166_v16 }
 0x29b   :  { %12419 = vmatprep.subr.msk.bf16.mxu1 %vm12418_vm0, %v13167_v48  ;;  %vm12356_vm14 = vmpackc.low %vm16405_vm2, %vm16401_vm7  ;;  %v10834_v13 = vcombine.low %v1543_v36, %v1544_v2  ;;  %v10850_v14 = vcombine.high %v1543_v36, %v1544_v2  ;;  %v10835_v10 = vcombine.low %v1545_v3, %v1546_v8  ;;  %v10851_v24 = vcombine.high %v1545_v3, %v1546_v8 }
 0x29c   :  { %12357 = vmatpush1.bf16.msk.msra.mxu0 %vm12356_vm14, %v13167_v48  ;;  %vm12420_vm3 = vmpackc.low %vm16413_vm11, %vm16409_vm10  ;;  %vm1063_vm4 = vcmp.eq.bf16.partialorder %v14132_v25, %v15627_v27  ;;  %vm1064_vm9 = vcmp.eq.bf16.partialorder %v14132_v25, %v15630_v9  ;;  %vm1065_vm8 = vcmp.eq.bf16.partialorder %v14132_v25, %v15633_v40  ;;  %vm1066_vm6 = vcmp.eq.bf16.partialorder %v14132_v25, %v15636_v38 }
 0x29d   :  { %12421 = vmatpush1.bf16.msk.msra.mxu1 %vm12420_vm3, %v13167_v48  ;;  %vm3585_vm1 = vcmp.ne.s16.totalorder %v10834_v13, 0  ;;  %vm3601_vm15 = vcmp.ne.s16.totalorder %v10850_v14, 0  ;;  %vm3586_vm7 = vcmp.ne.s16.totalorder %v10835_v10, 0  ;;  %vm3602_vm2 = vcmp.ne.s16.totalorder %v10851_v24, 0 }
 0x29e   :  { %v4097_v49 = vsel %vm3585_vm1, 65537, %v13166_v16  ;;  %v4113_v50 = vsel %vm3601_vm15, 65537, %v13166_v16  ;;  %v4098_v33 = vsel %vm3586_vm7, 65537, %v13166_v16  ;;  %v4114_v26 = vsel %vm3602_vm2, 65537, %v13166_v16 }
 0x29f   :  { %v5063_v51 = vunpack.c.l.b16 %v4097_v49  ;;  %v5064_v17 = vunpack.c.h.b16 %v4097_v49  ;;  %v5095_v41 = vunpack.c.l.b16 %v4113_v50  ;;  %v5096_v52 = vunpack.c.h.b16 %v4113_v50 }
 0x2a0   :  { %v5065_v53 = vunpack.c.l.b16 %v4098_v33  ;;  %v5066_v58 = vunpack.c.h.b16 %v4098_v33  ;;  %v5097_v59 = vunpack.c.l.b16 %v4114_v26  ;;  %v5098_v60 = vunpack.c.h.b16 %v4114_v26 }
 0x2a1   :  { %vm6088_vm12 = vcmp.ne.s32.totalorder %v5064_v17, 0  ;;  %vm6120_vm13 = vcmp.ne.s32.totalorder %v5096_v52, 0  ;;  %vm16457_vm5 = vcmp.ne.s32.totalorder %v5063_v51, 0  ;;  %vm16461_vm10 = vcmp.ne.s32.totalorder %v5095_v41, 0 }
 0x2a2   :  { %vm12358_vm11 = vmpackc.low %vm6120_vm13, %vm6088_vm12  ;;  %vm6090_vm0 = vcmp.ne.s32.totalorder %v5066_v58, 0  ;;  %vm6122_vm14 = vcmp.ne.s32.totalorder %v5098_v60, 0  ;;  %vm16465_vm3 = vcmp.ne.s32.totalorder %v5065_v53, 0  ;;  %vm16469_vm1 = vcmp.ne.s32.totalorder %v5097_v59, 0  ;;  %v13056_v58 = vld [vmem:[#allocation5 + $0x4] ss:$8 sps:$4 sm:$0xff]  }
 0x2a3   :  { %12359 = vmatprep.subr.msk.bf16.mxu0 %vm12358_vm11, %v13167_v48  ;;  %vm12422_vm15 = vmpackc.low %vm6122_vm14, %vm6090_vm0  ;;  %v1575_v45 = vsel %vm1063_vm4, 65537, %v13166_v16  ;;  %v1576_v19 = vsel %vm1064_vm9, 65537, %v13166_v16  ;;  %v1577_v46 = vsel %vm1065_vm8, 65537, %v13166_v16  ;;  %v1578_v36 = vsel %vm1066_vm6, 65537, %v13166_v16 }
 0x2a4   :  { %12423 = vmatprep.subr.msk.bf16.mxu1 %vm12422_vm15, %v13167_v48  ;;  %vm12360_vm4 = vmpackc.low %vm16461_vm10, %vm16457_vm5  ;;  %v10866_v27 = vcombine.low %v1575_v45, %v1576_v19  ;;  %v10882_v9 = vcombine.high %v1575_v45, %v1576_v19  ;;  %v10867_v2 = vcombine.low %v1577_v46, %v1578_v36  ;;  %v10883_v3 = vcombine.high %v1577_v46, %v1578_v36 }
 0x2a5   :  { %12361 = vmatpush1.bf16.msk.msra.mxu0 %vm12360_vm4, %v13167_v48  ;;  %vm12424_vm9 = vmpackc.low %vm16469_vm1, %vm16465_vm3  ;;  %v64_v40 = vand.u32 255, %v60_v22  ;;  %v9463_v38 = vrot.slane %v16109_v63, 1  ;;  %v9559_v8 = vrot.slane %v16109_v63, 2  ;;  %v9465_v13 = vrot.slane %v16111_v42, 1 }
 0x2a6   :  { %12425 = vmatpush1.bf16.msk.msra.mxu1 %vm12424_vm9, %v13167_v48  ;;  %vm3617_vm8 = vcmp.ne.s16.totalorder %v10866_v27, 0  ;;  %vm3633_vm6 = vcmp.ne.s16.totalorder %v10882_v9, 0  ;;  %vm3618_vm7 = vcmp.ne.s16.totalorder %v10867_v2, 0  ;;  %vm3634_vm2 = vcmp.ne.s16.totalorder %v10883_v3, 0 }
 0x2a7   :  { %v4129_v14 = vsel %vm3617_vm8, 65537, %v13166_v16  ;;  %v4145_v10 = vsel %vm3633_vm6, 65537, %v13166_v16  ;;  %v4130_v24 = vsel %vm3618_vm7, 65537, %v13166_v16  ;;  %v4146_v11 = vsel %vm3634_vm2, 65537, %v13166_v16 }
 0x2a8   :  { %v5127_v22 = vunpack.c.l.b16 %v4129_v14  ;;  %v5128_v49 = vunpack.c.h.b16 %v4129_v14  ;;  %v5159_v50 = vunpack.c.l.b16 %v4145_v10  ;;  %v5160_v33 = vunpack.c.h.b16 %v4145_v10 }
 0x2a9   :  { %v5129_v26 = vunpack.c.l.b16 %v4130_v24  ;;  %v5130_v51 = vunpack.c.h.b16 %v4130_v24  ;;  %v5161_v17 = vunpack.c.l.b16 %v4146_v11  ;;  %v5162_v41 = vunpack.c.h.b16 %v4146_v11  ;;  %v13055_v11 = vld [vmem:[#allocation5] ss:$8 sps:$4 sm:$0xff]  }
 0x2aa   :  { %vm6152_vm12 = vcmp.ne.s32.totalorder %v5128_v49, 0  ;;  %vm6184_vm13 = vcmp.ne.s32.totalorder %v5160_v33, 0  ;;  %vm16510_vm5 = vcmp.ne.s32.totalorder %v5127_v22, 0  ;;  %vm16514_vm10 = vcmp.ne.s32.totalorder %v5159_v50, 0 }
 0x2ab   :  { %vm12362_vm11 = vmpackc.low %vm6184_vm13, %vm6152_vm12  ;;  %vm6154_vm0 = vcmp.ne.s32.totalorder %v5130_v51, 0  ;;  %vm6186_vm14 = vcmp.ne.s32.totalorder %v5162_v41, 0  ;;  %vm16518_vm3 = vcmp.ne.s32.totalorder %v5129_v26, 0  ;;  %vm16522_vm1 = vcmp.ne.s32.totalorder %v5161_v17, 0 }
 0x2ac   :  { %12363 = vmatprep.subr.msk.bf16.mxu0 %vm12362_vm11, %v13167_v48  ;;  %vm12426_vm15 = vmpackc.low %vm6186_vm14, %vm6154_vm0  ;;  %v16527_v60 = vcvt.s32.f32 %v64_v40  ;;  %v9527_v35 = vadd.f32 %v9463_v38, %v16109_v63  ;;  %v9529_v61 = vadd.f32 %v9465_v13, %v16111_v42  ;;  %v9561_v62 = vrot.slane %v16111_v42, 2 }
 0x2ad   :  { %12427 = vmatprep.subr.msk.bf16.mxu1 %vm12426_vm15, %v13167_v48  ;;  %vm12364_vm4 = vmpackc.low %vm16514_vm10, %vm16510_vm5  ;;  %v9464_v18 = vrot.slane %v16117_v34, 1  ;;  %v9560_v45 = vrot.slane %v16117_v34, 2  ;;  %v9887_v19 = vcombine.low %v16109_v63, %v16117_v34  ;;  %v13168_v40 = vmov 1966171168  }
 0x2ae   :  { %12365 = vmatpush1.bf16.msk.msra.mxu0 %vm12364_vm4, %v13167_v48  ;;  %vm12428_vm9 = vmpackc.low %vm16522_vm1, %vm16518_vm3  ;;  %v222_v46 = vrot.slane %v16527_v60, %v13231_v4  ;;  %v226_v36 = vrot.slane %v16527_v60, %v13234_v5  ;;  %v230_v27 = vrot.slane %v16527_v60, %v13237_v6  ;;  %v234_v9 = vrot.slane %v16527_v60, %v13240_v7 }
 0x2af   :  { %12429 = vmatpush1.bf16.msk.msra.mxu1 %vm12428_vm9, %v13167_v48  ;;  %v9623_v63 = vadd.f32 %v9559_v8, %v9527_v35  ;;  %v16555_v2 = vadd.f32 %v9561_v62, %v9529_v61  ;;  %v9528_v3 = vadd.f32 %v9464_v18, %v16117_v34  ;;  %v9692_v38 = vunpack.c.l.s4 %v13168_v40 }
 0x2b0   :  { %v331_v13 = vpack.c.bf16 %v222_v46, %v222_v46  ;;  %v332_v14 = vpack.c.bf16 %v226_v36, %v226_v36  ;;  %v333_v10 = vpack.c.bf16 %v230_v27, %v230_v27  ;;  %v334_v24 = vpack.c.bf16 %v234_v9, %v234_v9 }
 0x2b1   :  { %9054 = vmatmul.mubr.bf16.vlgmr.msra.gmra.mrb[12].mxu0 %v13055_v11  ;;  %v9624_v22 = vadd.f32 %v9560_v45, %v9528_v3  ;;  %v9693_v49 = vunpack.c.0.s8 %v9692_v38  ;;  %v9466_v50 = vrot.slane %v16119_v43, 1  ;;  %v9562_v33 = vrot.slane %v16119_v43, 2 }
 0x2b2   :  { %9095 = vmatmul.mubr.bf16.vlgmr.msra.gmra.mrb[12].mxu1 %v13055_v11  ;;  %v460_v8 = vpack.i.b16 %v331_v13, %v331_v13  ;;  %v467_v26 = vpack.i.b16 %v332_v14, %v332_v14  ;;  %v474_v51 = vpack.i.b16 %v333_v10, %v333_v10  ;;  %v481_v17 = vpack.i.b16 %v334_v24, %v334_v24 }
 0x2b3   :  { %v9687_v34 = vcombine.low %v9623_v63, %v9624_v22  ;;  %v16561_v41 = vsub.s32 %v9693_v49, %v13226_v1  ;;  %v9530_v52 = vadd.f32 %v9466_v50, %v16119_v43  ;;  %v9888_v53 = vcombine.low %v16111_v42, %v16119_v43  ;;  %9135 = vmatprep.mubr.bf16.mxu0 %v13056_v58 }
 0x2b4   :  { %v16567_v59 = vrot.slane %v460_v8, %v13231_v4  ;;  %v16570_v35 = vrot.slane %v467_v26, %v13231_v4  ;;  %v16573_v61 = vrot.slane %v474_v51, %v13231_v4  ;;  %v16576_v62 = vrot.slane %v481_v17, %v13231_v4  ;;  %9176 = vmatprep.mubr.bf16.mxu1 %v13056_v58 }
 0x2b5   :  { %v16579_v1 = vrot.slane %v9687_v34, %v16561_v41  ;;  %v16582_v42 = vrot.slane %v9887_v19, %v16561_v41  ;;  %v16584_v43 = vadd.f32 %v9562_v33, %v9530_v52  ;;  %v16587_v18 = vrot.slane %v9888_v53, %v16561_v41 }
 0x2b6   :  { %vm587_vm8 = vcmp.eq.bf16.partialorder %v13249_v20, %v16567_v59  ;;  %vm588_vm6 = vcmp.eq.bf16.partialorder %v13249_v20, %v16570_v35  ;;  %vm589_vm7 = vcmp.eq.bf16.partialorder %v13249_v20, %v16573_v61  ;;  %vm590_vm2 = vcmp.eq.bf16.partialorder %v13249_v20, %v16576_v62 }
 0x2b7   :  { %v1099_v45 = vsel %vm587_vm8, 65537, %v13166_v16  ;;  %v1100_v19 = vsel %vm588_vm6, 65537, %v13166_v16  ;;  %v1101_v46 = vsel %vm589_vm7, 65537, %v13166_v16  ;;  %v1102_v36 = vsel %vm590_vm2, 65537, %v13166_v16 }
 0x2b8   :  { %v10388_v27 = vcombine.low %v1099_v45, %v1100_v19  ;;  %v10404_v9 = vcombine.high %v1099_v45, %v1100_v19  ;;  %v10389_v63 = vcombine.low %v1101_v46, %v1102_v36  ;;  %v10405_v3 = vcombine.high %v1101_v46, %v1102_v36 }
 0x2b9   :  { %vm619_vm12 = vcmp.eq.bf16.partialorder %v13251_v23, %v16567_v59  ;;  %vm620_vm13 = vcmp.eq.bf16.partialorder %v13251_v23, %v16570_v35  ;;  %vm621_vm5 = vcmp.eq.bf16.partialorder %v13251_v23, %v16573_v61  ;;  %vm622_vm10 = vcmp.eq.bf16.partialorder %v13251_v23, %v16576_v62 }
 0x2ba   :  { %vm3139_vm11 = vcmp.ne.s16.totalorder %v10388_v27, 0  ;;  %vm3155_vm0 = vcmp.ne.s16.totalorder %v10404_v9, 0  ;;  %vm3140_vm14 = vcmp.ne.s16.totalorder %v10389_v63, 0  ;;  %vm3156_vm3 = vcmp.ne.s16.totalorder %v10405_v3, 0 }
 0x2bb   :  { %v3651_v40 = vsel %vm3139_vm11, 65537, %v13166_v16  ;;  %v3667_v38 = vsel %vm3155_vm0, 65537, %v13166_v16  ;;  %v3652_v13 = vsel %vm3140_vm14, 65537, %v13166_v16  ;;  %v3668_v14 = vsel %vm3156_vm3, 65537, %v13166_v16 }
 0x2bc   :  { %v4171_v10 = vunpack.c.l.b16 %v3651_v40  ;;  %v4172_v24 = vunpack.c.h.b16 %v3651_v40  ;;  %v4203_v11 = vunpack.c.l.b16 %v3667_v38  ;;  %v4204_v22 = vunpack.c.h.b16 %v3667_v38 }
 0x2bd   :  { %v4173_v49 = vunpack.c.l.b16 %v3652_v13  ;;  %v4174_v50 = vunpack.c.h.b16 %v3652_v13  ;;  %v4205_v33 = vunpack.c.l.b16 %v3668_v14  ;;  %v4206_v8 = vunpack.c.h.b16 %v3668_v14 }
 0x2be   :  { %vm5196_vm1 = vcmp.ne.s32.totalorder %v4172_v24, 0  ;;  %vm5228_vm15 = vcmp.ne.s32.totalorder %v4204_v22, 0  ;;  %vm16613_vm4 = vcmp.ne.s32.totalorder %v4171_v10, 0  ;;  %vm16617_vm9 = vcmp.ne.s32.totalorder %v4203_v11, 0 }
 0x2bf   :  { %vm12430_vm8 = vmpackc.low %vm5228_vm15, %vm5196_vm1  ;;  %vm5198_vm6 = vcmp.ne.s32.totalorder %v4174_v50, 0  ;;  %vm5230_vm7 = vcmp.ne.s32.totalorder %v4206_v8, 0  ;;  %vm16621_vm2 = vcmp.ne.s32.totalorder %v4173_v49, 0  ;;  %vm16625_vm11 = vcmp.ne.s32.totalorder %v4205_v33, 0 }
 0x2c0   :  { %12431 = vmatprep.subr.msk.bf16.mxu0 %vm12430_vm8, %v13167_v48  ;;  %vm12494_vm0 = vmpackc.low %vm5230_vm7, %vm5198_vm6  ;;  %v1131_v52 = vsel %vm619_vm12, 65537, %v13166_v16  ;;  %v1132_v53 = vsel %vm620_vm13, 65537, %v13166_v16  ;;  %v1133_v58 = vsel %vm621_vm5, 65537, %v13166_v16  ;;  %v1134_v45 = vsel %vm622_vm10, 65537, %v13166_v16 }
 0x2c1   :  { %12495 = vmatprep.subr.msk.bf16.mxu1 %vm12494_vm0, %v13167_v48  ;;  %vm12432_vm12 = vmpackc.low %vm16617_vm9, %vm16613_vm4  ;;  %v10420_v19 = vcombine.low %v1131_v52, %v1132_v53  ;;  %v10436_v46 = vcombine.high %v1131_v52, %v1132_v53  ;;  %v10421_v36 = vcombine.low %v1133_v58, %v1134_v45  ;;  %v10437_v27 = vcombine.high %v1133_v58, %v1134_v45 }
 0x2c2   :  { %12433 = vmatpush1.bf16.msk.msra.mxu0 %vm12432_vm12, %v13167_v48  ;;  %vm12496_vm13 = vmpackc.low %vm16625_vm11, %vm16621_vm2  ;;  %vm651_vm5 = vcmp.eq.bf16.partialorder %v13254_v28, %v16567_v59  ;;  %vm652_vm10 = vcmp.eq.bf16.partialorder %v13254_v28, %v16570_v35  ;;  %vm653_vm14 = vcmp.eq.bf16.partialorder %v13254_v28, %v16573_v61  ;;  %vm654_vm3 = vcmp.eq.bf16.partialorder %v13254_v28, %v16576_v62 }
 0x2c3   :  { %12497 = vmatpush1.bf16.msk.msra.mxu1 %vm12496_vm13, %v13167_v48  ;;  %vm3171_vm1 = vcmp.ne.s16.totalorder %v10420_v19, 0  ;;  %vm3187_vm15 = vcmp.ne.s16.totalorder %v10436_v46, 0  ;;  %vm3172_vm4 = vcmp.ne.s16.totalorder %v10421_v36, 0  ;;  %vm3188_vm9 = vcmp.ne.s16.totalorder %v10437_v27, 0 }
 0x2c4   :  { %v3683_v9 = vsel %vm3171_vm1, 65537, %v13166_v16  ;;  %v3699_v63 = vsel %vm3187_vm15, 65537, %v13166_v16  ;;  %v3684_v3 = vsel %vm3172_vm4, 65537, %v13166_v16  ;;  %v3700_v40 = vsel %vm3188_vm9, 65537, %v13166_v16 }
 0x2c5   :  { %v4235_v38 = vunpack.c.l.b16 %v3683_v9  ;;  %v4236_v13 = vunpack.c.h.b16 %v3683_v9  ;;  %v4267_v14 = vunpack.c.l.b16 %v3699_v63  ;;  %v4268_v10 = vunpack.c.h.b16 %v3699_v63 }
 0x2c6   :  { %v4237_v24 = vunpack.c.l.b16 %v3684_v3  ;;  %v4238_v11 = vunpack.c.h.b16 %v3684_v3  ;;  %v4269_v22 = vunpack.c.l.b16 %v3700_v40  ;;  %v4270_v49 = vunpack.c.h.b16 %v3700_v40 }
 0x2c7   :  { %vm5260_vm8 = vcmp.ne.s32.totalorder %v4236_v13, 0  ;;  %vm5292_vm6 = vcmp.ne.s32.totalorder %v4268_v10, 0  ;;  %vm16669_vm7 = vcmp.ne.s32.totalorder %v4235_v38, 0  ;;  %vm16673_vm2 = vcmp.ne.s32.totalorder %v4267_v14, 0 }
 0x2c8   :  { %vm12434_vm11 = vmpackc.low %vm5292_vm6, %vm5260_vm8  ;;  %vm5262_vm0 = vcmp.ne.s32.totalorder %v4238_v11, 0  ;;  %vm5294_vm12 = vcmp.ne.s32.totalorder %v4270_v49, 0  ;;  %vm16677_vm13 = vcmp.ne.s32.totalorder %v4237_v24, 0  ;;  %vm16681_vm1 = vcmp.ne.s32.totalorder %v4269_v22, 0 }
 0x2c9   :  { %12435 = vmatprep.subr.msk.bf16.mxu0 %vm12434_vm11, %v13167_v48  ;;  %vm12498_vm15 = vmpackc.low %vm5294_vm12, %vm5262_vm0  ;;  %v1163_v51 = vsel %vm651_vm5, 65537, %v13166_v16  ;;  %v1164_v17 = vsel %vm652_vm10, 65537, %v13166_v16  ;;  %v1165_v34 = vsel %vm653_vm14, 65537, %v13166_v16  ;;  %v1166_v52 = vsel %vm654_vm3, 65537, %v13166_v16 }
 0x2ca   :  { %12499 = vmatprep.subr.msk.bf16.mxu1 %vm12498_vm15, %v13167_v48  ;;  %vm12436_vm5 = vmpackc.low %vm16673_vm2, %vm16669_vm7  ;;  %v10452_v53 = vcombine.low %v1163_v51, %v1164_v17  ;;  %v10468_v58 = vcombine.high %v1163_v51, %v1164_v17  ;;  %v10453_v45 = vcombine.low %v1165_v34, %v1166_v52  ;;  %v10469_v19 = vcombine.high %v1165_v34, %v1166_v52 }
 0x2cb   :  { %12437 = vmatpush1.bf16.msk.msra.mxu0 %vm12436_vm5, %v13167_v48  ;;  %vm12500_vm10 = vmpackc.low %vm16681_vm1, %vm16677_vm13  ;;  %vm683_vm14 = vcmp.eq.bf16.partialorder %v13257_v31, %v16567_v59  ;;  %vm684_vm3 = vcmp.eq.bf16.partialorder %v13257_v31, %v16570_v35  ;;  %vm685_vm4 = vcmp.eq.bf16.partialorder %v13257_v31, %v16573_v61  ;;  %vm686_vm9 = vcmp.eq.bf16.partialorder %v13257_v31, %v16576_v62 }
 0x2cc   :  { %12501 = vmatpush1.bf16.msk.msra.mxu1 %vm12500_vm10, %v13167_v48  ;;  %vm3203_vm8 = vcmp.ne.s16.totalorder %v10452_v53, 0  ;;  %vm3219_vm6 = vcmp.ne.s16.totalorder %v10468_v58, 0  ;;  %vm3204_vm7 = vcmp.ne.s16.totalorder %v10453_v45, 0  ;;  %vm3220_vm2 = vcmp.ne.s16.totalorder %v10469_v19, 0 }
 0x2cd   :  { %v3715_v46 = vsel %vm3203_vm8, 65537, %v13166_v16  ;;  %v3731_v36 = vsel %vm3219_vm6, 65537, %v13166_v16  ;;  %v3716_v27 = vsel %vm3204_vm7, 65537, %v13166_v16  ;;  %v3732_v9 = vsel %vm3220_vm2, 65537, %v13166_v16 }
 0x2ce   :  { %v4299_v63 = vunpack.c.l.b16 %v3715_v46  ;;  %v4300_v3 = vunpack.c.h.b16 %v3715_v46  ;;  %v4331_v40 = vunpack.c.l.b16 %v3731_v36  ;;  %v4332_v38 = vunpack.c.h.b16 %v3731_v36 }
 0x2cf   :  { %v4301_v13 = vunpack.c.l.b16 %v3716_v27  ;;  %v4302_v14 = vunpack.c.h.b16 %v3716_v27  ;;  %v4333_v10 = vunpack.c.l.b16 %v3732_v9  ;;  %v4334_v24 = vunpack.c.h.b16 %v3732_v9 }
 0x2d0   :  { %vm5324_vm11 = vcmp.ne.s32.totalorder %v4300_v3, 0  ;;  %vm5356_vm0 = vcmp.ne.s32.totalorder %v4332_v38, 0  ;;  %vm16725_vm12 = vcmp.ne.s32.totalorder %v4299_v63, 0  ;;  %vm16729_vm13 = vcmp.ne.s32.totalorder %v4331_v40, 0 }
 0x2d1   :  { %vm12438_vm1 = vmpackc.low %vm5356_vm0, %vm5324_vm11  ;;  %vm5326_vm15 = vcmp.ne.s32.totalorder %v4302_v14, 0  ;;  %vm5358_vm5 = vcmp.ne.s32.totalorder %v4334_v24, 0  ;;  %vm16733_vm10 = vcmp.ne.s32.totalorder %v4301_v13, 0  ;;  %vm16737_vm8 = vcmp.ne.s32.totalorder %v4333_v10, 0 }
 0x2d2   :  { %12439 = vmatprep.subr.msk.bf16.mxu0 %vm12438_vm1, %v13167_v48  ;;  %vm12502_vm6 = vmpackc.low %vm5358_vm5, %vm5326_vm15  ;;  %v1195_v33 = vsel %vm683_vm14, 65537, %v13166_v16  ;;  %v1196_v8 = vsel %vm684_vm3, 65537, %v13166_v16  ;;  %v1197_v26 = vsel %vm685_vm4, 65537, %v13166_v16  ;;  %v1198_v51 = vsel %vm686_vm9, 65537, %v13166_v16 }
 0x2d3   :  { %12503 = vmatprep.subr.msk.bf16.mxu1 %vm12502_vm6, %v13167_v48  ;;  %vm12440_vm14 = vmpackc.low %vm16729_vm13, %vm16725_vm12  ;;  %v10484_v17 = vcombine.low %v1195_v33, %v1196_v8  ;;  %v10500_v34 = vcombine.high %v1195_v33, %v1196_v8  ;;  %v10485_v52 = vcombine.low %v1197_v26, %v1198_v51  ;;  %v10501_v53 = vcombine.high %v1197_v26, %v1198_v51 }
 0x2d4   :  { %12441 = vmatpush1.bf16.msk.msra.mxu0 %vm12440_vm14, %v13167_v48  ;;  %vm12504_vm3 = vmpackc.low %vm16737_vm8, %vm16733_vm10  ;;  %vm715_vm4 = vcmp.eq.bf16.partialorder %v13265_v39, %v16567_v59  ;;  %vm716_vm9 = vcmp.eq.bf16.partialorder %v13265_v39, %v16570_v35  ;;  %vm717_vm7 = vcmp.eq.bf16.partialorder %v13265_v39, %v16573_v61  ;;  %vm718_vm2 = vcmp.eq.bf16.partialorder %v13265_v39, %v16576_v62 }
 0x2d5   :  { %12505 = vmatpush1.bf16.msk.msra.mxu1 %vm12504_vm3, %v13167_v48  ;;  %vm3235_vm11 = vcmp.ne.s16.totalorder %v10484_v17, 0  ;;  %vm3251_vm0 = vcmp.ne.s16.totalorder %v10500_v34, 0  ;;  %vm3236_vm12 = vcmp.ne.s16.totalorder %v10485_v52, 0  ;;  %vm3252_vm13 = vcmp.ne.s16.totalorder %v10501_v53, 0 }
 0x2d6   :  { %v3747_v58 = vsel %vm3235_vm11, 65537, %v13166_v16  ;;  %v3763_v45 = vsel %vm3251_vm0, 65537, %v13166_v16  ;;  %v3748_v19 = vsel %vm3236_vm12, 65537, %v13166_v16  ;;  %v3764_v46 = vsel %vm3252_vm13, 65537, %v13166_v16 }
 0x2d7   :  { %v4363_v36 = vunpack.c.l.b16 %v3747_v58  ;;  %v4364_v27 = vunpack.c.h.b16 %v3747_v58  ;;  %v4395_v9 = vunpack.c.l.b16 %v3763_v45  ;;  %v4396_v63 = vunpack.c.h.b16 %v3763_v45 }
 0x2d8   :  { %v4365_v3 = vunpack.c.l.b16 %v3748_v19  ;;  %v4366_v40 = vunpack.c.h.b16 %v3748_v19  ;;  %v4397_v38 = vunpack.c.l.b16 %v3764_v46  ;;  %v4398_v13 = vunpack.c.h.b16 %v3764_v46 }
 0x2d9   :  { %vm5388_vm1 = vcmp.ne.s32.totalorder %v4364_v27, 0  ;;  %vm5420_vm15 = vcmp.ne.s32.totalorder %v4396_v63, 0  ;;  %vm16781_vm5 = vcmp.ne.s32.totalorder %v4363_v36, 0  ;;  %vm16785_vm10 = vcmp.ne.s32.totalorder %v4395_v9, 0 }
 0x2da   :  { %vm12442_vm8 = vmpackc.low %vm5420_vm15, %vm5388_vm1  ;;  %vm5390_vm6 = vcmp.ne.s32.totalorder %v4366_v40, 0  ;;  %vm5422_vm14 = vcmp.ne.s32.totalorder %v4398_v13, 0  ;;  %vm16789_vm3 = vcmp.ne.s32.totalorder %v4365_v3, 0  ;;  %vm16793_vm11 = vcmp.ne.s32.totalorder %v4397_v38, 0 }
 0x2db   :  { %12443 = vmatprep.subr.msk.bf16.mxu0 %vm12442_vm8, %v13167_v48  ;;  %vm12506_vm0 = vmpackc.low %vm5422_vm14, %vm5390_vm6  ;;  %v1227_v22 = vsel %vm715_vm4, 65537, %v13166_v16  ;;  %v1228_v49 = vsel %vm716_vm9, 65537, %v13166_v16  ;;  %v1229_v50 = vsel %vm717_vm7, 65537, %v13166_v16  ;;  %v1230_v33 = vsel %vm718_vm2, 65537, %v13166_v16 }
 0x2dc   :  { %12507 = vmatprep.subr.msk.bf16.mxu1 %vm12506_vm0, %v13167_v48  ;;  %vm12444_vm4 = vmpackc.low %vm16785_vm10, %vm16781_vm5  ;;  %v10516_v8 = vcombine.low %v1227_v22, %v1228_v49  ;;  %v10532_v26 = vcombine.high %v1227_v22, %v1228_v49  ;;  %v10517_v51 = vcombine.low %v1229_v50, %v1230_v33  ;;  %v10533_v17 = vcombine.high %v1229_v50, %v1230_v33 }
 0x2dd   :  { %12445 = vmatpush1.bf16.msk.msra.mxu0 %vm12444_vm4, %v13167_v48  ;;  %vm12508_vm9 = vmpackc.low %vm16793_vm11, %vm16789_vm3  ;;  %v9688_v34 = vcombine.low %v16555_v2, %v16584_v43  ;;  %v10087_v53 = vcombine.high %v16582_v42, %v16587_v18  ;;  %vm747_vm7 = vcmp.eq.bf16.partialorder %v13276_v47, %v16567_v59 }
 0x2de   :  { %12509 = vmatpush1.bf16.msk.msra.mxu1 %vm12508_vm9, %v13167_v48  ;;  %vm3267_vm2 = vcmp.ne.s16.totalorder %v10516_v8, 0  ;;  %vm3283_vm12 = vcmp.ne.s16.totalorder %v10532_v26, 0  ;;  %vm3268_vm13 = vcmp.ne.s16.totalorder %v10517_v51, 0  ;;  %vm3284_vm1 = vcmp.ne.s16.totalorder %v10533_v17, 0 }
 0x2df   :  { %v3779_v58 = vsel %vm3267_vm2, 65537, %v13166_v16  ;;  %v3795_v45 = vsel %vm3283_vm12, 65537, %v13166_v16  ;;  %v3780_v2 = vsel %vm3268_vm13, 65537, %v13166_v16  ;;  %v3796_v43 = vsel %vm3284_vm1, 65537, %v13166_v16 }
 0x2e0   :  { %v4427_v19 = vunpack.c.l.b16 %v3779_v58  ;;  %v4428_v46 = vunpack.c.h.b16 %v3779_v58  ;;  %v4459_v36 = vunpack.c.l.b16 %v3795_v45  ;;  %v4460_v27 = vunpack.c.h.b16 %v3795_v45 }
 0x2e1   :  { %v4429_v9 = vunpack.c.l.b16 %v3780_v2  ;;  %v4430_v63 = vunpack.c.h.b16 %v3780_v2  ;;  %v4461_v3 = vunpack.c.l.b16 %v3796_v43  ;;  %v4462_v40 = vunpack.c.h.b16 %v3796_v43 }
 0x2e2   :  { %vm5452_vm15 = vcmp.ne.s32.totalorder %v4428_v46, 0  ;;  %vm5484_vm5 = vcmp.ne.s32.totalorder %v4460_v27, 0  ;;  %vm16837_vm10 = vcmp.ne.s32.totalorder %v4427_v19, 0  ;;  %vm16841_vm8 = vcmp.ne.s32.totalorder %v4459_v36, 0 }
 0x2e3   :  { %vm12446_vm6 = vmpackc.low %vm5484_vm5, %vm5452_vm15  ;;  %vm5454_vm14 = vcmp.ne.s32.totalorder %v4430_v63, 0  ;;  %vm5486_vm3 = vcmp.ne.s32.totalorder %v4462_v40, 0  ;;  %vm16845_vm11 = vcmp.ne.s32.totalorder %v4429_v9, 0  ;;  %vm16849_vm0 = vcmp.ne.s32.totalorder %v4461_v3, 0 }
 0x2e4   :  { %12447 = vmatprep.subr.msk.bf16.mxu0 %vm12446_vm6, %v13167_v48  ;;  %vm12510_vm4 = vmpackc.low %vm5486_vm3, %vm5454_vm14  ;;  %v16855_v24 = vrot.slane %v9688_v34, %v16561_v41  ;;  %vm748_vm9 = vcmp.eq.bf16.partialorder %v13276_v47, %v16570_v35  ;;  %v1259_v11 = vsel %vm747_vm7, 65537, %v13166_v16  ;;  %vm749_vm2 = vcmp.eq.bf16.partialorder %v13276_v47, %v16573_v61 }
 0x2e5   :  { %12511 = vmatprep.subr.msk.bf16.mxu1 %vm12510_vm4, %v13167_v48  ;;  %vm12448_vm12 = vmpackc.low %vm16841_vm8, %vm16837_vm10  ;;  %v1260_v22 = vsel %vm748_vm9, 65537, %v13166_v16  ;;  %vm750_vm13 = vcmp.eq.bf16.partialorder %v13276_v47, %v16576_v62  ;;  %v1261_v49 = vsel %vm749_vm2, 65537, %v13166_v16  ;;  %vm779_vm7 = vcmp.eq.bf16.partialorder %v13278_v55, %v16567_v59 }
 0x2e6   :  { %12449 = vmatpush1.bf16.msk.msra.mxu0 %vm12448_vm12, %v13167_v48  ;;  %vm12512_vm1 = vmpackc.low %vm16849_vm0, %vm16845_vm11  ;;  %v10548_v33 = vcombine.low %v1259_v11, %v1260_v22  ;;  %v10564_v8 = vcombine.high %v1259_v11, %v1260_v22  ;;  %v1262_v26 = vsel %vm750_vm13, 65537, %v13166_v16  ;;  %vm780_vm15 = vcmp.eq.bf16.partialorder %v13278_v55, %v16570_v35 }
 0x2e7   :  { %12513 = vmatpush1.bf16.msk.msra.mxu1 %vm12512_vm1, %v13167_v48  ;;  %v10549_v51 = vcombine.low %v1261_v49, %v1262_v26  ;;  %v10565_v17 = vcombine.high %v1261_v49, %v1262_v26  ;;  %v1291_v34 = vsel %vm779_vm7, 65537, %v13166_v16  ;;  %v1292_v58 = vsel %vm780_vm15, 65537, %v13166_v16 }
 0x2e8   :  { %vm3299_vm5 = vcmp.ne.s16.totalorder %v10548_v33, 0  ;;  %vm3315_vm10 = vcmp.ne.s16.totalorder %v10564_v8, 0  ;;  %vm781_vm8 = vcmp.eq.bf16.partialorder %v13278_v55, %v16573_v61  ;;  %v10580_v63 = vcombine.low %v1291_v34, %v1292_v58 }
 0x2e9   :  { %v3811_v45 = vsel %vm3299_vm5, 65537, %v13166_v16  ;;  %v3827_v2 = vsel %vm3315_vm10, 65537, %v13166_v16  ;;  %vm3300_vm6 = vcmp.ne.s16.totalorder %v10549_v51, 0  ;;  %vm3316_vm14 = vcmp.ne.s16.totalorder %v10565_v17, 0 }
 0x2ea   :  { %v4491_v43 = vunpack.c.l.b16 %v3811_v45  ;;  %v4492_v19 = vunpack.c.h.b16 %v3811_v45  ;;  %v4523_v46 = vunpack.c.l.b16 %v3827_v2  ;;  %v4524_v36 = vunpack.c.h.b16 %v3827_v2 }
 0x2eb   :  { %v3812_v27 = vsel %vm3300_vm6, 65537, %v13166_v16  ;;  %v3828_v9 = vsel %vm3316_vm14, 65537, %v13166_v16  ;;  %v10596_v3 = vcombine.high %v1291_v34, %v1292_v58  ;;  %vm3331_vm7 = vcmp.ne.s16.totalorder %v10580_v63, 0 }
 0x2ec   :  { %vm5516_vm3 = vcmp.ne.s32.totalorder %v4492_v19, 0  ;;  %vm5548_vm11 = vcmp.ne.s32.totalorder %v4524_v36, 0  ;;  %v4493_v40 = vunpack.c.l.b16 %v3812_v27  ;;  %v4494_v38 = vunpack.c.h.b16 %v3812_v27 }
 0x2ed   :  { %vm12450_vm0 = vmpackc.low %vm5548_vm11, %vm5516_vm3  ;;  %v4525_v13 = vunpack.c.l.b16 %v3828_v9  ;;  %v4526_v14 = vunpack.c.h.b16 %v3828_v9  ;;  %vm5515_vm4 = vcmp.ne.s32.totalorder %v4491_v43, 0  ;;  %vm5547_vm9 = vcmp.ne.s32.totalorder %v4523_v46, 0 }
 0x2ee   :  { %12451 = vmatprep.subr.msk.bf16.mxu0 %vm12450_vm0, %v13167_v48  ;;  %vm16896_vm2 = vcmp.ne.s32.totalorder %v4494_v38, 0  ;;  %vm12452_vm12 = vmpackc.low %vm5547_vm9, %vm5515_vm4  ;;  %vm16900_vm13 = vcmp.ne.s32.totalorder %v4493_v40, 0  ;;  %vm3347_vm1 = vcmp.ne.s16.totalorder %v10596_v3, 0  ;;  %v3843_v22 = vsel %vm3331_vm7, 65537, %v13166_v16 }
 0x2ef   :  { %vm5550_vm15 = vcmp.ne.s32.totalorder %v4526_v14, 0  ;;  %12453 = vmatpush1.bf16.msk.msra.mxu0 %vm12452_vm12, %v13167_v48  ;;  %vm5549_vm5 = vcmp.ne.s32.totalorder %v4525_v13, 0  ;;  %v3859_v49 = vsel %vm3347_vm1, 65537, %v13166_v16  ;;  %v4555_v33 = vunpack.c.l.b16 %v3843_v22 }
 0x2f0   :  { %vm12514_vm10 = vmpackc.low %vm5550_vm15, %vm16896_vm2  ;;  %v4556_v8 = vunpack.c.h.b16 %v3843_v22  ;;  %v4587_v26 = vunpack.c.l.b16 %v3859_v49  ;;  %v4588_v51 = vunpack.c.h.b16 %v3859_v49  ;;  %vm782_vm14 = vcmp.eq.bf16.partialorder %v13278_v55, %v16576_v62 }
 0x2f1   :  { %12515 = vmatprep.subr.msk.bf16.mxu1 %vm12514_vm10, %v13167_v48  ;;  %vm12516_vm6 = vmpackc.low %vm5549_vm5, %vm16900_vm13  ;;  %v1293_v17 = vsel %vm781_vm8, 65537, %v13166_v16  ;;  %vm811_vm3 = vcmp.eq.bf16.partialorder %v13280_v56, %v16567_v59  ;;  %vm812_vm11 = vcmp.eq.bf16.partialorder %v13280_v56, %v16570_v35  ;;  %v1294_v34 = vsel %vm782_vm14, 65537, %v13166_v16 }
 0x2f2   :  { %12517 = vmatpush1.bf16.msk.msra.mxu1 %vm12516_vm6, %v13167_v48  ;;  %vm5580_vm0 = vcmp.ne.s32.totalorder %v4556_v8, 0  ;;  %vm5612_vm4 = vcmp.ne.s32.totalorder %v4588_v51, 0  ;;  %vm5579_vm9 = vcmp.ne.s32.totalorder %v4555_v33, 0  ;;  %v10581_v58 = vcombine.low %v1293_v17, %v1294_v34 }
 0x2f3   :  { %vm12454_vm2 = vmpackc.low %vm5612_vm4, %vm5580_vm0  ;;  %v10597_v45 = vcombine.high %v1293_v17, %v1294_v34  ;;  %vm5611_vm12 = vcmp.ne.s32.totalorder %v4587_v26, 0  ;;  %v1323_v2 = vsel %vm811_vm3, 65537, %v13166_v16  ;;  %v1324_v43 = vsel %vm812_vm11, 65537, %v13166_v16 }
 0x2f4   :  { %12455 = vmatprep.subr.msk.bf16.mxu0 %vm12454_vm2, %v13167_v48  ;;  %vm12456_vm8 = vmpackc.low %vm5611_vm12, %vm5579_vm9  ;;  %vm813_vm13 = vcmp.eq.bf16.partialorder %v13280_v56, %v16573_v61  ;;  %vm814_vm7 = vcmp.eq.bf16.partialorder %v13280_v56, %v16576_v62  ;;  %vm843_vm1 = vcmp.eq.bf16.partialorder %v13302_v12, %v16567_v59  ;;  %vm3332_vm15 = vcmp.ne.s16.totalorder %v10581_v58, 0  ;;  %v16950_v58 = vpop.f32.mrb[4].mxu0 }
 0x2f5   :  { %vm3348_vm5 = vcmp.ne.s16.totalorder %v10597_v45, 0  ;;  %12457 = vmatpush1.bf16.msk.msra.mxu0 %vm12456_vm8, %v13167_v48  ;;  %v10612_v19 = vcombine.low %v1323_v2, %v1324_v43  ;;  %v10628_v46 = vcombine.high %v1323_v2, %v1324_v43  ;;  %v3844_v36 = vsel %vm3332_vm15, 65537, %v13166_v16  ;;  %v16952_v45 = vpop.f32.mrb[4].mxu1 }
 0x2f6   :  { %v3860_v27 = vsel %vm3348_vm5, 65537, %v13166_v16  ;;  %v1325_v9 = vsel %vm813_vm13, 65537, %v13166_v16  ;;  %v1326_v63 = vsel %vm814_vm7, 65537, %v13166_v16  ;;  %v4557_v3 = vunpack.c.l.b16 %v3844_v36 }
 0x2f7   :  { %v4558_v40 = vunpack.c.h.b16 %v3844_v36  ;;  %v4589_v38 = vunpack.c.l.b16 %v3860_v27  ;;  %v4590_v13 = vunpack.c.h.b16 %v3860_v27  ;;  %vm3363_vm10 = vcmp.ne.s16.totalorder %v10612_v19, 0  ;;  %v16954_v19 = vpop.f32.mrb[5].mxu0 }
 0x2f8   :  { %vm3379_vm6 = vcmp.ne.s16.totalorder %v10628_v46, 0  ;;  %v10613_v14 = vcombine.low %v1325_v9, %v1326_v63  ;;  %v10629_v10 = vcombine.high %v1325_v9, %v1326_v63  ;;  %vm5581_vm11 = vcmp.ne.s32.totalorder %v4557_v3, 0  ;;  %v8895_v27 = vpop.f32.mrb[6].mxu0 }
 0x2f9   :  { %vm5582_vm14 = vcmp.ne.s32.totalorder %v4558_v40, 0  ;;  %vm5614_vm3 = vcmp.ne.s32.totalorder %v4590_v13, 0  ;;  %vm5613_vm0 = vcmp.ne.s32.totalorder %v4589_v38, 0  ;;  %v3875_v11 = vsel %vm3363_vm10, 65537, %v13166_v16  ;;  %v16971_v40 = vpop.f32.mrb[5].mxu1  ;;  %v8896_v38 = vpop.f32.mrb[7].mxu0 }
 0x2fa   :  { %vm12518_vm4 = vmpackc.low %vm5614_vm3, %vm5582_vm14  ;;  %v3891_v22 = vsel %vm3379_vm6, 65537, %v13166_v16  ;;  %vm3364_vm9 = vcmp.ne.s16.totalorder %v10613_v14, 0  ;;  %vm3380_vm2 = vcmp.ne.s16.totalorder %v10629_v10, 0  ;;  %v4619_v49 = vunpack.c.l.b16 %v3875_v11 }
 0x2fb   :  { %12519 = vmatprep.subr.msk.bf16.mxu1 %vm12518_vm4, %v13167_v48  ;;  %vm12520_vm12 = vmpackc.low %vm5613_vm0, %vm5581_vm11  ;;  %v4620_v33 = vunpack.c.h.b16 %v3875_v11  ;;  %v4651_v8 = vunpack.c.l.b16 %v3891_v22  ;;  %v4652_v26 = vunpack.c.h.b16 %v3891_v22  ;;  %v3876_v51 = vsel %vm3364_vm9, 65537, %v13166_v16  ;;  %v8936_v11 = vpop.f32.mrb[6].mxu1 }
 0x2fc   :  { %12521 = vmatpush1.bf16.msk.msra.mxu1 %vm12520_vm12, %v13167_v48  ;;  %v3892_v17 = vsel %vm3380_vm2, 65537, %v13166_v16  ;;  %vm844_vm8 = vcmp.eq.bf16.partialorder %v13302_v12, %v16570_v35  ;;  %v1355_v34 = vsel %vm843_vm1, 65537, %v13166_v16  ;;  %v4621_v2 = vunpack.c.l.b16 %v3876_v51 }
 0x2fd   :  { %vm5644_vm13 = vcmp.ne.s32.totalorder %v4620_v33, 0  ;;  %vm5676_vm7 = vcmp.ne.s32.totalorder %v4652_v26, 0  ;;  %v4622_v43 = vunpack.c.h.b16 %v3876_v51  ;;  %v4653_v46 = vunpack.c.l.b16 %v3892_v17 }
 0x2fe   :  { %vm12458_vm15 = vmpackc.low %vm5676_vm7, %vm5644_vm13  ;;  %v4654_v36 = vunpack.c.h.b16 %v3892_v17  ;;  %vm5643_vm5 = vcmp.ne.s32.totalorder %v4619_v49, 0  ;;  %vm5675_vm10 = vcmp.ne.s32.totalorder %v4651_v8, 0  ;;  %vm16961_vm14 = vcmp.ne.s32.totalorder %v4621_v2, 0  ;;  %v8937_v49 = vpop.f32.mrb[7].mxu1 }
 0x2ff   :  { %12459 = vmatprep.subr.msk.bf16.mxu0 %vm12458_vm15, %v13167_v48  ;;  %vm16957_vm6 = vcmp.ne.s32.totalorder %v4622_v43, 0  ;;  %vm12460_vm1 = vmpackc.low %vm5675_vm10, %vm5643_vm5  ;;  %v1356_v3 = vsel %vm844_vm8, 65537, %v13166_v16  ;;  %vm845_vm3 = vcmp.eq.bf16.partialorder %v13302_v12, %v16573_v61  ;;  %vm16974_vm0 = vcmp.ne.s32.totalorder %v4653_v46, 0 }
 0x300   :  { %vm5678_vm11 = vcmp.ne.s32.totalorder %v4654_v36, 0  ;;  %12461 = vmatpush1.bf16.msk.msra.mxu0 %vm12460_vm1, %v13167_v48  ;;  %v10644_v14 = vcombine.low %v1355_v34, %v1356_v3  ;;  %v10660_v10 = vcombine.high %v1355_v34, %v1356_v3  ;;  %vm846_vm9 = vcmp.eq.bf16.partialorder %v13302_v12, %v16576_v62  ;;  %vm12524_vm8 = vmpackc.low %vm16974_vm0, %vm16961_vm14 }
 0x301   :  { %vm12522_vm4 = vmpackc.low %vm5678_vm11, %vm16957_vm6  ;;  %v1357_v22 = vsel %vm845_vm3, 65537, %v13166_v16  ;;  %vm875_vm2 = vcmp.eq.bf16.partialorder %v13772_v32, %v16567_v59  ;;  %vm876_vm12 = vcmp.eq.bf16.partialorder %v13772_v32, %v16570_v35  ;;  %v1358_v33 = vsel %vm846_vm9, 65537, %v13166_v16 }
 0x302   :  { %12523 = vmatprep.subr.msk.bf16.mxu1 %vm12522_vm4, %v13167_v48  ;;  %vm3395_vm13 = vcmp.ne.s16.totalorder %v10644_v14, 0  ;;  %vm3411_vm7 = vcmp.ne.s16.totalorder %v10660_v10, 0  ;;  %v1387_v8 = vsel %vm875_vm2, 65537, %v13166_v16  ;;  %v10645_v17 = vcombine.low %v1357_v22, %v1358_v33 }
 0x303   :  { %12525 = vmatpush1.bf16.msk.msra.mxu1 %vm12524_vm8, %v13167_v48  ;;  %v3907_v26 = vsel %vm3395_vm13, 65537, %v13166_v16  ;;  %v3923_v51 = vsel %vm3411_vm7, 65537, %v13166_v16  ;;  %v10661_v34 = vcombine.high %v1357_v22, %v1358_v33  ;;  %v1388_v27 = vsel %vm876_vm12, 65537, %v13166_v16 }
 0x304   :  { %v4683_v2 = vunpack.c.l.b16 %v3907_v26  ;;  %v4684_v43 = vunpack.c.h.b16 %v3907_v26  ;;  %v4715_v46 = vunpack.c.l.b16 %v3923_v51  ;;  %v4716_v36 = vunpack.c.h.b16 %v3923_v51 }
 0x305   :  { %vm3396_vm15 = vcmp.ne.s16.totalorder %v10645_v17, 0  ;;  %vm3412_vm5 = vcmp.ne.s16.totalorder %v10661_v34, 0  ;;  %vm877_vm10 = vcmp.eq.bf16.partialorder %v13772_v32, %v16573_v61  ;;  %v10676_v10 = vcombine.low %v1387_v8, %v1388_v27 }
 0x306   :  { %vm5708_vm6 = vcmp.ne.s32.totalorder %v4684_v43, 0  ;;  %vm5740_vm1 = vcmp.ne.s32.totalorder %v4716_v36, 0  ;;  %v3908_v9 = vsel %vm3396_vm15, 65537, %v13166_v16  ;;  %v3924_v63 = vsel %vm3412_vm5, 65537, %v13166_v16 }
 0x307   :  { %vm12462_vm14 = vmpackc.low %vm5740_vm1, %vm5708_vm6  ;;  %v4685_v3 = vunpack.c.l.b16 %v3908_v9  ;;  %v4686_v38 = vunpack.c.h.b16 %v3908_v9  ;;  %v4717_v13 = vunpack.c.l.b16 %v3924_v63  ;;  %v4718_v14 = vunpack.c.h.b16 %v3924_v63 }
 0x308   :  { %12463 = vmatprep.subr.msk.bf16.mxu0 %vm12462_vm14, %v13167_v48  ;;  %vm5707_vm3 = vcmp.ne.s32.totalorder %v4683_v2, 0  ;;  %vm5739_vm11 = vcmp.ne.s32.totalorder %v4715_v46, 0  ;;  %v10692_v11 = vcombine.high %v1387_v8, %v1388_v27  ;;  %vm3427_vm13 = vcmp.ne.s16.totalorder %v10676_v10, 0 }
 0x309   :  { %vm5710_vm0 = vcmp.ne.s32.totalorder %v4686_v38, 0  ;;  %vm5742_vm4 = vcmp.ne.s32.totalorder %v4718_v14, 0  ;;  %vm12464_vm9 = vmpackc.low %vm5739_vm11, %vm5707_vm3  ;;  %vm5709_vm2 = vcmp.ne.s32.totalorder %v4685_v3, 0  ;;  %vm5741_vm12 = vcmp.ne.s32.totalorder %v4717_v13, 0 }
 0x30a   :  { %vm12526_vm8 = vmpackc.low %vm5742_vm4, %vm5710_vm0  ;;  %12465 = vmatpush1.bf16.msk.msra.mxu0 %vm12464_vm9, %v13167_v48  ;;  %vm3443_vm7 = vcmp.ne.s16.totalorder %v10692_v11, 0  ;;  %vm878_vm15 = vcmp.eq.bf16.partialorder %v13772_v32, %v16576_v62  ;;  %v1389_v22 = vsel %vm877_vm10, 65537, %v13166_v16  ;;  %v3939_v49 = vsel %vm3427_vm13, 65537, %v13166_v16 }
 0x30b   :  { %12527 = vmatprep.subr.msk.bf16.mxu1 %vm12526_vm8, %v13167_v48  ;;  %vm12528_vm5 = vmpackc.low %vm5741_vm12, %vm5709_vm2  ;;  %v3955_v33 = vsel %vm3443_vm7, 65537, %v13166_v16  ;;  %v1390_v8 = vsel %vm878_vm15, 65537, %v13166_v16  ;;  %vm907_vm6 = vcmp.eq.bf16.partialorder %v13855_v37, %v16567_v59  ;;  %v4747_v26 = vunpack.c.l.b16 %v3939_v49 }
 0x30c   :  { %12529 = vmatpush1.bf16.msk.msra.mxu1 %vm12528_vm5, %v13167_v48  ;;  %v4748_v51 = vunpack.c.h.b16 %v3939_v49  ;;  %v4779_v17 = vunpack.c.l.b16 %v3955_v33  ;;  %v4780_v34 = vunpack.c.h.b16 %v3955_v33  ;;  %v10677_v2 = vcombine.low %v1389_v22, %v1390_v8 }
 0x30d   :  { %v10693_v43 = vcombine.high %v1389_v22, %v1390_v8  ;;  %vm908_vm10 = vcmp.eq.bf16.partialorder %v13855_v37, %v16570_v35  ;;  %v1419_v46 = vsel %vm907_vm6, 65537, %v13166_v16  ;;  %vm17023_vm3 = vcmp.ne.s32.totalorder %v4747_v26, 0 }
 0x30e   :  { %vm5772_vm1 = vcmp.ne.s32.totalorder %v4748_v51, 0  ;;  %vm5804_vm14 = vcmp.ne.s32.totalorder %v4780_v34, 0  ;;  %vm17027_vm11 = vcmp.ne.s32.totalorder %v4779_v17, 0  ;;  %vm3428_vm4 = vcmp.ne.s16.totalorder %v10677_v2, 0 }
 0x30f   :  { %vm12466_vm0 = vmpackc.low %vm5804_vm14, %vm5772_vm1  ;;  %vm3444_vm9 = vcmp.ne.s16.totalorder %v10693_v43, 0  ;;  %v1420_v9 = vsel %vm908_vm10, 65537, %v13166_v16  ;;  %vm909_vm2 = vcmp.eq.bf16.partialorder %v13855_v37, %v16573_v61  ;;  %v3940_v63 = vsel %vm3428_vm4, 65537, %v13166_v16 }
 0x310   :  { %12467 = vmatprep.subr.msk.bf16.mxu0 %vm12466_vm0, %v13167_v48  ;;  %v3956_v3 = vsel %vm3444_vm9, 65537, %v13166_v16  ;;  %vm12468_vm12 = vmpackc.low %vm17027_vm11, %vm17023_vm3  ;;  %v10708_v38 = vcombine.low %v1419_v46, %v1420_v9  ;;  %v10724_v13 = vcombine.high %v1419_v46, %v1420_v9  ;;  %v4749_v14 = vunpack.c.l.b16 %v3940_v63 }
 0x311   :  { %v4750_v10 = vunpack.c.h.b16 %v3940_v63  ;;  %v4781_v11 = vunpack.c.l.b16 %v3956_v3  ;;  %v4782_v22 = vunpack.c.h.b16 %v3956_v3  ;;  %12469 = vmatpush1.bf16.msk.msra.mxu0 %vm12468_vm12, %v13167_v48  ;;  %vm910_vm7 = vcmp.eq.bf16.partialorder %v13855_v37, %v16576_v62 }
 0x312   :  { %vm3459_vm8 = vcmp.ne.s16.totalorder %v10708_v38, 0  ;;  %vm3475_vm13 = vcmp.ne.s16.totalorder %v10724_v13, 0  ;;  %v1421_v49 = vsel %vm909_vm2, 65537, %v13166_v16  ;;  %vm5773_vm6 = vcmp.ne.s32.totalorder %v4749_v14, 0 }
 0x313   :  { %vm5774_vm15 = vcmp.ne.s32.totalorder %v4750_v10, 0  ;;  %vm5806_vm5 = vcmp.ne.s32.totalorder %v4782_v22, 0  ;;  %vm5805_vm10 = vcmp.ne.s32.totalorder %v4781_v11, 0  ;;  %v3971_v33 = vsel %vm3459_vm8, 65537, %v13166_v16 }
 0x314   :  { %vm12530_vm1 = vmpackc.low %vm5806_vm5, %vm5774_vm15  ;;  %v3987_v8 = vsel %vm3475_vm13, 65537, %v13166_v16  ;;  %v1422_v26 = vsel %vm910_vm7, 65537, %v13166_v16  ;;  %vm939_vm14 = vcmp.eq.bf16.partialorder %v13896_v54, %v16567_v59  ;;  %v4811_v51 = vunpack.c.l.b16 %v3971_v33 }
 0x315   :  { %12531 = vmatprep.subr.msk.bf16.mxu1 %vm12530_vm1, %v13167_v48  ;;  %vm12532_vm3 = vmpackc.low %vm5805_vm10, %vm5773_vm6  ;;  %v4812_v17 = vunpack.c.h.b16 %v3971_v33  ;;  %v4843_v34 = vunpack.c.l.b16 %v3987_v8  ;;  %v4844_v2 = vunpack.c.h.b16 %v3987_v8  ;;  %v10709_v43 = vcombine.low %v1421_v49, %v1422_v26 }
 0x316   :  { %12533 = vmatpush1.bf16.msk.msra.mxu1 %vm12532_vm3, %v13167_v48  ;;  %v10725_v46 = vcombine.high %v1421_v49, %v1422_v26  ;;  %vm940_vm11 = vcmp.eq.bf16.partialorder %v13896_v54, %v16570_v35  ;;  %v1451_v36 = vsel %vm939_vm14, 65537, %v13166_v16  ;;  %vm17055_vm9 = vcmp.ne.s32.totalorder %v4811_v51, 0 }
 0x317   :  { %vm5836_vm0 = vcmp.ne.s32.totalorder %v4812_v17, 0  ;;  %vm5868_vm4 = vcmp.ne.s32.totalorder %v4844_v2, 0  ;;  %vm17059_vm2 = vcmp.ne.s32.totalorder %v4843_v34, 0  ;;  %vm3460_vm8 = vcmp.ne.s16.totalorder %v10709_v43, 0 }
 0x318   :  { %vm12470_vm12 = vmpackc.low %vm5868_vm4, %vm5836_vm0  ;;  %vm3476_vm13 = vcmp.ne.s16.totalorder %v10725_v46, 0  ;;  %v1452_v63 = vsel %vm940_vm11, 65537, %v13166_v16  ;;  %vm941_vm7 = vcmp.eq.bf16.partialorder %v13896_v54, %v16573_v61  ;;  %v3972_v3 = vsel %vm3460_vm8, 65537, %v13166_v16 }
 0x319   :  { %12471 = vmatprep.subr.msk.bf16.mxu0 %vm12470_vm12, %v13167_v48  ;;  %v3988_v38 = vsel %vm3476_vm13, 65537, %v13166_v16  ;;  %vm12472_vm15 = vmpackc.low %vm17059_vm2, %vm17055_vm9  ;;  %v10740_v13 = vcombine.low %v1451_v36, %v1452_v63  ;;  %v10756_v14 = vcombine.high %v1451_v36, %v1452_v63  ;;  %v4813_v10 = vunpack.c.l.b16 %v3972_v3 }
 0x31a   :  { %v4814_v11 = vunpack.c.h.b16 %v3972_v3  ;;  %v4845_v22 = vunpack.c.l.b16 %v3988_v38  ;;  %v4846_v49 = vunpack.c.h.b16 %v3988_v38  ;;  %12473 = vmatpush1.bf16.msk.msra.mxu0 %vm12472_vm15, %v13167_v48  ;;  %vm942_vm10 = vcmp.eq.bf16.partialorder %v13896_v54, %v16576_v62 }
 0x31b   :  { %vm3491_vm5 = vcmp.ne.s16.totalorder %v10740_v13, 0  ;;  %vm3507_vm6 = vcmp.ne.s16.totalorder %v10756_v14, 0  ;;  %v1453_v33 = vsel %vm941_vm7, 65537, %v13166_v16  ;;  %vm5837_vm3 = vcmp.ne.s32.totalorder %v4813_v10, 0 }
 0x31c   :  { %vm5838_vm1 = vcmp.ne.s32.totalorder %v4814_v11, 0  ;;  %vm5870_vm14 = vcmp.ne.s32.totalorder %v4846_v49, 0  ;;  %vm5869_vm11 = vcmp.ne.s32.totalorder %v4845_v22, 0  ;;  %v4003_v8 = vsel %vm3491_vm5, 65537, %v13166_v16 }
 0x31d   :  { %vm12534_vm0 = vmpackc.low %vm5870_vm14, %vm5838_vm1  ;;  %v4019_v26 = vsel %vm3507_vm6, 65537, %v13166_v16  ;;  %v1454_v51 = vsel %vm942_vm10, 65537, %v13166_v16  ;;  %vm971_vm4 = vcmp.eq.bf16.partialorder %v13947_v15, %v16567_v59  ;;  %v4875_v17 = vunpack.c.l.b16 %v4003_v8 }
 0x31e   :  { %12535 = vmatprep.subr.msk.bf16.mxu1 %vm12534_vm0, %v13167_v48  ;;  %vm12536_vm9 = vmpackc.low %vm5869_vm11, %vm5837_vm3  ;;  %v4876_v34 = vunpack.c.h.b16 %v4003_v8  ;;  %v4907_v2 = vunpack.c.l.b16 %v4019_v26  ;;  %v4908_v43 = vunpack.c.h.b16 %v4019_v26  ;;  %v10741_v46 = vcombine.low %v1453_v33, %v1454_v51 }
 0x31f   :  { %12537 = vmatpush1.bf16.msk.msra.mxu1 %vm12536_vm9, %v13167_v48  ;;  %v10757_v36 = vcombine.high %v1453_v33, %v1454_v51  ;;  %vm972_vm2 = vcmp.eq.bf16.partialorder %v13947_v15, %v16570_v35  ;;  %v1483_v27 = vsel %vm971_vm4, 65537, %v13166_v16  ;;  %vm17087_vm13 = vcmp.ne.s32.totalorder %v4875_v17, 0 }
 0x320   :  { %vm5900_vm12 = vcmp.ne.s32.totalorder %v4876_v34, 0  ;;  %vm5932_vm8 = vcmp.ne.s32.totalorder %v4908_v43, 0  ;;  %vm17091_vm7 = vcmp.ne.s32.totalorder %v4907_v2, 0  ;;  %vm3492_vm5 = vcmp.ne.s16.totalorder %v10741_v46, 0 }
 0x321   :  { %vm12474_vm15 = vmpackc.low %vm5932_vm8, %vm5900_vm12  ;;  %vm3508_vm6 = vcmp.ne.s16.totalorder %v10757_v36, 0  ;;  %v1484_v3 = vsel %vm972_vm2, 65537, %v13166_v16  ;;  %vm973_vm10 = vcmp.eq.bf16.partialorder %v13947_v15, %v16573_v61  ;;  %v4004_v38 = vsel %vm3492_vm5, 65537, %v13166_v16 }
 0x322   :  { %12475 = vmatprep.subr.msk.bf16.mxu0 %vm12474_vm15, %v13167_v48  ;;  %v4020_v13 = vsel %vm3508_vm6, 65537, %v13166_v16  ;;  %vm12476_vm1 = vmpackc.low %vm17091_vm7, %vm17087_vm13  ;;  %v10772_v14 = vcombine.low %v1483_v27, %v1484_v3  ;;  %v10788_v10 = vcombine.high %v1483_v27, %v1484_v3  ;;  %v4877_v11 = vunpack.c.l.b16 %v4004_v38 }
 0x323   :  { %v4878_v22 = vunpack.c.h.b16 %v4004_v38  ;;  %v4909_v49 = vunpack.c.l.b16 %v4020_v13  ;;  %v4910_v33 = vunpack.c.h.b16 %v4020_v13  ;;  %12477 = vmatpush1.bf16.msk.msra.mxu0 %vm12476_vm1, %v13167_v48  ;;  %vm974_vm11 = vcmp.eq.bf16.partialorder %v13947_v15, %v16576_v62 }
 0x324   :  { %vm3523_vm14 = vcmp.ne.s16.totalorder %v10772_v14, 0  ;;  %vm3539_vm3 = vcmp.ne.s16.totalorder %v10788_v10, 0  ;;  %v1485_v8 = vsel %vm973_vm10, 65537, %v13166_v16  ;;  %vm5901_vm9 = vcmp.ne.s32.totalorder %v4877_v11, 0 }
 0x325   :  { %vm5902_vm0 = vcmp.ne.s32.totalorder %v4878_v22, 0  ;;  %vm5934_vm4 = vcmp.ne.s32.totalorder %v4910_v33, 0  ;;  %vm5933_vm2 = vcmp.ne.s32.totalorder %v4909_v49, 0  ;;  %v4035_v26 = vsel %vm3523_vm14, 65537, %v13166_v16 }
 0x326   :  { %vm12538_vm12 = vmpackc.low %vm5934_vm4, %vm5902_vm0  ;;  %v4051_v51 = vsel %vm3539_vm3, 65537, %v13166_v16  ;;  %v1486_v17 = vsel %vm974_vm11, 65537, %v13166_v16  ;;  %vm1003_vm8 = vcmp.eq.bf16.partialorder %v13949_v44, %v16567_v59  ;;  %v4939_v34 = vunpack.c.l.b16 %v4035_v26 }
 0x327   :  { %12539 = vmatprep.subr.msk.bf16.mxu1 %vm12538_vm12, %v13167_v48  ;;  %vm12540_vm13 = vmpackc.low %vm5933_vm2, %vm5901_vm9  ;;  %v4940_v2 = vunpack.c.h.b16 %v4035_v26  ;;  %v4971_v43 = vunpack.c.l.b16 %v4051_v51  ;;  %v4972_v46 = vunpack.c.h.b16 %v4051_v51  ;;  %v10773_v36 = vcombine.low %v1485_v8, %v1486_v17 }
 0x328   :  { %12541 = vmatpush1.bf16.msk.msra.mxu1 %vm12540_vm13, %v13167_v48  ;;  %v10789_v27 = vcombine.high %v1485_v8, %v1486_v17  ;;  %vm1004_vm7 = vcmp.eq.bf16.partialorder %v13949_v44, %v16570_v35  ;;  %v1515_v9 = vsel %vm1003_vm8, 65537, %v13166_v16  ;;  %vm17119_vm6 = vcmp.ne.s32.totalorder %v4939_v34, 0 }
 0x329   :  { %vm5964_vm15 = vcmp.ne.s32.totalorder %v4940_v2, 0  ;;  %vm5996_vm5 = vcmp.ne.s32.totalorder %v4972_v46, 0  ;;  %vm17123_vm10 = vcmp.ne.s32.totalorder %v4971_v43, 0  ;;  %vm3524_vm14 = vcmp.ne.s16.totalorder %v10773_v36, 0 }
 0x32a   :  { %vm12478_vm1 = vmpackc.low %vm5996_vm5, %vm5964_vm15  ;;  %vm3540_vm3 = vcmp.ne.s16.totalorder %v10789_v27, 0  ;;  %v1516_v38 = vsel %vm1004_vm7, 65537, %v13166_v16  ;;  %vm1005_vm11 = vcmp.eq.bf16.partialorder %v13949_v44, %v16573_v61  ;;  %v4036_v13 = vsel %vm3524_vm14, 65537, %v13166_v16 }
 0x32b   :  { %12479 = vmatprep.subr.msk.bf16.mxu0 %vm12478_vm1, %v13167_v48  ;;  %v4052_v14 = vsel %vm3540_vm3, 65537, %v13166_v16  ;;  %vm12480_vm0 = vmpackc.low %vm17123_vm10, %vm17119_vm6  ;;  %v10804_v10 = vcombine.low %v1515_v9, %v1516_v38  ;;  %v10820_v11 = vcombine.high %v1515_v9, %v1516_v38  ;;  %v4941_v22 = vunpack.c.l.b16 %v4036_v13 }
 0x32c   :  { %v4942_v49 = vunpack.c.h.b16 %v4036_v13  ;;  %v4973_v33 = vunpack.c.l.b16 %v4052_v14  ;;  %v4974_v8 = vunpack.c.h.b16 %v4052_v14  ;;  %12481 = vmatpush1.bf16.msk.msra.mxu0 %vm12480_vm0, %v13167_v48  ;;  %vm1006_vm2 = vcmp.eq.bf16.partialorder %v13949_v44, %v16576_v62 }
 0x32d   :  { %vm3555_vm4 = vcmp.ne.s16.totalorder %v10804_v10, 0  ;;  %vm3571_vm9 = vcmp.ne.s16.totalorder %v10820_v11, 0  ;;  %v1517_v26 = vsel %vm1005_vm11, 65537, %v13166_v16  ;;  %vm5965_vm13 = vcmp.ne.s32.totalorder %v4941_v22, 0 }
 0x32e   :  { %vm5966_vm12 = vcmp.ne.s32.totalorder %v4942_v49, 0  ;;  %vm5998_vm8 = vcmp.ne.s32.totalorder %v4974_v8, 0  ;;  %vm5997_vm7 = vcmp.ne.s32.totalorder %v4973_v33, 0  ;;  %v4067_v51 = vsel %vm3555_vm4, 65537, %v13166_v16 }
 0x32f   :  { %vm12542_vm15 = vmpackc.low %vm5998_vm8, %vm5966_vm12  ;;  %v4083_v17 = vsel %vm3571_vm9, 65537, %v13166_v16  ;;  %v1518_v34 = vsel %vm1006_vm2, 65537, %v13166_v16  ;;  %vm1035_vm5 = vcmp.eq.bf16.partialorder %v14056_v0, %v16567_v59  ;;  %v5003_v2 = vunpack.c.l.b16 %v4067_v51 }
 0x330   :  { %12543 = vmatprep.subr.msk.bf16.mxu1 %vm12542_vm15, %v13167_v48  ;;  %vm12544_vm6 = vmpackc.low %vm5997_vm7, %vm5965_vm13  ;;  %v5004_v43 = vunpack.c.h.b16 %v4067_v51  ;;  %v5035_v46 = vunpack.c.l.b16 %v4083_v17  ;;  %v5036_v36 = vunpack.c.h.b16 %v4083_v17  ;;  %v10805_v27 = vcombine.low %v1517_v26, %v1518_v34 }
 0x331   :  { %12545 = vmatpush1.bf16.msk.msra.mxu1 %vm12544_vm6, %v13167_v48  ;;  %v10821_v9 = vcombine.high %v1517_v26, %v1518_v34  ;;  %vm1036_vm10 = vcmp.eq.bf16.partialorder %v14056_v0, %v16570_v35  ;;  %v1547_v63 = vsel %vm1035_vm5, 65537, %v13166_v16  ;;  %vm17151_vm3 = vcmp.ne.s32.totalorder %v5003_v2, 0 }
 0x332   :  { %vm6028_vm1 = vcmp.ne.s32.totalorder %v5004_v43, 0  ;;  %vm6060_vm14 = vcmp.ne.s32.totalorder %v5036_v36, 0  ;;  %vm17155_vm11 = vcmp.ne.s32.totalorder %v5035_v46, 0  ;;  %vm3556_vm4 = vcmp.ne.s16.totalorder %v10805_v27, 0 }
 0x333   :  { %vm12482_vm0 = vmpackc.low %vm6060_vm14, %vm6028_vm1  ;;  %vm3572_vm9 = vcmp.ne.s16.totalorder %v10821_v9, 0  ;;  %v1548_v13 = vsel %vm1036_vm10, 65537, %v13166_v16  ;;  %vm1037_vm2 = vcmp.eq.bf16.partialorder %v14056_v0, %v16573_v61  ;;  %v4068_v14 = vsel %vm3556_vm4, 65537, %v13166_v16 }
 0x334   :  { %12483 = vmatprep.subr.msk.bf16.mxu0 %vm12482_vm0, %v13167_v48  ;;  %v4084_v10 = vsel %vm3572_vm9, 65537, %v13166_v16  ;;  %vm12484_vm12 = vmpackc.low %vm17155_vm11, %vm17151_vm3  ;;  %v10836_v11 = vcombine.low %v1547_v63, %v1548_v13  ;;  %v10852_v22 = vcombine.high %v1547_v63, %v1548_v13  ;;  %v5005_v49 = vunpack.c.l.b16 %v4068_v14 }
 0x335   :  { %v5006_v33 = vunpack.c.h.b16 %v4068_v14  ;;  %v5037_v8 = vunpack.c.l.b16 %v4084_v10  ;;  %v5038_v26 = vunpack.c.h.b16 %v4084_v10  ;;  %12485 = vmatpush1.bf16.msk.msra.mxu0 %vm12484_vm12, %v13167_v48  ;;  %vm1038_vm7 = vcmp.eq.bf16.partialorder %v14056_v0, %v16576_v62 }
 0x336   :  { %vm3587_vm8 = vcmp.ne.s16.totalorder %v10836_v11, 0  ;;  %vm3603_vm13 = vcmp.ne.s16.totalorder %v10852_v22, 0  ;;  %v1549_v51 = vsel %vm1037_vm2, 65537, %v13166_v16  ;;  %vm6029_vm6 = vcmp.ne.s32.totalorder %v5005_v49, 0 }
 0x337   :  { %vm6030_vm15 = vcmp.ne.s32.totalorder %v5006_v33, 0  ;;  %vm6062_vm5 = vcmp.ne.s32.totalorder %v5038_v26, 0  ;;  %vm6061_vm10 = vcmp.ne.s32.totalorder %v5037_v8, 0  ;;  %v4099_v17 = vsel %vm3587_vm8, 65537, %v13166_v16 }
 0x338   :  { %vm12546_vm1 = vmpackc.low %vm6062_vm5, %vm6030_vm15  ;;  %v4115_v34 = vsel %vm3603_vm13, 65537, %v13166_v16  ;;  %v1550_v2 = vsel %vm1038_vm7, 65537, %v13166_v16  ;;  %vm1067_vm14 = vcmp.eq.bf16.partialorder %v14132_v25, %v16567_v59  ;;  %v5067_v43 = vunpack.c.l.b16 %v4099_v17 }
 0x339   :  { %12547 = vmatprep.subr.msk.bf16.mxu1 %vm12546_vm1, %v13167_v48  ;;  %vm12548_vm3 = vmpackc.low %vm6061_vm10, %vm6029_vm6  ;;  %v5068_v46 = vunpack.c.h.b16 %v4099_v17  ;;  %v5099_v36 = vunpack.c.l.b16 %v4115_v34  ;;  %v5100_v27 = vunpack.c.h.b16 %v4115_v34  ;;  %v10837_v9 = vcombine.low %v1549_v51, %v1550_v2 }
 0x33a   :  { %12549 = vmatpush1.bf16.msk.msra.mxu1 %vm12548_vm3, %v13167_v48  ;;  %v10853_v63 = vcombine.high %v1549_v51, %v1550_v2  ;;  %vm1068_vm11 = vcmp.eq.bf16.partialorder %v14132_v25, %v16570_v35  ;;  %v1579_v3 = vsel %vm1067_vm14, 65537, %v13166_v16  ;;  %vm17183_vm9 = vcmp.ne.s32.totalorder %v5067_v43, 0 }
 0x33b   :  { %vm6092_vm0 = vcmp.ne.s32.totalorder %v5068_v46, 0  ;;  %vm6124_vm4 = vcmp.ne.s32.totalorder %v5100_v27, 0  ;;  %vm17187_vm2 = vcmp.ne.s32.totalorder %v5099_v36, 0  ;;  %vm3588_vm8 = vcmp.ne.s16.totalorder %v10837_v9, 0 }
 0x33c   :  { %vm12486_vm12 = vmpackc.low %vm6124_vm4, %vm6092_vm0  ;;  %vm3604_vm13 = vcmp.ne.s16.totalorder %v10853_v63, 0  ;;  %v1580_v13 = vsel %vm1068_vm11, 65537, %v13166_v16  ;;  %vm1069_vm7 = vcmp.eq.bf16.partialorder %v14132_v25, %v16573_v61  ;;  %v4100_v35 = vsel %vm3588_vm8, 65537, %v13166_v16 }
 0x33d   :  { %12487 = vmatprep.subr.msk.bf16.mxu0 %vm12486_vm12, %v13167_v48  ;;  %v4116_v14 = vsel %vm3604_vm13, 65537, %v13166_v16  ;;  %vm12488_vm15 = vmpackc.low %vm17187_vm2, %vm17183_vm9  ;;  %v10868_v10 = vcombine.low %v1579_v3, %v1580_v13  ;;  %v10884_v11 = vcombine.high %v1579_v3, %v1580_v13  ;;  %v5069_v22 = vunpack.c.l.b16 %v4100_v35 }
 0x33e   :  { %v5070_v49 = vunpack.c.h.b16 %v4100_v35  ;;  %v5101_v33 = vunpack.c.l.b16 %v4116_v14  ;;  %v5102_v8 = vunpack.c.h.b16 %v4116_v14  ;;  %12489 = vmatpush1.bf16.msk.msra.mxu0 %vm12488_vm15, %v13167_v48  ;;  %vm1070_vm10 = vcmp.eq.bf16.partialorder %v14132_v25, %v16576_v62 }
 0x33f   :  { %vm3619_vm5 = vcmp.ne.s16.totalorder %v10868_v10, 0  ;;  %vm3635_vm6 = vcmp.ne.s16.totalorder %v10884_v11, 0  ;;  %v1581_v61 = vsel %vm1069_vm7, 65537, %v13166_v16  ;;  %vm6093_vm3 = vcmp.ne.s32.totalorder %v5069_v22, 0 }
 0x340   :  { %vm6094_vm1 = vcmp.ne.s32.totalorder %v5070_v49, 0  ;;  %vm6126_vm14 = vcmp.ne.s32.totalorder %v5102_v8, 0  ;;  %vm6125_vm11 = vcmp.ne.s32.totalorder %v5101_v33, 0  ;;  %v4131_v26 = vsel %vm3619_vm5, 65537, %v13166_v16 }
 0x341   :  { %vm12550_vm0 = vmpackc.low %vm6126_vm14, %vm6094_vm1  ;;  %v4147_v51 = vsel %vm3635_vm6, 65537, %v13166_v16  ;;  %v1582_v17 = vsel %vm1070_vm10, 65537, %v13166_v16  ;;  %v238_v34 = vrot.slane %v16527_v60, %v14065_v21  ;;  %v5131_v62 = vunpack.c.l.b16 %v4131_v26 }
 0x342   :  { %12551 = vmatprep.subr.msk.bf16.mxu1 %vm12550_vm0, %v13167_v48  ;;  %vm12552_vm4 = vmpackc.low %vm6125_vm11, %vm6093_vm3  ;;  %v5132_v2 = vunpack.c.h.b16 %v4131_v26  ;;  %v5163_v43 = vunpack.c.l.b16 %v4147_v51  ;;  %v5164_v46 = vunpack.c.h.b16 %v4147_v51  ;;  %v10869_v36 = vcombine.low %v1581_v61, %v1582_v17 }
 0x343   :  { %12553 = vmatpush1.bf16.msk.msra.mxu1 %vm12552_vm4, %v13167_v48  ;;  %v10885_v27 = vcombine.high %v1581_v61, %v1582_v17  ;;  %v242_v9 = vrot.slane %v16527_v60, %v14117_v57  ;;  %v335_v63 = vpack.c.bf16 %v238_v34, %v238_v34  ;;  %vm17214_vm12 = vcmp.ne.s32.totalorder %v5131_v62, 0 }
 0x344   :  { %vm6156_vm9 = vcmp.ne.s32.totalorder %v5132_v2, 0  ;;  %vm6188_vm2 = vcmp.ne.s32.totalorder %v5164_v46, 0  ;;  %vm17218_vm8 = vcmp.ne.s32.totalorder %v5163_v43, 0  ;;  %vm3620_vm7 = vcmp.ne.s16.totalorder %v10869_v36, 0  ;;  %v13058_v36 = vld [vmem:[#allocation5 + $0x4] ss:$8 sps:$4 sm:$0xff]  }
 0x345   :  { %vm12490_vm13 = vmpackc.low %vm6188_vm2, %vm6156_vm9  ;;  %vm3636_vm15 = vcmp.ne.s16.totalorder %v10885_v27, 0  ;;  %v336_v38 = vpack.c.bf16 %v242_v9, %v242_v9  ;;  %v488_v13 = vpack.i.b16 %v335_v63, %v335_v63  ;;  %v4132_v35 = vsel %vm3620_vm7, 65537, %v13166_v16 }
 0x346   :  { %12491 = vmatprep.subr.msk.bf16.mxu0 %vm12490_vm13, %v13167_v48  ;;  %v4148_v14 = vsel %vm3636_vm15, 65537, %v13166_v16  ;;  %vm12492_vm5 = vmpackc.low %vm17218_vm8, %vm17214_vm12  ;;  %v246_v10 = vrot.slane %v16527_v60, %v14138_v29  ;;  %v250_v11 = vrot.slane %v16527_v60, %v14141_v30  ;;  %v5133_v22 = vunpack.c.l.b16 %v4132_v35  ;;  %v13057_v60 = vld [vmem:[#allocation5] ss:$8 sps:$4 sm:$0xff]  }
 0x347   :  { %v5134_v49 = vunpack.c.h.b16 %v4132_v35  ;;  %v5165_v33 = vunpack.c.l.b16 %v4148_v14  ;;  %v5166_v8 = vunpack.c.h.b16 %v4148_v14  ;;  %12493 = vmatpush1.bf16.msk.msra.mxu0 %vm12492_vm5, %v13167_v48  ;;  %v17235_v61 = vrot.slane %v488_v13, %v13231_v4 }
 0x348   :  { %v495_v26 = vpack.i.b16 %v336_v38, %v336_v38  ;;  %v337_v51 = vpack.c.bf16 %v246_v10, %v246_v10  ;;  %v338_v17 = vpack.c.bf16 %v250_v11, %v250_v11  ;;  %vm17237_vm1 = vcmp.ne.s32.totalorder %v5133_v22, 0 }
 0x349   :  { %vm6158_vm6 = vcmp.ne.s32.totalorder %v5134_v49, 0  ;;  %vm6190_vm10 = vcmp.ne.s32.totalorder %v5166_v8, 0  ;;  %vm6189_vm14 = vcmp.ne.s32.totalorder %v5165_v33, 0  ;;  %vm591_vm11 = vcmp.eq.bf16.partialorder %v13249_v20, %v17235_v61 }
 0x34a   :  { %vm12554_vm3 = vmpackc.low %vm6190_vm10, %vm6158_vm6  ;;  %9136 = vmatmul.mubr.bf16.vlgmr.msra.gmra.mrb[16].mxu0 %v13057_v60  ;;  %v17242_v62 = vrot.slane %v495_v26, %v13231_v4  ;;  %v502_v2 = vpack.i.b16 %v337_v51, %v337_v51  ;;  %v509_v43 = vpack.i.b16 %v338_v17, %v338_v17  ;;  %v1103_v46 = vsel %vm591_vm11, 65537, %v13166_v16 }
 0x34b   :  { %12555 = vmatprep.subr.msk.bf16.mxu1 %vm12554_vm3, %v13167_v48  ;;  %vm12556_vm0 = vmpackc.low %vm6189_vm14, %vm17237_vm1  ;;  %vm623_vm4 = vcmp.eq.bf16.partialorder %v13251_v23, %v17235_v61  ;;  %9217 = vmatprep.mubr.bf16.mxu0 %v13058_v36  ;;  %vm655_vm13 = vcmp.eq.bf16.partialorder %v13254_v28, %v17235_v61  ;;  %vm687_vm1 = vcmp.eq.bf16.partialorder %v13257_v31, %v17235_v61 }
 0x34c   :  { %12557 = vmatpush1.bf16.msk.msra.mxu1 %vm12556_vm0, %v13167_v48  ;;  %vm592_vm9 = vcmp.eq.bf16.partialorder %v13249_v20, %v17242_v62  ;;  %v17256_v27 = vrot.slane %v502_v2, %v13231_v4  ;;  %v17259_v9 = vrot.slane %v509_v43, %v13231_v4  ;;  %vm624_vm2 = vcmp.eq.bf16.partialorder %v13251_v23, %v17242_v62 }
 0x34d   :  { %v1104_v63 = vsel %vm592_vm9, 65537, %v13166_v16  ;;  %v1135_v3 = vsel %vm623_vm4, 65537, %v13166_v16  ;;  %v1136_v59 = vsel %vm624_vm2, 65537, %v13166_v16  ;;  %vm656_vm7 = vcmp.eq.bf16.partialorder %v13254_v28, %v17242_v62 }
 0x34e   :  { %v10390_v38 = vcombine.low %v1103_v46, %v1104_v63  ;;  %v10406_v13 = vcombine.high %v1103_v46, %v1104_v63  ;;  %vm593_vm12 = vcmp.eq.bf16.partialorder %v13249_v20, %v17256_v27  ;;  %vm594_vm8 = vcmp.eq.bf16.partialorder %v13249_v20, %v17259_v9 }
 0x34f   :  { %9177 = vmatmul.mubr.bf16.vlgmr.msra.gmra.mrb[16].mxu1 %v13057_v60  ;;  %v1105_v35 = vsel %vm593_vm12, 65537, %v13166_v16  ;;  %v1106_v14 = vsel %vm594_vm8, 65537, %v13166_v16  ;;  %v10422_v10 = vcombine.low %v1135_v3, %v1136_v59  ;;  %v10438_v11 = vcombine.high %v1135_v3, %v1136_v59 }
 0x350   :  { %vm3141_vm15 = vcmp.ne.s16.totalorder %v10390_v38, 0  ;;  %vm3157_vm5 = vcmp.ne.s16.totalorder %v10406_v13, 0  ;;  %v10391_v22 = vcombine.low %v1105_v35, %v1106_v14  ;;  %v10407_v49 = vcombine.high %v1105_v35, %v1106_v14  ;;  %9258 = vmatprep.mubr.bf16.mxu1 %v13058_v36 }
 0x351   :  { %v3653_v33 = vsel %vm3141_vm15, 65537, %v13166_v16  ;;  %v3669_v8 = vsel %vm3157_vm5, 65537, %v13166_v16  ;;  %vm3173_vm6 = vcmp.ne.s16.totalorder %v10422_v10, 0  ;;  %vm3189_vm10 = vcmp.ne.s16.totalorder %v10438_v11, 0 }
 0x352   :  { %v4175_v26 = vunpack.c.l.b16 %v3653_v33  ;;  %v4176_v51 = vunpack.c.h.b16 %v3653_v33  ;;  %v4207_v17 = vunpack.c.l.b16 %v3669_v8  ;;  %v4208_v34 = vunpack.c.h.b16 %v3669_v8 }
 0x353   :  { %vm3142_vm14 = vcmp.ne.s16.totalorder %v10391_v22, 0  ;;  %vm3158_vm3 = vcmp.ne.s16.totalorder %v10407_v49, 0  ;;  %v3685_v60 = vsel %vm3173_vm6, 65537, %v13166_v16  ;;  %v3701_v2 = vsel %vm3189_vm10, 65537, %v13166_v16 }
 0x354   :  { %vm5200_vm11 = vcmp.ne.s32.totalorder %v4176_v51, 0  ;;  %vm5232_vm0 = vcmp.ne.s32.totalorder %v4208_v34, 0  ;;  %v3654_v43 = vsel %vm3142_vm14, 65537, %v13166_v16  ;;  %v3670_v46 = vsel %vm3158_vm3, 65537, %v13166_v16 }
 0x355   :  { %vm12558_vm4 = vmpackc.low %vm5232_vm0, %vm5200_vm11  ;;  %v4177_v36 = vunpack.c.l.b16 %v3654_v43  ;;  %v4178_v63 = vunpack.c.h.b16 %v3654_v43  ;;  %v4209_v3 = vunpack.c.l.b16 %v3670_v46  ;;  %v4210_v59 = vunpack.c.h.b16 %v3670_v46 }
 0x356   :  { %12559 = vmatprep.subr.msk.bf16.mxu0 %vm12558_vm4, %v13167_v48  ;;  %vm5199_vm9 = vcmp.ne.s32.totalorder %v4175_v26, 0  ;;  %vm5231_vm2 = vcmp.ne.s32.totalorder %v4207_v17, 0  ;;  %v4239_v38 = vunpack.c.l.b16 %v3685_v60  ;;  %v4240_v13 = vunpack.c.h.b16 %v3685_v60 }
 0x357   :  { %vm5202_vm12 = vcmp.ne.s32.totalorder %v4178_v63, 0  ;;  %vm5234_vm8 = vcmp.ne.s32.totalorder %v4210_v59, 0  ;;  %vm12560_vm15 = vmpackc.low %vm5231_vm2, %vm5199_vm9  ;;  %vm5201_vm5 = vcmp.ne.s32.totalorder %v4177_v36, 0  ;;  %vm5233_vm6 = vcmp.ne.s32.totalorder %v4209_v3, 0 }
 0x358   :  { %vm12622_vm10 = vmpackc.low %vm5234_vm8, %vm5202_vm12  ;;  %12561 = vmatpush1.bf16.msk.msra.mxu0 %vm12560_vm15, %v13167_v48  ;;  %v4271_v35 = vunpack.c.l.b16 %v3701_v2  ;;  %v4272_v14 = vunpack.c.h.b16 %v3701_v2  ;;  %vm17286_vm14 = vcmp.ne.s32.totalorder %v4240_v13, 0  ;;  %vm625_vm3 = vcmp.eq.bf16.partialorder %v13251_v23, %v17256_v27 }
 0x359   :  { %12623 = vmatprep.subr.msk.bf16.mxu1 %vm12622_vm10, %v13167_v48  ;;  %vm12624_vm11 = vmpackc.low %vm5233_vm6, %vm5201_vm5  ;;  %vm626_vm0 = vcmp.eq.bf16.partialorder %v13251_v23, %v17259_v9  ;;  %v1137_v11 = vsel %vm625_vm3, 65537, %v13166_v16  ;;  %vm17296_vm4 = vcmp.ne.s32.totalorder %v4239_v38, 0  ;;  %v1167_v49 = vsel %vm655_vm13, 65537, %v13166_v16 }
 0x35a   :  { %12625 = vmatpush1.bf16.msk.msra.mxu1 %vm12624_vm11, %v13167_v48  ;;  %vm5296_vm9 = vcmp.ne.s32.totalorder %v4272_v14, 0  ;;  %v1138_v33 = vsel %vm626_vm0, 65537, %v13166_v16  ;;  %vm17306_vm2 = vcmp.ne.s32.totalorder %v4271_v35, 0  ;;  %v1168_v26 = vsel %vm656_vm7, 65537, %v13166_v16 }
 0x35b   :  { %vm12562_vm12 = vmpackc.low %vm5296_vm9, %vm17286_vm14  ;;  %v10423_v51 = vcombine.low %v1137_v11, %v1138_v33  ;;  %v10439_v17 = vcombine.high %v1137_v11, %v1138_v33  ;;  %v10454_v34 = vcombine.low %v1167_v49, %v1168_v26  ;;  %v10470_v60 = vcombine.high %v1167_v49, %v1168_v26 }
 0x35c   :  { %12563 = vmatprep.subr.msk.bf16.mxu0 %vm12562_vm12, %v13167_v48  ;;  %vm12564_vm13 = vmpackc.low %vm17306_vm2, %vm17296_vm4  ;;  %vm657_vm8 = vcmp.eq.bf16.partialorder %v13254_v28, %v17256_v27  ;;  %vm658_vm7 = vcmp.eq.bf16.partialorder %v13254_v28, %v17259_v9  ;;  %vm688_vm15 = vcmp.eq.bf16.partialorder %v13257_v31, %v17242_v62  ;;  %v1199_v2 = vsel %vm687_vm1, 65537, %v13166_v16 }
 0x35d   :  { %vm3174_vm5 = vcmp.ne.s16.totalorder %v10423_v51, 0  ;;  %vm3190_vm6 = vcmp.ne.s16.totalorder %v10439_v17, 0  ;;  %12565 = vmatpush1.bf16.msk.msra.mxu0 %vm12564_vm13, %v13167_v48  ;;  %vm3205_vm10 = vcmp.ne.s16.totalorder %v10454_v34, 0  ;;  %vm3221_vm14 = vcmp.ne.s16.totalorder %v10470_v60, 0 }
 0x35e   :  { %v3686_v43 = vsel %vm3174_vm5, 65537, %v13166_v16  ;;  %v3702_v46 = vsel %vm3190_vm6, 65537, %v13166_v16  ;;  %v3717_v36 = vsel %vm3205_vm10, 65537, %v13166_v16  ;;  %v3733_v63 = vsel %vm3221_vm14, 65537, %v13166_v16 }
 0x35f   :  { %v4241_v3 = vunpack.c.l.b16 %v3686_v43  ;;  %v4242_v59 = vunpack.c.h.b16 %v3686_v43  ;;  %v4273_v38 = vunpack.c.l.b16 %v3702_v46  ;;  %v4274_v13 = vunpack.c.h.b16 %v3702_v46 }
 0x360   :  { %v4303_v35 = vunpack.c.l.b16 %v3717_v36  ;;  %v4304_v14 = vunpack.c.h.b16 %v3717_v36  ;;  %v4335_v10 = vunpack.c.l.b16 %v3733_v63  ;;  %v4336_v11 = vunpack.c.h.b16 %v3733_v63 }
 0x361   :  { %vm5266_vm1 = vcmp.ne.s32.totalorder %v4242_v59, 0  ;;  %vm5298_vm3 = vcmp.ne.s32.totalorder %v4274_v13, 0  ;;  %vm5265_vm11 = vcmp.ne.s32.totalorder %v4241_v3, 0  ;;  %vm5297_vm0 = vcmp.ne.s32.totalorder %v4273_v38, 0 }
 0x362   :  { %vm12626_vm4 = vmpackc.low %vm5298_vm3, %vm5266_vm1  ;;  %vm17336_vm9 = vcmp.ne.s32.totalorder %v4304_v14, 0  ;;  %vm17340_vm2 = vcmp.ne.s32.totalorder %v4336_v11, 0  ;;  %v1169_v33 = vsel %vm657_vm8, 65537, %v13166_v16  ;;  %v1170_v8 = vsel %vm658_vm7, 65537, %v13166_v16 }
 0x363   :  { %12627 = vmatprep.subr.msk.bf16.mxu1 %vm12626_vm4, %v13167_v48  ;;  %vm12628_vm12 = vmpackc.low %vm5297_vm0, %vm5265_vm11  ;;  %v10455_v26 = vcombine.low %v1169_v33, %v1170_v8  ;;  %v10471_v51 = vcombine.high %v1169_v33, %v1170_v8  ;;  %vm17353_vm13 = vcmp.ne.s32.totalorder %v4303_v35, 0  ;;  %vm17357_vm5 = vcmp.ne.s32.totalorder %v4335_v10, 0 }
 0x364   :  { %12629 = vmatpush1.bf16.msk.msra.mxu1 %vm12628_vm12, %v13167_v48  ;;  %vm12566_vm8 = vmpackc.low %vm17340_vm2, %vm17336_vm9  ;;  %v1200_v60 = vsel %vm688_vm15, 65537, %v13166_v16  ;;  %vm689_vm7 = vcmp.eq.bf16.partialorder %v13257_v31, %v17256_v27  ;;  %vm690_vm6 = vcmp.eq.bf16.partialorder %v13257_v31, %v17259_v9  ;;  %vm719_vm10 = vcmp.eq.bf16.partialorder %v13265_v39, %v17235_v61 }
 0x365   :  { %12567 = vmatprep.subr.msk.bf16.mxu0 %vm12566_vm8, %v13167_v48  ;;  %vm3206_vm14 = vcmp.ne.s16.totalorder %v10455_v26, 0  ;;  %vm3222_vm1 = vcmp.ne.s16.totalorder %v10471_v51, 0  ;;  %vm12568_vm3 = vmpackc.low %vm17357_vm5, %vm17353_vm13  ;;  %v10486_v43 = vcombine.low %v1199_v2, %v1200_v60  ;;  %v10502_v46 = vcombine.high %v1199_v2, %v1200_v60 }
 0x366   :  { %v3718_v36 = vsel %vm3206_vm14, 65537, %v13166_v16  ;;  %v3734_v63 = vsel %vm3222_vm1, 65537, %v13166_v16  ;;  %12569 = vmatpush1.bf16.msk.msra.mxu0 %vm12568_vm3, %v13167_v48  ;;  %v1201_v3 = vsel %vm689_vm7, 65537, %v13166_v16  ;;  %v1202_v59 = vsel %vm690_vm6, 65537, %v13166_v16 }
 0x367   :  { %v4305_v38 = vunpack.c.l.b16 %v3718_v36  ;;  %v4306_v13 = vunpack.c.h.b16 %v3718_v36  ;;  %v4337_v35 = vunpack.c.l.b16 %v3734_v63  ;;  %v4338_v14 = vunpack.c.h.b16 %v3734_v63 }
 0x368   :  { %vm3237_vm15 = vcmp.ne.s16.totalorder %v10486_v43, 0  ;;  %vm3253_vm11 = vcmp.ne.s16.totalorder %v10502_v46, 0  ;;  %v10487_v10 = vcombine.low %v1201_v3, %v1202_v59  ;;  %v10503_v11 = vcombine.high %v1201_v3, %v1202_v59 }
 0x369   :  { %vm5330_vm0 = vcmp.ne.s32.totalorder %v4306_v13, 0  ;;  %vm5362_vm4 = vcmp.ne.s32.totalorder %v4338_v14, 0  ;;  %vm5329_vm9 = vcmp.ne.s32.totalorder %v4305_v38, 0  ;;  %vm5361_vm2 = vcmp.ne.s32.totalorder %v4337_v35, 0 }
 0x36a   :  { %vm12630_vm12 = vmpackc.low %vm5362_vm4, %vm5330_vm0  ;;  %v3749_v2 = vsel %vm3237_vm15, 65537, %v13166_v16  ;;  %v3765_v22 = vsel %vm3253_vm11, 65537, %v13166_v16  ;;  %vm3238_vm13 = vcmp.ne.s16.totalorder %v10487_v10, 0  ;;  %vm3254_vm5 = vcmp.ne.s16.totalorder %v10503_v11, 0 }
 0x36b   :  { %12631 = vmatprep.subr.msk.bf16.mxu1 %vm12630_vm12, %v13167_v48  ;;  %vm12632_vm8 = vmpackc.low %vm5361_vm2, %vm5329_vm9  ;;  %v4367_v49 = vunpack.c.l.b16 %v3749_v2  ;;  %v4368_v33 = vunpack.c.h.b16 %v3749_v2  ;;  %v4399_v8 = vunpack.c.l.b16 %v3765_v22  ;;  %v4400_v26 = vunpack.c.h.b16 %v3765_v22 }
 0x36c   :  { %12633 = vmatpush1.bf16.msk.msra.mxu1 %vm12632_vm8, %v13167_v48  ;;  %v3750_v51 = vsel %vm3238_vm13, 65537, %v13166_v16  ;;  %v3766_v17 = vsel %vm3254_vm5, 65537, %v13166_v16  ;;  %vm720_vm7 = vcmp.eq.bf16.partialorder %v13265_v39, %v17242_v62  ;;  %v1231_v34 = vsel %vm719_vm10, 65537, %v13166_v16 }
 0x36d   :  { %vm5392_vm6 = vcmp.ne.s32.totalorder %v4368_v33, 0  ;;  %vm5424_vm14 = vcmp.ne.s32.totalorder %v4400_v26, 0  ;;  %v4369_v60 = vunpack.c.l.b16 %v3750_v51  ;;  %v4370_v43 = vunpack.c.h.b16 %v3750_v51 }
 0x36e   :  { %vm12570_vm1 = vmpackc.low %vm5424_vm14, %vm5392_vm6  ;;  %v4401_v46 = vunpack.c.l.b16 %v3766_v17  ;;  %v4402_v36 = vunpack.c.h.b16 %v3766_v17  ;;  %vm5391_vm3 = vcmp.ne.s32.totalorder %v4367_v49, 0  ;;  %vm5423_vm15 = vcmp.ne.s32.totalorder %v4399_v8, 0 }
 0x36f   :  { %12571 = vmatprep.subr.msk.bf16.mxu0 %vm12570_vm1, %v13167_v48  ;;  %vm17399_vm11 = vcmp.ne.s32.totalorder %v4370_v43, 0  ;;  %vm12572_vm0 = vmpackc.low %vm5423_vm15, %vm5391_vm3  ;;  %vm17403_vm4 = vcmp.ne.s32.totalorder %v4369_v60, 0  ;;  %v1232_v59 = vsel %vm720_vm7, 65537, %v13166_v16  ;;  %vm721_vm10 = vcmp.eq.bf16.partialorder %v13265_v39, %v17256_v27 }
 0x370   :  { %vm5426_vm9 = vcmp.ne.s32.totalorder %v4402_v36, 0  ;;  %12573 = vmatpush1.bf16.msk.msra.mxu0 %vm12572_vm0, %v13167_v48  ;;  %vm5425_vm2 = vcmp.ne.s32.totalorder %v4401_v46, 0  ;;  %v10518_v38 = vcombine.low %v1231_v34, %v1232_v59  ;;  %v10534_v13 = vcombine.high %v1231_v34, %v1232_v59 }
 0x371   :  { %vm12634_vm12 = vmpackc.low %vm5426_vm9, %vm17399_vm11  ;;  %vm722_vm13 = vcmp.eq.bf16.partialorder %v13265_v39, %v17259_v9  ;;  %v1233_v35 = vsel %vm721_vm10, 65537, %v13166_v16  ;;  %v9467_v14 = vrot.slane %v16950_v58, 1  ;;  %v9563_v10 = vrot.slane %v16950_v58, 2 }
 0x372   :  { %12635 = vmatprep.subr.msk.bf16.mxu1 %vm12634_vm12, %v13167_v48  ;;  %vm12636_vm5 = vmpackc.low %vm5425_vm2, %vm17403_vm4  ;;  %vm3269_vm8 = vcmp.ne.s16.totalorder %v10518_v38, 0  ;;  %vm3285_vm7 = vcmp.ne.s16.totalorder %v10534_v13, 0  ;;  %v1234_v11 = vsel %vm722_vm13, 65537, %v13166_v16  ;;  %v9469_v2 = vrot.slane %v16952_v45, 1 }
 0x373   :  { %12637 = vmatpush1.bf16.msk.msra.mxu1 %vm12636_vm5, %v13167_v48  ;;  %v3781_v22 = vsel %vm3269_vm8, 65537, %v13166_v16  ;;  %v3797_v49 = vsel %vm3285_vm7, 65537, %v13166_v16  ;;  %v10519_v33 = vcombine.low %v1233_v35, %v1234_v11  ;;  %v10535_v8 = vcombine.high %v1233_v35, %v1234_v11 }
 0x374   :  { %v4431_v26 = vunpack.c.l.b16 %v3781_v22  ;;  %v4432_v51 = vunpack.c.h.b16 %v3781_v22  ;;  %v4463_v17 = vunpack.c.l.b16 %v3797_v49  ;;  %v4464_v34 = vunpack.c.h.b16 %v3797_v49 }
 0x375   :  { %vm3270_vm6 = vcmp.ne.s16.totalorder %v10519_v33, 0  ;;  %vm3286_vm14 = vcmp.ne.s16.totalorder %v10535_v8, 0  ;;  %v9531_v60 = vadd.f32 %v9467_v14, %v16950_v58  ;;  %v9533_v43 = vadd.f32 %v9469_v2, %v16952_v45 }
 0x376   :  { %vm5456_vm1 = vcmp.ne.s32.totalorder %v4432_v51, 0  ;;  %vm5488_vm3 = vcmp.ne.s32.totalorder %v4464_v34, 0  ;;  %v3782_v46 = vsel %vm3270_vm6, 65537, %v13166_v16  ;;  %v3798_v36 = vsel %vm3286_vm14, 65537, %v13166_v16 }
 0x377   :  { %vm12574_vm15 = vmpackc.low %vm5488_vm3, %vm5456_vm1  ;;  %v4433_v63 = vunpack.c.l.b16 %v3782_v46  ;;  %v4434_v3 = vunpack.c.h.b16 %v3782_v46  ;;  %v4465_v59 = vunpack.c.l.b16 %v3798_v36  ;;  %v4466_v38 = vunpack.c.h.b16 %v3798_v36 }
 0x378   :  { %12575 = vmatprep.subr.msk.bf16.mxu0 %vm12574_vm15, %v13167_v48  ;;  %vm5455_vm11 = vcmp.ne.s32.totalorder %v4431_v26, 0  ;;  %vm5487_vm0 = vcmp.ne.s32.totalorder %v4463_v17, 0  ;;  %v9627_v13 = vadd.f32 %v9563_v10, %v9531_v60  ;;  %v9565_v35 = vrot.slane %v16952_v45, 2 }
 0x379   :  { %vm5458_vm4 = vcmp.ne.s32.totalorder %v4434_v3, 0  ;;  %vm5490_vm10 = vcmp.ne.s32.totalorder %v4466_v38, 0  ;;  %vm12576_vm9 = vmpackc.low %vm5487_vm0, %vm5455_vm11  ;;  %vm5457_vm2 = vcmp.ne.s32.totalorder %v4433_v63, 0  ;;  %vm5489_vm12 = vcmp.ne.s32.totalorder %v4465_v59, 0 }
 0x37a   :  { %vm12638_vm13 = vmpackc.low %vm5490_vm10, %vm5458_vm4  ;;  %12577 = vmatpush1.bf16.msk.msra.mxu0 %vm12576_vm9, %v13167_v48  ;;  %v9629_v14 = vadd.f32 %v9565_v35, %v9533_v43  ;;  %v9468_v11 = vrot.slane %v16954_v19, 1  ;;  %v9564_v2 = vrot.slane %v16954_v19, 2  ;;  %v9889_v22 = vcombine.low %v16950_v58, %v16954_v19 }
 0x37b   :  { %12639 = vmatprep.subr.msk.bf16.mxu1 %vm12638_vm13, %v13167_v48  ;;  %vm12640_vm5 = vmpackc.low %vm5489_vm12, %vm5457_vm2  ;;  %v9470_v10 = vrot.slane %v16971_v40, 1  ;;  %v9566_v49 = vrot.slane %v16971_v40, 2  ;;  %v9890_v33 = vcombine.low %v16952_v45, %v16971_v40  ;;  %vm751_vm8 = vcmp.eq.bf16.partialorder %v13276_v47, %v17235_v61 }
 0x37c   :  { %12641 = vmatpush1.bf16.msk.msra.mxu1 %vm12640_vm5, %v13167_v48  ;;  %v9532_v8 = vadd.f32 %v9468_v11, %v16954_v19  ;;  %v17447_v26 = vrot.slane %v9889_v22, %v16561_v41  ;;  %vm752_vm7 = vcmp.eq.bf16.partialorder %v13276_v47, %v17242_v62  ;;  %v1263_v58 = vsel %vm751_vm8, 65537, %v13166_v16 }
 0x37d   :  { %v9534_v51 = vadd.f32 %v9470_v10, %v16971_v40  ;;  %v17454_v17 = vrot.slane %v9890_v33, %v16561_v41  ;;  %v1264_v45 = vsel %vm752_vm7, 65537, %v13166_v16  ;;  %vm753_vm6 = vcmp.eq.bf16.partialorder %v13276_v47, %v17256_v27 }
 0x37e   :  { %v9628_v34 = vadd.f32 %v9564_v2, %v9532_v8  ;;  %v10550_v19 = vcombine.low %v1263_v58, %v1264_v45  ;;  %v10566_v60 = vcombine.high %v1263_v58, %v1264_v45  ;;  %vm754_vm14 = vcmp.eq.bf16.partialorder %v13276_v47, %v17259_v9 }
 0x37f   :  { %v9630_v43 = vadd.f32 %v9566_v49, %v9534_v51  ;;  %v10088_v40 = vcombine.high %v17447_v26, %v17454_v17  ;;  %v1265_v36 = vsel %vm753_vm6, 65537, %v13166_v16  ;;  %v1266_v3 = vsel %vm754_vm14, 65537, %v13166_v16 }
 0x380   :  { %v9689_v63 = vcombine.low %v9627_v13, %v9628_v34  ;;  %vm3301_vm1 = vcmp.ne.s16.totalorder %v10550_v19, 0  ;;  %vm3317_vm3 = vcmp.ne.s16.totalorder %v10566_v60, 0  ;;  %v10551_v11 = vcombine.low %v1265_v36, %v1266_v3 }
 0x381   :  { %v9690_v59 = vcombine.low %v9629_v14, %v9630_v43  ;;  %v3813_v38 = vsel %vm3301_vm1, 65537, %v13166_v16  ;;  %v3829_v35 = vsel %vm3317_vm3, 65537, %v13166_v16  ;;  %v10567_v8 = vcombine.high %v1265_v36, %v1266_v3 }
 0x382   :  { %v17470_v2 = vrot.slane %v9689_v63, %v16561_v41  ;;  %v4495_v22 = vunpack.c.l.b16 %v3813_v38  ;;  %v4496_v10 = vunpack.c.h.b16 %v3813_v38  ;;  %v4527_v49 = vunpack.c.l.b16 %v3829_v35 }
 0x383   :  { %v17473_v33 = vrot.slane %v9690_v59, %v16561_v41  ;;  %v4528_v13 = vunpack.c.h.b16 %v3829_v35  ;;  %vm3302_vm15 = vcmp.ne.s16.totalorder %v10551_v11, 0  ;;  %vm3318_vm9 = vcmp.ne.s16.totalorder %v10567_v8, 0 }
 0x384   :  { %vm5520_vm11 = vcmp.ne.s32.totalorder %v4496_v10, 0  ;;  %v3814_v14 = vsel %vm3302_vm15, 65537, %v13166_v16  ;;  %vm17476_vm0 = vcmp.ne.s32.totalorder %v4495_v22, 0  ;;  %vm17480_vm4 = vcmp.ne.s32.totalorder %v4527_v49, 0 }
 0x385   :  { %vm5552_vm10 = vcmp.ne.s32.totalorder %v4528_v13, 0  ;;  %v4497_v34 = vunpack.c.l.b16 %v3814_v14  ;;  %vm12580_vm2 = vmpackc.low %vm17480_vm4, %vm17476_vm0  ;;  %v3830_v19 = vsel %vm3318_vm9, 65537, %v13166_v16  ;;  %v4498_v60 = vunpack.c.h.b16 %v3814_v14 }
 0x386   :  { %vm12578_vm12 = vmpackc.low %vm5552_vm10, %vm5520_vm11  ;;  %vm783_vm13 = vcmp.eq.bf16.partialorder %v13278_v55, %v17235_v61  ;;  %vm784_vm5 = vcmp.eq.bf16.partialorder %v13278_v55, %v17242_v62  ;;  %v4529_v43 = vunpack.c.l.b16 %v3830_v19  ;;  %v4530_v36 = vunpack.c.h.b16 %v3830_v19 }
 0x387   :  { %12579 = vmatprep.subr.msk.bf16.mxu0 %vm12578_vm12, %v13167_v48  ;;  %vm17496_vm8 = vcmp.ne.s32.totalorder %v4497_v34, 0  ;;  %v1295_v3 = vsel %vm783_vm13, 65537, %v13166_v16  ;;  %vm5522_vm7 = vcmp.ne.s32.totalorder %v4498_v60, 0  ;;  %v1296_v59 = vsel %vm784_vm5, 65537, %v13166_v16 }
 0x388   :  { %12581 = vmatpush1.bf16.msk.msra.mxu0 %vm12580_vm2, %v13167_v48  ;;  %vm785_vm6 = vcmp.eq.bf16.partialorder %v13278_v55, %v17256_v27  ;;  %vm786_vm14 = vcmp.eq.bf16.partialorder %v13278_v55, %v17259_v9  ;;  %vm5554_vm1 = vcmp.ne.s32.totalorder %v4530_v36, 0  ;;  %vm5553_vm3 = vcmp.ne.s32.totalorder %v4529_v43, 0 }
 0x389   :  { %v10582_v38 = vcombine.low %v1295_v3, %v1296_v59  ;;  %v10598_v35 = vcombine.high %v1295_v3, %v1296_v59  ;;  %vm12642_vm15 = vmpackc.low %vm5554_vm1, %vm5522_vm7  ;;  %v1297_v11 = vsel %vm785_vm6, 65537, %v13166_v16  ;;  %v1298_v22 = vsel %vm786_vm14, 65537, %v13166_v16 }
 0x38a   :  { %vm815_vm11 = vcmp.eq.bf16.partialorder %v13280_v56, %v17235_v61  ;;  %vm816_vm0 = vcmp.eq.bf16.partialorder %v13280_v56, %v17242_v62  ;;  %12643 = vmatprep.subr.msk.bf16.mxu1 %vm12642_vm15, %v13167_v48  ;;  %vm12644_vm4 = vmpackc.low %vm5553_vm3, %vm17496_vm8  ;;  %v10583_v10 = vcombine.low %v1297_v11, %v1298_v22  ;;  %v10599_v49 = vcombine.high %v1297_v11, %v1298_v22 }
 0x38b   :  { %vm3333_vm10 = vcmp.ne.s16.totalorder %v10582_v38, 0  ;;  %vm3349_vm9 = vcmp.ne.s16.totalorder %v10598_v35, 0  ;;  %12645 = vmatpush1.bf16.msk.msra.mxu1 %vm12644_vm4, %v13167_v48  ;;  %v1327_v14 = vsel %vm815_vm11, 65537, %v13166_v16  ;;  %v1328_v58 = vsel %vm816_vm0, 65537, %v13166_v16 }
 0x38c   :  { %v3845_v13 = vsel %vm3333_vm10, 65537, %v13166_v16  ;;  %v3861_v8 = vsel %vm3349_vm9, 65537, %v13166_v16  ;;  %vm3334_vm2 = vcmp.ne.s16.totalorder %v10583_v10, 0  ;;  %vm3350_vm12 = vcmp.ne.s16.totalorder %v10599_v49, 0 }
 0x38d   :  { %v4559_v51 = vunpack.c.l.b16 %v3845_v13  ;;  %v4560_v34 = vunpack.c.h.b16 %v3845_v13  ;;  %v4591_v19 = vunpack.c.l.b16 %v3861_v8  ;;  %v4592_v60 = vunpack.c.h.b16 %v3861_v8 }
 0x38e   :  { %v10614_v43 = vcombine.low %v1327_v14, %v1328_v58  ;;  %v10630_v36 = vcombine.high %v1327_v14, %v1328_v58  ;;  %v3846_v63 = vsel %vm3334_vm2, 65537, %v13166_v16  ;;  %v3862_v3 = vsel %vm3350_vm12, 65537, %v13166_v16 }
 0x38f   :  { %vm5584_vm13 = vcmp.ne.s32.totalorder %v4560_v34, 0  ;;  %vm5616_vm5 = vcmp.ne.s32.totalorder %v4592_v60, 0  ;;  %v4561_v59 = vunpack.c.l.b16 %v3846_v63  ;;  %v4562_v38 = vunpack.c.h.b16 %v3846_v63 }
 0x390   :  { %vm12582_vm8 = vmpackc.low %vm5616_vm5, %vm5584_vm13  ;;  %v4593_v35 = vunpack.c.l.b16 %v3862_v3  ;;  %v4594_v11 = vunpack.c.h.b16 %v3862_v3  ;;  %vm5583_vm7 = vcmp.ne.s32.totalorder %v4559_v51, 0  ;;  %vm5615_vm6 = vcmp.ne.s32.totalorder %v4591_v19, 0 }
 0x391   :  { %12583 = vmatprep.subr.msk.bf16.mxu0 %vm12582_vm8, %v13167_v48  ;;  %vm3365_vm14 = vcmp.ne.s16.totalorder %v10614_v43, 0  ;;  %vm3381_vm1 = vcmp.ne.s16.totalorder %v10630_v36, 0  ;;  %vm5586_vm3 = vcmp.ne.s32.totalorder %v4562_v38, 0  ;;  %vm12584_vm11 = vmpackc.low %vm5615_vm6, %vm5583_vm7  ;;  %vm5585_vm0 = vcmp.ne.s32.totalorder %v4561_v59, 0 }
 0x392   :  { %vm5618_vm15 = vcmp.ne.s32.totalorder %v4594_v11, 0  ;;  %vm5617_vm4 = vcmp.ne.s32.totalorder %v4593_v35, 0  ;;  %12585 = vmatpush1.bf16.msk.msra.mxu0 %vm12584_vm11, %v13167_v48  ;;  %v3877_v22 = vsel %vm3365_vm14, 65537, %v13166_v16  ;;  %v3893_v10 = vsel %vm3381_vm1, 65537, %v13166_v16 }
 0x393   :  { %vm12646_vm10 = vmpackc.low %vm5618_vm15, %vm5586_vm3  ;;  %vm817_vm9 = vcmp.eq.bf16.partialorder %v13280_v56, %v17256_v27  ;;  %vm818_vm2 = vcmp.eq.bf16.partialorder %v13280_v56, %v17259_v9  ;;  %v4623_v49 = vunpack.c.l.b16 %v3877_v22  ;;  %v4624_v13 = vunpack.c.h.b16 %v3877_v22 }
 0x394   :  { %12647 = vmatprep.subr.msk.bf16.mxu1 %vm12646_vm10, %v13167_v48  ;;  %vm12648_vm12 = vmpackc.low %vm5617_vm4, %vm5585_vm0  ;;  %v4655_v8 = vunpack.c.l.b16 %v3893_v10  ;;  %v4656_v14 = vunpack.c.h.b16 %v3893_v10  ;;  %v1329_v58 = vsel %vm817_vm9, 65537, %v13166_v16  ;;  %v1330_v51 = vsel %vm818_vm2, 65537, %v13166_v16 }
 0x395   :  { %12649 = vmatpush1.bf16.msk.msra.mxu1 %vm12648_vm12, %v13167_v48  ;;  %vm847_vm13 = vcmp.eq.bf16.partialorder %v13302_v12, %v17235_v61  ;;  %vm848_vm5 = vcmp.eq.bf16.partialorder %v13302_v12, %v17242_v62  ;;  %vm5648_vm8 = vcmp.ne.s32.totalorder %v4624_v13, 0  ;;  %v10615_v34 = vcombine.low %v1329_v58, %v1330_v51 }
 0x396   :  { %vm5680_vm7 = vcmp.ne.s32.totalorder %v4656_v14, 0  ;;  %v10631_v19 = vcombine.high %v1329_v58, %v1330_v51  ;;  %vm5647_vm14 = vcmp.ne.s32.totalorder %v4623_v49, 0  ;;  %vm5679_vm1 = vcmp.ne.s32.totalorder %v4655_v8, 0  ;;  %v17559_v14 = vpop.f32.mrb[8].mxu0  ;;  %v17561_v58 = vpop.f32.mrb[8].mxu1 }
 0x397   :  { %vm12586_vm6 = vmpackc.low %vm5680_vm7, %vm5648_vm8  ;;  %v1359_v60 = vsel %vm847_vm13, 65537, %v13166_v16  ;;  %v1360_v43 = vsel %vm848_vm5, 65537, %v13166_v16  ;;  %vm3366_vm3 = vcmp.ne.s16.totalorder %v10615_v34, 0  ;;  %vm849_vm0 = vcmp.eq.bf16.partialorder %v13302_v12, %v17256_v27 }
 0x398   :  { %12587 = vmatprep.subr.msk.bf16.mxu0 %vm12586_vm6, %v13167_v48  ;;  %vm3382_vm15 = vcmp.ne.s16.totalorder %v10631_v19, 0  ;;  %vm12588_vm11 = vmpackc.low %vm5679_vm1, %vm5647_vm14  ;;  %v10646_v36 = vcombine.low %v1359_v60, %v1360_v43  ;;  %v10662_v63 = vcombine.high %v1359_v60, %v1360_v43  ;;  %v3878_v3 = vsel %vm3366_vm3, 65537, %v13166_v16  ;;  %v17565_v43 = vpop.f32.mrb[9].mxu0 }
 0x399   :  { %v3894_v59 = vsel %vm3382_vm15, 65537, %v13166_v16  ;;  %12589 = vmatpush1.bf16.msk.msra.mxu0 %vm12588_vm11, %v13167_v48  ;;  %vm850_vm4 = vcmp.eq.bf16.partialorder %v13302_v12, %v17259_v9  ;;  %v4625_v38 = vunpack.c.l.b16 %v3878_v3  ;;  %v4626_v35 = vunpack.c.h.b16 %v3878_v3 }
 0x39a   :  { %v4657_v11 = vunpack.c.l.b16 %v3894_v59  ;;  %v4658_v22 = vunpack.c.h.b16 %v3894_v59  ;;  %vm3397_vm10 = vcmp.ne.s16.totalorder %v10646_v36, 0  ;;  %vm3413_vm9 = vcmp.ne.s16.totalorder %v10662_v63, 0  ;;  %v17567_v36 = vpop.f32.mrb[9].mxu1 }
 0x39b   :  { %v1361_v10 = vsel %vm849_vm0, 65537, %v13166_v16  ;;  %v1362_v49 = vsel %vm850_vm4, 65537, %v13166_v16  ;;  %vm5650_vm2 = vcmp.ne.s32.totalorder %v4626_v35, 0  ;;  %vm17551_vm13 = vcmp.ne.s32.totalorder %v4625_v38, 0  ;;  %v8977_v35 = vpop.f32.mrb[10].mxu0 }
 0x39c   :  { %vm5682_vm12 = vcmp.ne.s32.totalorder %v4658_v22, 0  ;;  %vm17555_vm5 = vcmp.ne.s32.totalorder %v4657_v11, 0  ;;  %v3909_v51 = vsel %vm3397_vm10, 65537, %v13166_v16  ;;  %v3925_v34 = vsel %vm3413_vm9, 65537, %v13166_v16  ;;  %v9018_v11 = vpop.f32.mrb[10].mxu1  ;;  %v8978_v22 = vpop.f32.mrb[11].mxu0 }
 0x39d   :  { %vm12650_vm8 = vmpackc.low %vm5682_vm12, %vm5650_vm2  ;;  %v10647_v19 = vcombine.low %v1361_v10, %v1362_v49  ;;  %v10663_v60 = vcombine.high %v1361_v10, %v1362_v49  ;;  %v4687_v63 = vunpack.c.l.b16 %v3909_v51  ;;  %v4688_v3 = vunpack.c.h.b16 %v3909_v51  ;;  %v9019_v10 = vpop.f32.mrb[11].mxu1 }
 0x39e   :  { %12651 = vmatprep.subr.msk.bf16.mxu1 %vm12650_vm8, %v13167_v48  ;;  %vm12652_vm7 = vmpackc.low %vm17555_vm5, %vm17551_vm13  ;;  %v4719_v59 = vunpack.c.l.b16 %v3925_v34  ;;  %v4720_v38 = vunpack.c.h.b16 %v3925_v34  ;;  %vm879_vm1 = vcmp.eq.bf16.partialorder %v13772_v32, %v17235_v61  ;;  %vm880_vm3 = vcmp.eq.bf16.partialorder %v13772_v32, %v17242_v62 }
 0x39f   :  { %12653 = vmatpush1.bf16.msk.msra.mxu1 %vm12652_vm7, %v13167_v48  ;;  %vm3398_vm6 = vcmp.ne.s16.totalorder %v10647_v19, 0  ;;  %vm3414_vm14 = vcmp.ne.s16.totalorder %v10663_v60, 0  ;;  %vm5712_vm15 = vcmp.ne.s32.totalorder %v4688_v3, 0  ;;  %vm5711_vm4 = vcmp.ne.s32.totalorder %v4687_v63, 0 }
 0x3a0   :  { %vm5744_vm11 = vcmp.ne.s32.totalorder %v4720_v38, 0  ;;  %v3910_v49 = vsel %vm3398_vm6, 65537, %v13166_v16  ;;  %v3926_v13 = vsel %vm3414_vm14, 65537, %v13166_v16  ;;  %vm5743_vm10 = vcmp.ne.s32.totalorder %v4719_v59, 0 }
 0x3a1   :  { %vm12590_vm0 = vmpackc.low %vm5744_vm11, %vm5712_vm15  ;;  %v4689_v8 = vunpack.c.l.b16 %v3910_v49  ;;  %v4690_v51 = vunpack.c.h.b16 %v3910_v49  ;;  %v4721_v34 = vunpack.c.l.b16 %v3926_v13  ;;  %v4722_v19 = vunpack.c.h.b16 %v3926_v13 }
 0x3a2   :  { %12591 = vmatprep.subr.msk.bf16.mxu0 %vm12590_vm0, %v13167_v48  ;;  %v1391_v60 = vsel %vm879_vm1, 65537, %v13166_v16  ;;  %v1392_v3 = vsel %vm880_vm3, 65537, %v13166_v16  ;;  %vm12592_vm12 = vmpackc.low %vm5743_vm10, %vm5711_vm4  ;;  %vm881_vm7 = vcmp.eq.bf16.partialorder %v13772_v32, %v17256_v27  ;;  %vm882_vm6 = vcmp.eq.bf16.partialorder %v13772_v32, %v17259_v9 }
 0x3a3   :  { %vm5714_vm9 = vcmp.ne.s32.totalorder %v4690_v51, 0  ;;  %vm5746_vm2 = vcmp.ne.s32.totalorder %v4722_v19, 0  ;;  %vm5713_vm13 = vcmp.ne.s32.totalorder %v4689_v8, 0  ;;  %vm5745_vm5 = vcmp.ne.s32.totalorder %v4721_v34, 0  ;;  %12593 = vmatpush1.bf16.msk.msra.mxu0 %vm12592_vm12, %v13167_v48 }
 0x3a4   :  { %vm12654_vm8 = vmpackc.low %vm5746_vm2, %vm5714_vm9  ;;  %v10678_v63 = vcombine.low %v1391_v60, %v1392_v3  ;;  %v10694_v59 = vcombine.high %v1391_v60, %v1392_v3  ;;  %v1393_v38 = vsel %vm881_vm7, 65537, %v13166_v16  ;;  %v1394_v35 = vsel %vm882_vm6, 65537, %v13166_v16 }
 0x3a5   :  { %12655 = vmatprep.subr.msk.bf16.mxu1 %vm12654_vm8, %v13167_v48  ;;  %vm12656_vm14 = vmpackc.low %vm5745_vm5, %vm5713_vm13  ;;  %vm911_vm1 = vcmp.eq.bf16.partialorder %v13855_v37, %v17235_v61  ;;  %vm912_vm3 = vcmp.eq.bf16.partialorder %v13855_v37, %v17242_v62  ;;  %v10679_v11 = vcombine.low %v1393_v38, %v1394_v35  ;;  %v10695_v22 = vcombine.high %v1393_v38, %v1394_v35 }
 0x3a6   :  { %12657 = vmatpush1.bf16.msk.msra.mxu1 %vm12656_vm14, %v13167_v48  ;;  %vm3429_vm15 = vcmp.ne.s16.totalorder %v10678_v63, 0  ;;  %vm3445_vm11 = vcmp.ne.s16.totalorder %v10694_v59, 0  ;;  %v1423_v13 = vsel %vm911_vm1, 65537, %v13166_v16  ;;  %v1424_v8 = vsel %vm912_vm3, 65537, %v13166_v16 }
 0x3a7   :  { %v3941_v10 = vsel %vm3429_vm15, 65537, %v13166_v16  ;;  %v3957_v49 = vsel %vm3445_vm11, 65537, %v13166_v16  ;;  %vm3430_vm0 = vcmp.ne.s16.totalorder %v10679_v11, 0  ;;  %vm3446_vm4 = vcmp.ne.s16.totalorder %v10695_v22, 0 }
 0x3a8   :  { %v4751_v51 = vunpack.c.l.b16 %v3941_v10  ;;  %v4752_v34 = vunpack.c.h.b16 %v3941_v10  ;;  %v4783_v19 = vunpack.c.l.b16 %v3957_v49  ;;  %v4784_v60 = vunpack.c.h.b16 %v3957_v49 }
 0x3a9   :  { %v10710_v3 = vcombine.low %v1423_v13, %v1424_v8  ;;  %v10726_v45 = vcombine.high %v1423_v13, %v1424_v8  ;;  %v3942_v63 = vsel %vm3430_vm0, 65537, %v13166_v16  ;;  %v3958_v59 = vsel %vm3446_vm4, 65537, %v13166_v16 }
 0x3aa   :  { %vm5776_vm10 = vcmp.ne.s32.totalorder %v4752_v34, 0  ;;  %vm5808_vm9 = vcmp.ne.s32.totalorder %v4784_v60, 0  ;;  %v4753_v38 = vunpack.c.l.b16 %v3942_v63  ;;  %v4754_v35 = vunpack.c.h.b16 %v3942_v63 }
 0x3ab   :  { %vm12594_vm2 = vmpackc.low %vm5808_vm9, %vm5776_vm10  ;;  %v4785_v50 = vunpack.c.l.b16 %v3958_v59  ;;  %v4786_v46 = vunpack.c.h.b16 %v3958_v59  ;;  %vm5775_vm12 = vcmp.ne.s32.totalorder %v4751_v51, 0  ;;  %vm5807_vm13 = vcmp.ne.s32.totalorder %v4783_v19, 0 }
 0x3ac   :  { %12595 = vmatprep.subr.msk.bf16.mxu0 %vm12594_vm2, %v13167_v48  ;;  %vm3461_vm5 = vcmp.ne.s16.totalorder %v10710_v3, 0  ;;  %vm3477_vm8 = vcmp.ne.s16.totalorder %v10726_v45, 0  ;;  %vm5778_vm7 = vcmp.ne.s32.totalorder %v4754_v35, 0  ;;  %vm12596_vm14 = vmpackc.low %vm5807_vm13, %vm5775_vm12  ;;  %vm5777_vm1 = vcmp.ne.s32.totalorder %v4753_v38, 0 }
 0x3ad   :  { %vm5810_vm6 = vcmp.ne.s32.totalorder %v4786_v46, 0  ;;  %vm5809_vm3 = vcmp.ne.s32.totalorder %v4785_v50, 0  ;;  %12597 = vmatpush1.bf16.msk.msra.mxu0 %vm12596_vm14, %v13167_v48  ;;  %v3973_v11 = vsel %vm3461_vm5, 65537, %v13166_v16  ;;  %v3989_v22 = vsel %vm3477_vm8, 65537, %v13166_v16 }
 0x3ae   :  { %vm12658_vm15 = vmpackc.low %vm5810_vm6, %vm5778_vm7  ;;  %vm913_vm11 = vcmp.eq.bf16.partialorder %v13855_v37, %v17256_v27  ;;  %vm914_vm0 = vcmp.eq.bf16.partialorder %v13855_v37, %v17259_v9  ;;  %v4815_v46 = vunpack.c.l.b16 %v3973_v11  ;;  %v4816_v45 = vunpack.c.h.b16 %v3973_v11 }
 0x3af   :  { %12659 = vmatprep.subr.msk.bf16.mxu1 %vm12658_vm15, %v13167_v48  ;;  %vm12660_vm4 = vmpackc.low %vm5809_vm3, %vm5777_vm1  ;;  %v4847_v10 = vunpack.c.l.b16 %v3989_v22  ;;  %v4848_v50 = vunpack.c.h.b16 %v3989_v22  ;;  %v1425_v49 = vsel %vm913_vm11, 65537, %v13166_v16  ;;  %v1426_v13 = vsel %vm914_vm0, 65537, %v13166_v16 }
 0x3b0   :  { %12661 = vmatpush1.bf16.msk.msra.mxu1 %vm12660_vm4, %v13167_v48  ;;  %vm943_vm10 = vcmp.eq.bf16.partialorder %v13896_v54, %v17235_v61  ;;  %vm944_vm9 = vcmp.eq.bf16.partialorder %v13896_v54, %v17242_v62  ;;  %vm5840_vm2 = vcmp.ne.s32.totalorder %v4816_v45, 0  ;;  %v10711_v8 = vcombine.low %v1425_v49, %v1426_v13 }
 0x3b1   :  { %vm5872_vm12 = vcmp.ne.s32.totalorder %v4848_v50, 0  ;;  %v10727_v51 = vcombine.high %v1425_v49, %v1426_v13  ;;  %vm5839_vm5 = vcmp.ne.s32.totalorder %v4815_v46, 0  ;;  %vm5871_vm8 = vcmp.ne.s32.totalorder %v4847_v10, 0 }
 0x3b2   :  { %vm12598_vm13 = vmpackc.low %vm5872_vm12, %vm5840_vm2  ;;  %v1455_v34 = vsel %vm943_vm10, 65537, %v13166_v16  ;;  %v1456_v19 = vsel %vm944_vm9, 65537, %v13166_v16  ;;  %vm3462_vm7 = vcmp.ne.s16.totalorder %v10711_v8, 0  ;;  %vm945_vm1 = vcmp.eq.bf16.partialorder %v13896_v54, %v17256_v27 }
 0x3b3   :  { %12599 = vmatprep.subr.msk.bf16.mxu0 %vm12598_vm13, %v13167_v48  ;;  %vm3478_vm6 = vcmp.ne.s16.totalorder %v10727_v51, 0  ;;  %vm12600_vm14 = vmpackc.low %vm5871_vm8, %vm5839_vm5  ;;  %v10742_v60 = vcombine.low %v1455_v34, %v1456_v19  ;;  %v10758_v3 = vcombine.high %v1455_v34, %v1456_v19  ;;  %v3974_v63 = vsel %vm3462_vm7, 65537, %v13166_v16 }
 0x3b4   :  { %v3990_v59 = vsel %vm3478_vm6, 65537, %v13166_v16  ;;  %12601 = vmatpush1.bf16.msk.msra.mxu0 %vm12600_vm14, %v13167_v48  ;;  %vm946_vm3 = vcmp.eq.bf16.partialorder %v13896_v54, %v17259_v9  ;;  %v4817_v38 = vunpack.c.l.b16 %v3974_v63  ;;  %v4818_v35 = vunpack.c.h.b16 %v3974_v63 }
 0x3b5   :  { %v4849_v11 = vunpack.c.l.b16 %v3990_v59  ;;  %v4850_v22 = vunpack.c.h.b16 %v3990_v59  ;;  %vm3493_vm15 = vcmp.ne.s16.totalorder %v10742_v60, 0  ;;  %vm3509_vm11 = vcmp.ne.s16.totalorder %v10758_v3, 0 }
 0x3b6   :  { %v1457_v46 = vsel %vm945_vm1, 65537, %v13166_v16  ;;  %v1458_v45 = vsel %vm946_vm3, 65537, %v13166_v16  ;;  %vm5842_vm0 = vcmp.ne.s32.totalorder %v4818_v35, 0  ;;  %vm5841_vm10 = vcmp.ne.s32.totalorder %v4817_v38, 0 }
 0x3b7   :  { %vm5874_vm4 = vcmp.ne.s32.totalorder %v4850_v22, 0  ;;  %vm5873_vm9 = vcmp.ne.s32.totalorder %v4849_v11, 0  ;;  %v4005_v10 = vsel %vm3493_vm15, 65537, %v13166_v16  ;;  %v4021_v50 = vsel %vm3509_vm11, 65537, %v13166_v16 }
 0x3b8   :  { %vm12662_vm2 = vmpackc.low %vm5874_vm4, %vm5842_vm0  ;;  %v10743_v49 = vcombine.low %v1457_v46, %v1458_v45  ;;  %v10759_v13 = vcombine.high %v1457_v46, %v1458_v45  ;;  %v4879_v8 = vunpack.c.l.b16 %v4005_v10  ;;  %v4880_v51 = vunpack.c.h.b16 %v4005_v10 }
 0x3b9   :  { %12663 = vmatprep.subr.msk.bf16.mxu1 %vm12662_vm2, %v13167_v48  ;;  %vm12664_vm12 = vmpackc.low %vm5873_vm9, %vm5841_vm10  ;;  %v4911_v34 = vunpack.c.l.b16 %v4021_v50  ;;  %v4912_v19 = vunpack.c.h.b16 %v4021_v50  ;;  %vm975_vm8 = vcmp.eq.bf16.partialorder %v13947_v15, %v17235_v61  ;;  %vm976_vm7 = vcmp.eq.bf16.partialorder %v13947_v15, %v17242_v62 }
 0x3ba   :  { %12665 = vmatpush1.bf16.msk.msra.mxu1 %vm12664_vm12, %v13167_v48  ;;  %vm3494_vm13 = vcmp.ne.s16.totalorder %v10743_v49, 0  ;;  %vm3510_vm5 = vcmp.ne.s16.totalorder %v10759_v13, 0  ;;  %vm5904_vm6 = vcmp.ne.s32.totalorder %v4880_v51, 0  ;;  %vm5903_vm3 = vcmp.ne.s32.totalorder %v4879_v8, 0 }
 0x3bb   :  { %vm5936_vm14 = vcmp.ne.s32.totalorder %v4912_v19, 0  ;;  %v4006_v60 = vsel %vm3494_vm13, 65537, %v13166_v16  ;;  %v4022_v3 = vsel %vm3510_vm5, 65537, %v13166_v16  ;;  %vm5935_vm15 = vcmp.ne.s32.totalorder %v4911_v34, 0 }
 0x3bc   :  { %vm12602_vm1 = vmpackc.low %vm5936_vm14, %vm5904_vm6  ;;  %v4881_v63 = vunpack.c.l.b16 %v4006_v60  ;;  %v4882_v59 = vunpack.c.h.b16 %v4006_v60  ;;  %v4913_v38 = vunpack.c.l.b16 %v4022_v3  ;;  %v4914_v35 = vunpack.c.h.b16 %v4022_v3 }
 0x3bd   :  { %12603 = vmatprep.subr.msk.bf16.mxu0 %vm12602_vm1, %v13167_v48  ;;  %v1487_v11 = vsel %vm975_vm8, 65537, %v13166_v16  ;;  %v1488_v22 = vsel %vm976_vm7, 65537, %v13166_v16  ;;  %vm12604_vm4 = vmpackc.low %vm5935_vm15, %vm5903_vm3  ;;  %vm977_vm12 = vcmp.eq.bf16.partialorder %v13947_v15, %v17256_v27  ;;  %vm978_vm13 = vcmp.eq.bf16.partialorder %v13947_v15, %v17259_v9 }
 0x3be   :  { %vm5906_vm11 = vcmp.ne.s32.totalorder %v4882_v59, 0  ;;  %vm5938_vm0 = vcmp.ne.s32.totalorder %v4914_v35, 0  ;;  %vm5905_vm10 = vcmp.ne.s32.totalorder %v4881_v63, 0  ;;  %vm5937_vm9 = vcmp.ne.s32.totalorder %v4913_v38, 0  ;;  %12605 = vmatpush1.bf16.msk.msra.mxu0 %vm12604_vm4, %v13167_v48 }
 0x3bf   :  { %vm12666_vm2 = vmpackc.low %vm5938_vm0, %vm5906_vm11  ;;  %v10774_v46 = vcombine.low %v1487_v11, %v1488_v22  ;;  %v10790_v45 = vcombine.high %v1487_v11, %v1488_v22  ;;  %v1489_v10 = vsel %vm977_vm12, 65537, %v13166_v16  ;;  %v1490_v50 = vsel %vm978_vm13, 65537, %v13166_v16 }
 0x3c0   :  { %12667 = vmatprep.subr.msk.bf16.mxu1 %vm12666_vm2, %v13167_v48  ;;  %vm12668_vm5 = vmpackc.low %vm5937_vm9, %vm5905_vm10  ;;  %vm1007_vm8 = vcmp.eq.bf16.partialorder %v13949_v44, %v17235_v61  ;;  %vm1008_vm7 = vcmp.eq.bf16.partialorder %v13949_v44, %v17242_v62  ;;  %v10775_v49 = vcombine.low %v1489_v10, %v1490_v50  ;;  %v10791_v13 = vcombine.high %v1489_v10, %v1490_v50 }
 0x3c1   :  { %12669 = vmatpush1.bf16.msk.msra.mxu1 %vm12668_vm5, %v13167_v48  ;;  %vm3525_vm6 = vcmp.ne.s16.totalorder %v10774_v46, 0  ;;  %vm3541_vm14 = vcmp.ne.s16.totalorder %v10790_v45, 0  ;;  %v1519_v34 = vsel %vm1007_vm8, 65537, %v13166_v16  ;;  %v1520_v19 = vsel %vm1008_vm7, 65537, %v13166_v16 }
 0x3c2   :  { %v4037_v8 = vsel %vm3525_vm6, 65537, %v13166_v16  ;;  %v4053_v51 = vsel %vm3541_vm14, 65537, %v13166_v16  ;;  %vm3526_vm1 = vcmp.ne.s16.totalorder %v10775_v49, 0  ;;  %vm3542_vm3 = vcmp.ne.s16.totalorder %v10791_v13, 0 }
 0x3c3   :  { %v4943_v60 = vunpack.c.l.b16 %v4037_v8  ;;  %v4944_v3 = vunpack.c.h.b16 %v4037_v8  ;;  %v4975_v63 = vunpack.c.l.b16 %v4053_v51  ;;  %v4976_v59 = vunpack.c.h.b16 %v4053_v51 }
 0x3c4   :  { %v10806_v38 = vcombine.low %v1519_v34, %v1520_v19  ;;  %v10822_v35 = vcombine.high %v1519_v34, %v1520_v19  ;;  %v4038_v11 = vsel %vm3526_vm1, 65537, %v13166_v16  ;;  %v4054_v22 = vsel %vm3542_vm3, 65537, %v13166_v16 }
 0x3c5   :  { %vm5968_vm15 = vcmp.ne.s32.totalorder %v4944_v3, 0  ;;  %vm6000_vm11 = vcmp.ne.s32.totalorder %v4976_v59, 0  ;;  %v4945_v46 = vunpack.c.l.b16 %v4038_v11  ;;  %v4946_v45 = vunpack.c.h.b16 %v4038_v11 }
 0x3c6   :  { %vm12606_vm0 = vmpackc.low %vm6000_vm11, %vm5968_vm15  ;;  %v4977_v10 = vunpack.c.l.b16 %v4054_v22  ;;  %v4978_v50 = vunpack.c.h.b16 %v4054_v22  ;;  %vm5967_vm4 = vcmp.ne.s32.totalorder %v4943_v60, 0  ;;  %vm5999_vm10 = vcmp.ne.s32.totalorder %v4975_v63, 0 }
 0x3c7   :  { %12607 = vmatprep.subr.msk.bf16.mxu0 %vm12606_vm0, %v13167_v48  ;;  %vm3557_vm9 = vcmp.ne.s16.totalorder %v10806_v38, 0  ;;  %vm3573_vm2 = vcmp.ne.s16.totalorder %v10822_v35, 0  ;;  %vm5970_vm12 = vcmp.ne.s32.totalorder %v4946_v45, 0  ;;  %vm12608_vm5 = vmpackc.low %vm5999_vm10, %vm5967_vm4  ;;  %vm5969_vm8 = vcmp.ne.s32.totalorder %v4945_v46, 0 }
 0x3c8   :  { %vm6002_vm13 = vcmp.ne.s32.totalorder %v4978_v50, 0  ;;  %vm6001_vm7 = vcmp.ne.s32.totalorder %v4977_v10, 0  ;;  %12609 = vmatpush1.bf16.msk.msra.mxu0 %vm12608_vm5, %v13167_v48  ;;  %v4069_v49 = vsel %vm3557_vm9, 65537, %v13166_v16  ;;  %v4085_v13 = vsel %vm3573_vm2, 65537, %v13166_v16 }
 0x3c9   :  { %vm12670_vm6 = vmpackc.low %vm6002_vm13, %vm5970_vm12  ;;  %vm1009_vm14 = vcmp.eq.bf16.partialorder %v13949_v44, %v17256_v27  ;;  %vm1010_vm1 = vcmp.eq.bf16.partialorder %v13949_v44, %v17259_v9  ;;  %v5007_v8 = vunpack.c.l.b16 %v4069_v49  ;;  %v5008_v51 = vunpack.c.h.b16 %v4069_v49 }
 0x3ca   :  { %12671 = vmatprep.subr.msk.bf16.mxu1 %vm12670_vm6, %v13167_v48  ;;  %vm12672_vm3 = vmpackc.low %vm6001_vm7, %vm5969_vm8  ;;  %v5039_v34 = vunpack.c.l.b16 %v4085_v13  ;;  %v5040_v19 = vunpack.c.h.b16 %v4085_v13  ;;  %v1521_v60 = vsel %vm1009_vm14, 65537, %v13166_v16  ;;  %v1522_v3 = vsel %vm1010_vm1, 65537, %v13166_v16 }
 0x3cb   :  { %12673 = vmatpush1.bf16.msk.msra.mxu1 %vm12672_vm3, %v13167_v48  ;;  %vm1039_vm15 = vcmp.eq.bf16.partialorder %v14056_v0, %v17235_v61  ;;  %vm1040_vm11 = vcmp.eq.bf16.partialorder %v14056_v0, %v17242_v62  ;;  %vm6032_vm0 = vcmp.ne.s32.totalorder %v5008_v51, 0  ;;  %v10807_v63 = vcombine.low %v1521_v60, %v1522_v3 }
 0x3cc   :  { %vm6064_vm4 = vcmp.ne.s32.totalorder %v5040_v19, 0  ;;  %v10823_v59 = vcombine.high %v1521_v60, %v1522_v3  ;;  %vm6031_vm9 = vcmp.ne.s32.totalorder %v5007_v8, 0  ;;  %vm6063_vm2 = vcmp.ne.s32.totalorder %v5039_v34, 0 }
 0x3cd   :  { %vm12610_vm10 = vmpackc.low %vm6064_vm4, %vm6032_vm0  ;;  %v1551_v38 = vsel %vm1039_vm15, 65537, %v13166_v16  ;;  %v1552_v35 = vsel %vm1040_vm11, 65537, %v13166_v16  ;;  %vm3558_vm12 = vcmp.ne.s16.totalorder %v10807_v63, 0  ;;  %vm1041_vm8 = vcmp.eq.bf16.partialorder %v14056_v0, %v17256_v27 }
 0x3ce   :  { %12611 = vmatprep.subr.msk.bf16.mxu0 %vm12610_vm10, %v13167_v48  ;;  %vm3574_vm13 = vcmp.ne.s16.totalorder %v10823_v59, 0  ;;  %vm12612_vm5 = vmpackc.low %vm6063_vm2, %vm6031_vm9  ;;  %v10838_v11 = vcombine.low %v1551_v38, %v1552_v35  ;;  %v10854_v22 = vcombine.high %v1551_v38, %v1552_v35  ;;  %v4070_v46 = vsel %vm3558_vm12, 65537, %v13166_v16 }
 0x3cf   :  { %v4086_v45 = vsel %vm3574_vm13, 65537, %v13166_v16  ;;  %12613 = vmatpush1.bf16.msk.msra.mxu0 %vm12612_vm5, %v13167_v48  ;;  %vm1042_vm7 = vcmp.eq.bf16.partialorder %v14056_v0, %v17259_v9  ;;  %v5009_v10 = vunpack.c.l.b16 %v4070_v46  ;;  %v5010_v50 = vunpack.c.h.b16 %v4070_v46 }
 0x3d0   :  { %v5041_v49 = vunpack.c.l.b16 %v4086_v45  ;;  %v5042_v13 = vunpack.c.h.b16 %v4086_v45  ;;  %vm3589_vm6 = vcmp.ne.s16.totalorder %v10838_v11, 0  ;;  %vm3605_vm14 = vcmp.ne.s16.totalorder %v10854_v22, 0 }
 0x3d1   :  { %v1553_v8 = vsel %vm1041_vm8, 65537, %v13166_v16  ;;  %v1554_v51 = vsel %vm1042_vm7, 65537, %v13166_v16  ;;  %vm6034_vm1 = vcmp.ne.s32.totalorder %v5010_v50, 0  ;;  %vm6033_vm15 = vcmp.ne.s32.totalorder %v5009_v10, 0 }
 0x3d2   :  { %vm6066_vm3 = vcmp.ne.s32.totalorder %v5042_v13, 0  ;;  %vm6065_vm11 = vcmp.ne.s32.totalorder %v5041_v49, 0  ;;  %v4101_v34 = vsel %vm3589_vm6, 65537, %v13166_v16  ;;  %v4117_v19 = vsel %vm3605_vm14, 65537, %v13166_v16 }
 0x3d3   :  { %vm12674_vm0 = vmpackc.low %vm6066_vm3, %vm6034_vm1  ;;  %v10839_v60 = vcombine.low %v1553_v8, %v1554_v51  ;;  %v10855_v3 = vcombine.high %v1553_v8, %v1554_v51  ;;  %v5071_v63 = vunpack.c.l.b16 %v4101_v34  ;;  %v5072_v59 = vunpack.c.h.b16 %v4101_v34 }
 0x3d4   :  { %12675 = vmatprep.subr.msk.bf16.mxu1 %vm12674_vm0, %v13167_v48  ;;  %vm12676_vm4 = vmpackc.low %vm6065_vm11, %vm6033_vm15  ;;  %v5103_v38 = vunpack.c.l.b16 %v4117_v19  ;;  %v5104_v35 = vunpack.c.h.b16 %v4117_v19  ;;  %vm1071_vm2 = vcmp.eq.bf16.partialorder %v14132_v25, %v17235_v61  ;;  %vm1072_vm12 = vcmp.eq.bf16.partialorder %v14132_v25, %v17242_v62  ;;  %v13059_v19 = vld [vmem:[#allocation2] sm:$0xff] }
 0x3d5   :  { %12677 = vmatpush1.bf16.msk.msra.mxu1 %vm12676_vm4, %v13167_v48  ;;  %vm3590_vm10 = vcmp.ne.s16.totalorder %v10839_v60, 0  ;;  %vm3606_vm9 = vcmp.ne.s16.totalorder %v10855_v3, 0  ;;  %vm6096_vm13 = vcmp.ne.s32.totalorder %v5072_v59, 0  ;;  %vm6095_vm7 = vcmp.ne.s32.totalorder %v5071_v63, 0 }
 0x3d6   :  { %vm6128_vm5 = vcmp.ne.s32.totalorder %v5104_v35, 0  ;;  %v4102_v11 = vsel %vm3590_vm10, 65537, %v13166_v16  ;;  %v4118_v22 = vsel %vm3606_vm9, 65537, %v13166_v16  ;;  %vm6127_vm6 = vcmp.ne.s32.totalorder %v5103_v38, 0 }
 0x3d7   :  { %vm12614_vm8 = vmpackc.low %vm6128_vm5, %vm6096_vm13  ;;  %v5073_v46 = vunpack.c.l.b16 %v4102_v11  ;;  %v5074_v45 = vunpack.c.h.b16 %v4102_v11  ;;  %v5105_v10 = vunpack.c.l.b16 %v4118_v22  ;;  %v5106_v50 = vunpack.c.h.b16 %v4118_v22 }
 0x3d8   :  { %12615 = vmatprep.subr.msk.bf16.mxu0 %vm12614_vm8, %v13167_v48  ;;  %v1583_v61 = vsel %vm1071_vm2, 65537, %v13166_v16  ;;  %v1584_v49 = vsel %vm1072_vm12, 65537, %v13166_v16  ;;  %vm12616_vm3 = vmpackc.low %vm6127_vm6, %vm6095_vm7  ;;  %vm1073_vm4 = vcmp.eq.bf16.partialorder %v14132_v25, %v17256_v27  ;;  %vm1074_vm10 = vcmp.eq.bf16.partialorder %v14132_v25, %v17259_v9 }
 0x3d9   :  { %vm6098_vm14 = vcmp.ne.s32.totalorder %v5074_v45, 0  ;;  %vm6130_vm1 = vcmp.ne.s32.totalorder %v5106_v50, 0  ;;  %vm17710_vm15 = vcmp.ne.s32.totalorder %v5073_v46, 0  ;;  %vm6129_vm11 = vcmp.ne.s32.totalorder %v5105_v10, 0  ;;  %12617 = vmatpush1.bf16.msk.msra.mxu0 %vm12616_vm3, %v13167_v48 }
 0x3da   :  { %vm12678_vm0 = vmpackc.low %vm6130_vm1, %vm6098_vm14  ;;  %v10870_v13 = vcombine.low %v1583_v61, %v1584_v49  ;;  %v10886_v8 = vcombine.high %v1583_v61, %v1584_v49  ;;  %v1585_v51 = vsel %vm1073_vm4, 65537, %v13166_v16  ;;  %v1586_v34 = vsel %vm1074_vm10, 65537, %v13166_v16 }
 0x3db   :  { %12679 = vmatprep.subr.msk.bf16.mxu1 %vm12678_vm0, %v13167_v48  ;;  %vm12680_vm9 = vmpackc.low %vm6129_vm11, %vm17710_vm15  ;;  %v61_v60 = vunpack.c.3.s8 %v13059_v19  ;;  %v9471_v3 = vrot.slane %v17559_v14, 1  ;;  %v10871_v27 = vcombine.low %v1585_v51, %v1586_v34  ;;  %v10887_v63 = vcombine.high %v1585_v51, %v1586_v34 }
 0x3dc   :  { %12681 = vmatpush1.bf16.msk.msra.mxu1 %vm12680_vm9, %v13167_v48  ;;  %vm3621_vm2 = vcmp.ne.s16.totalorder %v10870_v13, 0  ;;  %vm3637_vm12 = vcmp.ne.s16.totalorder %v10886_v8, 0  ;;  %v9567_v50 = vrot.slane %v17559_v14, 2 }
 0x3dd   :  { %v4133_v9 = vsel %vm3621_vm2, 65537, %v13166_v16  ;;  %v4149_v59 = vsel %vm3637_vm12, 65537, %v13166_v16  ;;  %v65_v38 = vand.u32 255, %v61_v60  ;;  %v9535_v35 = vadd.f32 %v9471_v3, %v17559_v14 }
 0x3de   :  { %v5135_v11 = vunpack.c.l.b16 %v4133_v9  ;;  %v5136_v22 = vunpack.c.h.b16 %v4133_v9  ;;  %v5167_v46 = vunpack.c.l.b16 %v4149_v59  ;;  %v5168_v45 = vunpack.c.h.b16 %v4149_v59 }
 0x3df   :  { %vm3622_vm13 = vcmp.ne.s16.totalorder %v10871_v27, 0  ;;  %vm3638_vm5 = vcmp.ne.s16.totalorder %v10887_v63, 0  ;;  %v17729_v10 = vcvt.s32.f32 %v65_v38  ;;  %v9473_v9 = vrot.slane %v17561_v58, 1 }
 0x3e0   :  { %vm6160_vm8 = vcmp.ne.s32.totalorder %v5136_v22, 0  ;;  %vm6192_vm7 = vcmp.ne.s32.totalorder %v5168_v45, 0  ;;  %v4134_v61 = vsel %vm3622_vm13, 65537, %v13166_v16  ;;  %v4150_v49 = vsel %vm3638_vm5, 65537, %v13166_v16  ;;  %v13060_v45 = vld [vmem:[#allocation5] ss:$8 sps:$4 sm:$0xff]  }
 0x3e1   :  { %vm12618_vm6 = vmpackc.low %vm6192_vm7, %vm6160_vm8  ;;  %v5137_v62 = vunpack.c.l.b16 %v4134_v61  ;;  %v5138_v13 = vunpack.c.h.b16 %v4134_v61  ;;  %v5169_v8 = vunpack.c.l.b16 %v4150_v49  ;;  %v5170_v51 = vunpack.c.h.b16 %v4150_v49 }
 0x3e2   :  { %12619 = vmatprep.subr.msk.bf16.mxu0 %vm12618_vm6, %v13167_v48  ;;  %vm6159_vm14 = vcmp.ne.s32.totalorder %v5135_v11, 0  ;;  %vm6191_vm1 = vcmp.ne.s32.totalorder %v5167_v46, 0  ;;  %v254_v34 = vrot.slane %v17729_v10, %v13231_v4  ;;  %v258_v19 = vrot.slane %v17729_v10, %v13234_v5 }
 0x3e3   :  { %vm6162_vm3 = vcmp.ne.s32.totalorder %v5138_v13, 0  ;;  %vm6194_vm15 = vcmp.ne.s32.totalorder %v5170_v51, 0  ;;  %vm12620_vm11 = vmpackc.low %vm6191_vm1, %vm6159_vm14  ;;  %vm6161_vm0 = vcmp.ne.s32.totalorder %v5137_v62, 0  ;;  %vm6193_vm4 = vcmp.ne.s32.totalorder %v5169_v8, 0  ;;  %v13061_v51 = vld [vmem:[#allocation5 + $0x4] ss:$8 sps:$4 sm:$0xff]  }
 0x3e4   :  { %vm12682_vm10 = vmpackc.low %vm6194_vm15, %vm6162_vm3  ;;  %12621 = vmatpush1.bf16.msk.msra.mxu0 %vm12620_vm11, %v13167_v48  ;;  %v339_v60 = vpack.c.bf16 %v254_v34, %v254_v34  ;;  %v340_v3 = vpack.c.bf16 %v258_v19, %v258_v19  ;;  %v262_v27 = vrot.slane %v17729_v10, %v13237_v6  ;;  %v266_v63 = vrot.slane %v17729_v10, %v13240_v7 }
 0x3e5   :  { %12683 = vmatprep.subr.msk.bf16.mxu1 %vm12682_vm10, %v13167_v48  ;;  %vm12684_vm9 = vmpackc.low %vm6193_vm4, %vm6161_vm0  ;;  %v17745_v5 = vadd.f32 %v9567_v50, %v9535_v35  ;;  %v9569_v59 = vrot.slane %v17561_v58, 2  ;;  %v9472_v38 = vrot.slane %v17565_v43, 1  ;;  %v9537_v7 = vadd.f32 %v9473_v9, %v17561_v58 }
 0x3e6   :  { %12685 = vmatpush1.bf16.msk.msra.mxu1 %vm12684_vm9, %v13167_v48  ;;  %v516_v11 = vpack.i.b16 %v339_v60, %v339_v60  ;;  %v523_v22 = vpack.i.b16 %v340_v3, %v340_v3  ;;  %v341_v46 = vpack.c.bf16 %v262_v27, %v262_v27  ;;  %v342_v6 = vpack.c.bf16 %v266_v63, %v266_v63 }
 0x3e7   :  { %9218 = vmatmul.mubr.bf16.vlgmr.msra.gmra.mrb[20].mxu0 %v13060_v45  ;;  %v9536_v61 = vadd.f32 %v9472_v38, %v17565_v43  ;;  %v9568_v35 = vrot.slane %v17565_v43, 2  ;;  %v9936_v50 = vcombine.low %v17559_v14, %v17565_v43  ;;  %v17762_v34 = vadd.f32 %v9569_v59, %v9537_v7 }
 0x3e8   :  { %v17757_v49 = vrot.slane %v516_v11, %v13231_v4  ;;  %v17760_v62 = vrot.slane %v523_v22, %v13231_v4  ;;  %v530_v13 = vpack.i.b16 %v341_v46, %v341_v46  ;;  %v537_v8 = vpack.i.b16 %v342_v6, %v342_v6  ;;  %9299 = vmatprep.mubr.bf16.mxu0 %v13061_v51 }
 0x3e9   :  { %9259 = vmatmul.mubr.bf16.vlgmr.msra.gmra.mrb[20].mxu1 %v13060_v45  ;;  %v17764_v19 = vadd.f32 %v9568_v35, %v9536_v61  ;;  %v17767_v60 = vrot.slane %v9936_v50, %v16561_v41  ;;  %v9474_v14 = vrot.slane %v17567_v36, 1 }
 0x3ea   :  { %vm595_vm2 = vcmp.eq.bf16.partialorder %v13249_v20, %v17757_v49  ;;  %vm596_vm12 = vcmp.eq.bf16.partialorder %v13249_v20, %v17760_v62  ;;  %v17775_v43 = vrot.slane %v530_v13, %v13231_v4  ;;  %v17778_v3 = vrot.slane %v537_v8, %v13231_v4  ;;  %9340 = vmatprep.mubr.bf16.mxu1 %v13061_v51 }
 0x3eb   :  { %v1107_v27 = vsel %vm595_vm2, 65537, %v13166_v16  ;;  %v1108_v63 = vsel %vm596_vm12, 65537, %v13166_v16  ;;  %vm627_vm13 = vcmp.eq.bf16.partialorder %v13251_v23, %v17757_v49  ;;  %vm628_vm5 = vcmp.eq.bf16.partialorder %v13251_v23, %v17760_v62 }
 0x3ec   :  { %v10392_v9 = vcombine.low %v1107_v27, %v1108_v63  ;;  %v10408_v59 = vcombine.high %v1107_v27, %v1108_v63  ;;  %vm597_vm8 = vcmp.eq.bf16.partialorder %v13249_v20, %v17775_v43  ;;  %vm598_vm7 = vcmp.eq.bf16.partialorder %v13249_v20, %v17778_v3 }
 0x3ed   :  { %v1109_v38 = vsel %vm597_vm8, 65537, %v13166_v16  ;;  %v1110_v11 = vsel %vm598_vm7, 65537, %v13166_v16  ;;  %v1139_v22 = vsel %vm627_vm13, 65537, %v13166_v16  ;;  %v1140_v46 = vsel %vm628_vm5, 65537, %v13166_v16 }
 0x3ee   :  { %vm3143_vm6 = vcmp.ne.s16.totalorder %v10392_v9, 0  ;;  %vm3159_vm14 = vcmp.ne.s16.totalorder %v10408_v59, 0  ;;  %v10393_v6 = vcombine.low %v1109_v38, %v1110_v11  ;;  %v10409_v45 = vcombine.high %v1109_v38, %v1110_v11 }
 0x3ef   :  { %v3655_v7 = vsel %vm3143_vm6, 65537, %v13166_v16  ;;  %v3671_v61 = vsel %vm3159_vm14, 65537, %v13166_v16  ;;  %v10424_v35 = vcombine.low %v1139_v22, %v1140_v46  ;;  %v10440_v50 = vcombine.high %v1139_v22, %v1140_v46 }
 0x3f0   :  { %v4179_v13 = vunpack.c.l.b16 %v3655_v7  ;;  %v4180_v8 = vunpack.c.h.b16 %v3655_v7  ;;  %v4211_v51 = vunpack.c.l.b16 %v3671_v61  ;;  %v4212_v27 = vunpack.c.h.b16 %v3671_v61 }
 0x3f1   :  { %vm3144_vm1 = vcmp.ne.s16.totalorder %v10393_v6, 0  ;;  %vm3160_vm3 = vcmp.ne.s16.totalorder %v10409_v45, 0  ;;  %vm3175_vm15 = vcmp.ne.s16.totalorder %v10424_v35, 0  ;;  %vm3191_vm11 = vcmp.ne.s16.totalorder %v10440_v50, 0 }
 0x3f2   :  { %vm5204_vm0 = vcmp.ne.s32.totalorder %v4180_v8, 0  ;;  %vm5236_vm4 = vcmp.ne.s32.totalorder %v4212_v27, 0  ;;  %v3656_v63 = vsel %vm3144_vm1, 65537, %v13166_v16  ;;  %v3672_v9 = vsel %vm3160_vm3, 65537, %v13166_v16 }
 0x3f3   :  { %vm12686_vm10 = vmpackc.low %vm5236_vm4, %vm5204_vm0  ;;  %v4181_v59 = vunpack.c.l.b16 %v3656_v63  ;;  %v4182_v38 = vunpack.c.h.b16 %v3656_v63  ;;  %v4213_v11 = vunpack.c.l.b16 %v3672_v9  ;;  %v4214_v52 = vunpack.c.h.b16 %v3672_v9 }
 0x3f4   :  { %12687 = vmatprep.subr.msk.bf16.mxu0 %vm12686_vm10, %v13167_v48  ;;  %vm5203_vm9 = vcmp.ne.s32.totalorder %v4179_v13, 0  ;;  %vm5235_vm2 = vcmp.ne.s32.totalorder %v4211_v51, 0  ;;  %v3687_v22 = vsel %vm3175_vm15, 65537, %v13166_v16  ;;  %v3703_v46 = vsel %vm3191_vm11, 65537, %v13166_v16 }
 0x3f5   :  { %vm5206_vm12 = vcmp.ne.s32.totalorder %v4182_v38, 0  ;;  %vm5238_vm13 = vcmp.ne.s32.totalorder %v4214_v52, 0  ;;  %vm12688_vm5 = vmpackc.low %vm5235_vm2, %vm5203_vm9  ;;  %vm5205_vm8 = vcmp.ne.s32.totalorder %v4181_v59, 0  ;;  %vm5237_vm7 = vcmp.ne.s32.totalorder %v4213_v11, 0 }
 0x3f6   :  { %vm12750_vm6 = vmpackc.low %vm5238_vm13, %vm5206_vm12  ;;  %12689 = vmatpush1.bf16.msk.msra.mxu0 %vm12688_vm5, %v13167_v48  ;;  %v4243_v6 = vunpack.c.l.b16 %v3687_v22  ;;  %v4244_v45 = vunpack.c.h.b16 %v3687_v22  ;;  %v4275_v7 = vunpack.c.l.b16 %v3703_v46  ;;  %v4276_v61 = vunpack.c.h.b16 %v3703_v46 }
 0x3f7   :  { %12751 = vmatprep.subr.msk.bf16.mxu1 %vm12750_vm6, %v13167_v48  ;;  %vm12752_vm14 = vmpackc.low %vm5237_vm7, %vm5205_vm8  ;;  %vm629_vm1 = vcmp.eq.bf16.partialorder %v13251_v23, %v17775_v43  ;;  %vm630_vm3 = vcmp.eq.bf16.partialorder %v13251_v23, %v17778_v3  ;;  %vm659_vm15 = vcmp.eq.bf16.partialorder %v13254_v28, %v17757_v49  ;;  %vm660_vm11 = vcmp.eq.bf16.partialorder %v13254_v28, %v17760_v62 }
 0x3f8   :  { %12753 = vmatpush1.bf16.msk.msra.mxu1 %vm12752_vm14, %v13167_v48  ;;  %vm5268_vm0 = vcmp.ne.s32.totalorder %v4244_v45, 0  ;;  %vm5300_vm4 = vcmp.ne.s32.totalorder %v4276_v61, 0  ;;  %v1141_v52 = vsel %vm629_vm1, 65537, %v13166_v16  ;;  %v1142_v35 = vsel %vm630_vm3, 65537, %v13166_v16 }
 0x3f9   :  { %vm12690_vm10 = vmpackc.low %vm5300_vm4, %vm5268_vm0  ;;  %v10425_v50 = vcombine.low %v1141_v52, %v1142_v35  ;;  %v10441_v13 = vcombine.high %v1141_v52, %v1142_v35  ;;  %vm5267_vm9 = vcmp.ne.s32.totalorder %v4243_v6, 0  ;;  %vm5299_vm2 = vcmp.ne.s32.totalorder %v4275_v7, 0 }
 0x3fa   :  { %12691 = vmatprep.subr.msk.bf16.mxu0 %vm12690_vm10, %v13167_v48  ;;  %vm12692_vm12 = vmpackc.low %vm5299_vm2, %vm5267_vm9  ;;  %v1171_v8 = vsel %vm659_vm15, 65537, %v13166_v16  ;;  %v1172_v51 = vsel %vm660_vm11, 65537, %v13166_v16  ;;  %vm661_vm13 = vcmp.eq.bf16.partialorder %v13254_v28, %v17775_v43  ;;  %vm662_vm5 = vcmp.eq.bf16.partialorder %v13254_v28, %v17778_v3 }
 0x3fb   :  { %vm3176_vm8 = vcmp.ne.s16.totalorder %v10425_v50, 0  ;;  %vm3192_vm7 = vcmp.ne.s16.totalorder %v10441_v13, 0  ;;  %12693 = vmatpush1.bf16.msk.msra.mxu0 %vm12692_vm12, %v13167_v48  ;;  %v10456_v27 = vcombine.low %v1171_v8, %v1172_v51  ;;  %v10472_v63 = vcombine.high %v1171_v8, %v1172_v51 }
 0x3fc   :  { %v3688_v9 = vsel %vm3176_vm8, 65537, %v13166_v16  ;;  %v3704_v59 = vsel %vm3192_vm7, 65537, %v13166_v16  ;;  %v1173_v38 = vsel %vm661_vm13, 65537, %v13166_v16  ;;  %v1174_v11 = vsel %vm662_vm5, 65537, %v13166_v16 }
 0x3fd   :  { %v4245_v22 = vunpack.c.l.b16 %v3688_v9  ;;  %v4246_v46 = vunpack.c.h.b16 %v3688_v9  ;;  %v4277_v6 = vunpack.c.l.b16 %v3704_v59  ;;  %v4278_v45 = vunpack.c.h.b16 %v3704_v59 }
 0x3fe   :  { %vm3207_vm6 = vcmp.ne.s16.totalorder %v10456_v27, 0  ;;  %vm3223_vm14 = vcmp.ne.s16.totalorder %v10472_v63, 0  ;;  %v10457_v7 = vcombine.low %v1173_v38, %v1174_v11  ;;  %v10473_v61 = vcombine.high %v1173_v38, %v1174_v11 }
 0x3ff   :  { %vm5270_vm1 = vcmp.ne.s32.totalorder %v4246_v46, 0  ;;  %vm5302_vm3 = vcmp.ne.s32.totalorder %v4278_v45, 0  ;;  %vm5269_vm15 = vcmp.ne.s32.totalorder %v4245_v22, 0  ;;  %vm5301_vm11 = vcmp.ne.s32.totalorder %v4277_v6, 0 }
 0x400   :  { %vm12754_vm0 = vmpackc.low %vm5302_vm3, %vm5270_vm1  ;;  %v3719_v52 = vsel %vm3207_vm6, 65537, %v13166_v16  ;;  %v3735_v35 = vsel %vm3223_vm14, 65537, %v13166_v16  ;;  %vm3208_vm4 = vcmp.ne.s16.totalorder %v10457_v7, 0  ;;  %vm3224_vm10 = vcmp.ne.s16.totalorder %v10473_v61, 0 }
 0x401   :  { %12755 = vmatprep.subr.msk.bf16.mxu1 %vm12754_vm0, %v13167_v48  ;;  %vm12756_vm9 = vmpackc.low %vm5301_vm11, %vm5269_vm15  ;;  %v4307_v50 = vunpack.c.l.b16 %v3719_v52  ;;  %v4308_v13 = vunpack.c.h.b16 %v3719_v52  ;;  %v4339_v8 = vunpack.c.l.b16 %v3735_v35  ;;  %v4340_v51 = vunpack.c.h.b16 %v3735_v35 }
 0x402   :  { %12757 = vmatpush1.bf16.msk.msra.mxu1 %vm12756_vm9, %v13167_v48  ;;  %v3720_v27 = vsel %vm3208_vm4, 65537, %v13166_v16  ;;  %v3736_v63 = vsel %vm3224_vm10, 65537, %v13166_v16  ;;  %vm691_vm2 = vcmp.eq.bf16.partialorder %v13257_v31, %v17757_v49  ;;  %vm692_vm12 = vcmp.eq.bf16.partialorder %v13257_v31, %v17760_v62 }
 0x403   :  { %vm5332_vm13 = vcmp.ne.s32.totalorder %v4308_v13, 0  ;;  %vm5364_vm5 = vcmp.ne.s32.totalorder %v4340_v51, 0  ;;  %v4309_v9 = vunpack.c.l.b16 %v3720_v27  ;;  %v4310_v59 = vunpack.c.h.b16 %v3720_v27 }
 0x404   :  { %vm12694_vm8 = vmpackc.low %vm5364_vm5, %vm5332_vm13  ;;  %v4341_v38 = vunpack.c.l.b16 %v3736_v63  ;;  %v4342_v11 = vunpack.c.h.b16 %v3736_v63  ;;  %vm5331_vm7 = vcmp.ne.s32.totalorder %v4307_v50, 0  ;;  %vm5363_vm6 = vcmp.ne.s32.totalorder %v4339_v8, 0 }
 0x405   :  { %12695 = vmatprep.subr.msk.bf16.mxu0 %vm12694_vm8, %v13167_v48  ;;  %vm17837_vm14 = vcmp.ne.s32.totalorder %v4310_v59, 0  ;;  %vm12696_vm1 = vmpackc.low %vm5363_vm6, %vm5331_vm7  ;;  %vm17841_vm3 = vcmp.ne.s32.totalorder %v4309_v9, 0  ;;  %v1203_v6 = vsel %vm691_vm2, 65537, %v13166_v16  ;;  %v1204_v45 = vsel %vm692_vm12, 65537, %v13166_v16 }
 0x406   :  { %vm5366_vm15 = vcmp.ne.s32.totalorder %v4342_v11, 0  ;;  %12697 = vmatpush1.bf16.msk.msra.mxu0 %vm12696_vm1, %v13167_v48  ;;  %vm5365_vm11 = vcmp.ne.s32.totalorder %v4341_v38, 0  ;;  %v10488_v7 = vcombine.low %v1203_v6, %v1204_v45  ;;  %v10504_v61 = vcombine.high %v1203_v6, %v1204_v45 }
 0x407   :  { %vm12758_vm0 = vmpackc.low %vm5366_vm15, %vm17837_vm14  ;;  %vm693_vm4 = vcmp.eq.bf16.partialorder %v13257_v31, %v17775_v43  ;;  %vm694_vm10 = vcmp.eq.bf16.partialorder %v13257_v31, %v17778_v3  ;;  %vm723_vm9 = vcmp.eq.bf16.partialorder %v13265_v39, %v17757_v49  ;;  %vm724_vm2 = vcmp.eq.bf16.partialorder %v13265_v39, %v17760_v62 }
 0x408   :  { %12759 = vmatprep.subr.msk.bf16.mxu1 %vm12758_vm0, %v13167_v48  ;;  %vm12760_vm12 = vmpackc.low %vm5365_vm11, %vm17841_vm3  ;;  %vm3239_vm13 = vcmp.ne.s16.totalorder %v10488_v7, 0  ;;  %vm3255_vm5 = vcmp.ne.s16.totalorder %v10504_v61, 0  ;;  %v1205_v52 = vsel %vm693_vm4, 65537, %v13166_v16  ;;  %v1206_v35 = vsel %vm694_vm10, 65537, %v13166_v16 }
 0x409   :  { %12761 = vmatpush1.bf16.msk.msra.mxu1 %vm12760_vm12, %v13167_v48  ;;  %v3751_v50 = vsel %vm3239_vm13, 65537, %v13166_v16  ;;  %v3767_v13 = vsel %vm3255_vm5, 65537, %v13166_v16  ;;  %v10489_v8 = vcombine.low %v1205_v52, %v1206_v35  ;;  %v10505_v51 = vcombine.high %v1205_v52, %v1206_v35 }
 0x40a   :  { %v4371_v27 = vunpack.c.l.b16 %v3751_v50  ;;  %v4372_v63 = vunpack.c.h.b16 %v3751_v50  ;;  %v4403_v9 = vunpack.c.l.b16 %v3767_v13  ;;  %v4404_v59 = vunpack.c.h.b16 %v3767_v13 }
 0x40b   :  { %vm3240_vm8 = vcmp.ne.s16.totalorder %v10489_v8, 0  ;;  %vm3256_vm7 = vcmp.ne.s16.totalorder %v10505_v51, 0  ;;  %v1235_v38 = vsel %vm723_vm9, 65537, %v13166_v16  ;;  %v1236_v11 = vsel %vm724_vm2, 65537, %v13166_v16 }
 0x40c   :  { %vm5396_vm6 = vcmp.ne.s32.totalorder %v4372_v63, 0  ;;  %vm5428_vm14 = vcmp.ne.s32.totalorder %v4404_v59, 0  ;;  %v3752_v22 = vsel %vm3240_vm8, 65537, %v13166_v16  ;;  %v3768_v46 = vsel %vm3256_vm7, 65537, %v13166_v16 }
 0x40d   :  { %vm12698_vm1 = vmpackc.low %vm5428_vm14, %vm5396_vm6  ;;  %v4373_v6 = vunpack.c.l.b16 %v3752_v22  ;;  %v4374_v45 = vunpack.c.h.b16 %v3752_v22  ;;  %v4405_v7 = vunpack.c.l.b16 %v3768_v46  ;;  %v4406_v61 = vunpack.c.h.b16 %v3768_v46 }
 0x40e   :  { %12699 = vmatprep.subr.msk.bf16.mxu0 %vm12698_vm1, %v13167_v48  ;;  %vm5395_vm3 = vcmp.ne.s32.totalorder %v4371_v27, 0  ;;  %vm5427_vm15 = vcmp.ne.s32.totalorder %v4403_v9, 0  ;;  %v10520_v52 = vcombine.low %v1235_v38, %v1236_v11  ;;  %v10536_v35 = vcombine.high %v1235_v38, %v1236_v11 }
 0x40f   :  { %vm5398_vm11 = vcmp.ne.s32.totalorder %v4374_v45, 0  ;;  %vm5430_vm0 = vcmp.ne.s32.totalorder %v4406_v61, 0  ;;  %vm12700_vm4 = vmpackc.low %vm5427_vm15, %vm5395_vm3  ;;  %vm5397_vm10 = vcmp.ne.s32.totalorder %v4373_v6, 0  ;;  %vm5429_vm9 = vcmp.ne.s32.totalorder %v4405_v7, 0 }
 0x410   :  { %vm12762_vm2 = vmpackc.low %vm5430_vm0, %vm5398_vm11  ;;  %12701 = vmatpush1.bf16.msk.msra.mxu0 %vm12700_vm4, %v13167_v48  ;;  %vm3271_vm12 = vcmp.ne.s16.totalorder %v10520_v52, 0  ;;  %vm3287_vm13 = vcmp.ne.s16.totalorder %v10536_v35, 0  ;;  %vm725_vm5 = vcmp.eq.bf16.partialorder %v13265_v39, %v17775_v43  ;;  %vm726_vm8 = vcmp.eq.bf16.partialorder %v13265_v39, %v17778_v3 }
 0x411   :  { %12763 = vmatprep.subr.msk.bf16.mxu1 %vm12762_vm2, %v13167_v48  ;;  %vm12764_vm7 = vmpackc.low %vm5429_vm9, %vm5397_vm10  ;;  %v3783_v50 = vsel %vm3271_vm12, 65537, %v13166_v16  ;;  %v3799_v13 = vsel %vm3287_vm13, 65537, %v13166_v16  ;;  %v1237_v8 = vsel %vm725_vm5, 65537, %v13166_v16  ;;  %v1238_v51 = vsel %vm726_vm8, 65537, %v13166_v16 }
 0x412   :  { %12765 = vmatpush1.bf16.msk.msra.mxu1 %vm12764_vm7, %v13167_v48  ;;  %v4435_v27 = vunpack.c.l.b16 %v3783_v50  ;;  %v4436_v63 = vunpack.c.h.b16 %v3783_v50  ;;  %v4467_v9 = vunpack.c.l.b16 %v3799_v13  ;;  %v4468_v59 = vunpack.c.h.b16 %v3799_v13 }
 0x413   :  { %v10521_v38 = vcombine.low %v1237_v8, %v1238_v51  ;;  %v10537_v11 = vcombine.high %v1237_v8, %v1238_v51  ;;  %v9736_v22 = vcombine.low %v17745_v5, %v17764_v19  ;;  %v9538_v46 = vadd.f32 %v9474_v14, %v17567_v36 }
 0x414   :  { %vm5460_vm6 = vcmp.ne.s32.totalorder %v4436_v63, 0  ;;  %vm5492_vm14 = vcmp.ne.s32.totalorder %v4468_v59, 0  ;;  %vm17893_vm1 = vcmp.ne.s32.totalorder %v4435_v27, 0  ;;  %vm17897_vm3 = vcmp.ne.s32.totalorder %v4467_v9, 0 }
 0x415   :  { %vm12702_vm15 = vmpackc.low %vm5492_vm14, %vm5460_vm6  ;;  %vm3272_vm11 = vcmp.ne.s16.totalorder %v10521_v38, 0  ;;  %vm3288_vm0 = vcmp.ne.s16.totalorder %v10537_v11, 0  ;;  %v17902_v7 = vrot.slane %v9736_v22, %v16561_v41  ;;  %v9570_v5 = vrot.slane %v17567_v36, 2 }
 0x416   :  { %12703 = vmatprep.subr.msk.bf16.mxu0 %vm12702_vm15, %v13167_v48  ;;  %v3784_v19 = vsel %vm3272_vm11, 65537, %v13166_v16  ;;  %v3800_v14 = vsel %vm3288_vm0, 65537, %v13166_v16  ;;  %vm12704_vm4 = vmpackc.low %vm17897_vm3, %vm17893_vm1  ;;  %v9937_v61 = vcombine.low %v17561_v58, %v17567_v36  ;;  %vm755_vm10 = vcmp.eq.bf16.partialorder %v13276_v47, %v17757_v49 }
 0x417   :  { %v4437_v52 = vunpack.c.l.b16 %v3784_v19  ;;  %v4438_v35 = vunpack.c.h.b16 %v3784_v19  ;;  %v4469_v50 = vunpack.c.l.b16 %v3800_v14  ;;  %v4470_v13 = vunpack.c.h.b16 %v3800_v14  ;;  %12705 = vmatpush1.bf16.msk.msra.mxu0 %vm12704_vm4, %v13167_v48 }
 0x418   :  { %v9634_v8 = vadd.f32 %v9570_v5, %v9538_v46  ;;  %v17918_v51 = vrot.slane %v9937_v61, %v16561_v41  ;;  %vm756_vm9 = vcmp.eq.bf16.partialorder %v13276_v47, %v17760_v62  ;;  %v1267_v27 = vsel %vm755_vm10, 65537, %v13166_v16 }
 0x419   :  { %vm5462_vm2 = vcmp.ne.s32.totalorder %v4438_v35, 0  ;;  %vm5494_vm12 = vcmp.ne.s32.totalorder %v4470_v13, 0  ;;  %vm5461_vm13 = vcmp.ne.s32.totalorder %v4437_v52, 0  ;;  %vm5493_vm5 = vcmp.ne.s32.totalorder %v4469_v50, 0 }
 0x41a   :  { %vm12766_vm8 = vmpackc.low %vm5494_vm12, %vm5462_vm2  ;;  %v9737_v58 = vcombine.low %v17762_v34, %v9634_v8  ;;  %v9968_v36 = vcombine.low %v17767_v60, %v17918_v51  ;;  %v10104_v63 = vcombine.high %v17767_v60, %v17918_v51  ;;  %v1268_v9 = vsel %vm756_vm9, 65537, %v13166_v16 }
 0x41b   :  { %12767 = vmatprep.subr.msk.bf16.mxu1 %vm12766_vm8, %v13167_v48  ;;  %vm12768_vm7 = vmpackc.low %vm5493_vm5, %vm5461_vm13  ;;  %v10552_v59 = vcombine.low %v1267_v27, %v1268_v9  ;;  %v10568_v38 = vcombine.high %v1267_v27, %v1268_v9  ;;  %vm757_vm6 = vcmp.eq.bf16.partialorder %v13276_v47, %v17775_v43  ;;  %vm758_vm14 = vcmp.eq.bf16.partialorder %v13276_v47, %v17778_v3 }
 0x41c   :  { %12769 = vmatpush1.bf16.msk.msra.mxu1 %vm12768_vm7, %v13167_v48  ;;  %v17936_v34 = vrot.slane %v9737_v58, %v16561_v41  ;;  %v1269_v11 = vsel %vm757_vm6, 65537, %v13166_v16  ;;  %v1270_v22 = vsel %vm758_vm14, 65537, %v13166_v16  ;;  %vm787_vm1 = vcmp.eq.bf16.partialorder %v13278_v55, %v17757_v49 }
 0x41d   :  { %vm3303_vm3 = vcmp.ne.s16.totalorder %v10552_v59, 0  ;;  %vm3319_vm15 = vcmp.ne.s16.totalorder %v10568_v38, 0  ;;  %v10553_v46 = vcombine.low %v1269_v11, %v1270_v22  ;;  %v10569_v6 = vcombine.high %v1269_v11, %v1270_v22 }
 0x41e   :  { %v3815_v5 = vsel %vm3303_vm3, 65537, %v13166_v16  ;;  %v3831_v19 = vsel %vm3319_vm15, 65537, %v13166_v16  ;;  %vm788_vm11 = vcmp.eq.bf16.partialorder %v13278_v55, %v17760_v62  ;;  %v1299_v50 = vsel %vm787_vm1, 65537, %v13166_v16 }
 0x41f   :  { %v4499_v14 = vunpack.c.l.b16 %v3815_v5  ;;  %v4500_v61 = vunpack.c.h.b16 %v3815_v5  ;;  %v4531_v52 = vunpack.c.l.b16 %v3831_v19  ;;  %v4532_v35 = vunpack.c.h.b16 %v3831_v19 }
 0x420   :  { %vm3304_vm0 = vcmp.ne.s16.totalorder %v10553_v46, 0  ;;  %vm3320_vm4 = vcmp.ne.s16.totalorder %v10569_v6, 0  ;;  %v1300_v13 = vsel %vm788_vm11, 65537, %v13166_v16  ;;  %vm789_vm11 = vcmp.eq.bf16.partialorder %v13278_v55, %v17775_v43 }
 0x421   :  { %vm5524_vm10 = vcmp.ne.s32.totalorder %v4500_v61, 0  ;;  %vm5556_vm9 = vcmp.ne.s32.totalorder %v4532_v35, 0  ;;  %v3816_v8 = vsel %vm3304_vm0, 65537, %v13166_v16  ;;  %v3832_v27 = vsel %vm3320_vm4, 65537, %v13166_v16 }
 0x422   :  { %vm12706_vm2 = vmpackc.low %vm5556_vm9, %vm5524_vm10  ;;  %v4501_v58 = vunpack.c.l.b16 %v3816_v8  ;;  %v4502_v9 = vunpack.c.h.b16 %v3816_v8  ;;  %v4533_v59 = vunpack.c.l.b16 %v3832_v27  ;;  %v4534_v38 = vunpack.c.h.b16 %v3832_v27 }
 0x423   :  { %12707 = vmatprep.subr.msk.bf16.mxu0 %vm12706_vm2, %v13167_v48  ;;  %vm5523_vm12 = vcmp.ne.s32.totalorder %v4499_v14, 0  ;;  %vm5555_vm13 = vcmp.ne.s32.totalorder %v4531_v52, 0  ;;  %v10584_v11 = vcombine.low %v1299_v50, %v1300_v13  ;;  %v10600_v22 = vcombine.high %v1299_v50, %v1300_v13 }
 0x424   :  { %vm5526_vm5 = vcmp.ne.s32.totalorder %v4502_v9, 0  ;;  %vm5558_vm8 = vcmp.ne.s32.totalorder %v4534_v38, 0  ;;  %vm12708_vm7 = vmpackc.low %vm5555_vm13, %vm5523_vm12  ;;  %vm5525_vm6 = vcmp.ne.s32.totalorder %v4501_v58, 0  ;;  %vm5557_vm14 = vcmp.ne.s32.totalorder %v4533_v59, 0 }
 0x425   :  { %vm12770_vm1 = vmpackc.low %vm5558_vm8, %vm5526_vm5  ;;  %12709 = vmatpush1.bf16.msk.msra.mxu0 %vm12708_vm7, %v13167_v48  ;;  %vm3335_vm3 = vcmp.ne.s16.totalorder %v10584_v11, 0  ;;  %vm3351_vm15 = vcmp.ne.s16.totalorder %v10600_v22, 0  ;;  %vm790_vm0 = vcmp.eq.bf16.partialorder %v13278_v55, %v17778_v3  ;;  %v1301_v5 = vsel %vm789_vm11, 65537, %v13166_v16 }
 0x426   :  { %12771 = vmatprep.subr.msk.bf16.mxu1 %vm12770_vm1, %v13167_v48  ;;  %vm12772_vm4 = vmpackc.low %vm5557_vm14, %vm5525_vm6  ;;  %v3847_v46 = vsel %vm3335_vm3, 65537, %v13166_v16  ;;  %v3863_v6 = vsel %vm3351_vm15, 65537, %v13166_v16  ;;  %v1302_v19 = vsel %vm790_vm0, 65537, %v13166_v16  ;;  %vm819_vm10 = vcmp.eq.bf16.partialorder %v13280_v56, %v17757_v49 }
 0x427   :  { %12773 = vmatpush1.bf16.msk.msra.mxu1 %vm12772_vm4, %v13167_v48  ;;  %v4563_v14 = vunpack.c.l.b16 %v3847_v46  ;;  %v4564_v61 = vunpack.c.h.b16 %v3847_v46  ;;  %v4595_v52 = vunpack.c.l.b16 %v3863_v6  ;;  %v4596_v35 = vunpack.c.h.b16 %v3863_v6 }
 0x428   :  { %v10585_v50 = vcombine.low %v1301_v5, %v1302_v19  ;;  %v10601_v13 = vcombine.high %v1301_v5, %v1302_v19  ;;  %vm820_vm9 = vcmp.eq.bf16.partialorder %v13280_v56, %v17760_v62  ;;  %v1331_v58 = vsel %vm819_vm10, 65537, %v13166_v16 }
 0x429   :  { %vm5588_vm2 = vcmp.ne.s32.totalorder %v4564_v61, 0  ;;  %vm5620_vm12 = vcmp.ne.s32.totalorder %v4596_v35, 0  ;;  %vm17968_vm13 = vcmp.ne.s32.totalorder %v4563_v14, 0  ;;  %vm17972_vm5 = vcmp.ne.s32.totalorder %v4595_v52, 0 }
 0x42a   :  { %vm12710_vm8 = vmpackc.low %vm5620_vm12, %vm5588_vm2  ;;  %vm3336_vm7 = vcmp.ne.s16.totalorder %v10585_v50, 0  ;;  %vm3352_vm6 = vcmp.ne.s16.totalorder %v10601_v13, 0  ;;  %v1332_v9 = vsel %vm820_vm9, 65537, %v13166_v16  ;;  %vm821_vm15 = vcmp.eq.bf16.partialorder %v13280_v56, %v17775_v43 }
 0x42b   :  { %12711 = vmatprep.subr.msk.bf16.mxu0 %vm12710_vm8, %v13167_v48  ;;  %v3848_v59 = vsel %vm3336_vm7, 65537, %v13166_v16  ;;  %v3864_v38 = vsel %vm3352_vm6, 65537, %v13166_v16  ;;  %vm12712_vm14 = vmpackc.low %vm17972_vm5, %vm17968_vm13  ;;  %v10616_v11 = vcombine.low %v1331_v58, %v1332_v9  ;;  %v10632_v22 = vcombine.high %v1331_v58, %v1332_v9 }
 0x42c   :  { %v4565_v46 = vunpack.c.l.b16 %v3848_v59  ;;  %v4566_v6 = vunpack.c.h.b16 %v3848_v59  ;;  %v4597_v5 = vunpack.c.l.b16 %v3864_v38  ;;  %v4598_v19 = vunpack.c.h.b16 %v3864_v38  ;;  %12713 = vmatpush1.bf16.msk.msra.mxu0 %vm12712_vm14, %v13167_v48 }
 0x42d   :  { %vm3367_vm1 = vcmp.ne.s16.totalorder %v10616_v11, 0  ;;  %vm3383_vm3 = vcmp.ne.s16.totalorder %v10632_v22, 0  ;;  %vm822_vm11 = vcmp.eq.bf16.partialorder %v13280_v56, %v17778_v3  ;;  %v1333_v52 = vsel %vm821_vm15, 65537, %v13166_v16 }
 0x42e   :  { %vm5590_vm0 = vcmp.ne.s32.totalorder %v4566_v6, 0  ;;  %vm5622_vm4 = vcmp.ne.s32.totalorder %v4598_v19, 0  ;;  %vm5589_vm10 = vcmp.ne.s32.totalorder %v4565_v46, 0  ;;  %vm5621_vm9 = vcmp.ne.s32.totalorder %v4597_v5, 0 }
 0x42f   :  { %vm12774_vm2 = vmpackc.low %vm5622_vm4, %vm5590_vm0  ;;  %v3879_v14 = vsel %vm3367_vm1, 65537, %v13166_v16  ;;  %v3895_v61 = vsel %vm3383_vm3, 65537, %v13166_v16  ;;  %v1334_v35 = vsel %vm822_vm11, 65537, %v13166_v16  ;;  %vm851_vm13 = vcmp.eq.bf16.partialorder %v13302_v12, %v17757_v49 }
 0x430   :  { %12775 = vmatprep.subr.msk.bf16.mxu1 %vm12774_vm2, %v13167_v48  ;;  %vm12776_vm12 = vmpackc.low %vm5621_vm9, %vm5589_vm10  ;;  %v4627_v50 = vunpack.c.l.b16 %v3879_v14  ;;  %v4628_v13 = vunpack.c.h.b16 %v3879_v14  ;;  %v4659_v8 = vunpack.c.l.b16 %v3895_v61  ;;  %v4660_v27 = vunpack.c.h.b16 %v3895_v61  ;;  %v18017_v14 = vpop.f32.mrb[12].mxu0  ;;  %v18019_v61 = vpop.f32.mrb[12].mxu1 }
 0x431   :  { %12777 = vmatpush1.bf16.msk.msra.mxu1 %vm12776_vm12, %v13167_v48  ;;  %v10617_v58 = vcombine.low %v1333_v52, %v1334_v35  ;;  %v10633_v9 = vcombine.high %v1333_v52, %v1334_v35  ;;  %vm852_vm5 = vcmp.eq.bf16.partialorder %v13302_v12, %v17760_v62  ;;  %v1363_v11 = vsel %vm851_vm13, 65537, %v13166_v16 }
 0x432   :  { %vm5652_vm8 = vcmp.ne.s32.totalorder %v4628_v13, 0  ;;  %vm5684_vm7 = vcmp.ne.s32.totalorder %v4660_v27, 0  ;;  %vm18000_vm6 = vcmp.ne.s32.totalorder %v4627_v50, 0  ;;  %vm18004_vm14 = vcmp.ne.s32.totalorder %v4659_v8, 0  ;;  %v18022_v8 = vpop.f32.mrb[13].mxu0  ;;  %v18028_v27 = vpop.f32.mrb[13].mxu1 }
 0x433   :  { %vm12714_vm1 = vmpackc.low %vm5684_vm7, %vm5652_vm8  ;;  %vm3368_vm3 = vcmp.ne.s16.totalorder %v10617_v58, 0  ;;  %vm3384_vm15 = vcmp.ne.s16.totalorder %v10633_v9, 0  ;;  %v1364_v22 = vsel %vm852_vm5, 65537, %v13166_v16  ;;  %vm853_vm10 = vcmp.eq.bf16.partialorder %v13302_v12, %v17775_v43  ;;  %v9059_v58 = vpop.f32.mrb[14].mxu0  ;;  %v9100_v38 = vpop.f32.mrb[14].mxu1 }
 0x434   :  { %12715 = vmatprep.subr.msk.bf16.mxu0 %vm12714_vm1, %v13167_v48  ;;  %v3880_v46 = vsel %vm3368_vm3, 65537, %v13166_v16  ;;  %v3896_v6 = vsel %vm3384_vm15, 65537, %v13166_v16  ;;  %vm12716_vm11 = vmpackc.low %vm18004_vm14, %vm18000_vm6  ;;  %v10648_v5 = vcombine.low %v1363_v11, %v1364_v22  ;;  %v10664_v19 = vcombine.high %v1363_v11, %v1364_v22  ;;  %v9060_v11 = vpop.f32.mrb[15].mxu0 }
 0x435   :  { %v4629_v52 = vunpack.c.l.b16 %v3880_v46  ;;  %v4630_v35 = vunpack.c.h.b16 %v3880_v46  ;;  %v4661_v50 = vunpack.c.l.b16 %v3896_v6  ;;  %v4662_v13 = vunpack.c.h.b16 %v3896_v6  ;;  %12717 = vmatpush1.bf16.msk.msra.mxu0 %vm12716_vm11, %v13167_v48 }
 0x436   :  { %vm3399_vm0 = vcmp.ne.s16.totalorder %v10648_v5, 0  ;;  %vm3415_vm4 = vcmp.ne.s16.totalorder %v10664_v19, 0  ;;  %vm854_vm9 = vcmp.eq.bf16.partialorder %v13302_v12, %v17778_v3  ;;  %v1365_v6 = vsel %vm853_vm10, 65537, %v13166_v16  ;;  %v9101_v19 = vpop.f32.mrb[15].mxu1 }
 0x437   :  { %vm5654_vm2 = vcmp.ne.s32.totalorder %v4630_v35, 0  ;;  %vm5686_vm12 = vcmp.ne.s32.totalorder %v4662_v13, 0  ;;  %vm18030_vm13 = vcmp.ne.s32.totalorder %v4629_v52, 0  ;;  %vm18034_vm5 = vcmp.ne.s32.totalorder %v4661_v50, 0 }
 0x438   :  { %vm12778_vm8 = vmpackc.low %vm5686_vm12, %vm5654_vm2  ;;  %v3911_v22 = vsel %vm3399_vm0, 65537, %v13166_v16  ;;  %v3927_v46 = vsel %vm3415_vm4, 65537, %v13166_v16  ;;  %v1366_v5 = vsel %vm854_vm9, 65537, %v13166_v16  ;;  %vm883_vm6 = vcmp.eq.bf16.partialorder %v13772_v32, %v17757_v49 }
 0x439   :  { %12779 = vmatprep.subr.msk.bf16.mxu1 %vm12778_vm8, %v13167_v48  ;;  %vm12780_vm7 = vmpackc.low %vm18034_vm5, %vm18030_vm13  ;;  %v4691_v52 = vunpack.c.l.b16 %v3911_v22  ;;  %v4692_v35 = vunpack.c.h.b16 %v3911_v22  ;;  %v4723_v50 = vunpack.c.l.b16 %v3927_v46  ;;  %v4724_v13 = vunpack.c.h.b16 %v3927_v46 }
 0x43a   :  { %12781 = vmatpush1.bf16.msk.msra.mxu1 %vm12780_vm7, %v13167_v48  ;;  %v10649_v58 = vcombine.low %v1365_v6, %v1366_v5  ;;  %v10665_v38 = vcombine.high %v1365_v6, %v1366_v5  ;;  %vm884_vm14 = vcmp.eq.bf16.partialorder %v13772_v32, %v17760_v62  ;;  %v1395_v11 = vsel %vm883_vm6, 65537, %v13166_v16 }
 0x43b   :  { %vm5716_vm1 = vcmp.ne.s32.totalorder %v4692_v35, 0  ;;  %vm5748_vm3 = vcmp.ne.s32.totalorder %v4724_v13, 0  ;;  %vm18052_vm15 = vcmp.ne.s32.totalorder %v4691_v52, 0  ;;  %vm18056_vm11 = vcmp.ne.s32.totalorder %v4723_v50, 0 }
 0x43c   :  { %vm12718_vm0 = vmpackc.low %vm5748_vm3, %vm5716_vm1  ;;  %vm3400_vm4 = vcmp.ne.s16.totalorder %v10649_v58, 0  ;;  %vm3416_vm10 = vcmp.ne.s16.totalorder %v10665_v38, 0  ;;  %v1396_v22 = vsel %vm884_vm14, 65537, %v13166_v16  ;;  %vm885_vm13 = vcmp.eq.bf16.partialorder %v13772_v32, %v17775_v43 }
 0x43d   :  { %12719 = vmatprep.subr.msk.bf16.mxu0 %vm12718_vm0, %v13167_v48  ;;  %v3912_v46 = vsel %vm3400_vm4, 65537, %v13166_v16  ;;  %v3928_v6 = vsel %vm3416_vm10, 65537, %v13166_v16  ;;  %vm12720_vm9 = vmpackc.low %vm18056_vm11, %vm18052_vm15  ;;  %v10680_v5 = vcombine.low %v1395_v11, %v1396_v22  ;;  %v10696_v19 = vcombine.high %v1395_v11, %v1396_v22 }
 0x43e   :  { %v4693_v52 = vunpack.c.l.b16 %v3912_v46  ;;  %v4694_v35 = vunpack.c.h.b16 %v3912_v46  ;;  %v4725_v50 = vunpack.c.l.b16 %v3928_v6  ;;  %v4726_v13 = vunpack.c.h.b16 %v3928_v6  ;;  %12721 = vmatpush1.bf16.msk.msra.mxu0 %vm12720_vm9, %v13167_v48 }
 0x43f   :  { %vm3431_vm2 = vcmp.ne.s16.totalorder %v10680_v5, 0  ;;  %vm3447_vm12 = vcmp.ne.s16.totalorder %v10696_v19, 0  ;;  %vm886_vm5 = vcmp.eq.bf16.partialorder %v13772_v32, %v17778_v3  ;;  %v1397_v9 = vsel %vm885_vm13, 65537, %v13166_v16 }
 0x440   :  { %vm5718_vm8 = vcmp.ne.s32.totalorder %v4694_v35, 0  ;;  %vm5750_vm7 = vcmp.ne.s32.totalorder %v4726_v13, 0  ;;  %vm5717_vm6 = vcmp.ne.s32.totalorder %v4693_v52, 0  ;;  %vm5749_vm14 = vcmp.ne.s32.totalorder %v4725_v50, 0 }
 0x441   :  { %vm12782_vm1 = vmpackc.low %vm5750_vm7, %vm5718_vm8  ;;  %v3943_v58 = vsel %vm3431_vm2, 65537, %v13166_v16  ;;  %v3959_v38 = vsel %vm3447_vm12, 65537, %v13166_v16  ;;  %v1398_v59 = vsel %vm886_vm5, 65537, %v13166_v16  ;;  %vm915_vm15 = vcmp.eq.bf16.partialorder %v13855_v37, %v17757_v49 }
 0x442   :  { %12783 = vmatprep.subr.msk.bf16.mxu1 %vm12782_vm1, %v13167_v48  ;;  %vm12784_vm3 = vmpackc.low %vm5749_vm14, %vm5717_vm6  ;;  %v4755_v11 = vunpack.c.l.b16 %v3943_v58  ;;  %v4756_v22 = vunpack.c.h.b16 %v3943_v58  ;;  %v4787_v46 = vunpack.c.l.b16 %v3959_v38  ;;  %v4788_v6 = vunpack.c.h.b16 %v3959_v38 }
 0x443   :  { %12785 = vmatpush1.bf16.msk.msra.mxu1 %vm12784_vm3, %v13167_v48  ;;  %v10681_v5 = vcombine.low %v1397_v9, %v1398_v59  ;;  %v10697_v19 = vcombine.high %v1397_v9, %v1398_v59  ;;  %vm916_vm11 = vcmp.eq.bf16.partialorder %v13855_v37, %v17760_v62  ;;  %v1427_v50 = vsel %vm915_vm15, 65537, %v13166_v16 }
 0x444   :  { %vm5780_vm0 = vcmp.ne.s32.totalorder %v4756_v22, 0  ;;  %vm5812_vm4 = vcmp.ne.s32.totalorder %v4788_v6, 0  ;;  %vm18084_vm10 = vcmp.ne.s32.totalorder %v4755_v11, 0  ;;  %vm18088_vm9 = vcmp.ne.s32.totalorder %v4787_v46, 0 }
 0x445   :  { %vm12722_vm2 = vmpackc.low %vm5812_vm4, %vm5780_vm0  ;;  %vm3432_vm12 = vcmp.ne.s16.totalorder %v10681_v5, 0  ;;  %vm3448_vm13 = vcmp.ne.s16.totalorder %v10697_v19, 0  ;;  %v1428_v13 = vsel %vm916_vm11, 65537, %v13166_v16  ;;  %vm917_vm6 = vcmp.eq.bf16.partialorder %v13855_v37, %v17775_v43 }
 0x446   :  { %12723 = vmatprep.subr.msk.bf16.mxu0 %vm12722_vm2, %v13167_v48  ;;  %v3944_v58 = vsel %vm3432_vm12, 65537, %v13166_v16  ;;  %v3960_v38 = vsel %vm3448_vm13, 65537, %v13166_v16  ;;  %vm12724_vm5 = vmpackc.low %vm18088_vm9, %vm18084_vm10  ;;  %v10712_v9 = vcombine.low %v1427_v50, %v1428_v13  ;;  %v10728_v59 = vcombine.high %v1427_v50, %v1428_v13 }
 0x447   :  { %v4757_v11 = vunpack.c.l.b16 %v3944_v58  ;;  %v4758_v22 = vunpack.c.h.b16 %v3944_v58  ;;  %v4789_v46 = vunpack.c.l.b16 %v3960_v38  ;;  %v4790_v6 = vunpack.c.h.b16 %v3960_v38  ;;  %12725 = vmatpush1.bf16.msk.msra.mxu0 %vm12724_vm5, %v13167_v48 }
 0x448   :  { %vm3463_vm8 = vcmp.ne.s16.totalorder %v10712_v9, 0  ;;  %vm3479_vm7 = vcmp.ne.s16.totalorder %v10728_v59, 0  ;;  %vm918_vm14 = vcmp.eq.bf16.partialorder %v13855_v37, %v17778_v3  ;;  %v1429_v52 = vsel %vm917_vm6, 65537, %v13166_v16 }
 0x449   :  { %vm5782_vm1 = vcmp.ne.s32.totalorder %v4758_v22, 0  ;;  %vm5814_vm3 = vcmp.ne.s32.totalorder %v4790_v6, 0  ;;  %vm5781_vm15 = vcmp.ne.s32.totalorder %v4757_v11, 0  ;;  %vm5813_vm11 = vcmp.ne.s32.totalorder %v4789_v46, 0 }
 0x44a   :  { %vm12786_vm0 = vmpackc.low %vm5814_vm3, %vm5782_vm1  ;;  %v3975_v5 = vsel %vm3463_vm8, 65537, %v13166_v16  ;;  %v3991_v19 = vsel %vm3479_vm7, 65537, %v13166_v16  ;;  %v1430_v35 = vsel %vm918_vm14, 65537, %v13166_v16  ;;  %vm947_vm10 = vcmp.eq.bf16.partialorder %v13896_v54, %v17757_v49 }
 0x44b   :  { %12787 = vmatprep.subr.msk.bf16.mxu1 %vm12786_vm0, %v13167_v48  ;;  %vm12788_vm4 = vmpackc.low %vm5813_vm11, %vm5781_vm15  ;;  %v4819_v50 = vunpack.c.l.b16 %v3975_v5  ;;  %v4820_v13 = vunpack.c.h.b16 %v3975_v5  ;;  %v4851_v58 = vunpack.c.l.b16 %v3991_v19  ;;  %v4852_v38 = vunpack.c.h.b16 %v3991_v19 }
 0x44c   :  { %12789 = vmatpush1.bf16.msk.msra.mxu1 %vm12788_vm4, %v13167_v48  ;;  %v10713_v9 = vcombine.low %v1429_v52, %v1430_v35  ;;  %v10729_v59 = vcombine.high %v1429_v52, %v1430_v35  ;;  %vm948_vm9 = vcmp.eq.bf16.partialorder %v13896_v54, %v17760_v62  ;;  %v1459_v46 = vsel %vm947_vm10, 65537, %v13166_v16 }
 0x44d   :  { %vm5844_vm2 = vcmp.ne.s32.totalorder %v4820_v13, 0  ;;  %vm5876_vm12 = vcmp.ne.s32.totalorder %v4852_v38, 0  ;;  %vm18116_vm13 = vcmp.ne.s32.totalorder %v4819_v50, 0  ;;  %vm18120_vm5 = vcmp.ne.s32.totalorder %v4851_v58, 0 }
 0x44e   :  { %vm12726_vm8 = vmpackc.low %vm5876_vm12, %vm5844_vm2  ;;  %vm3464_vm7 = vcmp.ne.s16.totalorder %v10713_v9, 0  ;;  %vm3480_vm6 = vcmp.ne.s16.totalorder %v10729_v59, 0  ;;  %v1460_v6 = vsel %vm948_vm9, 65537, %v13166_v16  ;;  %vm949_vm15 = vcmp.eq.bf16.partialorder %v13896_v54, %v17775_v43 }
 0x44f   :  { %12727 = vmatprep.subr.msk.bf16.mxu0 %vm12726_vm8, %v13167_v48  ;;  %v3976_v5 = vsel %vm3464_vm7, 65537, %v13166_v16  ;;  %v3992_v19 = vsel %vm3480_vm6, 65537, %v13166_v16  ;;  %vm12728_vm14 = vmpackc.low %vm18120_vm5, %vm18116_vm13  ;;  %v10744_v52 = vcombine.low %v1459_v46, %v1460_v6  ;;  %v10760_v35 = vcombine.high %v1459_v46, %v1460_v6 }
 0x450   :  { %v4821_v50 = vunpack.c.l.b16 %v3976_v5  ;;  %v4822_v13 = vunpack.c.h.b16 %v3976_v5  ;;  %v4853_v58 = vunpack.c.l.b16 %v3992_v19  ;;  %v4854_v38 = vunpack.c.h.b16 %v3992_v19  ;;  %12729 = vmatpush1.bf16.msk.msra.mxu0 %vm12728_vm14, %v13167_v48 }
 0x451   :  { %vm3495_vm1 = vcmp.ne.s16.totalorder %v10744_v52, 0  ;;  %vm3511_vm3 = vcmp.ne.s16.totalorder %v10760_v35, 0  ;;  %vm950_vm11 = vcmp.eq.bf16.partialorder %v13896_v54, %v17778_v3  ;;  %v1461_v11 = vsel %vm949_vm15, 65537, %v13166_v16 }
 0x452   :  { %vm5846_vm0 = vcmp.ne.s32.totalorder %v4822_v13, 0  ;;  %vm5878_vm4 = vcmp.ne.s32.totalorder %v4854_v38, 0  ;;  %vm5845_vm10 = vcmp.ne.s32.totalorder %v4821_v50, 0  ;;  %vm5877_vm9 = vcmp.ne.s32.totalorder %v4853_v58, 0 }
 0x453   :  { %vm12790_vm2 = vmpackc.low %vm5878_vm4, %vm5846_vm0  ;;  %v4007_v9 = vsel %vm3495_vm1, 65537, %v13166_v16  ;;  %v4023_v59 = vsel %vm3511_vm3, 65537, %v13166_v16  ;;  %v1462_v22 = vsel %vm950_vm11, 65537, %v13166_v16  ;;  %vm979_vm13 = vcmp.eq.bf16.partialorder %v13947_v15, %v17757_v49 }
 0x454   :  { %12791 = vmatprep.subr.msk.bf16.mxu1 %vm12790_vm2, %v13167_v48  ;;  %vm12792_vm12 = vmpackc.low %vm5877_vm9, %vm5845_vm10  ;;  %v4883_v46 = vunpack.c.l.b16 %v4007_v9  ;;  %v4884_v6 = vunpack.c.h.b16 %v4007_v9  ;;  %v4915_v5 = vunpack.c.l.b16 %v4023_v59  ;;  %v4916_v19 = vunpack.c.h.b16 %v4023_v59 }
 0x455   :  { %12793 = vmatpush1.bf16.msk.msra.mxu1 %vm12792_vm12, %v13167_v48  ;;  %v10745_v52 = vcombine.low %v1461_v11, %v1462_v22  ;;  %v10761_v35 = vcombine.high %v1461_v11, %v1462_v22  ;;  %vm980_vm5 = vcmp.eq.bf16.partialorder %v13947_v15, %v17760_v62  ;;  %v1491_v58 = vsel %vm979_vm13, 65537, %v13166_v16 }
 0x456   :  { %vm5908_vm8 = vcmp.ne.s32.totalorder %v4884_v6, 0  ;;  %vm5940_vm7 = vcmp.ne.s32.totalorder %v4916_v19, 0  ;;  %vm18148_vm6 = vcmp.ne.s32.totalorder %v4883_v46, 0  ;;  %vm18152_vm14 = vcmp.ne.s32.totalorder %v4915_v5, 0 }
 0x457   :  { %vm12730_vm1 = vmpackc.low %vm5940_vm7, %vm5908_vm8  ;;  %vm3496_vm3 = vcmp.ne.s16.totalorder %v10745_v52, 0  ;;  %vm3512_vm15 = vcmp.ne.s16.totalorder %v10761_v35, 0  ;;  %v1492_v38 = vsel %vm980_vm5, 65537, %v13166_v16  ;;  %vm981_vm10 = vcmp.eq.bf16.partialorder %v13947_v15, %v17775_v43 }
 0x458   :  { %12731 = vmatprep.subr.msk.bf16.mxu0 %vm12730_vm1, %v13167_v48  ;;  %v4008_v9 = vsel %vm3496_vm3, 65537, %v13166_v16  ;;  %v4024_v59 = vsel %vm3512_vm15, 65537, %v13166_v16  ;;  %vm12732_vm11 = vmpackc.low %vm18152_vm14, %vm18148_vm6  ;;  %v10776_v11 = vcombine.low %v1491_v58, %v1492_v38  ;;  %v10792_v22 = vcombine.high %v1491_v58, %v1492_v38 }
 0x459   :  { %v4885_v46 = vunpack.c.l.b16 %v4008_v9  ;;  %v4886_v6 = vunpack.c.h.b16 %v4008_v9  ;;  %v4917_v5 = vunpack.c.l.b16 %v4024_v59  ;;  %v4918_v19 = vunpack.c.h.b16 %v4024_v59  ;;  %12733 = vmatpush1.bf16.msk.msra.mxu0 %vm12732_vm11, %v13167_v48 }
 0x45a   :  { %vm3527_vm0 = vcmp.ne.s16.totalorder %v10776_v11, 0  ;;  %vm3543_vm4 = vcmp.ne.s16.totalorder %v10792_v22, 0  ;;  %vm982_vm9 = vcmp.eq.bf16.partialorder %v13947_v15, %v17778_v3  ;;  %v1493_v50 = vsel %vm981_vm10, 65537, %v13166_v16 }
 0x45b   :  { %vm5910_vm2 = vcmp.ne.s32.totalorder %v4886_v6, 0  ;;  %vm5942_vm12 = vcmp.ne.s32.totalorder %v4918_v19, 0  ;;  %vm5909_vm13 = vcmp.ne.s32.totalorder %v4885_v46, 0  ;;  %vm5941_vm5 = vcmp.ne.s32.totalorder %v4917_v5, 0 }
 0x45c   :  { %vm12794_vm8 = vmpackc.low %vm5942_vm12, %vm5910_vm2  ;;  %v4039_v52 = vsel %vm3527_vm0, 65537, %v13166_v16  ;;  %v4055_v35 = vsel %vm3543_vm4, 65537, %v13166_v16  ;;  %v1494_v13 = vsel %vm982_vm9, 65537, %v13166_v16  ;;  %vm1011_vm6 = vcmp.eq.bf16.partialorder %v13949_v44, %v17757_v49 }
 0x45d   :  { %12795 = vmatprep.subr.msk.bf16.mxu1 %vm12794_vm8, %v13167_v48  ;;  %vm12796_vm7 = vmpackc.low %vm5941_vm5, %vm5909_vm13  ;;  %v4947_v58 = vunpack.c.l.b16 %v4039_v52  ;;  %v4948_v38 = vunpack.c.h.b16 %v4039_v52  ;;  %v4979_v9 = vunpack.c.l.b16 %v4055_v35  ;;  %v4980_v59 = vunpack.c.h.b16 %v4055_v35 }
 0x45e   :  { %12797 = vmatpush1.bf16.msk.msra.mxu1 %vm12796_vm7, %v13167_v48  ;;  %v10777_v11 = vcombine.low %v1493_v50, %v1494_v13  ;;  %v10793_v22 = vcombine.high %v1493_v50, %v1494_v13  ;;  %vm1012_vm14 = vcmp.eq.bf16.partialorder %v13949_v44, %v17760_v62  ;;  %v1523_v5 = vsel %vm1011_vm6, 65537, %v13166_v16 }
 0x45f   :  { %vm5972_vm1 = vcmp.ne.s32.totalorder %v4948_v38, 0  ;;  %vm6004_vm3 = vcmp.ne.s32.totalorder %v4980_v59, 0  ;;  %vm18180_vm15 = vcmp.ne.s32.totalorder %v4947_v58, 0  ;;  %vm18184_vm11 = vcmp.ne.s32.totalorder %v4979_v9, 0 }
 0x460   :  { %vm12734_vm0 = vmpackc.low %vm6004_vm3, %vm5972_vm1  ;;  %vm3528_vm4 = vcmp.ne.s16.totalorder %v10777_v11, 0  ;;  %vm3544_vm10 = vcmp.ne.s16.totalorder %v10793_v22, 0  ;;  %v1524_v19 = vsel %vm1012_vm14, 65537, %v13166_v16  ;;  %vm1013_vm13 = vcmp.eq.bf16.partialorder %v13949_v44, %v17775_v43 }
 0x461   :  { %12735 = vmatprep.subr.msk.bf16.mxu0 %vm12734_vm0, %v13167_v48  ;;  %v4040_v52 = vsel %vm3528_vm4, 65537, %v13166_v16  ;;  %v4056_v35 = vsel %vm3544_vm10, 65537, %v13166_v16  ;;  %vm12736_vm9 = vmpackc.low %vm18184_vm11, %vm18180_vm15  ;;  %v10808_v50 = vcombine.low %v1523_v5, %v1524_v19  ;;  %v10824_v13 = vcombine.high %v1523_v5, %v1524_v19 }
 0x462   :  { %v4949_v58 = vunpack.c.l.b16 %v4040_v52  ;;  %v4950_v38 = vunpack.c.h.b16 %v4040_v52  ;;  %v4981_v9 = vunpack.c.l.b16 %v4056_v35  ;;  %v4982_v59 = vunpack.c.h.b16 %v4056_v35  ;;  %12737 = vmatpush1.bf16.msk.msra.mxu0 %vm12736_vm9, %v13167_v48 }
 0x463   :  { %vm3559_vm2 = vcmp.ne.s16.totalorder %v10808_v50, 0  ;;  %vm3575_vm12 = vcmp.ne.s16.totalorder %v10824_v13, 0  ;;  %vm1014_vm5 = vcmp.eq.bf16.partialorder %v13949_v44, %v17778_v3  ;;  %v1525_v46 = vsel %vm1013_vm13, 65537, %v13166_v16 }
 0x464   :  { %vm5974_vm8 = vcmp.ne.s32.totalorder %v4950_v38, 0  ;;  %vm6006_vm7 = vcmp.ne.s32.totalorder %v4982_v59, 0  ;;  %vm5973_vm6 = vcmp.ne.s32.totalorder %v4949_v58, 0  ;;  %vm6005_vm14 = vcmp.ne.s32.totalorder %v4981_v9, 0 }
 0x465   :  { %vm12798_vm1 = vmpackc.low %vm6006_vm7, %vm5974_vm8  ;;  %v4071_v11 = vsel %vm3559_vm2, 65537, %v13166_v16  ;;  %v4087_v22 = vsel %vm3575_vm12, 65537, %v13166_v16  ;;  %v1526_v6 = vsel %vm1014_vm5, 65537, %v13166_v16  ;;  %vm1043_vm15 = vcmp.eq.bf16.partialorder %v14056_v0, %v17757_v49 }
 0x466   :  { %12799 = vmatprep.subr.msk.bf16.mxu1 %vm12798_vm1, %v13167_v48  ;;  %vm12800_vm3 = vmpackc.low %vm6005_vm14, %vm5973_vm6  ;;  %v5011_v5 = vunpack.c.l.b16 %v4071_v11  ;;  %v5012_v19 = vunpack.c.h.b16 %v4071_v11  ;;  %v5043_v52 = vunpack.c.l.b16 %v4087_v22  ;;  %v5044_v35 = vunpack.c.h.b16 %v4087_v22 }
 0x467   :  { %12801 = vmatpush1.bf16.msk.msra.mxu1 %vm12800_vm3, %v13167_v48  ;;  %v10809_v50 = vcombine.low %v1525_v46, %v1526_v6  ;;  %v10825_v13 = vcombine.high %v1525_v46, %v1526_v6  ;;  %vm1044_vm11 = vcmp.eq.bf16.partialorder %v14056_v0, %v17760_v62  ;;  %v1555_v9 = vsel %vm1043_vm15, 65537, %v13166_v16 }
 0x468   :  { %vm6036_vm0 = vcmp.ne.s32.totalorder %v5012_v19, 0  ;;  %vm6068_vm4 = vcmp.ne.s32.totalorder %v5044_v35, 0  ;;  %vm18212_vm10 = vcmp.ne.s32.totalorder %v5011_v5, 0  ;;  %vm18216_vm9 = vcmp.ne.s32.totalorder %v5043_v52, 0 }
 0x469   :  { %vm12738_vm2 = vmpackc.low %vm6068_vm4, %vm6036_vm0  ;;  %vm3560_vm12 = vcmp.ne.s16.totalorder %v10809_v50, 0  ;;  %vm3576_vm13 = vcmp.ne.s16.totalorder %v10825_v13, 0  ;;  %v1556_v59 = vsel %vm1044_vm11, 65537, %v13166_v16  ;;  %vm1045_vm6 = vcmp.eq.bf16.partialorder %v14056_v0, %v17775_v43 }
 0x46a   :  { %12739 = vmatprep.subr.msk.bf16.mxu0 %vm12738_vm2, %v13167_v48  ;;  %v4072_v11 = vsel %vm3560_vm12, 65537, %v13166_v16  ;;  %v4088_v22 = vsel %vm3576_vm13, 65537, %v13166_v16  ;;  %vm12740_vm5 = vmpackc.low %vm18216_vm9, %vm18212_vm10  ;;  %v10840_v46 = vcombine.low %v1555_v9, %v1556_v59  ;;  %v10856_v6 = vcombine.high %v1555_v9, %v1556_v59 }
 0x46b   :  { %v5013_v5 = vunpack.c.l.b16 %v4072_v11  ;;  %v5014_v19 = vunpack.c.h.b16 %v4072_v11  ;;  %v5045_v52 = vunpack.c.l.b16 %v4088_v22  ;;  %v5046_v35 = vunpack.c.h.b16 %v4088_v22  ;;  %12741 = vmatpush1.bf16.msk.msra.mxu0 %vm12740_vm5, %v13167_v48 }
 0x46c   :  { %vm3591_vm8 = vcmp.ne.s16.totalorder %v10840_v46, 0  ;;  %vm3607_vm7 = vcmp.ne.s16.totalorder %v10856_v6, 0  ;;  %vm1046_vm14 = vcmp.eq.bf16.partialorder %v14056_v0, %v17778_v3  ;;  %v1557_v58 = vsel %vm1045_vm6, 65537, %v13166_v16 }
 0x46d   :  { %vm6038_vm1 = vcmp.ne.s32.totalorder %v5014_v19, 0  ;;  %vm6070_vm3 = vcmp.ne.s32.totalorder %v5046_v35, 0  ;;  %vm6037_vm15 = vcmp.ne.s32.totalorder %v5013_v5, 0  ;;  %vm6069_vm11 = vcmp.ne.s32.totalorder %v5045_v52, 0 }
 0x46e   :  { %vm12802_vm0 = vmpackc.low %vm6070_vm3, %vm6038_vm1  ;;  %v4103_v50 = vsel %vm3591_vm8, 65537, %v13166_v16  ;;  %v4119_v13 = vsel %vm3607_vm7, 65537, %v13166_v16  ;;  %v1558_v38 = vsel %vm1046_vm14, 65537, %v13166_v16  ;;  %vm1075_vm10 = vcmp.eq.bf16.partialorder %v14132_v25, %v17757_v49 }
 0x46f   :  { %12803 = vmatprep.subr.msk.bf16.mxu1 %vm12802_vm0, %v13167_v48  ;;  %vm12804_vm4 = vmpackc.low %vm6069_vm11, %vm6037_vm15  ;;  %v5075_v9 = vunpack.c.l.b16 %v4103_v50  ;;  %v5076_v59 = vunpack.c.h.b16 %v4103_v50  ;;  %v5107_v11 = vunpack.c.l.b16 %v4119_v13  ;;  %v5108_v22 = vunpack.c.h.b16 %v4119_v13 }
 0x470   :  { %12805 = vmatpush1.bf16.msk.msra.mxu1 %vm12804_vm4, %v13167_v48  ;;  %v10841_v46 = vcombine.low %v1557_v58, %v1558_v38  ;;  %v10857_v6 = vcombine.high %v1557_v58, %v1558_v38  ;;  %vm1076_vm9 = vcmp.eq.bf16.partialorder %v14132_v25, %v17760_v62  ;;  %v1587_v52 = vsel %vm1075_vm10, 65537, %v13166_v16 }
 0x471   :  { %vm6100_vm2 = vcmp.ne.s32.totalorder %v5076_v59, 0  ;;  %vm6132_vm12 = vcmp.ne.s32.totalorder %v5108_v22, 0  ;;  %vm18244_vm13 = vcmp.ne.s32.totalorder %v5075_v9, 0  ;;  %vm18248_vm5 = vcmp.ne.s32.totalorder %v5107_v11, 0 }
 0x472   :  { %vm12742_vm8 = vmpackc.low %vm6132_vm12, %vm6100_vm2  ;;  %vm3592_vm7 = vcmp.ne.s16.totalorder %v10841_v46, 0  ;;  %vm3608_vm6 = vcmp.ne.s16.totalorder %v10857_v6, 0  ;;  %v1588_v49 = vsel %vm1076_vm9, 65537, %v13166_v16  ;;  %vm1077_vm15 = vcmp.eq.bf16.partialorder %v14132_v25, %v17775_v43 }
 0x473   :  { %12743 = vmatprep.subr.msk.bf16.mxu0 %vm12742_vm8, %v13167_v48  ;;  %v4104_v62 = vsel %vm3592_vm7, 65537, %v13166_v16  ;;  %v4120_v35 = vsel %vm3608_vm6, 65537, %v13166_v16  ;;  %vm12744_vm14 = vmpackc.low %vm18248_vm5, %vm18244_vm13  ;;  %v10872_v50 = vcombine.low %v1587_v52, %v1588_v49  ;;  %v10888_v13 = vcombine.high %v1587_v52, %v1588_v49 }
 0x474   :  { %v5077_v58 = vunpack.c.l.b16 %v4104_v62  ;;  %v5078_v38 = vunpack.c.h.b16 %v4104_v62  ;;  %v5109_v9 = vunpack.c.l.b16 %v4120_v35  ;;  %v5110_v59 = vunpack.c.h.b16 %v4120_v35  ;;  %12745 = vmatpush1.bf16.msk.msra.mxu0 %vm12744_vm14, %v13167_v48 }
 0x475   :  { %vm3623_vm1 = vcmp.ne.s16.totalorder %v10872_v50, 0  ;;  %vm3639_vm3 = vcmp.ne.s16.totalorder %v10888_v13, 0  ;;  %vm1078_vm11 = vcmp.eq.bf16.partialorder %v14132_v25, %v17778_v3  ;;  %v1589_v46 = vsel %vm1077_vm15, 65537, %v13166_v16 }
 0x476   :  { %vm6102_vm0 = vcmp.ne.s32.totalorder %v5078_v38, 0  ;;  %vm6134_vm4 = vcmp.ne.s32.totalorder %v5110_v59, 0  ;;  %vm6101_vm10 = vcmp.ne.s32.totalorder %v5077_v58, 0  ;;  %vm6133_vm9 = vcmp.ne.s32.totalorder %v5109_v9, 0 }
 0x477   :  { %vm12806_vm2 = vmpackc.low %vm6134_vm4, %vm6102_vm0  ;;  %v4135_v11 = vsel %vm3623_vm1, 65537, %v13166_v16  ;;  %v4151_v22 = vsel %vm3639_vm3, 65537, %v13166_v16  ;;  %v1590_v6 = vsel %vm1078_vm11, 65537, %v13166_v16  ;;  %v270_v62 = vrot.slane %v17729_v10, %v14065_v21 }
 0x478   :  { %12807 = vmatprep.subr.msk.bf16.mxu1 %vm12806_vm2, %v13167_v48  ;;  %vm12808_vm12 = vmpackc.low %vm6133_vm9, %vm6101_vm10  ;;  %v5139_v43 = vunpack.c.l.b16 %v4135_v11  ;;  %v5140_v5 = vunpack.c.h.b16 %v4135_v11  ;;  %v5171_v19 = vunpack.c.l.b16 %v4151_v22  ;;  %v5172_v3 = vunpack.c.h.b16 %v4151_v22 }
 0x479   :  { %12809 = vmatpush1.bf16.msk.msra.mxu1 %vm12808_vm12, %v13167_v48  ;;  %v10873_v52 = vcombine.low %v1589_v46, %v1590_v6  ;;  %v10889_v49 = vcombine.high %v1589_v46, %v1590_v6  ;;  %v274_v35 = vrot.slane %v17729_v10, %v14117_v57  ;;  %v343_v58 = vpack.c.bf16 %v270_v62, %v270_v62 }
 0x47a   :  { %vm6164_vm13 = vcmp.ne.s32.totalorder %v5140_v5, 0  ;;  %vm6196_vm5 = vcmp.ne.s32.totalorder %v5172_v3, 0  ;;  %vm18276_vm8 = vcmp.ne.s32.totalorder %v5139_v43, 0  ;;  %vm18280_vm7 = vcmp.ne.s32.totalorder %v5171_v19, 0 }
 0x47b   :  { %vm12746_vm6 = vmpackc.low %vm6196_vm5, %vm6164_vm13  ;;  %vm3624_vm14 = vcmp.ne.s16.totalorder %v10873_v52, 0  ;;  %vm3640_vm1 = vcmp.ne.s16.totalorder %v10889_v49, 0  ;;  %v344_v38 = vpack.c.bf16 %v274_v35, %v274_v35  ;;  %v278_v9 = vrot.slane %v17729_v10, %v14138_v29 }
 0x47c   :  { %12747 = vmatprep.subr.msk.bf16.mxu0 %vm12746_vm6, %v13167_v48  ;;  %v4136_v21 = vsel %vm3624_vm14, 65537, %v13166_v16  ;;  %v4152_v57 = vsel %vm3640_vm1, 65537, %v13166_v16  ;;  %vm12748_vm3 = vmpackc.low %vm18280_vm7, %vm18276_vm8  ;;  %v282_v59 = vrot.slane %v17729_v10, %v14141_v30  ;;  %v544_v43 = vpack.i.b16 %v343_v58, %v343_v58  ;;  %v13062_v30 = vld [vmem:[#allocation5] ss:$8 sps:$4 sm:$0xff]  }
 0x47d   :  { %v5141_v11 = vunpack.c.l.b16 %v4136_v21  ;;  %v5142_v22 = vunpack.c.h.b16 %v4136_v21  ;;  %v5173_v46 = vunpack.c.l.b16 %v4152_v57  ;;  %v5174_v6 = vunpack.c.h.b16 %v4152_v57  ;;  %12749 = vmatpush1.bf16.msk.msra.mxu0 %vm12748_vm3, %v13167_v48  ;;  %v13063_v21 = vld [vmem:[#allocation5 + $0x4] ss:$8 sps:$4 sm:$0xff]  }
 0x47e   :  { %v551_v5 = vpack.i.b16 %v344_v38, %v344_v38  ;;  %v345_v19 = vpack.c.bf16 %v278_v9, %v278_v9  ;;  %v346_v3 = vpack.c.bf16 %v282_v59, %v282_v59  ;;  %v18305_v10 = vrot.slane %v544_v43, %v13231_v4 }
 0x47f   :  { %vm6166_vm15 = vcmp.ne.s32.totalorder %v5142_v22, 0  ;;  %vm6198_vm11 = vcmp.ne.s32.totalorder %v5174_v6, 0  ;;  %vm18296_vm0 = vcmp.ne.s32.totalorder %v5141_v11, 0  ;;  %vm18300_vm4 = vcmp.ne.s32.totalorder %v5173_v46, 0 }
 0x480   :  { %vm12810_vm10 = vmpackc.low %vm6198_vm11, %vm6166_vm15  ;;  %9300 = vmatmul.mubr.bf16.vlgmr.msra.gmra.mrb[24].mxu0 %v13062_v30  ;;  %v18308_v49 = vrot.slane %v551_v5, %v13231_v4  ;;  %v558_v62 = vpack.i.b16 %v345_v19, %v345_v19  ;;  %v565_v35 = vpack.i.b16 %v346_v3, %v346_v3  ;;  %v9475_v50 = vrot.slane %v18017_v14, 1 }
 0x481   :  { %12811 = vmatprep.subr.msk.bf16.mxu1 %vm12810_vm10, %v13167_v48  ;;  %vm12812_vm9 = vmpackc.low %vm18300_vm4, %vm18296_vm0  ;;  %v9571_v13 = vrot.slane %v18017_v14, 2  ;;  %v9477_v58 = vrot.slane %v18019_v61, 1  ;;  %v9573_v38 = vrot.slane %v18019_v61, 2  ;;  %9381 = vmatprep.mubr.bf16.mxu0 %v13063_v21  ;;  %vm599_vm2 = vcmp.eq.bf16.partialorder %v13249_v20, %v18305_v10 }
 0x482   :  { %12813 = vmatpush1.bf16.msk.msra.mxu1 %vm12812_vm9, %v13167_v48  ;;  %vm600_vm12 = vcmp.eq.bf16.partialorder %v13249_v20, %v18308_v49  ;;  %v18325_v57 = vrot.slane %v558_v62, %v13231_v4  ;;  %v18328_v9 = vrot.slane %v565_v35, %v13231_v4  ;;  %v1111_v59 = vsel %vm599_vm2, 65537, %v13166_v16 }
 0x483   :  { %v1112_v11 = vsel %vm600_vm12, 65537, %v13166_v16  ;;  %vm631_vm13 = vcmp.eq.bf16.partialorder %v13251_v23, %v18305_v10  ;;  %vm632_vm5 = vcmp.eq.bf16.partialorder %v13251_v23, %v18308_v49 }
 0x484   :  { %v10394_v22 = vcombine.low %v1111_v59, %v1112_v11  ;;  %v10410_v46 = vcombine.high %v1111_v59, %v1112_v11  ;;  %vm601_vm8 = vcmp.eq.bf16.partialorder %v13249_v20, %v18325_v57  ;;  %vm602_vm7 = vcmp.eq.bf16.partialorder %v13249_v20, %v18328_v9 }
 0x485   :  { %9341 = vmatmul.mubr.bf16.vlgmr.msra.gmra.mrb[24].mxu1 %v13062_v30  ;;  %v1113_v4 = vsel %vm601_vm8, 65537, %v13166_v16  ;;  %v1114_v6 = vsel %vm602_vm7, 65537, %v13166_v16  ;;  %v1143_v43 = vsel %vm631_vm13, 65537, %v13166_v16  ;;  %v1144_v5 = vsel %vm632_vm5, 65537, %v13166_v16 }
 0x486   :  { %vm3145_vm6 = vcmp.ne.s16.totalorder %v10394_v22, 0  ;;  %vm3161_vm14 = vcmp.ne.s16.totalorder %v10410_v46, 0  ;;  %v10395_v19 = vcombine.low %v1113_v4, %v1114_v6  ;;  %v10411_v3 = vcombine.high %v1113_v4, %v1114_v6  ;;  %9422 = vmatprep.mubr.bf16.mxu1 %v13063_v21 }
 0x487   :  { %v3657_v52 = vsel %vm3145_vm6, 65537, %v13166_v16  ;;  %v3673_v29 = vsel %vm3161_vm14, 65537, %v13166_v16  ;;  %v10426_v62 = vcombine.low %v1143_v43, %v1144_v5  ;;  %v10442_v20 = vcombine.high %v1143_v43, %v1144_v5 }
 0x488   :  { %v4183_v30 = vunpack.c.l.b16 %v3657_v52  ;;  %v4184_v35 = vunpack.c.h.b16 %v3657_v52  ;;  %v4215_v59 = vunpack.c.l.b16 %v3673_v29  ;;  %v4216_v11 = vunpack.c.h.b16 %v3673_v29 }
 0x489   :  { %vm3146_vm1 = vcmp.ne.s16.totalorder %v10395_v19, 0  ;;  %vm3162_vm3 = vcmp.ne.s16.totalorder %v10411_v3, 0  ;;  %vm3177_vm15 = vcmp.ne.s16.totalorder %v10426_v62, 0  ;;  %vm3193_vm11 = vcmp.ne.s16.totalorder %v10442_v20, 0 }
 0x48a   :  { %vm5208_vm0 = vcmp.ne.s32.totalorder %v4184_v35, 0  ;;  %vm5240_vm4 = vcmp.ne.s32.totalorder %v4216_v11, 0  ;;  %v3658_v22 = vsel %vm3146_vm1, 65537, %v13166_v16  ;;  %v3674_v21 = vsel %vm3162_vm3, 65537, %v13166_v16 }
 0x48b   :  { %vm12814_vm10 = vmpackc.low %vm5240_vm4, %vm5208_vm0  ;;  %v4185_v46 = vunpack.c.l.b16 %v3658_v22  ;;  %v4186_v4 = vunpack.c.h.b16 %v3658_v22  ;;  %v4217_v6 = vunpack.c.l.b16 %v3674_v21  ;;  %v4218_v45 = vunpack.c.h.b16 %v3674_v21 }
 0x48c   :  { %12815 = vmatprep.subr.msk.bf16.mxu0 %vm12814_vm10, %v13167_v48  ;;  %vm5207_vm9 = vcmp.ne.s32.totalorder %v4183_v30, 0  ;;  %vm5239_vm2 = vcmp.ne.s32.totalorder %v4215_v59, 0  ;;  %v3689_v43 = vsel %vm3177_vm15, 65537, %v13166_v16  ;;  %v3705_v5 = vsel %vm3193_vm11, 65537, %v13166_v16 }
 0x48d   :  { %vm5210_vm12 = vcmp.ne.s32.totalorder %v4186_v4, 0  ;;  %vm5242_vm13 = vcmp.ne.s32.totalorder %v4218_v45, 0  ;;  %vm12816_vm5 = vmpackc.low %vm5239_vm2, %vm5207_vm9  ;;  %vm5209_vm8 = vcmp.ne.s32.totalorder %v4185_v46, 0  ;;  %vm5241_vm7 = vcmp.ne.s32.totalorder %v4217_v6, 0 }
 0x48e   :  { %vm12878_vm6 = vmpackc.low %vm5242_vm13, %vm5210_vm12  ;;  %12817 = vmatpush1.bf16.msk.msra.mxu0 %vm12816_vm5, %v13167_v48  ;;  %v4247_v19 = vunpack.c.l.b16 %v3689_v43  ;;  %v4248_v3 = vunpack.c.h.b16 %v3689_v43  ;;  %v4279_v52 = vunpack.c.l.b16 %v3705_v5  ;;  %v4280_v29 = vunpack.c.h.b16 %v3705_v5 }
 0x48f   :  { %12879 = vmatprep.subr.msk.bf16.mxu1 %vm12878_vm6, %v13167_v48  ;;  %vm12880_vm14 = vmpackc.low %vm5241_vm7, %vm5209_vm8  ;;  %vm633_vm1 = vcmp.eq.bf16.partialorder %v13251_v23, %v18325_v57  ;;  %vm634_vm3 = vcmp.eq.bf16.partialorder %v13251_v23, %v18328_v9  ;;  %vm663_vm15 = vcmp.eq.bf16.partialorder %v13254_v28, %v18305_v10  ;;  %vm664_vm11 = vcmp.eq.bf16.partialorder %v13254_v28, %v18308_v49 }
 0x490   :  { %12881 = vmatpush1.bf16.msk.msra.mxu1 %vm12880_vm14, %v13167_v48  ;;  %vm5272_vm0 = vcmp.ne.s32.totalorder %v4248_v3, 0  ;;  %vm5304_vm4 = vcmp.ne.s32.totalorder %v4280_v29, 0  ;;  %v1145_v45 = vsel %vm633_vm1, 65537, %v13166_v16  ;;  %v1146_v62 = vsel %vm634_vm3, 65537, %v13166_v16 }
 0x491   :  { %vm12818_vm10 = vmpackc.low %vm5304_vm4, %vm5272_vm0  ;;  %v10427_v20 = vcombine.low %v1145_v45, %v1146_v62  ;;  %v10443_v30 = vcombine.high %v1145_v45, %v1146_v62  ;;  %vm5271_vm9 = vcmp.ne.s32.totalorder %v4247_v19, 0  ;;  %vm5303_vm2 = vcmp.ne.s32.totalorder %v4279_v52, 0 }
 0x492   :  { %12819 = vmatprep.subr.msk.bf16.mxu0 %vm12818_vm10, %v13167_v48  ;;  %vm12820_vm12 = vmpackc.low %vm5303_vm2, %vm5271_vm9  ;;  %v1175_v23 = vsel %vm663_vm15, 65537, %v13166_v16  ;;  %v1176_v35 = vsel %vm664_vm11, 65537, %v13166_v16  ;;  %vm665_vm13 = vcmp.eq.bf16.partialorder %v13254_v28, %v18325_v57  ;;  %vm666_vm5 = vcmp.eq.bf16.partialorder %v13254_v28, %v18328_v9 }
 0x493   :  { %vm3178_vm8 = vcmp.ne.s16.totalorder %v10427_v20, 0  ;;  %vm3194_vm7 = vcmp.ne.s16.totalorder %v10443_v30, 0  ;;  %12821 = vmatpush1.bf16.msk.msra.mxu0 %vm12820_vm12, %v13167_v48  ;;  %v10458_v59 = vcombine.low %v1175_v23, %v1176_v35  ;;  %v10474_v11 = vcombine.high %v1175_v23, %v1176_v35 }
 0x494   :  { %v3690_v22 = vsel %vm3178_vm8, 65537, %v13166_v16  ;;  %v3706_v21 = vsel %vm3194_vm7, 65537, %v13166_v16  ;;  %v1177_v46 = vsel %vm665_vm13, 65537, %v13166_v16  ;;  %v1178_v4 = vsel %vm666_vm5, 65537, %v13166_v16 }
 0x495   :  { %v4249_v6 = vunpack.c.l.b16 %v3690_v22  ;;  %v4250_v43 = vunpack.c.h.b16 %v3690_v22  ;;  %v4281_v5 = vunpack.c.l.b16 %v3706_v21  ;;  %v4282_v19 = vunpack.c.h.b16 %v3706_v21 }
 0x496   :  { %vm3209_vm6 = vcmp.ne.s16.totalorder %v10458_v59, 0  ;;  %vm3225_vm14 = vcmp.ne.s16.totalorder %v10474_v11, 0  ;;  %v10459_v28 = vcombine.low %v1177_v46, %v1178_v4  ;;  %v10475_v3 = vcombine.high %v1177_v46, %v1178_v4 }
 0x497   :  { %vm5274_vm1 = vcmp.ne.s32.totalorder %v4250_v43, 0  ;;  %vm5306_vm3 = vcmp.ne.s32.totalorder %v4282_v19, 0  ;;  %vm5273_vm15 = vcmp.ne.s32.totalorder %v4249_v6, 0  ;;  %vm5305_vm11 = vcmp.ne.s32.totalorder %v4281_v5, 0 }
 0x498   :  { %vm12882_vm0 = vmpackc.low %vm5306_vm3, %vm5274_vm1  ;;  %v3721_v52 = vsel %vm3209_vm6, 65537, %v13166_v16  ;;  %v3737_v29 = vsel %vm3225_vm14, 65537, %v13166_v16  ;;  %vm3210_vm4 = vcmp.ne.s16.totalorder %v10459_v28, 0  ;;  %vm3226_vm10 = vcmp.ne.s16.totalorder %v10475_v3, 0 }
 0x499   :  { %12883 = vmatprep.subr.msk.bf16.mxu1 %vm12882_vm0, %v13167_v48  ;;  %vm12884_vm9 = vmpackc.low %vm5305_vm11, %vm5273_vm15  ;;  %v4311_v45 = vunpack.c.l.b16 %v3721_v52  ;;  %v4312_v62 = vunpack.c.h.b16 %v3721_v52  ;;  %v4343_v20 = vunpack.c.l.b16 %v3737_v29  ;;  %v4344_v30 = vunpack.c.h.b16 %v3737_v29 }
 0x49a   :  { %12885 = vmatpush1.bf16.msk.msra.mxu1 %vm12884_vm9, %v13167_v48  ;;  %v3722_v23 = vsel %vm3210_vm4, 65537, %v13166_v16  ;;  %v3738_v35 = vsel %vm3226_vm10, 65537, %v13166_v16  ;;  %vm695_vm2 = vcmp.eq.bf16.partialorder %v13257_v31, %v18305_v10  ;;  %vm696_vm12 = vcmp.eq.bf16.partialorder %v13257_v31, %v18308_v49 }
 0x49b   :  { %vm5336_vm13 = vcmp.ne.s32.totalorder %v4312_v62, 0  ;;  %vm5368_vm5 = vcmp.ne.s32.totalorder %v4344_v30, 0  ;;  %v4313_v59 = vunpack.c.l.b16 %v3722_v23  ;;  %v4314_v11 = vunpack.c.h.b16 %v3722_v23 }
 0x49c   :  { %vm12822_vm8 = vmpackc.low %vm5368_vm5, %vm5336_vm13  ;;  %v4345_v22 = vunpack.c.l.b16 %v3738_v35  ;;  %v4346_v21 = vunpack.c.h.b16 %v3738_v35  ;;  %vm5335_vm7 = vcmp.ne.s32.totalorder %v4311_v45, 0  ;;  %vm5367_vm6 = vcmp.ne.s32.totalorder %v4343_v20, 0 }
 0x49d   :  { %12823 = vmatprep.subr.msk.bf16.mxu0 %vm12822_vm8, %v13167_v48  ;;  %vm18387_vm14 = vcmp.ne.s32.totalorder %v4314_v11, 0  ;;  %vm12824_vm1 = vmpackc.low %vm5367_vm6, %vm5335_vm7  ;;  %vm18391_vm3 = vcmp.ne.s32.totalorder %v4313_v59, 0  ;;  %v1207_v6 = vsel %vm695_vm2, 65537, %v13166_v16  ;;  %v1208_v43 = vsel %vm696_vm12, 65537, %v13166_v16 }
 0x49e   :  { %vm5370_vm15 = vcmp.ne.s32.totalorder %v4346_v21, 0  ;;  %12825 = vmatpush1.bf16.msk.msra.mxu0 %vm12824_vm1, %v13167_v48  ;;  %vm5369_vm11 = vcmp.ne.s32.totalorder %v4345_v22, 0  ;;  %v10490_v5 = vcombine.low %v1207_v6, %v1208_v43  ;;  %v10506_v19 = vcombine.high %v1207_v6, %v1208_v43 }
 0x49f   :  { %vm12886_vm0 = vmpackc.low %vm5370_vm15, %vm18387_vm14  ;;  %vm697_vm4 = vcmp.eq.bf16.partialorder %v13257_v31, %v18325_v57  ;;  %vm698_vm10 = vcmp.eq.bf16.partialorder %v13257_v31, %v18328_v9  ;;  %vm727_vm9 = vcmp.eq.bf16.partialorder %v13265_v39, %v18305_v10  ;;  %vm728_vm2 = vcmp.eq.bf16.partialorder %v13265_v39, %v18308_v49 }
 0x4a0   :  { %12887 = vmatprep.subr.msk.bf16.mxu1 %vm12886_vm0, %v13167_v48  ;;  %vm12888_vm12 = vmpackc.low %vm5369_vm11, %vm18391_vm3  ;;  %vm3241_vm13 = vcmp.ne.s16.totalorder %v10490_v5, 0  ;;  %vm3257_vm5 = vcmp.ne.s16.totalorder %v10506_v19, 0  ;;  %v1209_v28 = vsel %vm697_vm4, 65537, %v13166_v16  ;;  %v1210_v3 = vsel %vm698_vm10, 65537, %v13166_v16 }
 0x4a1   :  { %12889 = vmatpush1.bf16.msk.msra.mxu1 %vm12888_vm12, %v13167_v48  ;;  %v3753_v31 = vsel %vm3241_vm13, 65537, %v13166_v16  ;;  %v3769_v52 = vsel %vm3257_vm5, 65537, %v13166_v16  ;;  %v10491_v29 = vcombine.low %v1209_v28, %v1210_v3  ;;  %v10507_v45 = vcombine.high %v1209_v28, %v1210_v3 }
 0x4a2   :  { %v4375_v62 = vunpack.c.l.b16 %v3753_v31  ;;  %v4376_v20 = vunpack.c.h.b16 %v3753_v31  ;;  %v4407_v30 = vunpack.c.l.b16 %v3769_v52  ;;  %v4408_v23 = vunpack.c.h.b16 %v3769_v52 }
 0x4a3   :  { %vm3242_vm8 = vcmp.ne.s16.totalorder %v10491_v29, 0  ;;  %vm3258_vm7 = vcmp.ne.s16.totalorder %v10507_v45, 0  ;;  %v1239_v35 = vsel %vm727_vm9, 65537, %v13166_v16  ;;  %v1240_v59 = vsel %vm728_vm2, 65537, %v13166_v16 }
 0x4a4   :  { %vm5400_vm6 = vcmp.ne.s32.totalorder %v4376_v20, 0  ;;  %vm5432_vm14 = vcmp.ne.s32.totalorder %v4408_v23, 0  ;;  %v3754_v11 = vsel %vm3242_vm8, 65537, %v13166_v16  ;;  %v3770_v22 = vsel %vm3258_vm7, 65537, %v13166_v16 }
 0x4a5   :  { %vm12826_vm1 = vmpackc.low %vm5432_vm14, %vm5400_vm6  ;;  %v4377_v21 = vunpack.c.l.b16 %v3754_v11  ;;  %v4378_v46 = vunpack.c.h.b16 %v3754_v11  ;;  %v4409_v4 = vunpack.c.l.b16 %v3770_v22  ;;  %v4410_v6 = vunpack.c.h.b16 %v3770_v22  ;;  %v18452_v11 = vpop.f32.mrb[16].mxu0  ;;  %v18454_v22 = vpop.f32.mrb[16].mxu1 }
 0x4a6   :  { %12827 = vmatprep.subr.msk.bf16.mxu0 %vm12826_vm1, %v13167_v48  ;;  %vm5399_vm3 = vcmp.ne.s32.totalorder %v4375_v62, 0  ;;  %vm5431_vm15 = vcmp.ne.s32.totalorder %v4407_v30, 0  ;;  %v10522_v43 = vcombine.low %v1239_v35, %v1240_v59  ;;  %v10538_v5 = vcombine.high %v1239_v35, %v1240_v59 }
 0x4a7   :  { %vm5402_vm11 = vcmp.ne.s32.totalorder %v4378_v46, 0  ;;  %vm5434_vm0 = vcmp.ne.s32.totalorder %v4410_v6, 0  ;;  %vm12828_vm4 = vmpackc.low %vm5431_vm15, %vm5399_vm3  ;;  %vm5401_vm10 = vcmp.ne.s32.totalorder %v4377_v21, 0  ;;  %vm5433_vm9 = vcmp.ne.s32.totalorder %v4409_v4, 0  ;;  %v18460_v21 = vpop.f32.mrb[17].mxu0  ;;  %v18462_v46 = vpop.f32.mrb[17].mxu1 }
 0x4a8   :  { %vm12890_vm2 = vmpackc.low %vm5434_vm0, %vm5402_vm11  ;;  %12829 = vmatpush1.bf16.msk.msra.mxu0 %vm12828_vm4, %v13167_v48  ;;  %vm3273_vm12 = vcmp.ne.s16.totalorder %v10522_v43, 0  ;;  %vm3289_vm13 = vcmp.ne.s16.totalorder %v10538_v5, 0  ;;  %vm729_vm5 = vcmp.eq.bf16.partialorder %v13265_v39, %v18325_v57  ;;  %vm730_vm8 = vcmp.eq.bf16.partialorder %v13265_v39, %v18328_v9  ;;  %v9182_v5 = vpop.f32.mrb[18].mxu1 }
 0x4a9   :  { %12891 = vmatprep.subr.msk.bf16.mxu1 %vm12890_vm2, %v13167_v48  ;;  %vm12892_vm7 = vmpackc.low %vm5433_vm9, %vm5401_vm10  ;;  %v3785_v19 = vsel %vm3273_vm12, 65537, %v13166_v16  ;;  %v3801_v28 = vsel %vm3289_vm13, 65537, %v13166_v16  ;;  %v1241_v3 = vsel %vm729_vm5, 65537, %v13166_v16  ;;  %v1242_v31 = vsel %vm730_vm8, 65537, %v13166_v16 }
 0x4aa   :  { %12893 = vmatpush1.bf16.msk.msra.mxu1 %vm12892_vm7, %v13167_v48  ;;  %v4439_v52 = vunpack.c.l.b16 %v3785_v19  ;;  %v4440_v29 = vunpack.c.h.b16 %v3785_v19  ;;  %v4471_v45 = vunpack.c.l.b16 %v3801_v28  ;;  %v4472_v62 = vunpack.c.h.b16 %v3801_v28 }
 0x4ab   :  { %v10523_v20 = vcombine.low %v1241_v3, %v1242_v31  ;;  %v10539_v30 = vcombine.high %v1241_v3, %v1242_v31  ;;  %v9539_v39 = vadd.f32 %v9475_v50, %v18017_v14  ;;  %v9541_v23 = vadd.f32 %v9477_v58, %v18019_v61 }
 0x4ac   :  { %vm5464_vm6 = vcmp.ne.s32.totalorder %v4440_v29, 0  ;;  %vm5496_vm14 = vcmp.ne.s32.totalorder %v4472_v62, 0  ;;  %vm18444_vm1 = vcmp.ne.s32.totalorder %v4439_v52, 0  ;;  %vm18448_vm3 = vcmp.ne.s32.totalorder %v4471_v45, 0  ;;  %v9183_v29 = vpop.f32.mrb[19].mxu1 }
 0x4ad   :  { %vm12830_vm15 = vmpackc.low %vm5496_vm14, %vm5464_vm6  ;;  %vm3274_vm11 = vcmp.ne.s16.totalorder %v10523_v20, 0  ;;  %vm3290_vm0 = vcmp.ne.s16.totalorder %v10539_v30, 0  ;;  %v9635_v50 = vadd.f32 %v9571_v13, %v9539_v39  ;;  %v9637_v58 = vadd.f32 %v9573_v38, %v9541_v23  ;;  %v9141_v38 = vpop.f32.mrb[18].mxu0 }
 0x4ae   :  { %12831 = vmatprep.subr.msk.bf16.mxu0 %vm12830_vm15, %v13167_v48  ;;  %v3786_v4 = vsel %vm3274_vm11, 65537, %v13166_v16  ;;  %v3802_v6 = vsel %vm3290_vm0, 65537, %v13166_v16  ;;  %vm12832_vm4 = vmpackc.low %vm18448_vm3, %vm18444_vm1  ;;  %v9476_v13 = vrot.slane %v18022_v8, 1  ;;  %v9572_v43 = vrot.slane %v18022_v8, 2  ;;  %v9142_v52 = vpop.f32.mrb[19].mxu0 }
 0x4af   :  { %v4441_v19 = vunpack.c.l.b16 %v3786_v4  ;;  %v4442_v28 = vunpack.c.h.b16 %v3786_v4  ;;  %v4473_v3 = vunpack.c.l.b16 %v3802_v6  ;;  %v4474_v31 = vunpack.c.h.b16 %v3802_v6  ;;  %12833 = vmatpush1.bf16.msk.msra.mxu0 %vm12832_vm4, %v13167_v48 }
 0x4b0   :  { %v9540_v45 = vadd.f32 %v9476_v13, %v18022_v8  ;;  %v9938_v62 = vcombine.low %v18017_v14, %v18022_v8  ;;  %v9478_v20 = vrot.slane %v18028_v27, 1  ;;  %v9574_v30 = vrot.slane %v18028_v27, 2 }
 0x4b1   :  { %vm5466_vm10 = vcmp.ne.s32.totalorder %v4442_v28, 0  ;;  %vm5498_vm9 = vcmp.ne.s32.totalorder %v4474_v31, 0  ;;  %vm5465_vm2 = vcmp.ne.s32.totalorder %v4441_v19, 0  ;;  %vm5497_vm12 = vcmp.ne.s32.totalorder %v4473_v3, 0 }
 0x4b2   :  { %vm12894_vm13 = vmpackc.low %vm5498_vm9, %vm5466_vm10  ;;  %v9636_v39 = vadd.f32 %v9572_v43, %v9540_v45  ;;  %v18480_v23 = vrot.slane %v9938_v62, %v16561_v41  ;;  %v9542_v35 = vadd.f32 %v9478_v20, %v18028_v27  ;;  %v9939_v59 = vcombine.low %v18019_v61, %v18028_v27 }
 0x4b3   :  { %12895 = vmatprep.subr.msk.bf16.mxu1 %vm12894_vm13, %v13167_v48  ;;  %vm12896_vm5 = vmpackc.low %vm5497_vm12, %vm5465_vm2  ;;  %vm759_vm8 = vcmp.eq.bf16.partialorder %v13276_v47, %v18305_v10  ;;  %vm760_vm7 = vcmp.eq.bf16.partialorder %v13276_v47, %v18308_v49  ;;  %vm761_vm6 = vcmp.eq.bf16.partialorder %v13276_v47, %v18325_v57  ;;  %vm762_vm14 = vcmp.eq.bf16.partialorder %v13276_v47, %v18328_v9 }
 0x4b4   :  { %12897 = vmatpush1.bf16.msk.msra.mxu1 %vm12896_vm5, %v13167_v48  ;;  %v9738_v14 = vcombine.low %v9635_v50, %v9636_v39  ;;  %v9638_v8 = vadd.f32 %v9574_v30, %v9542_v35  ;;  %v18496_v61 = vrot.slane %v9939_v59, %v16561_v41  ;;  %v1271_v27 = vsel %vm759_vm8, 65537, %v13166_v16 }
 0x4b5   :  { %v1272_v4 = vsel %vm760_vm7, 65537, %v13166_v16  ;;  %v1273_v6 = vsel %vm761_vm6, 65537, %v13166_v16  ;;  %v1274_v13 = vsel %vm762_vm14, 65537, %v13166_v16  ;;  %vm791_vm1 = vcmp.eq.bf16.partialorder %v13278_v55, %v18305_v10 }
 0x4b6   :  { %v18505_v47 = vrot.slane %v9738_v14, %v16561_v41  ;;  %v9739_v43 = vcombine.low %v9637_v58, %v9638_v8  ;;  %v9969_v50 = vcombine.low %v18480_v23, %v18496_v61  ;;  %v10105_v38 = vcombine.high %v18480_v23, %v18496_v61 }
 0x4b7   :  { %v10554_v5 = vcombine.low %v1271_v27, %v1272_v4  ;;  %v10570_v19 = vcombine.high %v1271_v27, %v1272_v4  ;;  %v10555_v28 = vcombine.low %v1273_v6, %v1274_v13  ;;  %v10571_v3 = vcombine.high %v1273_v6, %v1274_v13 }
 0x4b8   :  { %v18512_v31 = vrot.slane %v9739_v43, %v16561_v41  ;;  %vm792_vm3 = vcmp.eq.bf16.partialorder %v13278_v55, %v18308_v49  ;;  %v1303_v52 = vsel %vm791_vm1, 65537, %v13166_v16  ;;  %vm793_vm15 = vcmp.eq.bf16.partialorder %v13278_v55, %v18325_v57 }
 0x4b9   :  { %vm3305_vm11 = vcmp.ne.s16.totalorder %v10554_v5, 0  ;;  %vm3321_vm0 = vcmp.ne.s16.totalorder %v10570_v19, 0  ;;  %vm3306_vm4 = vcmp.ne.s16.totalorder %v10555_v28, 0  ;;  %vm3322_vm10 = vcmp.ne.s16.totalorder %v10571_v3, 0 }
 0x4ba   :  { %v9769_v58 = vcombine.low %v18505_v47, %v18512_v31  ;;  %v3817_v29 = vsel %vm3305_vm11, 65537, %v13166_v16  ;;  %v3833_v45 = vsel %vm3321_vm0, 65537, %v13166_v16  ;;  %v3818_v62 = vsel %vm3306_vm4, 65537, %v13166_v16  ;;  %v18524_v59 = vpop.f32.mrb[20].mxu0 }
 0x4bb   :  { %v4503_v20 = vunpack.c.l.b16 %v3817_v29  ;;  %v4504_v30 = vunpack.c.h.b16 %v3817_v29  ;;  %v4535_v39 = vunpack.c.l.b16 %v3833_v45  ;;  %v4536_v35 = vunpack.c.h.b16 %v3833_v45  ;;  %v18533_v13 = vpop.f32.mrb[21].mxu0 }
 0x4bc   :  { %v3834_v14 = vsel %vm3322_vm10, 65537, %v13166_v16  ;;  %v4505_v8 = vunpack.c.l.b16 %v3818_v62  ;;  %v4506_v27 = vunpack.c.h.b16 %v3818_v62  ;;  %v1304_v4 = vsel %vm792_vm3, 65537, %v13166_v16  ;;  %v18531_v6 = vpop.f32.mrb[20].mxu1  ;;  %v9223_v28 = vpop.f32.mrb[22].mxu0 }
 0x4bd   :  { %vm5528_vm9 = vcmp.ne.s32.totalorder %v4504_v30, 0  ;;  %vm5560_vm2 = vcmp.ne.s32.totalorder %v4536_v35, 0  ;;  %v4537_v43 = vunpack.c.l.b16 %v3834_v14  ;;  %v4538_v5 = vunpack.c.h.b16 %v3834_v14  ;;  %v18535_v19 = vpop.f32.mrb[21].mxu1  ;;  %v9224_v62 = vpop.f32.mrb[23].mxu0 }
 0x4be   :  { %vm12834_vm12 = vmpackc.low %vm5560_vm2, %vm5528_vm9  ;;  %vm18537_vm13 = vcmp.ne.s32.totalorder %v4506_v27, 0  ;;  %vm5527_vm5 = vcmp.ne.s32.totalorder %v4503_v20, 0  ;;  %vm5559_vm8 = vcmp.ne.s32.totalorder %v4535_v39, 0  ;;  %vm18541_vm7 = vcmp.ne.s32.totalorder %v4505_v8, 0  ;;  %v9264_v45 = vpop.f32.mrb[22].mxu1 }
 0x4bf   :  { %12835 = vmatprep.subr.msk.bf16.mxu0 %vm12834_vm12, %v13167_v48  ;;  %vm5562_vm6 = vcmp.ne.s32.totalorder %v4538_v5, 0  ;;  %vm12836_vm14 = vmpackc.low %vm5559_vm8, %vm5527_vm5  ;;  %vm18546_vm1 = vcmp.ne.s32.totalorder %v4537_v43, 0  ;;  %v10586_v35 = vcombine.low %v1303_v52, %v1304_v4  ;;  %v10602_v14 = vcombine.high %v1303_v52, %v1304_v4  ;;  %v9265_v27 = vpop.f32.mrb[23].mxu1 }
 0x4c0   :  { %vm12898_vm3 = vmpackc.low %vm5562_vm6, %vm18537_vm13  ;;  %12837 = vmatpush1.bf16.msk.msra.mxu0 %vm12836_vm14, %v13167_v48  ;;  %vm794_vm11 = vcmp.eq.bf16.partialorder %v13278_v55, %v18328_v9  ;;  %v1305_v20 = vsel %vm793_vm15, 65537, %v13166_v16  ;;  %vm823_vm0 = vcmp.eq.bf16.partialorder %v13280_v56, %v18305_v10  ;;  %vm824_vm4 = vcmp.eq.bf16.partialorder %v13280_v56, %v18308_v49 }
 0x4c1   :  { %12899 = vmatprep.subr.msk.bf16.mxu1 %vm12898_vm3, %v13167_v48  ;;  %vm12900_vm10 = vmpackc.low %vm18546_vm1, %vm18541_vm7  ;;  %vm3337_vm9 = vcmp.ne.s16.totalorder %v10586_v35, 0  ;;  %vm3353_vm2 = vcmp.ne.s16.totalorder %v10602_v14, 0  ;;  %v1306_v52 = vsel %vm794_vm11, 65537, %v13166_v16  ;;  %v1335_v55 = vsel %vm823_vm0, 65537, %v13166_v16 }
 0x4c2   :  { %12901 = vmatpush1.bf16.msk.msra.mxu1 %vm12900_vm10, %v13167_v48  ;;  %v3849_v39 = vsel %vm3337_vm9, 65537, %v13166_v16  ;;  %v3865_v8 = vsel %vm3353_vm2, 65537, %v13166_v16  ;;  %v10587_v4 = vcombine.low %v1305_v20, %v1306_v52  ;;  %v10603_v43 = vcombine.high %v1305_v20, %v1306_v52 }
 0x4c3   :  { %v4567_v5 = vunpack.c.l.b16 %v3849_v39  ;;  %v4568_v28 = vunpack.c.h.b16 %v3849_v39  ;;  %v4599_v3 = vunpack.c.l.b16 %v3865_v8  ;;  %v4600_v29 = vunpack.c.h.b16 %v3865_v8 }
 0x4c4   :  { %vm3338_vm15 = vcmp.ne.s16.totalorder %v10587_v4, 0  ;;  %vm3354_vm12 = vcmp.ne.s16.totalorder %v10603_v43, 0  ;;  %v1336_v45 = vsel %vm824_vm4, 65537, %v13166_v16  ;;  %vm825_vm13 = vcmp.eq.bf16.partialorder %v13280_v56, %v18325_v57 }
 0x4c5   :  { %vm5592_vm5 = vcmp.ne.s32.totalorder %v4568_v28, 0  ;;  %vm5624_vm8 = vcmp.ne.s32.totalorder %v4600_v29, 0  ;;  %v3850_v62 = vsel %vm3338_vm15, 65537, %v13166_v16  ;;  %v3866_v30 = vsel %vm3354_vm12, 65537, %v13166_v16 }
 0x4c6   :  { %vm12838_vm7 = vmpackc.low %vm5624_vm8, %vm5592_vm5  ;;  %v4569_v35 = vunpack.c.l.b16 %v3850_v62  ;;  %v4570_v14 = vunpack.c.h.b16 %v3850_v62  ;;  %v4601_v27 = vunpack.c.l.b16 %v3866_v30  ;;  %v4602_v20 = vunpack.c.h.b16 %v3866_v30 }
 0x4c7   :  { %12839 = vmatprep.subr.msk.bf16.mxu0 %vm12838_vm7, %v13167_v48  ;;  %vm5591_vm6 = vcmp.ne.s32.totalorder %v4567_v5, 0  ;;  %vm5623_vm14 = vcmp.ne.s32.totalorder %v4599_v3, 0  ;;  %v10618_v52 = vcombine.low %v1335_v55, %v1336_v45  ;;  %v10634_v39 = vcombine.high %v1335_v55, %v1336_v45 }
 0x4c8   :  { %vm5594_vm1 = vcmp.ne.s32.totalorder %v4570_v14, 0  ;;  %vm5626_vm3 = vcmp.ne.s32.totalorder %v4602_v20, 0  ;;  %vm12840_vm11 = vmpackc.low %vm5623_vm14, %vm5591_vm6  ;;  %vm5593_vm0 = vcmp.ne.s32.totalorder %v4569_v35, 0  ;;  %vm5625_vm4 = vcmp.ne.s32.totalorder %v4601_v27, 0 }
 0x4c9   :  { %vm12902_vm10 = vmpackc.low %vm5626_vm3, %vm5594_vm1  ;;  %12841 = vmatpush1.bf16.msk.msra.mxu0 %vm12840_vm11, %v13167_v48  ;;  %vm3369_vm9 = vcmp.ne.s16.totalorder %v10618_v52, 0  ;;  %vm3385_vm2 = vcmp.ne.s16.totalorder %v10634_v39, 0  ;;  %vm826_vm15 = vcmp.eq.bf16.partialorder %v13280_v56, %v18328_v9  ;;  %v1337_v8 = vsel %vm825_vm13, 65537, %v13166_v16 }
 0x4ca   :  { %12903 = vmatprep.subr.msk.bf16.mxu1 %vm12902_vm10, %v13167_v48  ;;  %vm12904_vm12 = vmpackc.low %vm5625_vm4, %vm5593_vm0  ;;  %v3881_v55 = vsel %vm3369_vm9, 65537, %v13166_v16  ;;  %v3897_v4 = vsel %vm3385_vm2, 65537, %v13166_v16  ;;  %v1338_v43 = vsel %vm826_vm15, 65537, %v13166_v16  ;;  %vm855_vm5 = vcmp.eq.bf16.partialorder %v13302_v12, %v18305_v10 }
 0x4cb   :  { %12905 = vmatpush1.bf16.msk.msra.mxu1 %vm12904_vm12, %v13167_v48  ;;  %v4631_v5 = vunpack.c.l.b16 %v3881_v55  ;;  %v4632_v28 = vunpack.c.h.b16 %v3881_v55  ;;  %v4663_v3 = vunpack.c.l.b16 %v3897_v4  ;;  %v4664_v29 = vunpack.c.h.b16 %v3897_v4 }
 0x4cc   :  { %v10619_v56 = vcombine.low %v1337_v8, %v1338_v43  ;;  %v10635_v45 = vcombine.high %v1337_v8, %v1338_v43  ;;  %vm856_vm13 = vcmp.eq.bf16.partialorder %v13302_v12, %v18308_v49  ;;  %v1367_v62 = vsel %vm855_vm5, 65537, %v13166_v16 }
 0x4cd   :  { %vm5656_vm8 = vcmp.ne.s32.totalorder %v4632_v28, 0  ;;  %vm5688_vm7 = vcmp.ne.s32.totalorder %v4664_v29, 0  ;;  %vm18599_vm6 = vcmp.ne.s32.totalorder %v4631_v5, 0  ;;  %vm18603_vm14 = vcmp.ne.s32.totalorder %v4663_v3, 0 }
 0x4ce   :  { %vm12842_vm1 = vmpackc.low %vm5688_vm7, %vm5656_vm8  ;;  %vm3370_vm3 = vcmp.ne.s16.totalorder %v10619_v56, 0  ;;  %vm3386_vm11 = vcmp.ne.s16.totalorder %v10635_v45, 0  ;;  %v1368_v14 = vsel %vm856_vm13, 65537, %v13166_v16  ;;  %vm857_vm0 = vcmp.eq.bf16.partialorder %v13302_v12, %v18325_v57 }
 0x4cf   :  { %12843 = vmatprep.subr.msk.bf16.mxu0 %vm12842_vm1, %v13167_v48  ;;  %v3882_v27 = vsel %vm3370_vm3, 65537, %v13166_v16  ;;  %v3898_v20 = vsel %vm3386_vm11, 65537, %v13166_v16  ;;  %vm12844_vm4 = vmpackc.low %vm18603_vm14, %vm18599_vm6  ;;  %v10650_v52 = vcombine.low %v1367_v62, %v1368_v14  ;;  %v10666_v39 = vcombine.high %v1367_v62, %v1368_v14 }
 0x4d0   :  { %v4633_v8 = vunpack.c.l.b16 %v3882_v27  ;;  %v4634_v55 = vunpack.c.h.b16 %v3882_v27  ;;  %v4665_v4 = vunpack.c.l.b16 %v3898_v20  ;;  %v4666_v43 = vunpack.c.h.b16 %v3898_v20  ;;  %12845 = vmatpush1.bf16.msk.msra.mxu0 %vm12844_vm4, %v13167_v48 }
 0x4d1   :  { %vm3401_vm10 = vcmp.ne.s16.totalorder %v10650_v52, 0  ;;  %vm3417_vm9 = vcmp.ne.s16.totalorder %v10666_v39, 0  ;;  %vm858_vm2 = vcmp.eq.bf16.partialorder %v13302_v12, %v18328_v9  ;;  %v1369_v5 = vsel %vm857_vm0, 65537, %v13166_v16 }
 0x4d2   :  { %vm5658_vm15 = vcmp.ne.s32.totalorder %v4634_v55, 0  ;;  %vm5690_vm12 = vcmp.ne.s32.totalorder %v4666_v43, 0  ;;  %vm5657_vm5 = vcmp.ne.s32.totalorder %v4633_v8, 0  ;;  %vm5689_vm13 = vcmp.ne.s32.totalorder %v4665_v4, 0 }
 0x4d3   :  { %vm12906_vm8 = vmpackc.low %vm5690_vm12, %vm5658_vm15  ;;  %v3913_v28 = vsel %vm3401_vm10, 65537, %v13166_v16  ;;  %v3929_v3 = vsel %vm3417_vm9, 65537, %v13166_v16  ;;  %v1370_v29 = vsel %vm858_vm2, 65537, %v13166_v16  ;;  %vm887_vm7 = vcmp.eq.bf16.partialorder %v13772_v32, %v18305_v10 }
 0x4d4   :  { %12907 = vmatprep.subr.msk.bf16.mxu1 %vm12906_vm8, %v13167_v48  ;;  %vm12908_vm6 = vmpackc.low %vm5689_vm13, %vm5657_vm5  ;;  %v4695_v12 = vunpack.c.l.b16 %v3913_v28  ;;  %v4696_v56 = vunpack.c.h.b16 %v3913_v28  ;;  %v4727_v45 = vunpack.c.l.b16 %v3929_v3  ;;  %v4728_v62 = vunpack.c.h.b16 %v3929_v3 }
 0x4d5   :  { %12909 = vmatpush1.bf16.msk.msra.mxu1 %vm12908_vm6, %v13167_v48  ;;  %v10651_v30 = vcombine.low %v1369_v5, %v1370_v29  ;;  %v10667_v35 = vcombine.high %v1369_v5, %v1370_v29  ;;  %vm888_vm14 = vcmp.eq.bf16.partialorder %v13772_v32, %v18308_v49  ;;  %v1399_v14 = vsel %vm887_vm7, 65537, %v13166_v16 }
 0x4d6   :  { %vm5720_vm1 = vcmp.ne.s32.totalorder %v4696_v56, 0  ;;  %vm5752_vm3 = vcmp.ne.s32.totalorder %v4728_v62, 0  ;;  %vm18631_vm11 = vcmp.ne.s32.totalorder %v4695_v12, 0  ;;  %vm18635_vm0 = vcmp.ne.s32.totalorder %v4727_v45, 0 }
 0x4d7   :  { %vm12846_vm4 = vmpackc.low %vm5752_vm3, %vm5720_vm1  ;;  %vm3402_vm10 = vcmp.ne.s16.totalorder %v10651_v30, 0  ;;  %vm3418_vm9 = vcmp.ne.s16.totalorder %v10667_v35, 0  ;;  %v1400_v52 = vsel %vm888_vm14, 65537, %v13166_v16  ;;  %vm889_vm2 = vcmp.eq.bf16.partialorder %v13772_v32, %v18325_v57 }
 0x4d8   :  { %12847 = vmatprep.subr.msk.bf16.mxu0 %vm12846_vm4, %v13167_v48  ;;  %v3914_v39 = vsel %vm3402_vm10, 65537, %v13166_v16  ;;  %v3930_v8 = vsel %vm3418_vm9, 65537, %v13166_v16  ;;  %vm12848_vm15 = vmpackc.low %vm18635_vm0, %vm18631_vm11  ;;  %v10682_v55 = vcombine.low %v1399_v14, %v1400_v52  ;;  %v10698_v4 = vcombine.high %v1399_v14, %v1400_v52 }
 0x4d9   :  { %v4697_v43 = vunpack.c.l.b16 %v3914_v39  ;;  %v4698_v5 = vunpack.c.h.b16 %v3914_v39  ;;  %v4729_v28 = vunpack.c.l.b16 %v3930_v8  ;;  %v4730_v3 = vunpack.c.h.b16 %v3930_v8  ;;  %12849 = vmatpush1.bf16.msk.msra.mxu0 %vm12848_vm15, %v13167_v48 }
 0x4da   :  { %vm3433_vm12 = vcmp.ne.s16.totalorder %v10682_v55, 0  ;;  %vm3449_vm5 = vcmp.ne.s16.totalorder %v10698_v4, 0  ;;  %vm890_vm13 = vcmp.eq.bf16.partialorder %v13772_v32, %v18328_v9  ;;  %v1401_v29 = vsel %vm889_vm2, 65537, %v13166_v16 }
 0x4db   :  { %vm5722_vm8 = vcmp.ne.s32.totalorder %v4698_v5, 0  ;;  %vm5754_vm7 = vcmp.ne.s32.totalorder %v4730_v3, 0  ;;  %vm5721_vm6 = vcmp.ne.s32.totalorder %v4697_v43, 0  ;;  %vm5753_vm14 = vcmp.ne.s32.totalorder %v4729_v28, 0 }
 0x4dc   :  { %vm12910_vm1 = vmpackc.low %vm5754_vm7, %vm5722_vm8  ;;  %v3945_v12 = vsel %vm3433_vm12, 65537, %v13166_v16  ;;  %v3961_v56 = vsel %vm3449_vm5, 65537, %v13166_v16  ;;  %v1402_v45 = vsel %vm890_vm13, 65537, %v13166_v16  ;;  %vm919_vm3 = vcmp.eq.bf16.partialorder %v13855_v37, %v18305_v10 }
 0x4dd   :  { %12911 = vmatprep.subr.msk.bf16.mxu1 %vm12910_vm1, %v13167_v48  ;;  %vm12912_vm11 = vmpackc.low %vm5753_vm14, %vm5721_vm6  ;;  %v4759_v32 = vunpack.c.l.b16 %v3945_v12  ;;  %v4760_v62 = vunpack.c.h.b16 %v3945_v12  ;;  %v4791_v30 = vunpack.c.l.b16 %v3961_v56  ;;  %v4792_v35 = vunpack.c.h.b16 %v3961_v56 }
 0x4de   :  { %12913 = vmatpush1.bf16.msk.msra.mxu1 %vm12912_vm11, %v13167_v48  ;;  %v10683_v14 = vcombine.low %v1401_v29, %v1402_v45  ;;  %v10699_v27 = vcombine.high %v1401_v29, %v1402_v45  ;;  %vm920_vm0 = vcmp.eq.bf16.partialorder %v13855_v37, %v18308_v49  ;;  %v1431_v20 = vsel %vm919_vm3, 65537, %v13166_v16 }
 0x4df   :  { %vm5784_vm4 = vcmp.ne.s32.totalorder %v4760_v62, 0  ;;  %vm5816_vm10 = vcmp.ne.s32.totalorder %v4792_v35, 0  ;;  %vm18663_vm9 = vcmp.ne.s32.totalorder %v4759_v32, 0  ;;  %vm18667_vm2 = vcmp.ne.s32.totalorder %v4791_v30, 0 }
 0x4e0   :  { %vm12850_vm15 = vmpackc.low %vm5816_vm10, %vm5784_vm4  ;;  %vm3434_vm12 = vcmp.ne.s16.totalorder %v10683_v14, 0  ;;  %vm3450_vm5 = vcmp.ne.s16.totalorder %v10699_v27, 0  ;;  %v1432_v8 = vsel %vm920_vm0, 65537, %v13166_v16  ;;  %vm921_vm13 = vcmp.eq.bf16.partialorder %v13855_v37, %v18325_v57 }
 0x4e1   :  { %12851 = vmatprep.subr.msk.bf16.mxu0 %vm12850_vm15, %v13167_v48  ;;  %v3946_v55 = vsel %vm3434_vm12, 65537, %v13166_v16  ;;  %v3962_v4 = vsel %vm3450_vm5, 65537, %v13166_v16  ;;  %vm12852_vm8 = vmpackc.low %vm18667_vm2, %vm18663_vm9  ;;  %v10714_v43 = vcombine.low %v1431_v20, %v1432_v8  ;;  %v10730_v5 = vcombine.high %v1431_v20, %v1432_v8 }
 0x4e2   :  { %v4761_v28 = vunpack.c.l.b16 %v3946_v55  ;;  %v4762_v3 = vunpack.c.h.b16 %v3946_v55  ;;  %v4793_v29 = vunpack.c.l.b16 %v3962_v4  ;;  %v4794_v12 = vunpack.c.h.b16 %v3962_v4  ;;  %12853 = vmatpush1.bf16.msk.msra.mxu0 %vm12852_vm8, %v13167_v48 }
 0x4e3   :  { %vm3465_vm7 = vcmp.ne.s16.totalorder %v10714_v43, 0  ;;  %vm3481_vm6 = vcmp.ne.s16.totalorder %v10730_v5, 0  ;;  %vm922_vm14 = vcmp.eq.bf16.partialorder %v13855_v37, %v18328_v9  ;;  %v1433_v56 = vsel %vm921_vm13, 65537, %v13166_v16 }
 0x4e4   :  { %vm5786_vm1 = vcmp.ne.s32.totalorder %v4762_v3, 0  ;;  %vm5818_vm3 = vcmp.ne.s32.totalorder %v4794_v12, 0  ;;  %vm5785_vm11 = vcmp.ne.s32.totalorder %v4761_v28, 0  ;;  %vm5817_vm0 = vcmp.ne.s32.totalorder %v4793_v29, 0 }
 0x4e5   :  { %vm12914_vm4 = vmpackc.low %vm5818_vm3, %vm5786_vm1  ;;  %v3977_v45 = vsel %vm3465_vm7, 65537, %v13166_v16  ;;  %v3993_v32 = vsel %vm3481_vm6, 65537, %v13166_v16  ;;  %v1434_v62 = vsel %vm922_vm14, 65537, %v13166_v16  ;;  %vm951_vm10 = vcmp.eq.bf16.partialorder %v13896_v54, %v18305_v10 }
 0x4e6   :  { %12915 = vmatprep.subr.msk.bf16.mxu1 %vm12914_vm4, %v13167_v48  ;;  %vm12916_vm9 = vmpackc.low %vm5817_vm0, %vm5785_vm11  ;;  %v4823_v37 = vunpack.c.l.b16 %v3977_v45  ;;  %v4824_v30 = vunpack.c.h.b16 %v3977_v45  ;;  %v4855_v35 = vunpack.c.l.b16 %v3993_v32  ;;  %v4856_v14 = vunpack.c.h.b16 %v3993_v32 }
 0x4e7   :  { %12917 = vmatpush1.bf16.msk.msra.mxu1 %vm12916_vm9, %v13167_v48  ;;  %v10715_v27 = vcombine.low %v1433_v56, %v1434_v62  ;;  %v10731_v20 = vcombine.high %v1433_v56, %v1434_v62  ;;  %vm952_vm2 = vcmp.eq.bf16.partialorder %v13896_v54, %v18308_v49  ;;  %v1463_v52 = vsel %vm951_vm10, 65537, %v13166_v16 }
 0x4e8   :  { %vm5848_vm15 = vcmp.ne.s32.totalorder %v4824_v30, 0  ;;  %vm5880_vm12 = vcmp.ne.s32.totalorder %v4856_v14, 0  ;;  %vm18695_vm5 = vcmp.ne.s32.totalorder %v4823_v37, 0  ;;  %vm18699_vm13 = vcmp.ne.s32.totalorder %v4855_v35, 0 }
 0x4e9   :  { %vm12854_vm8 = vmpackc.low %vm5880_vm12, %vm5848_vm15  ;;  %vm3466_vm7 = vcmp.ne.s16.totalorder %v10715_v27, 0  ;;  %vm3482_vm6 = vcmp.ne.s16.totalorder %v10731_v20, 0  ;;  %v1464_v55 = vsel %vm952_vm2, 65537, %v13166_v16  ;;  %vm953_vm14 = vcmp.eq.bf16.partialorder %v13896_v54, %v18325_v57 }
 0x4ea   :  { %12855 = vmatprep.subr.msk.bf16.mxu0 %vm12854_vm8, %v13167_v48  ;;  %v3978_v4 = vsel %vm3466_vm7, 65537, %v13166_v16  ;;  %v3994_v43 = vsel %vm3482_vm6, 65537, %v13166_v16  ;;  %vm12856_vm1 = vmpackc.low %vm18699_vm13, %vm18695_vm5  ;;  %v10746_v5 = vcombine.low %v1463_v52, %v1464_v55  ;;  %v10762_v28 = vcombine.high %v1463_v52, %v1464_v55 }
 0x4eb   :  { %v4825_v3 = vunpack.c.l.b16 %v3978_v4  ;;  %v4826_v29 = vunpack.c.h.b16 %v3978_v4  ;;  %v4857_v12 = vunpack.c.l.b16 %v3994_v43  ;;  %v4858_v56 = vunpack.c.h.b16 %v3994_v43  ;;  %12857 = vmatpush1.bf16.msk.msra.mxu0 %vm12856_vm1, %v13167_v48 }
 0x4ec   :  { %vm3497_vm3 = vcmp.ne.s16.totalorder %v10746_v5, 0  ;;  %vm3513_vm11 = vcmp.ne.s16.totalorder %v10762_v28, 0  ;;  %vm954_vm0 = vcmp.eq.bf16.partialorder %v13896_v54, %v18328_v9  ;;  %v1465_v45 = vsel %vm953_vm14, 65537, %v13166_v16 }
 0x4ed   :  { %vm5850_vm4 = vcmp.ne.s32.totalorder %v4826_v29, 0  ;;  %vm5882_vm10 = vcmp.ne.s32.totalorder %v4858_v56, 0  ;;  %vm5849_vm9 = vcmp.ne.s32.totalorder %v4825_v3, 0  ;;  %vm5881_vm2 = vcmp.ne.s32.totalorder %v4857_v12, 0 }
 0x4ee   :  { %vm12918_vm15 = vmpackc.low %vm5882_vm10, %vm5850_vm4  ;;  %v4009_v32 = vsel %vm3497_vm3, 65537, %v13166_v16  ;;  %v4025_v62 = vsel %vm3513_vm11, 65537, %v13166_v16  ;;  %v1466_v37 = vsel %vm954_vm0, 65537, %v13166_v16  ;;  %vm983_vm12 = vcmp.eq.bf16.partialorder %v13947_v15, %v18305_v10 }
 0x4ef   :  { %12919 = vmatprep.subr.msk.bf16.mxu1 %vm12918_vm15, %v13167_v48  ;;  %vm12920_vm5 = vmpackc.low %vm5881_vm2, %vm5849_vm9  ;;  %v4887_v54 = vunpack.c.l.b16 %v4009_v32  ;;  %v4888_v30 = vunpack.c.h.b16 %v4009_v32  ;;  %v4919_v35 = vunpack.c.l.b16 %v4025_v62  ;;  %v4920_v14 = vunpack.c.h.b16 %v4025_v62 }
 0x4f0   :  { %12921 = vmatpush1.bf16.msk.msra.mxu1 %vm12920_vm5, %v13167_v48  ;;  %v10747_v27 = vcombine.low %v1465_v45, %v1466_v37  ;;  %v10763_v20 = vcombine.high %v1465_v45, %v1466_v37  ;;  %vm984_vm13 = vcmp.eq.bf16.partialorder %v13947_v15, %v18308_v49  ;;  %v1495_v52 = vsel %vm983_vm12, 65537, %v13166_v16 }
 0x4f1   :  { %vm5912_vm8 = vcmp.ne.s32.totalorder %v4888_v30, 0  ;;  %vm5944_vm7 = vcmp.ne.s32.totalorder %v4920_v14, 0  ;;  %vm18727_vm6 = vcmp.ne.s32.totalorder %v4887_v54, 0  ;;  %vm18731_vm14 = vcmp.ne.s32.totalorder %v4919_v35, 0 }
 0x4f2   :  { %vm12858_vm1 = vmpackc.low %vm5944_vm7, %vm5912_vm8  ;;  %vm3498_vm3 = vcmp.ne.s16.totalorder %v10747_v27, 0  ;;  %vm3514_vm11 = vcmp.ne.s16.totalorder %v10763_v20, 0  ;;  %v1496_v55 = vsel %vm984_vm13, 65537, %v13166_v16  ;;  %vm985_vm0 = vcmp.eq.bf16.partialorder %v13947_v15, %v18325_v57 }
 0x4f3   :  { %12859 = vmatprep.subr.msk.bf16.mxu0 %vm12858_vm1, %v13167_v48  ;;  %v4010_v4 = vsel %vm3498_vm3, 65537, %v13166_v16  ;;  %v4026_v43 = vsel %vm3514_vm11, 65537, %v13166_v16  ;;  %vm12860_vm4 = vmpackc.low %vm18731_vm14, %vm18727_vm6  ;;  %v10778_v5 = vcombine.low %v1495_v52, %v1496_v55  ;;  %v10794_v28 = vcombine.high %v1495_v52, %v1496_v55 }
 0x4f4   :  { %v4889_v3 = vunpack.c.l.b16 %v4010_v4  ;;  %v4890_v29 = vunpack.c.h.b16 %v4010_v4  ;;  %v4921_v12 = vunpack.c.l.b16 %v4026_v43  ;;  %v4922_v56 = vunpack.c.h.b16 %v4026_v43  ;;  %12861 = vmatpush1.bf16.msk.msra.mxu0 %vm12860_vm4, %v13167_v48 }
 0x4f5   :  { %vm3529_vm10 = vcmp.ne.s16.totalorder %v10778_v5, 0  ;;  %vm3545_vm9 = vcmp.ne.s16.totalorder %v10794_v28, 0  ;;  %vm986_vm2 = vcmp.eq.bf16.partialorder %v13947_v15, %v18328_v9  ;;  %v1497_v45 = vsel %vm985_vm0, 65537, %v13166_v16 }
 0x4f6   :  { %vm5914_vm15 = vcmp.ne.s32.totalorder %v4890_v29, 0  ;;  %vm5946_vm12 = vcmp.ne.s32.totalorder %v4922_v56, 0  ;;  %vm5913_vm5 = vcmp.ne.s32.totalorder %v4889_v3, 0  ;;  %vm5945_vm13 = vcmp.ne.s32.totalorder %v4921_v12, 0 }
 0x4f7   :  { %vm12922_vm8 = vmpackc.low %vm5946_vm12, %vm5914_vm15  ;;  %v4041_v32 = vsel %vm3529_vm10, 65537, %v13166_v16  ;;  %v4057_v62 = vsel %vm3545_vm9, 65537, %v13166_v16  ;;  %v1498_v37 = vsel %vm986_vm2, 65537, %v13166_v16  ;;  %vm1015_vm7 = vcmp.eq.bf16.partialorder %v13949_v44, %v18305_v10 }
 0x4f8   :  { %12923 = vmatprep.subr.msk.bf16.mxu1 %vm12922_vm8, %v13167_v48  ;;  %vm12924_vm6 = vmpackc.low %vm5945_vm13, %vm5913_vm5  ;;  %v4951_v15 = vunpack.c.l.b16 %v4041_v32  ;;  %v4952_v54 = vunpack.c.h.b16 %v4041_v32  ;;  %v4983_v30 = vunpack.c.l.b16 %v4057_v62  ;;  %v4984_v35 = vunpack.c.h.b16 %v4057_v62 }
 0x4f9   :  { %12925 = vmatpush1.bf16.msk.msra.mxu1 %vm12924_vm6, %v13167_v48  ;;  %v10779_v14 = vcombine.low %v1497_v45, %v1498_v37  ;;  %v10795_v27 = vcombine.high %v1497_v45, %v1498_v37  ;;  %vm1016_vm14 = vcmp.eq.bf16.partialorder %v13949_v44, %v18308_v49  ;;  %v1527_v20 = vsel %vm1015_vm7, 65537, %v13166_v16 }
 0x4fa   :  { %vm5976_vm1 = vcmp.ne.s32.totalorder %v4952_v54, 0  ;;  %vm6008_vm3 = vcmp.ne.s32.totalorder %v4984_v35, 0  ;;  %vm18759_vm11 = vcmp.ne.s32.totalorder %v4951_v15, 0  ;;  %vm18763_vm0 = vcmp.ne.s32.totalorder %v4983_v30, 0 }
 0x4fb   :  { %vm12862_vm4 = vmpackc.low %vm6008_vm3, %vm5976_vm1  ;;  %vm3530_vm10 = vcmp.ne.s16.totalorder %v10779_v14, 0  ;;  %vm3546_vm9 = vcmp.ne.s16.totalorder %v10795_v27, 0  ;;  %v1528_v8 = vsel %vm1016_vm14, 65537, %v13166_v16  ;;  %vm1017_vm2 = vcmp.eq.bf16.partialorder %v13949_v44, %v18325_v57 }
 0x4fc   :  { %12863 = vmatprep.subr.msk.bf16.mxu0 %vm12862_vm4, %v13167_v48  ;;  %v4042_v55 = vsel %vm3530_vm10, 65537, %v13166_v16  ;;  %v4058_v4 = vsel %vm3546_vm9, 65537, %v13166_v16  ;;  %vm12864_vm15 = vmpackc.low %vm18763_vm0, %vm18759_vm11  ;;  %v10810_v43 = vcombine.low %v1527_v20, %v1528_v8  ;;  %v10826_v5 = vcombine.high %v1527_v20, %v1528_v8 }
 0x4fd   :  { %v4953_v28 = vunpack.c.l.b16 %v4042_v55  ;;  %v4954_v3 = vunpack.c.h.b16 %v4042_v55  ;;  %v4985_v29 = vunpack.c.l.b16 %v4058_v4  ;;  %v4986_v12 = vunpack.c.h.b16 %v4058_v4  ;;  %12865 = vmatpush1.bf16.msk.msra.mxu0 %vm12864_vm15, %v13167_v48 }
 0x4fe   :  { %vm3561_vm12 = vcmp.ne.s16.totalorder %v10810_v43, 0  ;;  %vm3577_vm5 = vcmp.ne.s16.totalorder %v10826_v5, 0  ;;  %vm1018_vm13 = vcmp.eq.bf16.partialorder %v13949_v44, %v18328_v9  ;;  %v1529_v56 = vsel %vm1017_vm2, 65537, %v13166_v16 }
 0x4ff   :  { %vm5978_vm8 = vcmp.ne.s32.totalorder %v4954_v3, 0  ;;  %vm6010_vm7 = vcmp.ne.s32.totalorder %v4986_v12, 0  ;;  %vm5977_vm6 = vcmp.ne.s32.totalorder %v4953_v28, 0  ;;  %vm6009_vm14 = vcmp.ne.s32.totalorder %v4985_v29, 0 }
 0x500   :  { %vm12926_vm1 = vmpackc.low %vm6010_vm7, %vm5978_vm8  ;;  %v4073_v45 = vsel %vm3561_vm12, 65537, %v13166_v16  ;;  %v4089_v32 = vsel %vm3577_vm5, 65537, %v13166_v16  ;;  %v1530_v62 = vsel %vm1018_vm13, 65537, %v13166_v16  ;;  %vm1047_vm3 = vcmp.eq.bf16.partialorder %v14056_v0, %v18305_v10 }
 0x501   :  { %12927 = vmatprep.subr.msk.bf16.mxu1 %vm12926_vm1, %v13167_v48  ;;  %vm12928_vm11 = vmpackc.low %vm6009_vm14, %vm5977_vm6  ;;  %v5015_v44 = vunpack.c.l.b16 %v4073_v45  ;;  %v5016_v37 = vunpack.c.h.b16 %v4073_v45  ;;  %v5047_v15 = vunpack.c.l.b16 %v4089_v32  ;;  %v5048_v54 = vunpack.c.h.b16 %v4089_v32 }
 0x502   :  { %12929 = vmatpush1.bf16.msk.msra.mxu1 %vm12928_vm11, %v13167_v48  ;;  %v10811_v30 = vcombine.low %v1529_v56, %v1530_v62  ;;  %v10827_v35 = vcombine.high %v1529_v56, %v1530_v62  ;;  %vm1048_vm0 = vcmp.eq.bf16.partialorder %v14056_v0, %v18308_v49  ;;  %v1559_v14 = vsel %vm1047_vm3, 65537, %v13166_v16 }
 0x503   :  { %vm6040_vm4 = vcmp.ne.s32.totalorder %v5016_v37, 0  ;;  %vm6072_vm10 = vcmp.ne.s32.totalorder %v5048_v54, 0  ;;  %vm18791_vm9 = vcmp.ne.s32.totalorder %v5015_v44, 0  ;;  %vm18795_vm2 = vcmp.ne.s32.totalorder %v5047_v15, 0 }
 0x504   :  { %vm12866_vm15 = vmpackc.low %vm6072_vm10, %vm6040_vm4  ;;  %vm3562_vm12 = vcmp.ne.s16.totalorder %v10811_v30, 0  ;;  %vm3578_vm5 = vcmp.ne.s16.totalorder %v10827_v35, 0  ;;  %v1560_v52 = vsel %vm1048_vm0, 65537, %v13166_v16  ;;  %vm1049_vm13 = vcmp.eq.bf16.partialorder %v14056_v0, %v18325_v57 }
 0x505   :  { %12867 = vmatprep.subr.msk.bf16.mxu0 %vm12866_vm15, %v13167_v48  ;;  %v4074_v39 = vsel %vm3562_vm12, 65537, %v13166_v16  ;;  %v4090_v8 = vsel %vm3578_vm5, 65537, %v13166_v16  ;;  %vm12868_vm8 = vmpackc.low %vm18795_vm2, %vm18791_vm9  ;;  %v10842_v55 = vcombine.low %v1559_v14, %v1560_v52  ;;  %v10858_v4 = vcombine.high %v1559_v14, %v1560_v52 }
 0x506   :  { %v5017_v43 = vunpack.c.l.b16 %v4074_v39  ;;  %v5018_v5 = vunpack.c.h.b16 %v4074_v39  ;;  %v5049_v28 = vunpack.c.l.b16 %v4090_v8  ;;  %v5050_v3 = vunpack.c.h.b16 %v4090_v8  ;;  %12869 = vmatpush1.bf16.msk.msra.mxu0 %vm12868_vm8, %v13167_v48 }
 0x507   :  { %vm3593_vm7 = vcmp.ne.s16.totalorder %v10842_v55, 0  ;;  %vm3609_vm6 = vcmp.ne.s16.totalorder %v10858_v4, 0  ;;  %vm1050_vm14 = vcmp.eq.bf16.partialorder %v14056_v0, %v18328_v9  ;;  %v1561_v29 = vsel %vm1049_vm13, 65537, %v13166_v16 }
 0x508   :  { %vm6042_vm1 = vcmp.ne.s32.totalorder %v5018_v5, 0  ;;  %vm6074_vm3 = vcmp.ne.s32.totalorder %v5050_v3, 0  ;;  %vm6041_vm11 = vcmp.ne.s32.totalorder %v5017_v43, 0  ;;  %vm6073_vm0 = vcmp.ne.s32.totalorder %v5049_v28, 0 }
 0x509   :  { %vm12930_vm4 = vmpackc.low %vm6074_vm3, %vm6042_vm1  ;;  %v4105_v12 = vsel %vm3593_vm7, 65537, %v13166_v16  ;;  %v4121_v56 = vsel %vm3609_vm6, 65537, %v13166_v16  ;;  %v1562_v45 = vsel %vm1050_vm14, 65537, %v13166_v16  ;;  %vm1079_vm10 = vcmp.eq.bf16.partialorder %v14132_v25, %v18305_v10 }
 0x50a   :  { %12931 = vmatprep.subr.msk.bf16.mxu1 %vm12930_vm4, %v13167_v48  ;;  %vm12932_vm9 = vmpackc.low %vm6073_vm0, %vm6041_vm11  ;;  %v5079_v0 = vunpack.c.l.b16 %v4105_v12  ;;  %v5080_v32 = vunpack.c.h.b16 %v4105_v12  ;;  %v5111_v62 = vunpack.c.l.b16 %v4121_v56  ;;  %v5112_v44 = vunpack.c.h.b16 %v4121_v56 }
 0x50b   :  { %12933 = vmatpush1.bf16.msk.msra.mxu1 %vm12932_vm9, %v13167_v48  ;;  %v10843_v37 = vcombine.low %v1561_v29, %v1562_v45  ;;  %v10859_v15 = vcombine.high %v1561_v29, %v1562_v45  ;;  %vm1080_vm2 = vcmp.eq.bf16.partialorder %v14132_v25, %v18308_v49  ;;  %v1591_v54 = vsel %vm1079_vm10, 65537, %v13166_v16 }
 0x50c   :  { %vm6104_vm15 = vcmp.ne.s32.totalorder %v5080_v32, 0  ;;  %vm6136_vm12 = vcmp.ne.s32.totalorder %v5112_v44, 0  ;;  %vm18823_vm5 = vcmp.ne.s32.totalorder %v5079_v0, 0  ;;  %vm18827_vm13 = vcmp.ne.s32.totalorder %v5111_v62, 0  ;;  %v13024_v62 = vld [vmem:[#allocation7 + $0x40] sm:$0xff]  }
 0x50d   :  { %vm12870_vm8 = vmpackc.low %vm6136_vm12, %vm6104_vm15  ;;  %vm3594_vm7 = vcmp.ne.s16.totalorder %v10843_v37, 0  ;;  %vm3610_vm6 = vcmp.ne.s16.totalorder %v10859_v15, 0  ;;  %v1592_v35 = vsel %vm1080_vm2, 65537, %v13166_v16  ;;  %vm1081_vm14 = vcmp.eq.bf16.partialorder %v14132_v25, %v18325_v57 }
 0x50e   :  { %12871 = vmatprep.subr.msk.bf16.mxu0 %vm12870_vm8, %v13167_v48  ;;  %v4106_v49 = vsel %vm3594_vm7, 65537, %v13166_v16  ;;  %v4122_v14 = vsel %vm3610_vm6, 65537, %v13166_v16  ;;  %vm12872_vm1 = vmpackc.low %vm18827_vm13, %vm18823_vm5  ;;  %v10874_v27 = vcombine.low %v1591_v54, %v1592_v35  ;;  %v10890_v20 = vcombine.high %v1591_v54, %v1592_v35 }
 0x50f   :  { %v5081_v52 = vunpack.c.l.b16 %v4106_v49  ;;  %v5082_v39 = vunpack.c.h.b16 %v4106_v49  ;;  %v5113_v8 = vunpack.c.l.b16 %v4122_v14  ;;  %v5114_v55 = vunpack.c.h.b16 %v4122_v14  ;;  %12873 = vmatpush1.bf16.msk.msra.mxu0 %vm12872_vm1, %v13167_v48 }
 0x510   :  { %vm3625_vm3 = vcmp.ne.s16.totalorder %v10874_v27, 0  ;;  %vm3641_vm11 = vcmp.ne.s16.totalorder %v10890_v20, 0  ;;  %vm1082_vm0 = vcmp.eq.bf16.partialorder %v14132_v25, %v18328_v9  ;;  %v1593_v57 = vsel %vm1081_vm14, 65537, %v13166_v16 }
 0x511   :  { %vm6106_vm4 = vcmp.ne.s32.totalorder %v5082_v39, 0  ;;  %vm6138_vm10 = vcmp.ne.s32.totalorder %v5114_v55, 0  ;;  %vm6105_vm9 = vcmp.ne.s32.totalorder %v5081_v52, 0  ;;  %vm6137_vm2 = vcmp.ne.s32.totalorder %v5113_v8, 0  ;;  %v13026_v8 = vld [vmem:[#allocation7 + $0x48] sm:$0xff]   ;;  %v13032_v52 = vld [vmem:[#allocation7 + $0x60] sm:$0xff]  }
 0x512   :  { %vm12934_vm15 = vmpackc.low %vm6138_vm10, %vm6106_vm4  ;;  %v4137_v4 = vsel %vm3625_vm3, 65537, %v13166_v16  ;;  %v4153_v43 = vsel %vm3641_vm11, 65537, %v13166_v16  ;;  %v1594_v5 = vsel %vm1082_vm0, 65537, %v13166_v16  ;;  %v10095_v28 = vrot.slane %v10087_v53, %v16561_v41  ;;  %v13064_v55 = vld [vmem:[#allocation5] ss:$8 sps:$4 sm:$0xff]  }
 0x513   :  { %12935 = vmatprep.subr.msk.bf16.mxu1 %vm12934_vm15, %v13167_v48  ;;  %vm12936_vm12 = vmpackc.low %vm6137_vm2, %vm6105_vm9  ;;  %v5143_v25 = vunpack.c.l.b16 %v4137_v4  ;;  %v5144_v9 = vunpack.c.h.b16 %v4137_v4  ;;  %v5175_v3 = vunpack.c.l.b16 %v4153_v43  ;;  %v5176_v29 = vunpack.c.h.b16 %v4153_v43 }
 0x514   :  { %12937 = vmatpush1.bf16.msk.msra.mxu1 %vm12936_vm12, %v13167_v48  ;;  %v10875_v12 = vcombine.low %v1593_v57, %v1594_v5  ;;  %v10891_v56 = vcombine.high %v1593_v57, %v1594_v5  ;;  %v10102_v45 = vrot.slane %v10088_v40, %v16561_v41  ;;  %v10112_v53 = vrot.slane %v10104_v63, %v16561_v41 }
 0x515   :  { %vm6168_vm5 = vcmp.ne.s32.totalorder %v5144_v9, 0  ;;  %vm6200_vm13 = vcmp.ne.s32.totalorder %v5176_v29, 0  ;;  %vm18862_vm8 = vcmp.ne.s32.totalorder %v5143_v25, 0  ;;  %vm18866_vm7 = vcmp.ne.s32.totalorder %v5175_v3, 0 }
 0x516   :  { %vm12874_vm6 = vmpackc.low %vm6200_vm13, %vm6168_vm5  ;;  %vm3626_vm14 = vcmp.ne.s16.totalorder %v10875_v12, 0  ;;  %vm3642_vm1 = vcmp.ne.s16.totalorder %v10891_v56, 0  ;;  %v10103_v40 = vcombine.low %v10095_v28, %v10102_v45  ;;  %v10119_v63 = vrot.slane %v10105_v38, %v16561_v41  ;;  %v13025_v38 = vld [vmem:[#allocation7] sm:$0xff]   ;;  %v13027_v28 = vld [vmem:[#allocation7 + $0x8] sm:$0xff]  }
 0x517   :  { %12875 = vmatprep.subr.msk.bf16.mxu0 %vm12874_vm6, %v13167_v48  ;;  %v4138_v44 = vsel %vm3626_vm14, 65537, %v13166_v16  ;;  %v4154_v37 = vsel %vm3642_vm1, 65537, %v13166_v16  ;;  %vm12876_vm3 = vmpackc.low %vm18866_vm7, %vm18862_vm8  ;;  %v9479_v15 = vrot.slane %v18452_v11, 1  ;;  %v9575_v54 = vrot.slane %v18452_v11, 2  ;;  %v13028_v12 = vld [vmem:[#allocation7 + $0x50] sm:$0xff]  }
 0x518   :  { %v5145_v10 = vunpack.c.l.b16 %v4138_v44  ;;  %v5146_v30 = vunpack.c.h.b16 %v4138_v44  ;;  %v5177_v35 = vunpack.c.l.b16 %v4154_v37  ;;  %v5178_v49 = vunpack.c.h.b16 %v4154_v37  ;;  %12877 = vmatpush1.bf16.msk.msra.mxu0 %vm12876_vm3, %v13167_v48 }
 0x519   :  { %12958 = vmatprep.subr.bf16.mxu0 %v13024_v62  ;;  %v10120_v14 = vcombine.low %v10112_v53, %v10119_v63  ;;  %v9543_v16 = vadd.f32 %v9479_v15, %v18452_v11  ;;  %v9481_v27 = vrot.slane %v18454_v22, 1  ;;  %v9577_v20 = vrot.slane %v18454_v22, 2 }
 0x51a   :  { %vm6170_vm11 = vcmp.ne.s32.totalorder %v5146_v30, 0  ;;  %vm6202_vm0 = vcmp.ne.s32.totalorder %v5178_v49, 0  ;;  %vm18887_vm4 = vcmp.ne.s32.totalorder %v5145_v10, 0  ;;  %vm18891_vm10 = vcmp.ne.s32.totalorder %v5177_v35, 0 }
 0x51b   :  { %vm12938_vm9 = vmpackc.low %vm6202_vm0, %vm6170_vm11  ;;  %9382 = vmatmul.mubr.bf16.vlgmr.msra.gmra.mrb[28].mxu0 %v13064_v55  ;;  %v10160_v57 = vpack.c.bf16 %v10120_v14, %v10103_v40  ;;  %v9639_v4 = vadd.f32 %v9575_v54, %v9543_v16  ;;  %v9545_v43 = vadd.f32 %v9481_v27, %v18454_v22  ;;  %v9480_v5 = vrot.slane %v18460_v21, 1  ;;  %v13030_v54 = vld [vmem:[#allocation7 + $0x58] sm:$0xff]  }
 0x51c   :  { %12939 = vmatprep.subr.msk.bf16.mxu1 %vm12938_vm9, %v13167_v48  ;;  %vm12940_vm2 = vmpackc.low %vm18891_vm10, %vm18887_vm4  ;;  %12959 = vmatpush3.bf16.msra.mxu0 %v13025_v38  ;;  %v9576_v25 = vrot.slane %v18460_v21, 2  ;;  %v9985_v9 = vcombine.low %v18452_v11, %v18460_v21  ;;  %v9482_v3 = vrot.slane %v18462_v46, 1  ;;  %v9578_v29 = vrot.slane %v18462_v46, 2  ;;  %v13031_v14 = vld [vmem:[#allocation7 + $0x18] sm:$0xff]  }
 0x51d   :  { %12941 = vmatpush1.bf16.msk.msra.mxu1 %vm12940_vm2, %v13167_v48  ;;  %10323 = vmatprep.mubr.bf16.mxu0 %v10160_v57  ;;  %v9641_v56 = vadd.f32 %v9577_v20, %v9545_v43  ;;  %v9544_v45 = vadd.f32 %v9480_v5, %v18460_v21  ;;  %v9986_v53 = vcombine.low %v18454_v22, %v18462_v46  ;;  %v9483_v0 = vrot.slane %v18524_v59, 1 }
 0x51e   :  { %12960 = vmatprep.subr.bf16.mxu0 %v13026_v8  ;;  %v18913_v32 = vrot.slane %v9985_v9, %v16561_v41  ;;  %v9546_v11 = vadd.f32 %v9482_v3, %v18462_v46  ;;  %v19742_v48 = vcombine.low %v16582_v42, %v16587_v18  ;;  %v19743_v21 = vcombine.low %v17447_v26, %v17454_v17  ;;  %v13029_v18 = vld [vmem:[#allocation7 + $0x10] sm:$0xff]  }
 0x51f   :  { %v9640_v44 = vadd.f32 %v9576_v25, %v9544_v45  ;;  %v18925_v22 = vrot.slane %v9986_v53, %v16561_v41  ;;  %v9976_v37 = vrot.slane %v9968_v36, %v16561_v41  ;;  %v9983_v42 = vrot.slane %v9969_v50, %v16561_v41  ;;  %12986 = vmatprep.subr.bf16.mxu1 %v13024_v62 }
 0x520   :  { %v9927_v40 = vrot.slane %v19742_v48, %v16561_v41  ;;  %v9934_v63 = vrot.slane %v19743_v21, %v16561_v41  ;;  %9423 = vmatmul.mubr.bf16.vlgmr.msra.gmra.mrb[28].mxu1 %v13064_v55  ;;  %12961 = vmatpush3.bf16.msra.mxu0 %v13027_v28  ;;  %v9642_v26 = vadd.f32 %v9578_v29, %v9546_v11  ;;  %v9579_v15 = vrot.slane %v18524_v59, 2  ;;  %v13036_v11 = vld [vmem:[#allocation7 + $0x70] sm:$0xff]   ;;  %v13038_v21 = vld [vmem:[#allocation7 + $0x78] sm:$0xff]  }
 0x521   :  { %v9547_v46 = vadd.f32 %v9483_v0, %v18524_v59  ;;  %12962 = vmatprep.subr.bf16.mxu0 %v13028_v12  ;;  %v9785_v10 = vcombine.low %v9639_v4, %v9640_v44  ;;  %v10017_v60 = vcombine.low %v18913_v32, %v18925_v22  ;;  %v10121_v51 = vcombine.high %v18913_v32, %v18925_v22 }
 0x522   :  { %v9935_v17 = vcombine.low %v9927_v40, %v9934_v63  ;;  %v9984_v36 = vcombine.low %v9976_v37, %v9983_v42  ;;  %v9786_v23 = vcombine.low %v9641_v56, %v9642_v26  ;;  %v9485_v61 = vrot.slane %v18531_v6, 1  ;;  %12994 = vmatpush3.bf16.msra.mxu1 %v13025_v38  ;;  %v13034_v56 = vld [vmem:[#allocation7 + $0x68] sm:$0xff]   ;;  %v13037_v40 = vld [vmem:[#allocation7 + $0x30] sm:$0xff]   ;;  %v13039_v63 = vld [vmem:[#allocation7 + $0x38] sm:$0xff]  }
 0x523   :  { %v9581_v50 = vrot.slane %v18531_v6, 2  ;;  %v18944_v62 = vrot.slane %v9785_v10, %v16561_v41  ;;  %v9643_v35 = vadd.f32 %v9579_v15, %v9547_v46  ;;  %v9484_v49 = vrot.slane %v18533_v13, 1  ;;  %12987 = vmatprep.subr.bf16.mxu1 %v13026_v8 }
 0x524   :  { %v10159_v30 = vpack.c.bf16 %v9984_v36, %v9935_v17  ;;  %12963 = vmatpush3.bf16.msra.mxu0 %v13029_v18  ;;  %v18948_v16 = vrot.slane %v9786_v23, %v16561_v41  ;;  %v9549_v27 = vadd.f32 %v9485_v61, %v18531_v6  ;;  %v9987_v20 = vcombine.low %v18524_v59, %v18533_v13 }
 0x525   :  { %v9486_v38 = vrot.slane %v18535_v19, 1  ;;  %12964 = vmatprep.subr.bf16.mxu0 %v13030_v54  ;;  %v9548_v39 = vadd.f32 %v9484_v49, %v18533_v13  ;;  %v9580_v55 = vrot.slane %v18533_v13, 2  ;;  %v9582_v8 = vrot.slane %v18535_v19, 2 }
 0x526   :  { %v9988_v57 = vcombine.low %v18531_v6, %v18535_v19  ;;  %v9817_v4 = vcombine.low %v18944_v62, %v18948_v16  ;;  %v9645_v43 = vadd.f32 %v9581_v50, %v9549_v27  ;;  %v18962_v5 = vrot.slane %v9987_v20, %v16561_v41  ;;  %12995 = vmatpush3.bf16.msra.mxu1 %v13027_v28 }
 0x527   :  { %v9550_v59 = vadd.f32 %v9486_v38, %v18535_v19  ;;  %v9644_v25 = vadd.f32 %v9580_v55, %v9548_v39  ;;  %12988 = vmatprep.subr.bf16.mxu1 %v13028_v12  ;;  %v19744_v13 = vcombine.low %v16579_v1, %v16855_v24  ;;  %v19745_v3 = vcombine.low %v17470_v2, %v17473_v33  ;;  %v13033_v19 = vld [vmem:[#allocation7 + $0x20] sm:$0xff]   ;;  %v13035_v33 = vld [vmem:[#allocation7 + $0x28] sm:$0xff]  }
 0x528   :  { %v18966_v9 = vrot.slane %v9988_v57, %v16561_v41  ;;  %12965 = vmatpush3.bf16.msra.mxu0 %v13031_v14  ;;  %v10025_v47 = vrot.slane %v10017_v60, %v16561_v41 }
 0x529   :  { %v18972_v6 = vrot.slane %v19744_v13, %v16561_v41  ;;  %v18978_v29 = vrot.slane %v19745_v3, %v16561_v41  ;;  %v9646_v28 = vadd.f32 %v9582_v8, %v9550_v59  ;;  %12966 = vmatprep.subr.bf16.mxu0 %v13032_v52  ;;  %v9787_v45 = vcombine.low %v9643_v35, %v9644_v25 }
 0x52a   :  { %v10018_v12 = vcombine.low %v18962_v5, %v18966_v9  ;;  %v10122_v1 = vcombine.high %v18962_v5, %v18966_v9  ;;  %12996 = vmatpush3.bf16.msra.mxu1 %v13029_v18 }
 0x52b   :  { %v9735_v24 = vcombine.high %v18972_v6, %v18978_v29  ;;  %v9788_v53 = vcombine.low %v9645_v43, %v9646_v28  ;;  %v18987_v2 = vrot.slane %v9787_v45, %v16561_v41  ;;  %12989 = vmatprep.subr.bf16.mxu1 %v13030_v54 }
 0x52c   :  { %12967 = vmatpush3.bf16.msra.mxu0 %v13033_v19  ;;  %v10032_v31 = vrot.slane %v10018_v12, %v16561_v41 }
 0x52d   :  { %v18990_v0 = vrot.slane %v9788_v53, %v16561_v41  ;;  %12968 = vmatprep.subr.bf16.mxu0 %v13034_v56  ;;  %v19746_v53 = vcombine.low %v17902_v7, %v17936_v34  ;;  %v10136_v7 = vrot.slane %v10122_v1, %v16561_v41 }
 0x52e   :  { %12997 = vmatpush3.bf16.msra.mxu1 %v13031_v14 }
 0x52f   :  { %v9818_v48 = vcombine.low %v18987_v2, %v18990_v0  ;;  %12990 = vmatprep.subr.bf16.mxu1 %v13032_v52 }
 0x530   :  { %12969 = vmatpush3.bf16.msra.mxu0 %v13035_v33 }
 0x531   :  { %12970 = vmatprep.subr.bf16.mxu0 %v13036_v11  ;;  %v19048_v1 = vrot.slane %v9818_v48, %v16561_v41 }
 0x532   :  { %12998 = vmatpush3.bf16.msra.mxu1 %v13033_v19 }
 0x533   :  { %12991 = vmatprep.subr.bf16.mxu1 %v13034_v56 }
 0x534   :  { %12971 = vmatpush3.bf16.msra.mxu0 %v13037_v40 }
 0x535   :  { %12972 = vmatprep.subr.bf16.mxu0 %v13038_v21 }
 0x536   :  { %12999 = vmatpush3.bf16.msra.mxu1 %v13035_v33  ;;  %v19012_v33 = vrot.slane %v19746_v53, %v16561_v41 }
 0x537   :  { %12992 = vmatprep.subr.bf16.mxu1 %v13036_v11  ;;  %v19018_v11 = vrot.slane %v9769_v58, %v16561_v41  ;;  %v10033_v58 = vcombine.low %v10025_v47, %v10032_v31 }
 0x538   :  { %12973 = vmatpush3.bf16.msra.mxu0 %v13039_v63 }
 0x53a   :  { %13000 = vmatpush3.bf16.msra.mxu1 %v13037_v40  ;;  %v9784_v40 = vcombine.high %v19012_v33, %v19018_v11 }
 0x53b   :  { %10324 = vmatmul.mubr.bf16.vlgmr.msra.gmra.mrb[32].mxu0 %v10159_v30  ;;  %12993 = vmatprep.subr.bf16.mxu1 %v13038_v21  ;;  %v10129_v21 = vrot.slane %v10121_v51, %v16561_v41  ;;  %v19042_v51 = vrot.slane %v9817_v4, %v16561_v41 }
 0x53d   :  { %v10137_v34 = vcombine.low %v10129_v21, %v10136_v7  ;;  %v9833_v32 = vcombine.high %v19042_v51, %v19048_v1 }
 0x53e   :  { %13001 = vmatpush3.bf16.msra.mxu1 %v13039_v63 }
 0x553   :  { %v9301_v44 = vpop.f32.mrb[24].mxu0 }
 0x554   :  { %v9487_v37 = vrot.slane %v9301_v44, 1  ;;  %v9583_v42 = vrot.slane %v9301_v44, 2  ;;  %v9303_v18 = vpop.f32.mrb[25].mxu0 }
 0x555   :  { %v9488_v26 = vrot.slane %v9303_v18, 1  ;;  %v10034_v17 = vcombine.low %v9301_v44, %v9303_v18  ;;  %v9305_v46 = vpop.f32.mrb[26].mxu0  ;;  %v9584_v36 = vrot.slane %v9303_v18, 2 }
 0x556   :  { %v9551_v15 = vadd.f32 %v9487_v37, %v9301_v44  ;;  %v9306_v54 = vpop.f32.mrb[27].mxu0 }
 0x557   :  { %v9552_v10 = vadd.f32 %v9488_v26, %v9303_v18  ;;  %v18995_v30 = vrot.slane %v10034_v17, %v16561_v41 }
 0x558   :  { %v9647_v23 = vadd.f32 %v9583_v42, %v9551_v15  ;;  %v9342_v61 = vpop.f32.mrb[24].mxu1 }
 0x559   :  { %v9489_v50 = vrot.slane %v9342_v61, 1  ;;  %v9585_v35 = vrot.slane %v9342_v61, 2  ;;  %v9648_v49 = vadd.f32 %v9584_v36, %v9552_v10  ;;  %v9344_v14 = vpop.f32.mrb[25].mxu1 }
 0x55a   :  { %v9490_v27 = vrot.slane %v9344_v14, 1  ;;  %v10035_v20 = vcombine.low %v9342_v61, %v9344_v14  ;;  %v9346_v38 = vpop.f32.mrb[26].mxu1  ;;  %v9586_v57 = vrot.slane %v9344_v14, 2 }
 0x55b   :  { %v9553_v52 = vadd.f32 %v9489_v50, %v9342_v61  ;;  %v9834_v39 = vcombine.low %v9647_v23, %v9648_v49  ;;  %v9347_v55 = vpop.f32.mrb[27].mxu1 }
 0x55c   :  { %v9554_v8 = vadd.f32 %v9490_v27, %v9344_v14  ;;  %v10051_v43 = vrot.slane %v10035_v20, %v16561_v41 }
 0x55d   :  { %v9649_v59 = vadd.f32 %v9585_v35, %v9553_v52  ;;  %v19001_v19 = vrot.slane %v9834_v39, %v16561_v41 }
 0x55e   :  { %v9650_v25 = vadd.f32 %v9586_v57, %v9554_v8  ;;  %v10066_v13 = vcombine.low %v18995_v30, %v10051_v43  ;;  %v10138_v3 = vcombine.high %v18995_v30, %v10051_v43 }
 0x560   :  { %v9835_v28 = vcombine.low %v9649_v59, %v9650_v25  ;;  %v10146_v20 = vrot.slane %v10138_v3, %v16561_v41  ;;  %v10074_v38 = vrot.slane %v10066_v13, %v16561_v41 }
 0x562   :  { %v19004_v56 = vrot.slane %v9835_v28, %v16561_v41 }
 0x564   :  { %v9866_v45 = vcombine.low %v19001_v19, %v19004_v56 }
 0x5ee   :  { %v9383_v22 = vpop.f32.mrb[28].mxu0 }
 0x5ef   :  { %v9491_v60 = vrot.slane %v9383_v22, 1  ;;  %v9385_v5 = vpop.f32.mrb[29].mxu0  ;;  %v9587_v37 = vrot.slane %v9383_v22, 2 }
 0x5f0   :  { %v9492_v9 = vrot.slane %v9385_v5, 1  ;;  %v10036_v12 = vcombine.low %v9383_v22, %v9385_v5  ;;  %v9387_v63 = vpop.f32.mrb[30].mxu0  ;;  %v9588_v4 = vrot.slane %v9385_v5, 2 }
 0x5f1   :  { %v9555_v44 = vadd.f32 %v9491_v60, %v9383_v22  ;;  %v9388_v62 = vpop.f32.mrb[31].mxu0 }
 0x5f2   :  { %v9556_v16 = vadd.f32 %v9492_v9, %v9385_v5  ;;  %v10058_v48 = vrot.slane %v10036_v12, %v16561_v41  ;;  %v9874_v5 = vrot.slane %v9866_v45, %v16561_v41 }
 0x5f3   :  { %v9651_v42 = vadd.f32 %v9587_v37, %v9555_v44  ;;  %v9424_v18 = vpop.f32.mrb[28].mxu1 }
 0x5f4   :  { %v9493_v26 = vrot.slane %v9424_v18, 1  ;;  %v9652_v2 = vadd.f32 %v9588_v4, %v9556_v16  ;;  %v9426_v0 = vpop.f32.mrb[29].mxu1  ;;  %v9589_v10 = vrot.slane %v9424_v18, 2 }
 0x5f5   :  { %v9494_v17 = vrot.slane %v9426_v0, 1  ;;  %v10037_v46 = vcombine.low %v9424_v18, %v9426_v0  ;;  %v9428_v15 = vpop.f32.mrb[30].mxu1  ;;  %v9590_v50 = vrot.slane %v9426_v0, 2 }
 0x5f6   :  { %v9557_v54 = vadd.f32 %v9493_v26, %v9424_v18  ;;  %v9836_v36 = vcombine.low %v9651_v42, %v9652_v2  ;;  %v9429_v23 = vpop.f32.mrb[31].mxu1 }
 0x5f7   :  { %v9558_v61 = vadd.f32 %v9494_v17, %v9426_v0  ;;  %v10065_v35 = vrot.slane %v10037_v46, %v16561_v41 }
 0x5f8   :  { %v9653_v49 = vadd.f32 %v9589_v10, %v9557_v54  ;;  %v9858_v52 = vrot.slane %v9836_v36, %v16561_v41 }
 0x5f9   :  { %v9654_v14 = vadd.f32 %v9590_v50, %v9558_v61  ;;  %v10067_v30 = vcombine.low %v10058_v48, %v10065_v35  ;;  %v10139_v27 = vcombine.high %v10058_v48, %v10065_v35 }
 0x5fb   :  { %v9837_v39 = vcombine.low %v9653_v49, %v9654_v14  ;;  %v10153_v55 = vrot.slane %v10139_v27, %v16561_v41  ;;  %v10081_v8 = vrot.slane %v10067_v30, %v16561_v41 }
 0x5fd   :  { %v9865_v57 = vrot.slane %v9837_v39, %v16561_v41  ;;  %v10154_v43 = vcombine.low %v10146_v20, %v10153_v55  ;;  %v10082_v59 = vcombine.low %v10074_v38, %v10081_v8 }
 0x5ff   :  { %v9867_v25 = vcombine.low %v9858_v52, %v9865_v57  ;;  %v10162_v28 = vpack.c.bf16 %v10154_v43, %v10137_v34  ;;  %v10161_v53 = vpack.c.bf16 %v10082_v59, %v10033_v58 }
 0x601   :  { %10331 = vmatprep.mubr.bf16.mxu1 %v10162_v28  ;;  %v9881_v34 = vrot.slane %v9867_v25, %v16561_v41 }
 0x602   :  { %10332 = vmatmul.mubr.bf16.vlgmr.msra.gmra.mrb[32].mxu1 %v10161_v53 }
 0x603   :  { %v9882_v12 = vcombine.high %v9874_v5, %v9881_v34 }
 0x60e   :  { %v12974_v21 = vpop.f32.mrb[32].mxu0 }
 0x60f   :  { %v12975_v3 = vpop.f32.mrb[33].mxu0 }
 0x610   :  { %v12976_v7 = vadd.f32 %v12975_v3, %v12974_v21  ;;  %v12977_v13 = vpop.f32.mrb[34].mxu0 }
 0x611   :  { %v12978_v47 = vpop.f32.mrb[35].mxu0 }
 0x612   :  { %v12979_v31 = vadd.f32 %v12978_v47, %v12977_v13  ;;  %13040 = vrcp.f32 %v12976_v7 }
 0x614   :  { %13042 = vrcp.f32 %v12979_v31 }
 0x61c   :  { %v13041_v22 = vpop.eup %13040 }
 0x61d   :  { %v10341_v58 = vmul.f32 %v13041_v22, %v9735_v24 }
 0x61e   :  { %v13043_v60 = vpop.eup %13042 }
 0x61f   :  { %v10343_v9 = vmul.f32 %v13043_v60, %v9784_v40  ;;  %v10348_v63 = vmax.f32 %v10341_v58, 0.0 }
 0x621   :  { %v10349_v44 = vmax.f32 %v10343_v9, 0.0  ;;  %v10352_v37 = vmin.f32 %v10348_v63, 255.0 }
 0x623   :  { %v10353_v62 = vmin.f32 %v10349_v44, 255.0  ;;  %v13002_v16 = vtrunc.f32 %v10352_v37 }
 0x625   :  { %v13004_v4 = vtrunc.f32 %v10353_v62  ;;  %v13003_v42 = vcvt.f32.s32 %v13002_v16 }
 0x627   :  { %v13005_v19 = vcvt.f32.s32 %v13004_v4 }
 0x629   :  { %v10360_v56 = vpack.c.b16 %v13005_v19, %v13003_v42 }
 0x6d5   :  { %v12980_v45 = vpop.f32.mrb[32].mxu1 }
 0x6d6   :  { %v12981_v41 = vpop.f32.mrb[33].mxu1 }
 0x6d7   :  { %v12982_v18 = vadd.f32 %v12981_v41, %v12980_v45  ;;  %v12983_v26 = vpop.f32.mrb[34].mxu1 }
 0x6d8   :  { %v12984_v6 = vpop.f32.mrb[35].mxu1 }
 0x6d9   :  { %13044 = vrcp.f32 %v12982_v18  ;;  %v12985_v29 = vadd.f32 %v12984_v6, %v12983_v26 }
 0x6db   :  { %13046 = vrcp.f32 %v12985_v29 }
 0x6e3   :  { %v13045_v24 = vpop.eup %13044 }
 0x6e4   :  { %v10345_v33 = vmul.f32 %v13045_v24, %v9833_v32 }
 0x6e5   :  { %v13047_v11 = vpop.eup %13046 }
 0x6e6   :  { %v10347_v40 = vmul.f32 %v13047_v11, %v9882_v12  ;;  %v10350_v2 = vmax.f32 %v10345_v33, 0.0 }
 0x6e8   :  { %v10351_v0 = vmax.f32 %v10347_v40, 0.0  ;;  %v10354_v48 = vmin.f32 %v10350_v2, 255.0 }
 0x6ea   :  { %v10355_v17 = vmin.f32 %v10351_v0, 255.0  ;;  %v13006_v46 = vtrunc.f32 %v10354_v48 }
 0x6ec   :  { %v13008_v15 = vtrunc.f32 %v10355_v17  ;;  %v13007_v54 = vcvt.f32.s32 %v13006_v46 }
 0x6ee   :  { %v13009_v10 = vcvt.f32.s32 %v13008_v15 }
 0x6f0   :  { %v10361_v36 = vpack.c.b16 %v13009_v10, %v13007_v54 }
 0x6f2   :  { %v10362_v23 = vpack.c.b8 %v10361_v36, %v10360_v56 }
 0x6f4   :  { %10363 = vst [vmem:[#allocation8] sm:$0xff] %v10362_v23 }
 0x6f5   :  { %13142 = shalt.err (!%p13139_p0)
}
 0x6f6   :  { %s13143_s27 = scalar_lea.hbm %s19089_s3, 128 }
 0x6f7   :  { %p13144_p1 = scmp.ne.s32.totalorder %s19089_s3, %s13143_s27  ;;  %p13147_p2 = scmp.lt.u32.totalorder %s13143_s27, %s19089_s3 }
 0x6f9   :  { %p13149_p3 = pnand %p13147_p2, %p13144_p1 }
 0x6fb   :  { %13152 = shalt.err (!%p13149_p3)
}
 0x6fc   :  { %10373 = dma.vmem_to_hbm [thread:$0]  %s10371_s23, 128, %s19089_s3, [#allocation4]  }
 0x6fd   :  { %13157 = dma.done.wait [#allocation4], 128  }
 0x6fe   :  { %13158 = vsyncadd [#allocation4], 4294967168 }
 0x6ff   :  { %10377 = vsyncpa [#allocation3], 1 }
 0x700   :  { %10378 = vsyncpa [#allocation6], 1 }
 0x701   :  { %10379 = vsyncpa [#allocation4], 1 }

</bundles_post_ra>
